<compile_context>
chip_gen: v6e
topology: v6e:2x2x1
jax: 0.10.0
libtpu: 0.0.40
codegen_flags: <defaults>
</compile_context>

<pallas_src>
import functools

import jax
import jax.numpy as jnp
from jax import lax
from jax.experimental import pallas as pl
from jax.experimental.pallas import tpu as pltpu

EPS = 1e-5  # matches nn.GroupNorm default


# --------------------------- host-side weight prep ---------------------------
def _band_weights_3x3(w_hwio, W):
  """(3, 3, cin, cout) -> (3, W*cin, W*cout) block-banded matrices, one per kernel row.

  M[kh][w_in*cin + ci, w_out*cout + co] = w[kh, w_in - w_out + 1, ci, co] when
  |w_in - w_out| <= 1, else 0.  Out-of-range taps vanish == zero padding along W.
  """
  _, _, cin, cout = w_hwio.shape
  win = jnp.arange(W)[:, None]    # input column index
  wout = jnp.arange(W)[None, :]   # output column index
  mats = []
  for kh in range(3):
    m4 = jnp.zeros((W, cin, W, cout), jnp.float32)
    for kw in range(3):
      sel = (win == wout + kw - 1).astype(jnp.float32)          # (W, W)
      m4 = m4 + sel[:, None, :, None] * w_hwio[kh, kw][None, :, None, :]
    mats.append(m4.reshape(W * cin, W * cout))
  return jnp.stack(mats, axis=0)


def _band_weights_1x1(wd, W):
  """(cin, cout) -> (W*cin, W*cout) block-diagonal matrix for the 1x1 downsample conv."""
  cin, cout = wd.shape
  eye = jnp.eye(W, dtype=jnp.float32)
  return (eye[:, None, :, None] * wd[None, :, None, :]).reshape(W * cin, W * cout)


# --------------------------------- kernel ------------------------------------
def _make_kernel(M, has_downsample):
  f32 = jnp.float32
  bf16 = jnp.bfloat16

  def kernel(x_ref, rm_ref, wb1_ref, b1_ref, g1_ref, be1_ref,
             wb2_ref, b2_ref, g2_ref, be2_ref, pc_ref, r_ref, e_ref, *rest):
    if has_downsample:
      wdb_ref, bd_ref, gd_ref, bed_ref, out_ref = rest
    else:
      (out_ref,) = rest

    xb = x_ref[...]            # (M, W*cin) bf16, M = Bt*H lane-dense rows
    mask_dn = rm_ref[0]        # (M, 1) f32: 0 on first row of each sample
    mask_up = rm_ref[1]        # (M, 1) f32: 0 on last row of each sample
    Pc = pc_ref[...]           # (W*C, W*C) bf16: same-group projection / count
    Rb = r_ref[...]            # (Bt, M) bf16: per-sample row sum
    Eb = e_ref[...]            # (M, Bt) bf16: per-sample broadcast back

    def conv3x3(zb, wb_ref, bias):
      # Banded 3x3 conv: one wide bf16 matmul per kernel row; the +/-1 row offsets
      # are realised with pltpu.roll (XLU) + boundary masks (VPU), accumulated in
      # place so at most two (M, W*C) f32 slabs are live.
      y = jnp.dot(zb, wb_ref[1], preferred_element_type=f32) + bias
      a = jnp.dot(zb, wb_ref[0], preferred_element_type=f32)      # kh=0 tap
      y = y + mask_dn * pltpu.roll(a, shift=1, axis=0)            # out[h] += a[h-1]
      a = jnp.dot(zb, wb_ref[2], preferred_element_type=f32)      # kh=2 tap
      y = y + mask_up * pltpu.roll(a, shift=M - 1, axis=0)        # out[h] += a[h+1]
      return y

    def gn(y, gamma, beta, apply_relu):
      # Segmented (per-sample, per-group) GroupNorm via small bf16 matmuls:
      #   R @ y   : per-sample column sums           (Bt, WC)
      #   (.) @ Pc: per-group mean, replicated/lane  (Bt, WC)
      #   E @ (.) : broadcast back to all H rows     (M,  WC)
      # Centered (two-pass) variance; f32 accumulation throughout.
      s1 = jnp.dot(Rb, y.astype(bf16), preferred_element_type=f32)
      mean_s = jnp.dot(s1.astype(bf16), Pc, preferred_element_type=f32)
      mean_b = jnp.dot(Eb, mean_s.astype(bf16), preferred_element_type=f32)
      yc = y - mean_b
      s2 = jnp.dot(Rb, (yc * yc).astype(bf16), preferred_element_type=f32)
      var_s = jnp.dot(s2.astype(bf16), Pc, preferred_element_type=f32)
      inv_s = lax.rsqrt(var_s + EPS)
      inv_b = jnp.dot(Eb, inv_s.astype(bf16), preferred_element_type=f32)
      out = yc * (inv_b * gamma) + beta
      return jnp.maximum(out, 0.0) if apply_relu else out

    # conv1 -> GN -> ReLU
    y1 = gn(conv3x3(xb, wb1_ref, b1_ref[...]), g1_ref[...], be1_ref[...], True)
    # conv2 -> GN -> ReLU
    y2 = gn(conv3x3(y1.astype(bf16), wb2_ref, b2_ref[...]), g2_ref[...], be2_ref[...], True)

    # shortcut
    if has_downsample:
      xs = jnp.dot(xb, wdb_ref[...], preferred_element_type=f32) + bd_ref[...]
      xs = gn(xs, gd_ref[...], bed_ref[...], False)
    else:
      xs = xb.astype(f32)   # cin == cout, identical lane-dense layout

    out_ref[...] = jnp.maximum(xs + y2, 0.0)   # lane-dense unmasked store

  return kernel


# -------------------------------- wrapper ------------------------------------
def _pick_batch_tile(N, H, target_rows=256):
  """Largest divisor of N with Bt*H <= target_rows; prefer grid>=2 for v7x's 2 TCs."""
  bt = 1
  for d in range(1, N + 1):
    if N % d == 0 and d * H <= target_rows:
      bt = d
  if N // bt == 1 and bt % 2 == 0 and (bt // 2) * H >= 128:
    bt //= 2   # keep both v7x TensorCores busy while each still gets >=128 MXU rows
  return bt


def residual_block_pallas(x_nchw, params, *, in_planes, planes, stride=1, batch_tile=None):
  # TODO(synk): stride > 1 not implemented.
  assert stride == 1
  has_ds = not (stride == 1 and in_planes == planes)
  num_groups = planes // 8
  cpg = planes // num_groups

  N, C, H, W = x_nchw.shape
  assert C == in_planes
  cin, cout = in_planes, planes
  wc_in, wc_out = W * cin, W * cout
  assert H % 8 == 0 and wc_in % 128 == 0 and wc_out % 128 == 0, "lane/sublane alignment"

  bt = batch_tile or _pick_batch_tile(N, H)
  assert N % bt == 0
  M = bt * H
  cnt = float(H * W * cpg)   # elements per (sample, group)

  # Lane-dense bf16 activations: NCHW -> NHWC -> (N*H, W*C).  No host-side pad.
  x2d = jnp.transpose(x_nchw, (0, 2, 3, 1)).reshape(N * H, wc_in).astype(jnp.bfloat16)

  # Per-sample boundary masks for the rolled +/-1 row taps.
  r = jnp.arange(M)
  mask_dn = (r % H != 0).astype(jnp.float32).reshape(M, 1)
  mask_up = (r % H != H - 1).astype(jnp.float32).reshape(M, 1)
  rowmask = jnp.stack([mask_dn, mask_up], axis=0)                     # (2, M, 1)

  # Block-banded conv weights, bf16 MXU operands.
  wb1 = _band_weights_3x3(params["w1"], W).astype(jnp.bfloat16)       # (3, W*cin, W*cout)
  wb2 = _band_weights_3x3(params["w2"], W).astype(jnp.bfloat16)       # (3, W*cout, W*cout)

  def lane_vec(p):   # per-channel (C,) -> lane-dense (1, W*C): value at w*C + c is p[c]
    return jnp.tile(p.astype(jnp.float32), (W,)).reshape(1, wc_out)

  # GroupNorm helper matrices (exact 0/1, or divided by a power-of-two count -> bf16 safe).
  grp = (jnp.arange(wc_out) % cout) // cpg
  Pc = ((grp[:, None] == grp[None, :]).astype(jnp.float32) / cnt).astype(jnp.bfloat16)
  Rf = (jnp.arange(M)[None, :] // H == jnp.arange(bt)[:, None]).astype(jnp.float32)
  Rb = Rf.astype(jnp.bfloat16)          # (Bt, M)
  Eb = Rf.T.astype(jnp.bfloat16)        # (M, Bt)

  inputs = [x2d, rowmask,
            wb1, lane_vec(params["b1"]), lane_vec(params["g1"]), lane_vec(params["be1"]),
            wb2, lane_vec(params["b2"]), lane_vec(params["g2"]), lane_vec(params["be2"]),
            Pc, Rb, Eb]
  if has_ds:
    wdb = _band_weights_1x1(params["wd"], W).astype(jnp.bfloat16)     # (W*cin, W*cout)
    inputs += [wdb, lane_vec(params["bd"]), lane_vec(params["gd"]), lane_vec(params["bed"])]

  def full_spec(arr):
    nd = arr.ndim
    # NOTE(perf/v7x): these grid-invariant operands could be single-buffered with
    # pipeline_mode=pl.Buffered(1) to halve their VMEM footprint; at W*C=256 the
    # footprint is tiny, so the default is kept for maximum compile portability.
    return pl.BlockSpec(arr.shape, lambda n, nd=nd: (0,) * nd)

  in_specs = [pl.BlockSpec((M, wc_in), lambda n: (n, 0))]
  in_specs += [full_spec(a) for a in inputs[1:]]

  kernel = _make_kernel(M, has_ds)

  out2d = pl.pallas_call(
      kernel,
      out_shape=jax.ShapeDtypeStruct((N * H, wc_out), jnp.float32),
      grid_spec=pltpu.PrefetchScalarGridSpec(
          num_scalar_prefetch=0,
          grid=(N // bt,),
          in_specs=in_specs,
          out_specs=pl.BlockSpec((M, wc_out), lambda n: (n, 0)),
      ),
      compiler_params=pltpu.CompilerParams(
          dimension_semantics=("parallel",),       # batch tiles are independent
          vmem_limit_bytes=32 * 1024 * 1024),
  )(*inputs)

  # TODO(synk): in a stacked extractor keep this lane-dense NHWC layout between blocks
  # and transpose only at the network edges (avoids a full HBM round trip per block).
  out_nhwc = out2d.reshape(N, H, W, cout)        # free, contiguous reshape
  return jnp.transpose(out_nhwc, (0, 3, 1, 2))   # back to NCHW


# ---------------------------- pure-JAX reference ------------------------------
def residual_block_ref(x_nchw, params, *, in_planes, planes, stride=1):
  has_ds = not (stride == 1 and in_planes == planes)
  num_groups = planes // 8
  x = jnp.transpose(x_nchw, (0, 2, 3, 1)).astype(jnp.float32)

  def conv(inp, w, b):
    return lax.conv_general_dilated(
        inp, w, (1, 1), "SAME",
        dimension_numbers=("NHWC", "HWIO", "NHWC")) + b

  def gn(y, gamma, beta):
    N, H, W, C = y.shape
    yr = y.reshape(N, H * W, num_groups, C // num_groups)
    m = yr.mean(axis=(1, 3), keepdims=True)
    v = yr.var(axis=(1, 3), keepdims=True)
    yn = (yr - m) / jnp.sqrt(v + EPS)
    return yn.reshape(N, H, W, C) * gamma + beta

  y = jax.nn.relu(gn(conv(x, params["w1"], params["b1"]), params["g1"], params["be1"]))
  y = jax.nn.relu(gn(conv(y, params["w2"], params["b2"]), params["g2"], params["be2"]))
  if has_ds:
    xs = conv(x, params["wd"].reshape(1, 1, in_planes, planes), params["bd"])
    xs = gn(xs, params["gd"], params["bed"])
  else:
    xs = x
  return jnp.transpose(jax.nn.relu(xs + y), (0, 3, 1, 2))


# ---------------------------------- main --------------------------------------
def make_params(key, in_planes, planes, has_ds):
  ks = jax.random.split(key, 12)
  p = {
      "w1": 0.1 * jax.random.normal(ks[0], (3, 3, in_planes, planes), jnp.float32),
      "b1": 0.05 * jax.random.normal(ks[1], (planes,), jnp.float32),
      "g1": 1.0 + 0.1 * jax.random.normal(ks[2], (planes,), jnp.float32),
      "be1": 0.05 * jax.random.normal(ks[3], (planes,), jnp.float32),
      "w2": 0.1 * jax.random.normal(ks[4], (3, 3, planes, planes), jnp.float32),
      "b2": 0.05 * jax.random.normal(ks[5], (planes,), jnp.float32),
      "g2": 1.0 + 0.1 * jax.random.normal(ks[6], (planes,), jnp.float32),
      "be2": 0.05 * jax.random.normal(ks[7], (planes,), jnp.float32),
  }
  if has_ds:
    p.update({
        "wd": 0.1 * jax.random.normal(ks[8], (in_planes, planes), jnp.float32),
        "bd": 0.05 * jax.random.normal(ks[9], (planes,), jnp.float32),
        "gd": 1.0 + 0.1 * jax.random.normal(ks[10], (planes,), jnp.float32),
        "bed": 0.05 * jax.random.normal(ks[11], (planes,), jnp.float32),
    })
  return p


if __name__ == "__main__":
  N, H, W = 16, 16, 16   # N=16 -> batch tile 8, grid=2, 128 MXU rows per step
  configs = [
      dict(in_planes=8, planes=16),    # downsample path (1x1 conv + norm3)
      dict(in_planes=16, planes=16),   # identity shortcut
  ]
  key = jax.random.PRNGKey(0)
  for cfg in configs:
    in_planes, planes = cfg["in_planes"], cfg["planes"]
    has_ds = in_planes != planes
    key, pkey, xkey = jax.random.split(key, 3)
    params = make_params(pkey, in_planes, planes, has_ds)
    x = jax.random.normal(xkey, (N, in_planes, H, W), jnp.float32)

    run = jax.jit(functools.partial(
        residual_block_pallas, in_planes=in_planes, planes=planes, stride=1))
    out = jax.block_until_ready(run(x, params))

    ref = residual_block_ref(x, params, in_planes=in_planes, planes=planes, stride=1)
    assert out.shape == (N, planes, H, W)
    err = float(jnp.max(jnp.abs(out - ref)))
    # bf16 activations / weights with f32 accumulation -> bf16-scaled tolerance.
    assert jnp.allclose(out, ref, rtol=3e-2, atol=3e-2), f"max abs err = {err}"

  print("KERNEL_OK")
</pallas_src>

<mosaic_0001>
module attributes {stable_mosaic.version = 11 : i64} {
  func.func @kernel(%arg0: i32, %arg1: memref<128x128xbf16, #tpu.memory_space<vmem>>, %arg2: memref<2x128x1xf32, #tpu.memory_space<vmem>>, %arg3: memref<3x128x256xbf16, #tpu.memory_space<vmem>>, %arg4: memref<1x256xf32, #tpu.memory_space<vmem>>, %arg5: memref<1x256xf32, #tpu.memory_space<vmem>>, %arg6: memref<1x256xf32, #tpu.memory_space<vmem>>, %arg7: memref<3x256x256xbf16, #tpu.memory_space<vmem>>, %arg8: memref<1x256xf32, #tpu.memory_space<vmem>>, %arg9: memref<1x256xf32, #tpu.memory_space<vmem>>, %arg10: memref<1x256xf32, #tpu.memory_space<vmem>>, %arg11: memref<256x256xbf16, #tpu.memory_space<vmem>>, %arg12: memref<8x128xbf16, #tpu.memory_space<vmem>>, %arg13: memref<128x8xbf16, #tpu.memory_space<vmem>>, %arg14: memref<128x256xbf16, #tpu.memory_space<vmem>>, %arg15: memref<1x256xf32, #tpu.memory_space<vmem>>, %arg16: memref<1x256xf32, #tpu.memory_space<vmem>>, %arg17: memref<1x256xf32, #tpu.memory_space<vmem>>, %arg18: memref<128x256xf32, #tpu.memory_space<vmem>>) attributes {dimension_semantics = [#tpu.dimension_semantics<parallel>], iteration_bounds = array<i64: 2>, scalar_prefetch = 0 : i64, scratch_operands = 0 : i64, tpu.core_type = #tpu.core_type<tc>, window_params = [{transform_indices = @transform_0, window_bounds = array<i64: 128, 128>}, {pipeline_mode = #tpu.pipeline_mode<synchronous>, transform_indices = @transform_1, window_bounds = array<i64: 2, 128, 1>}, {pipeline_mode = #tpu.pipeline_mode<synchronous>, transform_indices = @transform_2, window_bounds = array<i64: 3, 128, 256>}, {pipeline_mode = #tpu.pipeline_mode<synchronous>, transform_indices = @transform_3, window_bounds = array<i64: 1, 256>}, {pipeline_mode = #tpu.pipeline_mode<synchronous>, transform_indices = @transform_4, window_bounds = array<i64: 1, 256>}, {pipeline_mode = #tpu.pipeline_mode<synchronous>, transform_indices = @transform_5, window_bounds = array<i64: 1, 256>}, {pipeline_mode = #tpu.pipeline_mode<synchronous>, transform_indices = @transform_6, window_bounds = array<i64: 3, 256, 256>}, {pipeline_mode = #tpu.pipeline_mode<synchronous>, transform_indices = @transform_7, window_bounds = array<i64: 1, 256>}, {pipeline_mode = #tpu.pipeline_mode<synchronous>, transform_indices = @transform_8, window_bounds = array<i64: 1, 256>}, {pipeline_mode = #tpu.pipeline_mode<synchronous>, transform_indices = @transform_9, window_bounds = array<i64: 1, 256>}, {pipeline_mode = #tpu.pipeline_mode<synchronous>, transform_indices = @transform_10, window_bounds = array<i64: 256, 256>}, {pipeline_mode = #tpu.pipeline_mode<synchronous>, transform_indices = @transform_11, window_bounds = array<i64: 8, 128>}, {pipeline_mode = #tpu.pipeline_mode<synchronous>, transform_indices = @transform_12, window_bounds = array<i64: 128, 8>}, {pipeline_mode = #tpu.pipeline_mode<synchronous>, transform_indices = @transform_13, window_bounds = array<i64: 128, 256>}, {pipeline_mode = #tpu.pipeline_mode<synchronous>, transform_indices = @transform_14, window_bounds = array<i64: 1, 256>}, {pipeline_mode = #tpu.pipeline_mode<synchronous>, transform_indices = @transform_15, window_bounds = array<i64: 1, 256>}, {pipeline_mode = #tpu.pipeline_mode<synchronous>, transform_indices = @transform_16, window_bounds = array<i64: 1, 256>}, {transform_indices = @transform_17, window_bounds = array<i64: 128, 256>}]} {
    %c0 = arith.constant 0 : index
    %c0_0 = arith.constant 0 : index
    %0 = vector.load %arg1[%c0, %c0_0] : memref<128x128xbf16, #tpu.memory_space<vmem>>, vector<128x128xbf16>
    %c0_1 = arith.constant 0 : index
    %c0_2 = arith.constant 0 : index
    %c0_3 = arith.constant 0 : index
    %1 = vector.load %arg2[%c0_1, %c0_2, %c0_3] : memref<2x128x1xf32, #tpu.memory_space<vmem>>, vector<1x128x1xf32>
    %2 = vector.shape_cast %1 : vector<1x128x1xf32> to vector<128x1xf32>
    %c1 = arith.constant 1 : index
    %c0_4 = arith.constant 0 : index
    %c0_5 = arith.constant 0 : index
    %3 = vector.load %arg2[%c1, %c0_4, %c0_5] : memref<2x128x1xf32, #tpu.memory_space<vmem>>, vector<1x128x1xf32>
    %4 = vector.shape_cast %3 : vector<1x128x1xf32> to vector<128x1xf32>
    %c0_6 = arith.constant 0 : index
    %c0_7 = arith.constant 0 : index
    %5 = vector.load %arg11[%c0_6, %c0_7] : memref<256x256xbf16, #tpu.memory_space<vmem>>, vector<256x256xbf16>
    %c0_8 = arith.constant 0 : index
    %c0_9 = arith.constant 0 : index
    %6 = vector.load %arg12[%c0_8, %c0_9] : memref<8x128xbf16, #tpu.memory_space<vmem>>, vector<8x128xbf16>
    %c0_10 = arith.constant 0 : index
    %c0_11 = arith.constant 0 : index
    %7 = vector.load %arg13[%c0_10, %c0_11] : memref<128x8xbf16, #tpu.memory_space<vmem>>, vector<128x8xbf16>
    %c0_12 = arith.constant 0 : index
    %c0_13 = arith.constant 0 : index
    %8 = vector.load %arg4[%c0_12, %c0_13] : memref<1x256xf32, #tpu.memory_space<vmem>>, vector<1x256xf32>
    %c1_14 = arith.constant 1 : index
    %c0_15 = arith.constant 0 : index
    %c0_16 = arith.constant 0 : index
    %9 = vector.load %arg3[%c1_14, %c0_15, %c0_16] : memref<3x128x256xbf16, #tpu.memory_space<vmem>>, vector<1x128x256xbf16>
    %10 = vector.shape_cast %9 : vector<1x128x256xbf16> to vector<128x256xbf16>
    %cst = arith.constant dense<0.000000e+00> : vector<128x256xf32>
    %11 = tpu.matmul %0, %10, %cst {dimension_numbers = #tpu.dot_dimension_numbers<[1], [0], [0], [1], [0, 0, 1, 1], [], []>} : vector<128x128xbf16>, vector<128x256xbf16>, vector<128x256xf32> -> vector<128x256xf32>
    %12 = vector.broadcast %8 : vector<1x256xf32> to vector<128x256xf32>
    %13 = arith.addf %11, %12 : vector<128x256xf32>
    %c0_17 = arith.constant 0 : index
    %c0_18 = arith.constant 0 : index
    %c0_19 = arith.constant 0 : index
    %14 = vector.load %arg3[%c0_17, %c0_18, %c0_19] : memref<3x128x256xbf16, #tpu.memory_space<vmem>>, vector<1x128x256xbf16>
    %15 = vector.shape_cast %14 : vector<1x128x256xbf16> to vector<128x256xbf16>
    %cst_20 = arith.constant dense<0.000000e+00> : vector<128x256xf32>
    %16 = tpu.matmul %0, %15, %cst_20 {dimension_numbers = #tpu.dot_dimension_numbers<[1], [0], [0], [1], [0, 0, 1, 1], [], []>} : vector<128x128xbf16>, vector<128x256xbf16>, vector<128x256xf32> -> vector<128x256xf32>
    %c1_i32 = arith.constant 1 : i32
    %17 = tpu.dynamic_rotate %16 by %c1_i32 dim 0 : vector<128x256xf32>, i32 -> vector<128x256xf32>
    %18 = vector.broadcast %2 : vector<128x1xf32> to vector<128x256xf32>
    %19 = arith.mulf %18, %17 : vector<128x256xf32>
    %20 = arith.addf %13, %19 : vector<128x256xf32>
    %c2 = arith.constant 2 : index
    %c0_21 = arith.constant 0 : index
    %c0_22 = arith.constant 0 : index
    %21 = vector.load %arg3[%c2, %c0_21, %c0_22] : memref<3x128x256xbf16, #tpu.memory_space<vmem>>, vector<1x128x256xbf16>
    %22 = vector.shape_cast %21 : vector<1x128x256xbf16> to vector<128x256xbf16>
    %cst_23 = arith.constant dense<0.000000e+00> : vector<128x256xf32>
    %23 = tpu.matmul %0, %22, %cst_23 {dimension_numbers = #tpu.dot_dimension_numbers<[1], [0], [0], [1], [0, 0, 1, 1], [], []>} : vector<128x128xbf16>, vector<128x256xbf16>, vector<128x256xf32> -> vector<128x256xf32>
    %c127_i32 = arith.constant 127 : i32
    %24 = tpu.dynamic_rotate %23 by %c127_i32 dim 0 : vector<128x256xf32>, i32 -> vector<128x256xf32>
    %25 = vector.broadcast %4 : vector<128x1xf32> to vector<128x256xf32>
    %26 = arith.mulf %25, %24 : vector<128x256xf32>
    %27 = arith.addf %20, %26 : vector<128x256xf32>
    %c0_24 = arith.constant 0 : index
    %c0_25 = arith.constant 0 : index
    %28 = vector.load %arg5[%c0_24, %c0_25] : memref<1x256xf32, #tpu.memory_space<vmem>>, vector<1x256xf32>
    %c0_26 = arith.constant 0 : index
    %c0_27 = arith.constant 0 : index
    %29 = vector.load %arg6[%c0_26, %c0_27] : memref<1x256xf32, #tpu.memory_space<vmem>>, vector<1x256xf32>
    %30 = arith.truncf %27 : vector<128x256xf32> to vector<128x256xbf16>
    %cst_28 = arith.constant dense<0.000000e+00> : vector<8x256xf32>
    %31 = tpu.matmul %6, %30, %cst_28 {dimension_numbers = #tpu.dot_dimension_numbers<[1], [0], [0], [1], [0, 0, 1, 1], [], []>} : vector<8x128xbf16>, vector<128x256xbf16>, vector<8x256xf32> -> vector<8x256xf32>
    %32 = arith.truncf %31 : vector<8x256xf32> to vector<8x256xbf16>
    %cst_29 = arith.constant dense<0.000000e+00> : vector<8x256xf32>
    %33 = tpu.matmul %32, %5, %cst_29 {dimension_numbers = #tpu.dot_dimension_numbers<[1], [0], [0], [1], [0, 0, 1, 1], [], []>} : vector<8x256xbf16>, vector<256x256xbf16>, vector<8x256xf32> -> vector<8x256xf32>
    %34 = arith.truncf %33 : vector<8x256xf32> to vector<8x256xbf16>
    %cst_30 = arith.constant dense<0.000000e+00> : vector<128x256xf32>
    %35 = tpu.matmul %7, %34, %cst_30 {dimension_numbers = #tpu.dot_dimension_numbers<[1], [0], [0], [1], [0, 0, 1, 1], [], []>} : vector<128x8xbf16>, vector<8x256xbf16>, vector<128x256xf32> -> vector<128x256xf32>
    %36 = arith.subf %27, %35 : vector<128x256xf32>
    %37 = arith.mulf %36, %36 : vector<128x256xf32>
    %38 = arith.truncf %37 : vector<128x256xf32> to vector<128x256xbf16>
    %cst_31 = arith.constant dense<0.000000e+00> : vector<8x256xf32>
    %39 = tpu.matmul %6, %38, %cst_31 {dimension_numbers = #tpu.dot_dimension_numbers<[1], [0], [0], [1], [0, 0, 1, 1], [], []>} : vector<8x128xbf16>, vector<128x256xbf16>, vector<8x256xf32> -> vector<8x256xf32>
    %40 = arith.truncf %39 : vector<8x256xf32> to vector<8x256xbf16>
    %cst_32 = arith.constant dense<0.000000e+00> : vector<8x256xf32>
    %41 = tpu.matmul %40, %5, %cst_32 {dimension_numbers = #tpu.dot_dimension_numbers<[1], [0], [0], [1], [0, 0, 1, 1], [], []>} : vector<8x256xbf16>, vector<256x256xbf16>, vector<8x256xf32> -> vector<8x256xf32>
    %cst_33 = arith.constant 9.99999974E-6 : f32
    %42 = vector.broadcast %cst_33 : f32 to vector<8x256xf32>
    %43 = arith.addf %41, %42 : vector<8x256xf32>
    %44 = math.rsqrt %43 : vector<8x256xf32>
    %45 = arith.truncf %44 : vector<8x256xf32> to vector<8x256xbf16>
    %cst_34 = arith.constant dense<0.000000e+00> : vector<128x256xf32>
    %46 = tpu.matmul %7, %45, %cst_34 {dimension_numbers = #tpu.dot_dimension_numbers<[1], [0], [0], [1], [0, 0, 1, 1], [], []>} : vector<128x8xbf16>, vector<8x256xbf16>, vector<128x256xf32> -> vector<128x256xf32>
    %47 = vector.broadcast %28 : vector<1x256xf32> to vector<128x256xf32>
    %48 = arith.mulf %46, %47 : vector<128x256xf32>
    %49 = arith.mulf %36, %48 : vector<128x256xf32>
    %50 = vector.broadcast %29 : vector<1x256xf32> to vector<128x256xf32>
    %51 = arith.addf %49, %50 : vector<128x256xf32>
    %cst_35 = arith.constant 0.000000e+00 : f32
    %52 = vector.broadcast %cst_35 : f32 to vector<128x256xf32>
    %53 = arith.maximumf %51, %52 : vector<128x256xf32>
    %54 = arith.truncf %53 : vector<128x256xf32> to vector<128x256xbf16>
    %c0_36 = arith.constant 0 : index
    %c0_37 = arith.constant 0 : index
    %55 = vector.load %arg8[%c0_36, %c0_37] : memref<1x256xf32, #tpu.memory_space<vmem>>, vector<1x256xf32>
    %c1_38 = arith.constant 1 : index
    %c0_39 = arith.constant 0 : index
    %c0_40 = arith.constant 0 : index
    %56 = vector.load %arg7[%c1_38, %c0_39, %c0_40] : memref<3x256x256xbf16, #tpu.memory_space<vmem>>, vector<1x256x256xbf16>
    %57 = vector.shape_cast %56 : vector<1x256x256xbf16> to vector<256x256xbf16>
    %cst_41 = arith.constant dense<0.000000e+00> : vector<128x256xf32>
    %58 = tpu.matmul %54, %57, %cst_41 {dimension_numbers = #tpu.dot_dimension_numbers<[1], [0], [0], [1], [0, 0, 1, 1], [], []>} : vector<128x256xbf16>, vector<256x256xbf16>, vector<128x256xf32> -> vector<128x256xf32>
    %59 = vector.broadcast %55 : vector<1x256xf32> to vector<128x256xf32>
    %60 = arith.addf %58, %59 : vector<128x256xf32>
    %c0_42 = arith.constant 0 : index
    %c0_43 = arith.constant 0 : index
    %c0_44 = arith.constant 0 : index
    %61 = vector.load %arg7[%c0_42, %c0_43, %c0_44] : memref<3x256x256xbf16, #tpu.memory_space<vmem>>, vector<1x256x256xbf16>
    %62 = vector.shape_cast %61 : vector<1x256x256xbf16> to vector<256x256xbf16>
    %cst_45 = arith.constant dense<0.000000e+00> : vector<128x256xf32>
    %63 = tpu.matmul %54, %62, %cst_45 {dimension_numbers = #tpu.dot_dimension_numbers<[1], [0], [0], [1], [0, 0, 1, 1], [], []>} : vector<128x256xbf16>, vector<256x256xbf16>, vector<128x256xf32> -> vector<128x256xf32>
    %c1_i32_46 = arith.constant 1 : i32
    %64 = tpu.dynamic_rotate %63 by %c1_i32_46 dim 0 : vector<128x256xf32>, i32 -> vector<128x256xf32>
    %65 = vector.broadcast %2 : vector<128x1xf32> to vector<128x256xf32>
    %66 = arith.mulf %65, %64 : vector<128x256xf32>
    %67 = arith.addf %60, %66 : vector<128x256xf32>
    %c2_47 = arith.constant 2 : index
    %c0_48 = arith.constant 0 : index
    %c0_49 = arith.constant 0 : index
    %68 = vector.load %arg7[%c2_47, %c0_48, %c0_49] : memref<3x256x256xbf16, #tpu.memory_space<vmem>>, vector<1x256x256xbf16>
    %69 = vector.shape_cast %68 : vector<1x256x256xbf16> to vector<256x256xbf16>
    %cst_50 = arith.constant dense<0.000000e+00> : vector<128x256xf32>
    %70 = tpu.matmul %54, %69, %cst_50 {dimension_numbers = #tpu.dot_dimension_numbers<[1], [0], [0], [1], [0, 0, 1, 1], [], []>} : vector<128x256xbf16>, vector<256x256xbf16>, vector<128x256xf32> -> vector<128x256xf32>
    %c127_i32_51 = arith.constant 127 : i32
    %71 = tpu.dynamic_rotate %70 by %c127_i32_51 dim 0 : vector<128x256xf32>, i32 -> vector<128x256xf32>
    %72 = vector.broadcast %4 : vector<128x1xf32> to vector<128x256xf32>
    %73 = arith.mulf %72, %71 : vector<128x256xf32>
    %74 = arith.addf %67, %73 : vector<128x256xf32>
    %c0_52 = arith.constant 0 : index
    %c0_53 = arith.constant 0 : index
    %75 = vector.load %arg9[%c0_52, %c0_53] : memref<1x256xf32, #tpu.memory_space<vmem>>, vector<1x256xf32>
    %c0_54 = arith.constant 0 : index
    %c0_55 = arith.constant 0 : index
    %76 = vector.load %arg10[%c0_54, %c0_55] : memref<1x256xf32, #tpu.memory_space<vmem>>, vector<1x256xf32>
    %77 = arith.truncf %74 : vector<128x256xf32> to vector<128x256xbf16>
    %cst_56 = arith.constant dense<0.000000e+00> : vector<8x256xf32>
    %78 = tpu.matmul %6, %77, %cst_56 {dimension_numbers = #tpu.dot_dimension_numbers<[1], [0], [0], [1], [0, 0, 1, 1], [], []>} : vector<8x128xbf16>, vector<128x256xbf16>, vector<8x256xf32> -> vector<8x256xf32>
    %79 = arith.truncf %78 : vector<8x256xf32> to vector<8x256xbf16>
    %cst_57 = arith.constant dense<0.000000e+00> : vector<8x256xf32>
    %80 = tpu.matmul %79, %5, %cst_57 {dimension_numbers = #tpu.dot_dimension_numbers<[1], [0], [0], [1], [0, 0, 1, 1], [], []>} : vector<8x256xbf16>, vector<256x256xbf16>, vector<8x256xf32> -> vector<8x256xf32>
    %81 = arith.truncf %80 : vector<8x256xf32> to vector<8x256xbf16>
    %cst_58 = arith.constant dense<0.000000e+00> : vector<128x256xf32>
    %82 = tpu.matmul %7, %81, %cst_58 {dimension_numbers = #tpu.dot_dimension_numbers<[1], [0], [0], [1], [0, 0, 1, 1], [], []>} : vector<128x8xbf16>, vector<8x256xbf16>, vector<128x256xf32> -> vector<128x256xf32>
    %83 = arith.subf %74, %82 : vector<128x256xf32>
    %84 = arith.mulf %83, %83 : vector<128x256xf32>
    %85 = arith.truncf %84 : vector<128x256xf32> to vector<128x256xbf16>
    %cst_59 = arith.constant dense<0.000000e+00> : vector<8x256xf32>
    %86 = tpu.matmul %6, %85, %cst_59 {dimension_numbers = #tpu.dot_dimension_numbers<[1], [0], [0], [1], [0, 0, 1, 1], [], []>} : vector<8x128xbf16>, vector<128x256xbf16>, vector<8x256xf32> -> vector<8x256xf32>
    %87 = arith.truncf %86 : vector<8x256xf32> to vector<8x256xbf16>
    %cst_60 = arith.constant dense<0.000000e+00> : vector<8x256xf32>
    %88 = tpu.matmul %87, %5, %cst_60 {dimension_numbers = #tpu.dot_dimension_numbers<[1], [0], [0], [1], [0, 0, 1, 1], [], []>} : vector<8x256xbf16>, vector<256x256xbf16>, vector<8x256xf32> -> vector<8x256xf32>
    %cst_61 = arith.constant 9.99999974E-6 : f32
    %89 = vector.broadcast %cst_61 : f32 to vector<8x256xf32>
    %90 = arith.addf %88, %89 : vector<8x256xf32>
    %91 = math.rsqrt %90 : vector<8x256xf32>
    %92 = arith.truncf %91 : vector<8x256xf32> to vector<8x256xbf16>
    %cst_62 = arith.constant dense<0.000000e+00> : vector<128x256xf32>
    %93 = tpu.matmul %7, %92, %cst_62 {dimension_numbers = #tpu.dot_dimension_numbers<[1], [0], [0], [1], [0, 0, 1, 1], [], []>} : vector<128x8xbf16>, vector<8x256xbf16>, vector<128x256xf32> -> vector<128x256xf32>
    %94 = vector.broadcast %75 : vector<1x256xf32> to vector<128x256xf32>
    %95 = arith.mulf %93, %94 : vector<128x256xf32>
    %96 = arith.mulf %83, %95 : vector<128x256xf32>
    %97 = vector.broadcast %76 : vector<1x256xf32> to vector<128x256xf32>
    %98 = arith.addf %96, %97 : vector<128x256xf32>
    %cst_63 = arith.constant 0.000000e+00 : f32
    %99 = vector.broadcast %cst_63 : f32 to vector<128x256xf32>
    %100 = arith.maximumf %98, %99 : vector<128x256xf32>
    %c0_64 = arith.constant 0 : index
    %c0_65 = arith.constant 0 : index
    %101 = vector.load %arg14[%c0_64, %c0_65] : memref<128x256xbf16, #tpu.memory_space<vmem>>, vector<128x256xbf16>
    %cst_66 = arith.constant dense<0.000000e+00> : vector<128x256xf32>
    %102 = tpu.matmul %0, %101, %cst_66 {dimension_numbers = #tpu.dot_dimension_numbers<[1], [0], [0], [1], [0, 0, 1, 1], [], []>} : vector<128x128xbf16>, vector<128x256xbf16>, vector<128x256xf32> -> vector<128x256xf32>
    %c0_67 = arith.constant 0 : index
    %c0_68 = arith.constant 0 : index
    %103 = vector.load %arg15[%c0_67, %c0_68] : memref<1x256xf32, #tpu.memory_space<vmem>>, vector<1x256xf32>
    %104 = vector.broadcast %103 : vector<1x256xf32> to vector<128x256xf32>
    %105 = arith.addf %102, %104 : vector<128x256xf32>
    %c0_69 = arith.constant 0 : index
    %c0_70 = arith.constant 0 : index
    %106 = vector.load %arg16[%c0_69, %c0_70] : memref<1x256xf32, #tpu.memory_space<vmem>>, vector<1x256xf32>
    %c0_71 = arith.constant 0 : index
    %c0_72 = arith.constant 0 : index
    %107 = vector.load %arg17[%c0_71, %c0_72] : memref<1x256xf32, #tpu.memory_space<vmem>>, vector<1x256xf32>
    %108 = arith.truncf %105 : vector<128x256xf32> to vector<128x256xbf16>
    %cst_73 = arith.constant dense<0.000000e+00> : vector<8x256xf32>
    %109 = tpu.matmul %6, %108, %cst_73 {dimension_numbers = #tpu.dot_dimension_numbers<[1], [0], [0], [1], [0, 0, 1, 1], [], []>} : vector<8x128xbf16>, vector<128x256xbf16>, vector<8x256xf32> -> vector<8x256xf32>
    %110 = arith.truncf %109 : vector<8x256xf32> to vector<8x256xbf16>
    %cst_74 = arith.constant dense<0.000000e+00> : vector<8x256xf32>
    %111 = tpu.matmul %110, %5, %cst_74 {dimension_numbers = #tpu.dot_dimension_numbers<[1], [0], [0], [1], [0, 0, 1, 1], [], []>} : vector<8x256xbf16>, vector<256x256xbf16>, vector<8x256xf32> -> vector<8x256xf32>
    %112 = arith.truncf %111 : vector<8x256xf32> to vector<8x256xbf16>
    %cst_75 = arith.constant dense<0.000000e+00> : vector<128x256xf32>
    %113 = tpu.matmul %7, %112, %cst_75 {dimension_numbers = #tpu.dot_dimension_numbers<[1], [0], [0], [1], [0, 0, 1, 1], [], []>} : vector<128x8xbf16>, vector<8x256xbf16>, vector<128x256xf32> -> vector<128x256xf32>
    %114 = arith.subf %105, %113 : vector<128x256xf32>
    %115 = arith.mulf %114, %114 : vector<128x256xf32>
    %116 = arith.truncf %115 : vector<128x256xf32> to vector<128x256xbf16>
    %cst_76 = arith.constant dense<0.000000e+00> : vector<8x256xf32>
    %117 = tpu.matmul %6, %116, %cst_76 {dimension_numbers = #tpu.dot_dimension_numbers<[1], [0], [0], [1], [0, 0, 1, 1], [], []>} : vector<8x128xbf16>, vector<128x256xbf16>, vector<8x256xf32> -> vector<8x256xf32>
    %118 = arith.truncf %117 : vector<8x256xf32> to vector<8x256xbf16>
    %cst_77 = arith.constant dense<0.000000e+00> : vector<8x256xf32>
    %119 = tpu.matmul %118, %5, %cst_77 {dimension_numbers = #tpu.dot_dimension_numbers<[1], [0], [0], [1], [0, 0, 1, 1], [], []>} : vector<8x256xbf16>, vector<256x256xbf16>, vector<8x256xf32> -> vector<8x256xf32>
    %cst_78 = arith.constant 9.99999974E-6 : f32
    %120 = vector.broadcast %cst_78 : f32 to vector<8x256xf32>
    %121 = arith.addf %119, %120 : vector<8x256xf32>
    %122 = math.rsqrt %121 : vector<8x256xf32>
    %123 = arith.truncf %122 : vector<8x256xf32> to vector<8x256xbf16>
    %cst_79 = arith.constant dense<0.000000e+00> : vector<128x256xf32>
    %124 = tpu.matmul %7, %123, %cst_79 {dimension_numbers = #tpu.dot_dimension_numbers<[1], [0], [0], [1], [0, 0, 1, 1], [], []>} : vector<128x8xbf16>, vector<8x256xbf16>, vector<128x256xf32> -> vector<128x256xf32>
    %125 = vector.broadcast %106 : vector<1x256xf32> to vector<128x256xf32>
    %126 = arith.mulf %124, %125 : vector<128x256xf32>
    %127 = arith.mulf %114, %126 : vector<128x256xf32>
    %128 = vector.broadcast %107 : vector<1x256xf32> to vector<128x256xf32>
    %129 = arith.addf %127, %128 : vector<128x256xf32>
    %130 = arith.addf %129, %100 : vector<128x256xf32>
    %cst_80 = arith.constant 0.000000e+00 : f32
    %131 = vector.broadcast %cst_80 : f32 to vector<128x256xf32>
    %132 = arith.maximumf %130, %131 : vector<128x256xf32>
    %c0_81 = arith.constant 0 : index
    %c0_82 = arith.constant 0 : index
    %133 = vector.load %arg18[%c0_81, %c0_82] : memref<128x256xf32, #tpu.memory_space<vmem>>, vector<128x256xf32>
    tpu.vector_store %arg18[%c0_81, %c0_82], %132 {strides = array<i32>} : memref<128x256xf32, #tpu.memory_space<vmem>>, vector<128x256xf32>,
    return
  }
  func.func @transform_0(%arg0: i32) -> (i32, i32) {
    %c0_i32 = arith.constant 0 : i32
    %c0_i32_0 = arith.constant 0 : i32
    return %arg0, %c0_i32 : i32, i32
  }
  func.func @transform_1(%arg0: i32) -> (i32, i32, i32) {
    %c0_i32 = arith.constant 0 : i32
    %c0_i32_0 = arith.constant 0 : i32
    %c0_i32_1 = arith.constant 0 : i32
    %c0_i32_2 = arith.constant 0 : i32
    return %c0_i32, %c0_i32_0, %c0_i32_1 : i32, i32, i32
  }
  func.func @transform_2(%arg0: i32) -> (i32, i32, i32) {
    %c0_i32 = arith.constant 0 : i32
    %c0_i32_0 = arith.constant 0 : i32
    %c0_i32_1 = arith.constant 0 : i32
    %c0_i32_2 = arith.constant 0 : i32
    return %c0_i32, %c0_i32_0, %c0_i32_1 : i32, i32, i32
  }
  func.func @transform_3(%arg0: i32) -> (i32, i32) {
    %c0_i32 = arith.constant 0 : i32
    %c0_i32_0 = arith.constant 0 : i32
    %c0_i32_1 = arith.constant 0 : i32
    return %c0_i32, %c0_i32_0 : i32, i32
  }
  func.func @transform_4(%arg0: i32) -> (i32, i32) {
    %c0_i32 = arith.constant 0 : i32
    %c0_i32_0 = arith.constant 0 : i32
    %c0_i32_1 = arith.constant 0 : i32
    return %c0_i32, %c0_i32_0 : i32, i32
  }
  func.func @transform_5(%arg0: i32) -> (i32, i32) {
    %c0_i32 = arith.constant 0 : i32
    %c0_i32_0 = arith.constant 0 : i32
    %c0_i32_1 = arith.constant 0 : i32
    return %c0_i32, %c0_i32_0 : i32, i32
  }
  func.func @transform_6(%arg0: i32) -> (i32, i32, i32) {
    %c0_i32 = arith.constant 0 : i32
    %c0_i32_0 = arith.constant 0 : i32
    %c0_i32_1 = arith.constant 0 : i32
    %c0_i32_2 = arith.constant 0 : i32
    return %c0_i32, %c0_i32_0, %c0_i32_1 : i32, i32, i32
  }
  func.func @transform_7(%arg0: i32) -> (i32, i32) {
    %c0_i32 = arith.constant 0 : i32
    %c0_i32_0 = arith.constant 0 : i32
    %c0_i32_1 = arith.constant 0 : i32
    return %c0_i32, %c0_i32_0 : i32, i32
  }
  func.func @transform_8(%arg0: i32) -> (i32, i32) {
    %c0_i32 = arith.constant 0 : i32
    %c0_i32_0 = arith.constant 0 : i32
    %c0_i32_1 = arith.constant 0 : i32
    return %c0_i32, %c0_i32_0 : i32, i32
  }
  func.func @transform_9(%arg0: i32) -> (i32, i32) {
    %c0_i32 = arith.constant 0 : i32
    %c0_i32_0 = arith.constant 0 : i32
    %c0_i32_1 = arith.constant 0 : i32
    return %c0_i32, %c0_i32_0 : i32, i32
  }
  func.func @transform_10(%arg0: i32) -> (i32, i32) {
    %c0_i32 = arith.constant 0 : i32
    %c0_i32_0 = arith.constant 0 : i32
    %c0_i32_1 = arith.constant 0 : i32
    return %c0_i32, %c0_i32_0 : i32, i32
  }
  func.func @transform_11(%arg0: i32) -> (i32, i32) {
    %c0_i32 = arith.constant 0 : i32
    %c0_i32_0 = arith.constant 0 : i32
    %c0_i32_1 = arith.constant 0 : i32
    return %c0_i32, %c0_i32_0 : i32, i32
  }
  func.func @transform_12(%arg0: i32) -> (i32, i32) {
    %c0_i32 = arith.constant 0 : i32
    %c0_i32_0 = arith.constant 0 : i32
    %c0_i32_1 = arith.constant 0 : i32
    return %c0_i32, %c0_i32_0 : i32, i32
  }
  func.func @transform_13(%arg0: i32) -> (i32, i32) {
    %c0_i32 = arith.constant 0 : i32
    %c0_i32_0 = arith.constant 0 : i32
    %c0_i32_1 = arith.constant 0 : i32
    return %c0_i32, %c0_i32_0 : i32, i32
  }
  func.func @transform_14(%arg0: i32) -> (i32, i32) {
    %c0_i32 = arith.constant 0 : i32
    %c0_i32_0 = arith.constant 0 : i32
    %c0_i32_1 = arith.constant 0 : i32
    return %c0_i32, %c0_i32_0 : i32, i32
  }
  func.func @transform_15(%arg0: i32) -> (i32, i32) {
    %c0_i32 = arith.constant 0 : i32
    %c0_i32_0 = arith.constant 0 : i32
    %c0_i32_1 = arith.constant 0 : i32
    return %c0_i32, %c0_i32_0 : i32, i32
  }
  func.func @transform_16(%arg0: i32) -> (i32, i32) {
    %c0_i32 = arith.constant 0 : i32
    %c0_i32_0 = arith.constant 0 : i32
    %c0_i32_1 = arith.constant 0 : i32
    return %c0_i32, %c0_i32_0 : i32, i32
  }
  func.func @transform_17(%arg0: i32) -> (i32, i32) {
    %c0_i32 = arith.constant 0 : i32
    %c0_i32_0 = arith.constant 0 : i32
    return %arg0, %c0_i32 : i32, i32
  }
}

</mosaic_0001>

<bundles_post_ra>
// kernel: tile.48
= control target key start
LH: loop header
LB: loop body
LE: loop exit
PB: predicated region body
PF: predicated region fallthrough
CT: control target
= control target key end

     0   :  { %2 = vsyncpa [#allocation1], 0  ;;  %s45_s6 = smov [#allocation0]   ;;  %s65_s0 = inlined_call_operand.hbm [shape: f32[16], index: 0, kind: input, shape index: {}]   ;;  %s66_s1 = inlined_call_operand.vmem [shape: f32[16,16], index: 1, kind: output, shape index: {}]  }
   0x1   :  { %s9_s7 = sshll.u32 %s45_s6, 4  ;;  %s10_s7 = int_to_ptr.vmem [resolvable:$true] %s9_s7 }
   0x2   :  { %s31_s8 = scalar_lea.vmem %s10_s7, 16  ;;  %s35_s9 = scalar_lea.vmem %s10_s7, 32 }
   0x3   :  { %p32_p0 = scmp.ne.s32.totalorder %s10_s7, %s31_s8  ;;  %p36_p1 = scmp.lt.s32.totalorder %s10_s7, %s10_s7 }
   0x4   :  { %p37_p2 = scmp.lt.s32.totalorder %s35_s9, %s31_s8 }
   0x6   :  { %p38_p3 = por %p37_p2, %p36_p1 }
   0x8   :  { %p39_p4 = pnand %p38_p3, %p32_p0 }
   0xa   :  { %42 = shalt.err (!%p39_p4)
}
   0xb   :  { %12 = dma.hbm_to_vmem [thread:$0]  %s65_s0, 16, %s10_s7, [#allocation1]  }
   0xc   :  { %43 = dma.done.wait [#allocation1], 16  }
   0xd   :  { %44 = vsyncadd [#allocation1], 4294967280  ;;  %v16_v0 = vld [vmem:[#allocation0] ss:$0 sm:$0xff] }
   0xe   :  { %17 = vst [vmem:[%s66_s1] sm:$0xff] %v16_v0  ;;  %21 = vst [vmem:[%s66_s1 + $0x8] sm:$0xff] %v16_v0 }
   0xf   :  { %20 = vsyncpa [#allocation1], 1 }

// kernel: tile.49
= control target key start
LH: loop header
LB: loop body
LE: loop exit
PB: predicated region body
PF: predicated region fallthrough
CT: control target
= control target key end

     0   :  { %s7_s6 = smov 3  ;;  %s21_s9 = smov 3  ;;  %vm4_vm0 = vcmask 130048   ;;  %vm11_vm1 = vcmask 1048448   ;;  %vm18_vm2 = vcmask 917248   ;;  %vm25_vm3 = vcmask 786048   ;;  %s131_s0 = inlined_call_operand.vmem [shape: f32[16,16], index: 0, kind: input, shape index: {}]   ;;  %s132_s1 = inlined_call_operand.vmem [shape: f32[1,256], index: 1, kind: output, shape index: {}]  }
   0x1   :  { %v69_v0 = vld [vmem:[%s131_s0 + $0x7] ss:$8 sm:%s7_s6]   ;;  %s84_s10 = smov 112   ;;  %v71_v1 = vld [vmem:[%s131_s0 + $0x5] ss:$8 sm:%s21_s9]   ;;  %s14_s13 = smov 3 }
   0x2   :  { %9 = vrot.lane.b32.xlu0 %v69_v0, %s84_s10  ;;  %s85_s14 = smov 80   ;;  %v70_v2 = vld [vmem:[%s131_s0 + $0x6] ss:$8 sm:%s14_s13]   ;;  %s28_s17 = smov 3  ;;  %vm32_vm4 = vcmask 654848   ;;  %vm39_vm5 = vcmask 523648  }
   0x3   :  { %23 = vrot.lane.b32.xlu1 %v71_v1, %s85_s14  ;;  %v72_v3 = vld [vmem:[%s131_s0 + $0x4] ss:$8 sm:%s28_s17]   ;;  %s35_s20 = smov 3  ;;  %s42_s21 = smov 3  ;;  %vm46_vm6 = vcmask 392448   ;;  %vm53_vm7 = vcmask 261248  }
   0x4   :  { %s86_s22 = smov 96   ;;  %s87_s23 = smov 64   ;;  %v73_v4 = vld [vmem:[%s131_s0 + $0x3] ss:$8 sm:%s35_s20]   ;;  %v74_v5 = vld [vmem:[%s131_s0 + $0x2] ss:$8 sm:%s42_s21]  }
   0x5   :  { %s2_s26 = smov 3  ;;  %s49_s29 = smov 3 }
   0x6   :  { %16 = vrot.lane.b32.xlu0 %v70_v2, %s86_s22  ;;  %v3_v6 = vld [vmem:[%s131_s0] ss:$8 sm:%s2_s26]   ;;  %s88_s3 = smov 48   ;;  %s89_s4 = smov 32  }
   0x7   :  { %30 = vrot.lane.b32.xlu1 %v72_v3, %s87_s23  ;;  %5 = vst.msk [vmem:[#allocation0] ss:$8 sm:$0x3] %vm4_vm0, %v3_v6   ;;  %v75_v7 = vld [vmem:[%s131_s0 + $0x1] ss:$8 sm:%s49_s29]   ;;  %s90_s0 = smov 16  }
   0xa   :  { %37 = vrot.lane.b32.xlu0 %v73_v4, %s88_s3 }
   0xb   :  { %44 = vrot.lane.b32.xlu1 %v74_v5, %s89_s4 }
   0xe   :  { %51 = vrot.lane.b32.xlu0 %v75_v7, %s90_s0 }
  0x74   :  { %v10_v8 = vpop.permute.xlu0 %9  }
  0x75   :  { %12 = vst.msk [vmem:[#allocation0] ss:$8 sm:$0x3] %vm11_vm1, %v10_v8   ;;  %v24_v9 = vpop.permute.xlu1 %23  }
  0x78   :  { %v17_v10 = vpop.permute.xlu0 %16  }
  0x79   :  { %19 = vst.msk [vmem:[#allocation0] ss:$8 sm:$0x3] %vm18_vm2, %v17_v10   ;;  %v31_v11 = vpop.permute.xlu1 %30  }
  0x7a   :  { %26 = vst.msk [vmem:[#allocation0] ss:$8 sm:$0x3] %vm25_vm3, %v24_v9  }
  0x7b   :  { %33 = vst.msk [vmem:[#allocation0] ss:$8 sm:$0x3] %vm32_vm4, %v31_v11  }
  0x7c   :  { %v38_v12 = vpop.permute.xlu0 %37  }
  0x7d   :  { %40 = vst.msk [vmem:[#allocation0] ss:$8 sm:$0x3] %vm39_vm5, %v38_v12   ;;  %v45_v13 = vpop.permute.xlu1 %44  }
  0x7e   :  { %47 = vst.msk [vmem:[#allocation0] ss:$8 sm:$0x3] %vm46_vm6, %v45_v13  }
  0x80   :  { %v52_v14 = vpop.permute.xlu0 %51  }
  0x81   :  { %54 = vst.msk [vmem:[#allocation0] ss:$8 sm:$0x3] %vm53_vm7, %v52_v14  }
  0x88   :  { %v59_v15 = vld [vmem:[#allocation0] sm:$0x1]  ;;  %v64_v16 = vld [vmem:[#allocation0 + $0x8] sm:$0x1] }
  0x89   :  { %62 = vst [vmem:[%s132_s1] sm:$0x1] %v59_v15  ;;  %76 = vst [vmem:[%s132_s1 + $0x1] sm:$0x1] %v64_v16 }

// kernel: residual_block_pallas.1
= control target key start
LH: loop header
LB: loop body
LE: loop exit
PB: predicated region body
PF: predicated region fallthrough
CT: control target
= control target key end

     0   :  { %s6415_s24 = smov 0   ;;  %s10876_s0 = inlined_call_operand.vmem [shape: bf16[256,128], index: 0, kind: input, shape index: {}]   ;;  %s10877_s1 = inlined_call_operand.vmem [shape: f32[2,128,1], index: 1, kind: input, shape index: {}]   ;;  %s10878_s2 = inlined_call_operand.vmem [shape: bf16[3,128,256], index: 2, kind: input, shape index: {}]   ;;  %s10879_s3 = inlined_call_operand.vmem [shape: f32[1,256], index: 3, kind: input, shape index: {}]   ;;  %s10880_s4 = inlined_call_operand.vmem [shape: f32[1,256], index: 4, kind: input, shape index: {}]   ;;  %s10881_s5 = inlined_call_operand.vmem [shape: f32[1,256], index: 5, kind: input, shape index: {}]   ;;  %s10882_s6 = inlined_call_operand.vmem [shape: bf16[3,256,256], index: 6, kind: input, shape index: {}]   ;;  %s10883_s7 = inlined_call_operand.vmem [shape: f32[1,256], index: 7, kind: input, shape index: {}]   ;;  %s10884_s8 = inlined_call_operand.vmem [shape: f32[1,256], index: 8, kind: input, shape index: {}]   ;;  %s10885_s9 = inlined_call_operand.vmem [shape: f32[1,256], index: 9, kind: input, shape index: {}]   ;;  %s10886_s10 = inlined_call_operand.vmem [shape: bf16[256,256], index: 10, kind: input, shape index: {}]   ;;  %s10887_s11 = inlined_call_operand.vmem [shape: bf16[8,128], index: 11, kind: input, shape index: {}]   ;;  %s10888_s12 = inlined_call_operand.vmem [shape: bf16[128,8], index: 12, kind: input, shape index: {}]   ;;  %s10889_s13 = inlined_call_operand.vmem [shape: bf16[128,256], index: 13, kind: input, shape index: {}]   ;;  %s10890_s14 = inlined_call_operand.vmem [shape: f32[1,256], index: 14, kind: input, shape index: {}]   ;;  %s10891_s15 = inlined_call_operand.vmem [shape: f32[1,256], index: 15, kind: input, shape index: {}]   ;;  %s10892_s16 = inlined_call_operand.vmem [shape: f32[1,256], index: 16, kind: input, shape index: {}]   ;;  %s10893_s17 = inlined_call_operand.vmem [shape: f32[256,256], index: 17, kind: output, shape index: {}]  }
   0x1   :  { %11163 = sst [smem:[#allocation111_spill]] %s10876_s0 }
   0x2   :  { %11164 = sst [smem:[#allocation112_spill]] %s10877_s1 }
   0x3 LB: > { %s5512_s25 = sadd.s32 4294967295, %s6322_s24   ;;  %p5516_p0 = scmp.ge.s32.totalorder %s6322_s24, 1  ;;  %s6322_s24 = sphi %s6415_s24, %s27_s24  }
   0x4   : > { %p488_p1 = scmp.lt.s32.totalorder %s6322_s24, 3 }
   0x6   : > { %p489_p2 = pnand %p5516_p0, %p488_p1 }
   0x8   : > { %492 = sbr.rel (%p489_p2) target bundleno = 4671 (0x123f), region = 88 }
   0xd   : > { %v5910_v0 = vld [vmem:[%s10878_s2 + $0xf4] ss:$8 sps:$4 sm:$0xff]   ;;  %v10895_v2 = vmov 0   ;;  %v5914_v3 = vld [vmem:[%s10878_s2 + $0xf0] ss:$8 sps:$4 sm:$0xff]   ;;  %s5517_s30 = sshll.u32 %s5512_s25, 4 }
   0xe   : > { %v5912_v1 = vld [vmem:[%s10878_s2 + $0x74] ss:$8 sps:$4 sm:$0xff]   ;;  %842 = vmatprep.mubr.bf16.mxu0 %v10895_v2  ;;  %1051 = vmatprep.mubr.bf16.mxu1 %v10895_v2  ;;  %v5915_v4 = vld [vmem:[%s10878_s2 + $0x70] ss:$8 sps:$4 sm:$0xff]   ;;  %v5916_v5 = vld [vmem:[%s10878_s2 + $0xe4] ss:$8 sps:$4 sm:$0xff]  }
   0xf   : > { %810 = vmatprep.subr.bf16.mxu0 %v5910_v0  ;;  %5909 = vset.pattern.permute.xlu1 %v10895_v2  ;;  %v5918_v6 = vld [vmem:[%s10878_s2 + $0x64] ss:$8 sps:$4 sm:$0xff]   ;;  %v5920_v7 = vld [vmem:[%s10878_s2 + $0xe0] ss:$8 sps:$4 sm:$0xff]   ;;  %v5922_v9 = vld [vmem:[%s10878_s2 + $0xd4] ss:$8 sps:$4 sm:$0xff]  }
  0x10   : > { %1019 = vmatprep.subr.bf16.mxu1 %v5912_v1  ;;  %5908 = vset.pattern.permute.xlu0 %v10895_v2  ;;  %v5921_v8 = vld [vmem:[%s10878_s2 + $0x60] ss:$8 sps:$4 sm:$0xff]   ;;  %v5924_v10 = vld [vmem:[%s10878_s2 + $0x54] ss:$8 sps:$4 sm:$0xff]   ;;  %v5926_v11 = vld [vmem:[%s10878_s2 + $0xd0] ss:$8 sps:$4 sm:$0xff]  }
  0x11   : > { %811 = vmatpush1.bf16.msra.mxu0 %v5914_v3  ;;  %1020 = vmatpush1.bf16.msra.mxu1 %v5915_v4  ;;  %v5927_v12 = vld [vmem:[%s10878_s2 + $0x50] ss:$8 sps:$4 sm:$0xff]   ;;  %v5928_v13 = vld [vmem:[%s10878_s2 + $0xc4] ss:$8 sps:$4 sm:$0xff]   ;;  %p542_p3 = scmp.lt.s32.totalorder %s5517_s30, 31  ;;  %s11165_s27 = sld [smem:[#allocation111_spill]] }
  0x12   : > { %812 = vmatprep.subr.bf16.mxu0 %v5916_v5  ;;  %1021 = vmatprep.subr.bf16.mxu1 %v5918_v6  ;;  %v5930_v14 = vld [vmem:[%s10878_s2 + $0x44] ss:$8 sps:$4 sm:$0xff]   ;;  %v5932_v15 = vld [vmem:[%s10878_s2 + $0xc0] ss:$8 sps:$4 sm:$0xff]   ;;  %v5934_v17 = vld [vmem:[%s10878_s2 + $0xb4] ss:$8 sps:$4 sm:$0xff]  }
  0x13   : > { %v5933_v16 = vld [vmem:[%s10878_s2 + $0x40] ss:$8 sps:$4 sm:$0xff]   ;;  %v5936_v18 = vld [vmem:[%s10878_s2 + $0x34] ss:$8 sps:$4 sm:$0xff]   ;;  %s11819_s30 = smov (!%p542_p3, %s5517_s30), 31  ;;  %s11166_s25 = sld [smem:[#allocation112_spill]] }
  0x14   : > { %v5938_v19 = vld [vmem:[%s10878_s2 + $0xb0] ss:$8 sps:$4 sm:$0xff]   ;;  %v5940_v21 = vld [vmem:[%s10878_s2 + $0xa4] ss:$8 sps:$4 sm:$0xff]   ;;  %s5518_s18 = sshll.u32 %s11819_s30, 2  ;;  %vm2091_vm2 = vcmask 1043456  }
  0x15   : > { %813 = vmatpush1.bf16.msra.mxu0 %v5920_v7  ;;  %1022 = vmatpush1.bf16.msra.mxu1 %v5921_v8  ;;  %v5939_v20 = vld [vmem:[%s10878_s2 + $0x30] ss:$8 sps:$4 sm:$0xff]   ;;  %v5942_v22 = vld [vmem:[%s10878_s2 + $0x24] ss:$8 sps:$4 sm:$0xff]   ;;  %v5944_v23 = vld [vmem:[%s10878_s2 + $0xa0] ss:$8 sps:$4 sm:$0xff]  }
  0x16   : > { %814 = vmatprep.subr.bf16.mxu0 %v5922_v9  ;;  %1023 = vmatprep.subr.bf16.mxu1 %v5924_v10  ;;  %v5945_v24 = vld [vmem:[%s10878_s2 + $0x20] ss:$8 sps:$4 sm:$0xff]   ;;  %v5946_v25 = vld [vmem:[%s10878_s2 + $0x94] ss:$8 sps:$4 sm:$0xff]   ;;  %v5950_v27 = vld [vmem:[%s10878_s2 + $0x90] ss:$8 sps:$4 sm:$0xff]  }
  0x17   : > { %s6508_s28 = scalar_lea.vmem %s11165_s27, %s5518_s18  ;;  %v5948_v26 = vld [vmem:[%s10878_s2 + $0x14] ss:$8 sps:$4 sm:$0xff]   ;;  %v5951_v28 = vld [vmem:[%s10878_s2 + $0x10] ss:$8 sps:$4 sm:$0xff]   ;;  %v5952_v29 = vld [vmem:[%s10878_s2 + $0x84] ss:$8 sps:$4 sm:$0xff]  }
  0x18   : > { %v5954_v31 = vld [vmem:[%s10878_s2 + $0x4] ss:$8 sps:$4 sm:$0xff]   ;;  %v5956_v32 = vld [vmem:[%s10878_s2 + $0x80] ss:$8 sps:$4 sm:$0xff]   ;;  %v5964_v36 = vld [vmem:[%s10878_s2 + $0x174] ss:$8 sps:$4 sm:$0xff]  }
  0x19   : > { %815 = vmatpush1.bf16.msra.mxu0 %v5926_v11  ;;  %1024 = vmatpush1.bf16.msra.mxu1 %v5927_v12  ;;  %v5536_v30 = vld [vmem:[%s11166_s25 + $0xf0] sm:$0xff]  ;;  %v5537_v33 = vld [vmem:[%s11166_s25 + $0xf8] sm:$0xff]  ;;  %v5957_v35 = vld [vmem:[%s10878_s2] ss:$8 sps:$4 sm:$0xff]   ;;  %vm2066_vm3 = vcmask 64512   ;;  %s5898_s0 = sshll.u32 %s11819_s30, 4 }
  0x1a   : > { %816 = vmatprep.subr.bf16.mxu0 %v5928_v13  ;;  %1025 = vmatprep.subr.bf16.mxu1 %v5930_v14  ;;  %v585_v34 = vld [vmem:[%s11166_s25 + $0x70] sm:$0xff]  ;;  %v6544_v37 = vld [vmem:[%s6508_s28] sm:$0xff]   ;;  %v584_v38 = vld [vmem:[%s11166_s25 + $0x68] sm:$0xff]  ;;  %s10622_s1 = scalar_lea.vmem %s10893_s17, %s5898_s0 }
  0x1b   : > { %1690 = vperm.xlu1 %5909, %v5536_v30   ;;  %1271 = vperm.xlu0 %5908, %v585_v34   ;;  %v586_v39 = vld [vmem:[%s11166_s25 + $0x78] sm:$0xff]  ;;  %v5968_v41 = vld [vmem:[%s10878_s2 + $0x164] ss:$8 sps:$4 sm:$0xff]   ;;  %v5966_v44 = vld [vmem:[%s10878_s2 + $0x160] ss:$8 sps:$4 sm:$0xff]  }
  0x1c   : > { %v5962_v40 = vld [vmem:[%s10878_s2 + $0x170] ss:$8 sps:$4 sm:$0xff]   ;;  %v5535_v42 = vld [vmem:[%s11166_s25 + $0xe8] sm:$0xff]  ;;  %v583_v43 = vld [vmem:[%s11166_s25 + $0x60] sm:$0xff] }
  0x1d   : > { %817 = vmatpush1.bf16.msra.mxu0 %v5932_v15  ;;  %1026 = vmatpush1.bf16.msra.mxu1 %v5933_v16  ;;  %v5972_v45 = vld [vmem:[%s10878_s2 + $0x154] ss:$8 sps:$4 sm:$0xff]   ;;  %v6575_v46 = vld [vmem:[%s6508_s28 + $0x8] sm:$0xff]   ;;  %v5970_v48 = vld [vmem:[%s10878_s2 + $0x150] ss:$8 sps:$4 sm:$0xff]  }
  0x1e   : > { %818 = vmatprep.subr.bf16.mxu0 %v5934_v17  ;;  %1027 = vmatprep.subr.bf16.mxu1 %v5936_v18  ;;  %v582_v47 = vld [vmem:[%s11166_s25 + $0x58] sm:$0xff]  ;;  %v5534_v49 = vld [vmem:[%s11166_s25 + $0xe0] sm:$0xff]  ;;  %v581_v53 = vld [vmem:[%s11166_s25 + $0x50] sm:$0xff] }
  0x1f   : > { %1695 = vperm.xlu1 %5909, %v5537_v33   ;;  %1276 = vperm.xlu0 %5908, %v586_v39   ;;  %v5975_v50 = vld [vmem:[%s10878_s2 + $0x144] ss:$8 sps:$4 sm:$0xff]   ;;  %v5533_v51 = vld [vmem:[%s11166_s25 + $0xd8] sm:$0xff]  ;;  %v5973_v52 = vld [vmem:[%s10878_s2 + $0x140] ss:$8 sps:$4 sm:$0xff]  }
  0x20   : > { %v5979_v54 = vld [vmem:[%s10878_s2 + $0x134] ss:$8 sps:$4 sm:$0xff]   ;;  %v580_v56 = vld [vmem:[%s11166_s25 + $0x48] sm:$0xff]  ;;  %v5977_v58 = vld [vmem:[%s10878_s2 + $0x130] ss:$8 sps:$4 sm:$0xff]  }
  0x21   : > { %819 = vmatpush1.bf16.msra.mxu0 %v5938_v19  ;;  %1028 = vmatpush1.bf16.msra.mxu1 %v5939_v20  ;;  %v6606_v55 = vld [vmem:[%s6508_s28 + $0x10] sm:$0xff]   ;;  %v5531_v57 = vld [vmem:[%s11166_s25 + $0xc8] sm:$0xff]  ;;  %v579_v62 = vld [vmem:[%s11166_s25 + $0x40] sm:$0xff] }
  0x22   : > { %820 = vmatprep.subr.bf16.mxu0 %v5940_v21  ;;  %1029 = vmatprep.subr.bf16.mxu1 %v5942_v22  ;;  %v5532_v59 = vld [vmem:[%s11166_s25 + $0xd0] sm:$0xff]  ;;  %v5982_v60 = vld [vmem:[%s10878_s2 + $0x124] ss:$8 sps:$4 sm:$0xff]   ;;  %v5980_v61 = vld [vmem:[%s10878_s2 + $0x120] ss:$8 sps:$4 sm:$0xff]  }
  0x23   : > { %1266 = vperm.xlu1 %5909, %v584_v38   ;;  %1261 = vperm.xlu0 %5908, %v583_v43   ;;  %v5986_v63 = vld [vmem:[%s10878_s2 + $0x114] ss:$8 sps:$4 sm:$0xff]   ;;  %v5984_v3 = vld [vmem:[%s10878_s2 + $0x110] ss:$8 sps:$4 sm:$0xff]   ;;  %v5530_v4 = vld [vmem:[%s11166_s25 + $0xc0] sm:$0xff] }
  0x24   : > { %v6637_v0 = vld [vmem:[%s6508_s28 + $0x18] sm:$0xff]   ;;  %v5989_v5 = vld [vmem:[%s10878_s2 + $0x104] ss:$8 sps:$4 sm:$0xff]   ;;  %v5987_v7 = vld [vmem:[%s10878_s2 + $0x100] ss:$8 sps:$4 sm:$0xff]  }
  0x25   : > { %821 = vmatpush1.bf16.msra.mxu0 %v5944_v23  ;;  %1030 = vmatpush1.bf16.msra.mxu1 %v5945_v24  ;;  %v578_v1 = vld [vmem:[%s11166_s25 + $0x38] sm:$0xff]  ;;  %v577_v8 = vld [vmem:[%s11166_s25 + $0x30] sm:$0xff]  ;;  %v5965_v9 = vld [vmem:[%s6508_s28 + $0x20] sm:$0xff]  }
  0x26   : > { %822 = vmatprep.subr.bf16.mxu0 %v5946_v25  ;;  %1031 = vmatprep.subr.bf16.mxu1 %v5948_v26  ;;  %v5529_v6 = vld [vmem:[%s11166_s25 + $0xb8] sm:$0xff]  ;;  %v576_v10 = vld [vmem:[%s11166_s25 + $0x28] sm:$0xff]  ;;  %v5528_v11 = vld [vmem:[%s11166_s25 + $0xb0] sm:$0xff] }
  0x27   : > { %1685 = vperm.xlu1 %5909, %v5535_v42   ;;  %1680 = vperm.xlu0 %5908, %v5534_v49   ;;  %v5527_v12 = vld [vmem:[%s11166_s25 + $0xa8] sm:$0xff]  ;;  %v574_v14 = vld [vmem:[%s11166_s25 + $0x18] sm:$0xff]  ;;  %v575_v15 = vld [vmem:[%s11166_s25 + $0x20] sm:$0xff]  ;;  %v672_v49 = vlaneseq }
  0x28   : > { %v5969_v13 = vld [vmem:[%s6508_s28 + $0x28] sm:$0xff]   ;;  %v5526_v16 = vld [vmem:[%s11166_s25 + $0xa0] sm:$0xff]  ;;  %v5525_v17 = vld [vmem:[%s11166_s25 + $0x98] sm:$0xff] }
  0x29   : > { %823 = vmatpush1.bf16.msra.mxu0 %v5950_v27  ;;  %1032 = vmatpush1.bf16.msra.mxu1 %v5951_v28  ;;  %v573_v18 = vld [vmem:[%s11166_s25 + $0x10] sm:$0xff]  ;;  %v572_v20 = vld [vmem:[%s11166_s25 + $0x8] sm:$0xff]  ;;  %v571_v23 = vld [vmem:[%s11166_s25] sm:$0xff] }
  0x2a   : > { %824 = vmatprep.subr.bf16.mxu0 %v5952_v29  ;;  %1033 = vmatprep.subr.bf16.mxu1 %v5954_v31  ;;  %v5976_v19 = vld [vmem:[%s6508_s28 + $0x30] sm:$0xff]   ;;  %v5523_v22 = vld [vmem:[%s11166_s25 + $0x88] sm:$0xff]  ;;  %v5983_v24 = vld [vmem:[%s6508_s28 + $0x38] sm:$0xff]  }
  0x2b   : > { %1256 = vperm.xlu1 %5909, %v582_v47   ;;  %1251 = vperm.xlu0 %5908, %v581_v53   ;;  %v5524_v21 = vld [vmem:[%s11166_s25 + $0x90] sm:$0xff]  ;;  %v5522_v25 = vld [vmem:[%s11166_s25 + $0x80] sm:$0xff] }
  0x2d   : > { %825 = vmatpush1.bf16.msra.mxu0 %v5956_v32  ;;  %1034 = vmatpush1.bf16.msra.mxu1 %v5957_v35 }
  0x2e   : > { %1440 = vmatprep.subr.bf16.mxu0 %v5964_v36 }
  0x2f   : > { %1675 = vperm.xlu1 %5909, %v5533_v51   ;;  %1670 = vperm.xlu0 %5908, %v5532_v59   ;;  %v6774_v51 = vshrl.u32 %v672_v49, 7 }
  0x30   : > { %843 = vmatmul.mubr.bf16.vlgmr.msra.gmra.mxu0 %v6544_v37  ;;  %1052 = vmatmul.mubr.bf16.vlgmr.msra.gmra.mxu1 %v6544_v37 }
  0x31   : > { %852 = vmatprep.mubr.bf16.mxu0 %v10895_v2  ;;  %1061 = vmatprep.mubr.bf16.mxu1 %v10895_v2  ;;  %11191 = vst [vmem:[#allocation26_spill] sm:$0xff] %v6774_v51  ;;  %vm1166_vm0 = vcmp.lt.s32.totalorder %v6774_v51, 1  ;;  %vm1585_vm1 = vcmp.lt.s32.totalorder %v6774_v51, 7 }
  0x32   : > { %1441 = vmatpush1.bf16.msra.mxu0 %v5962_v40 }
  0x33   : > { %1442 = vmatprep.subr.bf16.mxu0 %v5968_v41  ;;  %1246 = vperm.xlu1 %5909, %v580_v56  }
  0x34   : > { %1241 = vperm.xlu0 %5908, %v579_v62  }
  0x36   : > { %1443 = vmatpush1.bf16.msra.mxu0 %v5966_v44 }
  0x37   : > { %1444 = vmatprep.subr.bf16.mxu0 %v5972_v45  ;;  %1665 = vperm.xlu1 %5909, %v5531_v57  }
  0x38   : > { %853 = vmatmul.mubr.bf16.gmra.mxu0 %v6575_v46  ;;  %1062 = vmatmul.mubr.bf16.gmra.mxu1 %v6575_v46 }
  0x39   : > { %862 = vmatprep.mubr.bf16.mxu0 %v10895_v2  ;;  %1071 = vmatprep.mubr.bf16.mxu1 %v10895_v2 }
  0x3a   : > { %1445 = vmatpush1.bf16.msra.mxu0 %v5970_v48  ;;  %1660 = vperm.xlu0 %5908, %v5530_v4  }
  0x3b   : > { %1446 = vmatprep.subr.bf16.mxu0 %v5975_v50  ;;  %1236 = vperm.xlu1 %5909, %v578_v1  }
  0x3e   : > { %1447 = vmatpush1.bf16.msra.mxu0 %v5973_v52  ;;  %1231 = vperm.xlu0 %5908, %v577_v8  }
  0x3f   : > { %1448 = vmatprep.subr.bf16.mxu0 %v5979_v54  ;;  %1655 = vperm.xlu1 %5909, %v5529_v6   ;;  %v6810_v6 = vsub.s32 1, %v6774_v51 }
  0x40   : > { %863 = vmatmul.mubr.bf16.gmra.mxu0 %v6606_v55  ;;  %1072 = vmatmul.mubr.bf16.gmra.mxu1 %v6606_v55 }
  0x41   : > { %872 = vmatprep.mubr.bf16.mxu0 %v10895_v2  ;;  %1081 = vmatprep.mubr.bf16.mxu1 %v10895_v2  ;;  %11196 = vst [vmem:[#allocation31_spill] sm:$0xff] %v6810_v6 }
  0x42   : > { %1449 = vmatpush1.bf16.msra.mxu0 %v5977_v58  ;;  %1650 = vperm.xlu0 %5908, %v5528_v11   ;;  %v653_v58 = vld [vmem:[%s10879_s3] sm:$0x3] }
  0x43   : > { %1450 = vmatprep.subr.bf16.mxu0 %v5982_v60  ;;  %1226 = vperm.xlu1 %5909, %v576_v10  }
  0x46   : > { %1451 = vmatpush1.bf16.msra.mxu0 %v5980_v61  ;;  %1221 = vperm.xlu0 %5908, %v575_v15  }
  0x47   : > { %1452 = vmatprep.subr.bf16.mxu0 %v5986_v63  ;;  %1645 = vperm.xlu1 %5909, %v5527_v12  }
  0x48   : > { %873 = vmatmul.mubr.bf16.gmra.mxu0 %v6637_v0  ;;  %1082 = vmatmul.mubr.bf16.gmra.mxu1 %v6637_v0 }
  0x49   : > { %882 = vmatprep.mubr.bf16.mxu0 %v10895_v2  ;;  %1091 = vmatprep.mubr.bf16.mxu1 %v10895_v2 }
  0x4a   : > { %1453 = vmatpush1.bf16.msra.mxu0 %v5984_v3  ;;  %1640 = vperm.xlu0 %5908, %v5526_v16  }
  0x4b   : > { %1454 = vmatprep.subr.bf16.mxu0 %v5989_v5  ;;  %1216 = vperm.xlu1 %5909, %v574_v14  }
  0x4e   : > { %1455 = vmatpush1.bf16.msra.mxu0 %v5987_v7  ;;  %1211 = vperm.xlu0 %5908, %v573_v18  }
  0x4f   : > { %1635 = vperm.xlu1 %5909, %v5525_v17  }
  0x50   : > { %883 = vmatmul.mubr.bf16.gmra.mxu0 %v5965_v9  ;;  %1092 = vmatmul.mubr.bf16.gmra.mxu1 %v5965_v9 }
  0x51   : > { %892 = vmatprep.mubr.bf16.mxu0 %v10895_v2  ;;  %1101 = vmatprep.mubr.bf16.mxu1 %v10895_v2 }
  0x52   : > { %1630 = vperm.xlu0 %5908, %v5524_v21  }
  0x53   : > { %1206 = vperm.xlu1 %5909, %v572_v20  }
  0x56   : > { %1201 = vperm.xlu0 %5908, %v571_v23  }
  0x57   : > { %1625 = vperm.xlu1 %5909, %v5523_v22  }
  0x58   : > { %893 = vmatmul.mubr.bf16.gmra.mxu0 %v5969_v13  ;;  %1102 = vmatmul.mubr.bf16.gmra.mxu1 %v5969_v13 }
  0x59   : > { %902 = vmatprep.mubr.bf16.mxu0 %v10895_v2  ;;  %1111 = vmatprep.mubr.bf16.mxu1 %v10895_v2 }
  0x5a   : > { %1620 = vperm.xlu0 %5908, %v5522_v25  }
  0x60   : > { %903 = vmatmul.mubr.bf16.gmra.mxu0 %v5976_v19  ;;  %1112 = vmatmul.mubr.bf16.gmra.mxu1 %v5976_v19 }
  0x61   : > { %912 = vmatprep.mubr.bf16.mxu0 %v10895_v2  ;;  %1121 = vmatprep.mubr.bf16.mxu1 %v10895_v2 }
  0x68   : > { %913 = vmatmul.mubr.bf16.gmra.mxu0 %v5983_v24  ;;  %1122 = vmatmul.mubr.bf16.gmra.mxu1 %v5983_v24 }
  0x69   : > { %1472 = vmatprep.mubr.bf16.mxu0 %v10895_v2  ;;  %1812 = vmatprep.mubr.bf16.mxu1 %v10895_v2 }
  0x70   : > { %1473 = vmatmul.mubr.bf16.vlgmr.msra.gmra.mxu0 %v6544_v37 }
  0x71   : > { %1482 = vmatprep.mubr.bf16.mxu0 %v10895_v2 }
  0x78   : > { %1483 = vmatmul.mubr.bf16.gmra.mxu0 %v6575_v46 }
  0x79   : > { %1492 = vmatprep.mubr.bf16.mxu0 %v10895_v2 }
  0x80   : > { %1493 = vmatmul.mubr.bf16.gmra.mxu0 %v6606_v55  ;;  %v6783_v55 = vsub.s32 0, %v6774_v51 }
  0x81   : > { %1502 = vmatprep.mubr.bf16.mxu0 %v10895_v2 }
  0x82   : > { %11193 = vst [vmem:[#allocation28_spill] sm:$0xff] %v6783_v55  ;;  %v6799_v1 = vrot.slane %v653_v58, %v6783_v55 }
  0x88   : > { %1503 = vmatmul.mubr.bf16.gmra.mxu0 %v6637_v0 }
  0x89   : > { %1512 = vmatprep.mubr.bf16.mxu0 %v10895_v2 }
  0x90   : > { %1513 = vmatmul.mubr.bf16.gmra.mxu0 %v5965_v9 }
  0x91   : > { %1522 = vmatprep.mubr.bf16.mxu0 %v10895_v2 }
  0x96   : > { %v6726_v26 = vpop.permute.xlu1 %1690  ;;  %v6732_v29 = vpop.permute.xlu0 %1271 }
  0x97   : > { %11167 = vst [vmem:[#allocation2_spill] sm:$0xff] %v6726_v26  ;;  %11170 = vst [vmem:[#allocation5_spill] sm:$0xff] %v6732_v29 }
  0x98   : > { %1523 = vmatmul.mubr.bf16.gmra.mxu0 %v5969_v13 }
  0x99   : > { %1532 = vmatprep.mubr.bf16.mxu0 %v10895_v2 }
  0x9a   : > { %v6728_v27 = vpop.permute.xlu1 %1695  ;;  %v6736_v31 = vpop.permute.xlu0 %1276 }
  0x9b   : > { %11168 = vst [vmem:[#allocation3_spill] sm:$0xff] %v6728_v27  ;;  %11172 = vst [vmem:[#allocation7_spill] sm:$0xff] %v6736_v31 }
  0x9e   : > { %v6730_v28 = vpop.permute.xlu1 %1266  ;;  %v6740_v33 = vpop.permute.xlu0 %1261 }
  0x9f   : > { %11169 = vst [vmem:[#allocation4_spill] sm:$0xff] %v6730_v28  ;;  %11174 = vst [vmem:[#allocation9_spill] sm:$0xff] %v6740_v33 }
  0xa0   : > { %1533 = vmatmul.mubr.bf16.gmra.mxu0 %v5976_v19  ;;  %v6825_v19 = vrot.slane %v653_v58, %v6810_v6 }
  0xa1   : > { %1542 = vmatprep.mubr.bf16.mxu0 %v10895_v2 }
  0xa2   : > { %v6734_v30 = vpop.permute.xlu1 %1685  ;;  %v6744_v35 = vpop.permute.xlu0 %1680 }
  0xa3   : > { %11171 = vst [vmem:[#allocation6_spill] sm:$0xff] %v6734_v30  ;;  %11176 = vst [vmem:[#allocation11_spill] sm:$0xff] %v6744_v35  ;;  %v6936_v35 = vld [vmem:[%s10886_s10 + $0x60] ss:$8 sps:$4 sm:$0xff]   ;;  %v6946_v30 = vld [vmem:[%s10886_s10 + $0x54] ss:$8 sps:$4 sm:$0xff]  }
  0xa4   : > { %11206 = vst [vmem:[#allocation41_spill] sm:$0xff] %v6936_v35  ;;  %11208 = vst [vmem:[#allocation43_spill] sm:$0xff] %v6946_v30 }
  0xa6   : > { %v6738_v32 = vpop.permute.xlu1 %1256  ;;  %v6748_v37 = vpop.permute.xlu0 %1251 }
  0xa7   : > { %11173 = vst [vmem:[#allocation8_spill] sm:$0xff] %v6738_v32  ;;  %11178 = vst [vmem:[#allocation13_spill] sm:$0xff] %v6748_v37  ;;  %v7049_v37 = vld [vmem:[%s10886_s10 + $0x10] ss:$8 sps:$4 sm:$0xff]  }
  0xa8   : > { %1543 = vmatmul.mubr.bf16.gmra.mxu0 %v5983_v24  ;;  %11237 = vst [vmem:[#allocation71_spill] sm:$0xff] %v7049_v37 }
  0xaa   : > { %v6742_v34 = vpop.permute.xlu1 %1675  ;;  %v6752_v39 = vpop.permute.xlu0 %1670 }
  0xab   : > { %11175 = vst [vmem:[#allocation10_spill] sm:$0xff] %v6742_v34  ;;  %11180 = vst [vmem:[#allocation15_spill] sm:$0xff] %v6752_v39 }
  0xae   : > { %v6746_v36 = vpop.permute.xlu1 %1246 }
  0xaf   : > { %11177 = vst [vmem:[#allocation12_spill] sm:$0xff] %v6746_v36  ;;  %v6756_v41 = vpop.permute.xlu0 %1241 }
  0xb0   : > { %11182 = vst [vmem:[#allocation17_spill] sm:$0xff] %v6756_v41 }
  0xb2   : > { %v6750_v38 = vpop.permute.xlu1 %1665 }
  0xb3   : > { %11179 = vst [vmem:[#allocation14_spill] sm:$0xff] %v6750_v38  ;;  %v6925_v38 = vld [vmem:[%s10886_s10 + $0x64] ss:$8 sps:$4 sm:$0xff]  }
  0xb4   : > { %11204 = vst [vmem:[#allocation39_spill] sm:$0xff] %v6925_v38 }
  0xb5   : > { %v6760_v43 = vpop.permute.xlu0 %1660 }
  0xb6   : > { %v6754_v40 = vpop.permute.xlu1 %1236  ;;  %11184 = vst [vmem:[#allocation19_spill] sm:$0xff] %v6760_v43  ;;  %v6920_v43 = vld [vmem:[%s10886_s10 + $0x70] ss:$8 sps:$4 sm:$0xff]  }
  0xb7   : > { %11181 = vst [vmem:[#allocation16_spill] sm:$0xff] %v6754_v40  ;;  %11203 = vst [vmem:[#allocation38_spill] sm:$0xff] %v6920_v43 }
  0xb9   : > { %v6764_v45 = vpop.permute.xlu0 %1231 }
  0xba   : > { %v6758_v42 = vpop.permute.xlu1 %1655  ;;  %11186 = vst [vmem:[#allocation21_spill] sm:$0xff] %v6764_v45 }
  0xbb   : > { %11183 = vst [vmem:[#allocation18_spill] sm:$0xff] %v6758_v42  ;;  %v6915_v42 = vld [vmem:[%s10886_s10 + $0x74] ss:$8 sps:$4 sm:$0xff]  }
  0xbc   : > { %11202 = vst [vmem:[#allocation37_spill] sm:$0xff] %v6915_v42  ;;  %1983 = vmatprep.subr.bf16.mxu0 %v6915_v42 }
  0xbd   : > { %v6768_v47 = vpop.permute.xlu0 %1650  ;;  %1984 = vmatpush1.bf16.msra.mxu0 %v6920_v43  ;;  %v6956_v43 = vld [vmem:[%s10886_s10 + $0x50] ss:$8 sps:$4 sm:$0xff]  }
  0xbe   : > { %v6762_v44 = vpop.permute.xlu1 %1226  ;;  %11188 = vst [vmem:[#allocation23_spill] sm:$0xff] %v6768_v47  ;;  %1985 = vmatprep.subr.bf16.mxu0 %v6925_v38  ;;  %11210 = vst [vmem:[#allocation45_spill] sm:$0xff] %v6956_v43  ;;  %v6966_v38 = vld [vmem:[%s10886_s10 + $0x44] ss:$8 sps:$4 sm:$0xff]  }
  0xbf   : > { %11185 = vst [vmem:[#allocation20_spill] sm:$0xff] %v6762_v44  ;;  %11213 = vst [vmem:[#allocation48_spill] sm:$0xff] %v6966_v38 }
  0xc1   : > { %v6772_v50 = vpop.permute.xlu0 %1221  ;;  %1986 = vmatpush1.bf16.msra.mxu0 %v6936_v35  ;;  %v6976_v35 = vld [vmem:[%s10886_s10 + $0x40] ss:$8 sps:$4 sm:$0xff]  }
  0xc2   : > { %v6766_v46 = vpop.permute.xlu1 %1645  ;;  %11190 = vst [vmem:[#allocation25_spill] sm:$0xff] %v6772_v50  ;;  %1987 = vmatprep.subr.bf16.mxu0 %v6946_v30  ;;  %11216 = vst [vmem:[#allocation51_spill] sm:$0xff] %v6976_v35  ;;  %v6986_v30 = vld [vmem:[%s10886_s10 + $0x34] ss:$8 sps:$4 sm:$0xff]  }
  0xc3   : > { %11187 = vst [vmem:[#allocation22_spill] sm:$0xff] %v6766_v46  ;;  %11219 = vst [vmem:[#allocation54_spill] sm:$0xff] %v6986_v30 }
  0xc5   : > { %v6793_v60 = vpop.permute.xlu0 %1640  ;;  %1988 = vmatpush1.bf16.msra.mxu0 %v6956_v43 }
  0xc6   : > { %v6770_v48 = vpop.permute.xlu1 %1216  ;;  %11194 = vst [vmem:[#allocation29_spill] sm:$0xff] %v6793_v60  ;;  %1989 = vmatprep.subr.bf16.mxu0 %v6966_v38 }
  0xc7   : > { %11189 = vst [vmem:[#allocation24_spill] sm:$0xff] %v6770_v48 }
  0xc9   : > { %v6814_v12 = vpop.permute.xlu0 %1211  ;;  %1990 = vmatpush1.bf16.msra.mxu0 %v6976_v35  ;;  %v7018_v35 = vld [vmem:[%s10886_s10 + $0x20] ss:$8 sps:$4 sm:$0xff]  }
  0xca   : > { %v6776_v52 = vpop.permute.xlu1 %1635  ;;  %11197 = vst [vmem:[#allocation32_spill] sm:$0xff] %v6814_v12  ;;  %1991 = vmatprep.subr.bf16.mxu0 %v6986_v30  ;;  %11229 = vst [vmem:[#allocation64_spill] sm:$0xff] %v7018_v35  ;;  %v7028_v30 = vld [vmem:[%s10886_s10 + $0x14] ss:$8 sps:$4 sm:$0xff]  }
  0xcb   : > { %11192 = vst [vmem:[#allocation27_spill] sm:$0xff] %v6776_v52  ;;  %11232 = vst [vmem:[#allocation67_spill] sm:$0xff] %v7028_v30 }
  0xcd   : > { %v6992_v43 = vpop.permute.xlu0 %1630 }
  0xce   : > { %v6796_v0 = vpop.permute.xlu1 %1206  ;;  %11222 = vst [vmem:[#allocation57_spill] sm:$0xff] %v6992_v43 }
  0xcf   : > { %11195 = vst [vmem:[#allocation30_spill] sm:$0xff] %v6796_v0 }
  0xf0   : > { %v6778_v53 = vpop.f32.mrf.mxu0  ;;  %v6780_v54 = vpop.f32.mrf.mxu1 }
  0xf1   : > { %v10899_v59 = vrot.slane %v6780_v54, 7 }
  0xf2   : > { %v6785_v56 = vpop.f32.mrf.mxu0  ;;  %v6787_v57 = vpop.f32.mrf.mxu1 }
  0xf4   : > { %v848_v61 = vpop.f32.mrf.mxu0  ;;  %v1057_v62 = vpop.f32.mrf.mxu1 }
  0xf5   : > { %v1134_v63 = vrot.slane %v1057_v62, 7  ;;  %v849_v7 = vadd.f32 %v848_v61, %v6799_v1 }
  0xf6   : > { %v6801_v3 = vpop.f32.mrf.mxu0  ;;  %v6803_v4 = vpop.f32.mrf.mxu1 }
  0xf7   : > { %v1195_v5 = vsel %vm1166_vm0, %v10899_v59, %v1134_v63  ;;  %v10898_v16 = vrot.slane %v6803_v4, 7 }
  0xf8   : > { %v1281_v8 = vmul.f32 %v6796_v0, %v1195_v5  ;;  %v854_v9 = vpop.f32.mrf.mxu0  ;;  %v1063_v10 = vpop.f32.mrf.mxu1 }
  0xf9   : > { %v1136_v11 = vrot.slane %v1063_v10, 7  ;;  %v855_v20 = vadd.f32 %v854_v9, %v6799_v1 }
  0xfa   : > { %v856_v13 = vpop.f32.mrf.mxu0  ;;  %v6816_v14 = vpop.f32.mrf.mxu1  ;;  %v6818_v15 = vadd.f32 %v1281_v8, %v849_v7 }
  0xfb   : > { %v1193_v17 = vsel %vm1166_vm0, %v1134_v63, %v1136_v11  ;;  %v10897_v18 = vrot.slane %v6816_v14, 7  ;;  %v857_v49 = vadd.f32 %v856_v13, %v6825_v19 }
  0xfc   : > { %v1283_v21 = vmul.f32 %v6814_v12, %v1193_v17  ;;  %v858_v22 = vpop.f32.mrf.mxu0  ;;  %v1067_v23 = vpop.f32.mrf.mxu1 }
  0xfd   : > { %v1194_v24 = vsel %vm1166_vm0, %v10898_v16, %v10897_v18  ;;  %v1138_v25 = vrot.slane %v1067_v23, 7  ;;  %v859_v8 = vadd.f32 %v858_v22, %v6799_v1 }
  0xfe   : > { %v1284_v61 = vmul.f32 %v6814_v12, %v1194_v24  ;;  %v6837_v58 = vadd.f32 %v1283_v21, %v855_v20  ;;  %v6839_v62 = vpop.f32.mrf.mxu0  ;;  %v6841_v63 = vpop.f32.mrf.mxu1 }
  0xff   : > { %v1191_v5 = vsel %vm1166_vm0, %v1136_v11, %v1138_v25 }
 0x100   : > { %v6845_v7 = vadd.f32 %v1284_v61, %v857_v49  ;;  %v1285_v9 = vmul.f32 %v6770_v48, %v1191_v5  ;;  %v864_v10 = vpop.f32.mrf.mxu0  ;;  %v1073_v17 = vpop.f32.mrf.mxu1 }
 0x101   : > { %v1140_v13 = vrot.slane %v1073_v17, 7  ;;  %v865_v11 = vadd.f32 %v864_v10, %v6799_v1 }
 0x102   : > { %v6849_v23 = vadd.f32 %v1285_v9, %v859_v8  ;;  %v6851_v20 = vpop.f32.mrf.mxu0  ;;  %v6853_v21 = vpop.f32.mrf.mxu1 }
 0x103   : > { %11198 = vst [vmem:[#allocation33_spill] sm:$0xff] %v6851_v20  ;;  %v1189_v24 = vsel %vm1166_vm0, %v1138_v25, %v1140_v13 }
 0x104   : > { %v1287_v49 = vmul.f32 %v6772_v50, %v1189_v24  ;;  %v868_v61 = vpop.f32.mrf.mxu0  ;;  %v6859_v22 = vpop.f32.mrf.mxu1 }
 0x105   : > { %v10904_v5 = vrot.slane %v6859_v22, 7  ;;  %v869_v10 = vadd.f32 %v868_v61, %v6799_v1 }
 0x106   : > { %v6862_v2 = vadd.f32 %v1287_v49, %v865_v11  ;;  %v6864_v8 = vpop.f32.mrf.mxu0  ;;  %v6866_v9 = vpop.f32.mrf.mxu1 }
 0x107   : > { %v1187_v25 = vsel %vm1166_vm0, %v1140_v13, %v10904_v5 }
 0x108   : > { %v1289_v17 = vmul.f32 %v6762_v44, %v1187_v25  ;;  %v6874_v24 = vpop.f32.mrf.mxu0  ;;  %v6876_v18 = vpop.f32.mrf.mxu1 }
 0x10a   : > { %v6878_v16 = vadd.f32 %v1289_v17, %v869_v10  ;;  %v6880_v11 = vpop.f32.mrf.mxu0  ;;  %v6882_v49 = vpop.f32.mrf.mxu1 }
 0x10c   : > { %11199 = vst [vmem:[#allocation34_spill] sm:$0xff] %v6878_v16  ;;  %v6884_v59 = vpop.f32.mrf.mxu0  ;;  %v6886_v12 = vpop.f32.mrf.mxu1 }
 0x10e   : > { %v6888_v6 = vpop.f32.mrf.mxu0  ;;  %v6890_v13 = vpop.f32.mrf.mxu1 }
 0x110   : > { %v6892_v61 = vpop.f32.mrf.mxu0  ;;  %v6894_v25 = vpop.f32.mrf.mxu1 }
 0x112   : > { %v6896_v5 = vpop.f32.mrf.mxu0  ;;  %v6898_v10 = vpop.f32.mrf.mxu1 }
 0x114   : > { %v6900_v17 = vpop.f32.mrf.mxu0  ;;  %v6902_v55 = vpop.f32.mrf.mxu1 }
 0x116   : > { %v6904_v16 = vpop.f32.mrf.mxu0  ;;  %v6906_v20 = vpop.f32.mrf.mxu1 }
 0x117   : > { %11200 = vst [vmem:[#allocation35_spill] sm:$0xff] %v6904_v16 }
 0x118   : > { %v6908_v46 = vpop.f32.mrf.mxu0  ;;  %v6910_v47 = vpop.f32.mrf.mxu1 }
 0x119   : > { %11201 = vst [vmem:[#allocation36_spill] sm:$0xff] %v6908_v46 }
 0x11a   : > { %v6927_v39 = vpop.f32.mrf.mxu0  ;;  %v6929_v34 = vpop.f32.mrf.mxu1 }
 0x11b   : > { %11205 = vst [vmem:[#allocation40_spill] sm:$0xff] %v6927_v39 }
 0x11c   : > { %v6938_v27 = vpop.f32.mrf.mxu0  ;;  %v6940_v26 = vpop.f32.mrf.mxu1 }
 0x11d   : > { %11207 = vst [vmem:[#allocation42_spill] sm:$0xff] %v6938_v27 }
 0x11e   : > { %v6948_v31 = vpop.f32.mrf.mxu0  ;;  %v6950_v42 = vpop.f32.mrf.mxu1 }
 0x11f   : > { %11209 = vst [vmem:[#allocation44_spill] sm:$0xff] %v6948_v31 }
 0x120   : > { %v6958_v29 = vpop.f32.mrf.mxu0  ;;  %v6960_v28 = vpop.f32.mrf.mxu1 }
 0x121   : > { %11211 = vst [vmem:[#allocation46_spill] sm:$0xff] %v6958_v29  ;;  %11212 = vst [vmem:[#allocation47_spill] sm:$0xff] %v6960_v28 }
 0x122   : > { %v6968_v33 = vpop.f32.mrf.mxu0  ;;  %v6970_v31 = vpop.f32.mrf.mxu1 }
 0x123   : > { %11214 = vst [vmem:[#allocation49_spill] sm:$0xff] %v6968_v33  ;;  %11215 = vst [vmem:[#allocation50_spill] sm:$0xff] %v6970_v31  ;;  %v1133_v31 = vrot.slane %v6787_v57, 7 }
 0x124   : > { %v6978_v29 = vpop.f32.mrf.mxu0  ;;  %v6980_v32 = vpop.f32.mrf.mxu1 }
 0x125   : > { %11217 = vst [vmem:[#allocation52_spill] sm:$0xff] %v6978_v29  ;;  %11218 = vst [vmem:[#allocation53_spill] sm:$0xff] %v6980_v32  ;;  %v6998_v29 = vld [vmem:[%s10886_s10 + $0x30] ss:$8 sps:$4 sm:$0xff]  }
 0x126   : > { %v6988_v33 = vpop.f32.mrf.mxu0  ;;  %v6990_v27 = vpop.f32.mrf.mxu1  ;;  %11223 = vst [vmem:[#allocation58_spill] sm:$0xff] %v6998_v29  ;;  %1992 = vmatpush1.bf16.msra.mxu0 %v6998_v29 }
 0x127   : > { %11220 = vst [vmem:[#allocation55_spill] sm:$0xff] %v6988_v33  ;;  %11221 = vst [vmem:[#allocation56_spill] sm:$0xff] %v6990_v27  ;;  %v7008_v33 = vld [vmem:[%s10886_s10 + $0x24] ss:$8 sps:$4 sm:$0xff]  }
 0x128   : > { %v7000_v39 = vpop.f32.mrf.mxu0  ;;  %v7002_v38 = vpop.f32.mrf.mxu1  ;;  %11226 = vst [vmem:[#allocation61_spill] sm:$0xff] %v7008_v33  ;;  %1993 = vmatprep.subr.bf16.mxu0 %v7008_v33 }
 0x129   : > { %11224 = vst [vmem:[#allocation59_spill] sm:$0xff] %v7000_v39  ;;  %11225 = vst [vmem:[#allocation60_spill] sm:$0xff] %v7002_v38 }
 0x12a   : > { %v7010_v46 = vpop.f32.mrf.mxu0  ;;  %v7012_v27 = vpop.f32.mrf.mxu1  ;;  %1994 = vmatpush1.bf16.msra.mxu0 %v7018_v35  ;;  %v847_v35 = vadd.f32 %v6785_v56, %v6825_v19 }
 0x12b   : > { %11227 = vst [vmem:[#allocation62_spill] sm:$0xff] %v7010_v46  ;;  %11228 = vst [vmem:[#allocation63_spill] sm:$0xff] %v7012_v27  ;;  %v7031_v27 = vpop.permute.xlu0 %1201  ;;  %1995 = vmatprep.subr.bf16.mxu0 %v7028_v30  ;;  %v7075_v30 = vld [vmem:[%s10886_s10] ss:$8 sps:$4 sm:$0xff]  }
 0x12c   : > { %v7020_v39 = vpop.f32.mrf.mxu0  ;;  %v7022_v38 = vpop.f32.mrf.mxu1  ;;  %11233 = vst [vmem:[#allocation68_spill] sm:$0xff] %v7031_v27  ;;  %11241 = vst [vmem:[#allocation75_spill] sm:$0xff] %v7075_v30 }
 0x12d   : > { %11230 = vst [vmem:[#allocation65_spill] sm:$0xff] %v7020_v39  ;;  %11231 = vst [vmem:[#allocation66_spill] sm:$0xff] %v7022_v38  ;;  %v10935_v46 = vrot.slane %v7022_v38, 7  ;;  %v11236_v39 = vrot.slane %v6780_v54, 7 }
 0x12e   : > { %v7033_v29 = vpop.f32.mrf.mxu0  ;;  %v7035_v32 = vpop.f32.mrf.mxu1  ;;  %1996 = vmatpush1.bf16.msra.mxu0 %v7049_v37 }
 0x12f   : > { %11234 = vst [vmem:[#allocation69_spill] sm:$0xff] %v7033_v29  ;;  %11235 = vst [vmem:[#allocation70_spill] sm:$0xff] %v7035_v32  ;;  %v1197_v33 = vsel %vm1166_vm0, %v10935_v46, %v11236_v39  ;;  %v10940_v28 = vrot.slane %v7035_v32, 7  ;;  %v845_v29 = vadd.f32 %v6778_v53, %v6799_v1  ;;  %v7060_v39 = vld [vmem:[%s10886_s10 + $0x4] ss:$8 sps:$4 sm:$0xff]  }
 0x130   : > { %v1279_v57 = vmul.f32 %v7031_v27, %v1197_v33  ;;  %v7054_v54 = vpop.f32.mrf.mxu0  ;;  %11239 = vst [vmem:[#allocation73_spill] sm:$0xff] %v7060_v39  ;;  %1997 = vmatprep.subr.bf16.mxu0 %v7060_v39 }
 0x131   : > { %11238 = vst [vmem:[#allocation72_spill] sm:$0xff] %v7054_v54  ;;  %v1198_v46 = vsel %vm1166_vm0, %v10940_v28, %v1133_v31 }
 0x132   : > { %v1280_v53 = vmul.f32 %v7031_v27, %v1198_v46  ;;  %v7069_v33 = vpop.f32.mrf.mxu0  ;;  %v1311_v38 = vadd.f32 %v1279_v57, %v845_v29  ;;  %v7084_v46 = vld [vmem:[%s10886_s10 + $0xf4] ss:$8 sps:$4 sm:$0xff]   ;;  %v10945_v29 = vrot.slane %v7054_v54, 1  ;;  %v7087_v57 = vpop.permute.xlu0 %1620  ;;  %v11246_v27 = vrot.slane %v6803_v4, 7  ;;  %1998 = vmatpush1.bf16.msra.mxu0 %v7075_v30 }
 0x133   : > { %11240 = vst [vmem:[#allocation74_spill] sm:$0xff] %v7069_v33  ;;  %11243 = vst [vmem:[#allocation77_spill] sm:$0xff] %v7084_v46  ;;  %1999 = vmatprep.subr.bf16.mxu0 %v7084_v46  ;;  %v7112_v4 = vpop.permute.xlu1 %1625  ;;  %v7124_v46 = vld [vmem:[%s10886_s10 + $0xe0] ss:$8 sps:$4 sm:$0xff]  }
 0x134   : > { %v1478_v16 = vpop.f32.mrf.mxu0  ;;  %v7078_v32 = vadd.f32 %v1280_v53, %v847_v35  ;;  %11244 = vst [vmem:[#allocation78_spill] sm:$0xff] %v7087_v57  ;;  %v1196_v35 = vsel %vm1166_vm0, %v1133_v31, %v11246_v27  ;;  %v7110_v27 = vld [vmem:[%s10886_s10 + $0xe4] ss:$8 sps:$4 sm:$0xff]   ;;  %11249 = vst [vmem:[#allocation82_spill] sm:$0xff] %v7112_v4 }
 0x135   : > { %v1555_v56 = vrot.slane %v1478_v16, 1  ;;  %v7103_v16 = vld [vmem:[%s10886_s10 + $0xf0] ss:$8 sps:$4 sm:$0xff]   ;;  %11248 = vst [vmem:[#allocation81_spill] sm:$0xff] %v7110_v27  ;;  %11251 = vst [vmem:[#allocation84_spill] sm:$0xff] %v7124_v46 }
 0x136   : > { %11242 = vst [vmem:[#allocation76_spill] sm:$0xff] %v7078_v32  ;;  %v7089_v28 = vpop.f32.mrf.mxu0  ;;  %11247 = vst [vmem:[#allocation80_spill] sm:$0xff] %v7103_v16  ;;  %2000 = vmatpush2.bf16.msra.mxu0 %v7103_v16 }
 0x137   : > { %11245 = vst [vmem:[#allocation79_spill] sm:$0xff] %v7089_v28  ;;  %v1614_v53 = vsel %vm1585_vm1, %v10945_v29, %v1555_v56  ;;  %v1282_v29 = vmul.f32 %v6796_v0, %v1196_v35  ;;  %v10955_v54 = vrot.slane %v7089_v28, 1  ;;  %2001 = vmatprep.subr.bf16.mxu0 %v7110_v27 }
 0x138   : > { %v1698_v39 = vmul.f32 %v7087_v57, %v1614_v53  ;;  %v1484_v37 = vpop.f32.mrf.mxu0 }
 0x139   : > { %v1557_v31 = vrot.slane %v1484_v37, 1  ;;  %v851_v37 = vadd.f32 %v6801_v3, %v6825_v19 }
 0x13a   : > { %v7115_v30 = vadd.f32 %v1698_v39, %v1311_v38  ;;  %v1486_v32 = vpop.f32.mrf.mxu0  ;;  %2002 = vmatpush2.bf16.msra.mxu0 %v7124_v46  ;;  %v11273_v46 = vrot.slane %v6859_v22, 7  ;;  %v1150_v22 = vrot.slane %v6902_v55, 7  ;;  %v877_v55 = vadd.f32 %v6880_v11, %v6825_v19 }
 0x13b   : > { %v1558_v33 = vrot.slane %v1486_v32, 1  ;;  %v1612_v53 = vsel %vm1585_vm1, %v1555_v56, %v1557_v31  ;;  %v7133_v32 = vld [vmem:[%s10886_s10 + $0xd4] ss:$8 sps:$4 sm:$0xff]   ;;  %v1314_v0 = vadd.f32 %v1282_v29, %v851_v37 }
 0x13c   : > { %11250 = vst [vmem:[#allocation83_spill] sm:$0xff] %v7115_v30  ;;  %v1700_v38 = vmul.f32 %v7112_v4, %v1612_v53  ;;  %v1488_v39 = vpop.f32.mrf.mxu0  ;;  %11252 = vst [vmem:[#allocation85_spill] sm:$0xff] %v7133_v32  ;;  %2003 = vmatprep.subr.bf16.mxu0 %v7133_v32 }
 0x13d   : > { %v1613_v56 = vsel %vm1585_vm1, %v10955_v54, %v1558_v33  ;;  %v1559_v35 = vrot.slane %v1488_v39, 1  ;;  %v7152_v54 = vld [vmem:[%s10886_s10 + $0xd0] ss:$8 sps:$4 sm:$0xff]  }
 0x13e   : > { %v1701_v16 = vmul.f32 %v7112_v4, %v1613_v56  ;;  %v7141_v3 = vadd.f32 %v1700_v38, %v6818_v15  ;;  %v7143_v53 = vpop.f32.mrf.mxu0  ;;  %11255 = vst [vmem:[#allocation88_spill] sm:$0xff] %v7152_v54  ;;  %2004 = vmatpush2.bf16.msra.mxu0 %v7152_v54  ;;  %v7179_v4 = vld [vmem:[%s10886_s10 + $0xc0] ss:$8 sps:$4 sm:$0xff]   ;;  %v1144_v54 = vrot.slane %v6876_v18, 7  ;;  %v7263_v18 = vadd.f32 %v6839_v62, %v6825_v19 }
 0x13f   : > { %11254 = vst [vmem:[#allocation87_spill] sm:$0xff] %v7143_v53  ;;  %v1610_v27 = vsel %vm1585_vm1, %v1557_v31, %v1559_v35  ;;  %v10958_v30 = vrot.slane %v7143_v53, 1  ;;  %v7161_v31 = vld [vmem:[%s10886_s10 + $0xc4] ss:$8 sps:$4 sm:$0xff]   ;;  %11259 = vst [vmem:[#allocation92_spill] sm:$0xff] %v7179_v4 }
 0x140   : > { %11253 = vst [vmem:[#allocation86_spill] sm:$0xff] %v7141_v3  ;;  %v7154_v29 = vadd.f32 %v1701_v16, %v1314_v0  ;;  %v1702_v37 = vmul.f32 %v6992_v43, %v1610_v27  ;;  %v1494_v15 = vpop.f32.mrf.mxu0  ;;  %11257 = vst [vmem:[#allocation90_spill] sm:$0xff] %v7161_v31  ;;  %2005 = vmatprep.subr.bf16.mxu0 %v7161_v31  ;;  %v1143_v31 = vrot.slane %v6866_v9, 7  ;;  %v11281_v3 = vld [vmem:[#allocation13_spill] sm:$0xff]  ;;  %v11316_v53 = vld [vmem:[#allocation10_spill] sm:$0xff] }
 0x141   : > { %v1611_v38 = vsel %vm1585_vm1, %v1558_v33, %v10958_v30  ;;  %v1561_v39 = vrot.slane %v1494_v15, 1  ;;  %11270 = vst [vmem:[#allocation102_spill] sm:$0xff] %v7263_v18 }
 0x142   : > { %11256 = vst [vmem:[#allocation89_spill] sm:$0xff] %v7154_v29  ;;  %v7168_v56 = vadd.f32 %v1702_v37, %v6837_v58  ;;  %v1703_v0 = vmul.f32 %v6992_v43, %v1611_v38  ;;  %v7171_v16 = vpop.f32.mrf.mxu0  ;;  %2006 = vmatpush2.bf16.msra.mxu0 %v7179_v4  ;;  %v1141_v4 = vrot.slane %v6853_v21, 7 }
 0x143   : > { %v1608_v27 = vsel %vm1585_vm1, %v1559_v35, %v1561_v39  ;;  %v7191_v35 = vld [vmem:[%s10886_s10 + $0xb4] ss:$8 sps:$4 sm:$0xff]  }
 0x144   : > { %11258 = vst [vmem:[#allocation91_spill] sm:$0xff] %v7168_v56  ;;  %v1704_v33 = vmul.f32 %v6776_v52, %v1608_v27  ;;  %v7182_v15 = vpop.f32.mrf.mxu0  ;;  %v7185_v58 = vadd.f32 %v1703_v0, %v6845_v7  ;;  %11261 = vst [vmem:[#allocation94_spill] sm:$0xff] %v7191_v35  ;;  %v7207_v0 = vld [vmem:[%s10886_s10 + $0xb0] ss:$8 sps:$4 sm:$0xff]   ;;  %2007 = vmatprep.subr.bf16.mxu0 %v7191_v35  ;;  %v11287_v56 = vld [vmem:[#allocation63_spill] sm:$0xff] }
 0x145   : > { %v10961_v37 = vrot.slane %v7182_v15, 1  ;;  %11263 = vst [vmem:[#allocation96_spill] sm:$0xff] %v7207_v0  ;;  %v11299_v52 = vld [vmem:[#allocation4_spill] sm:$0xff] }
 0x146   : > { %11260 = vst [vmem:[#allocation93_spill] sm:$0xff] %v7185_v58  ;;  %v7195_v38 = vadd.f32 %v1704_v33, %v6849_v23  ;;  %v7197_v30 = vpop.f32.mrf.mxu0  ;;  %v7216_v23 = vld [vmem:[%s10886_s10 + $0xa4] ss:$8 sps:$4 sm:$0xff]   ;;  %2008 = vmatpush2.bf16.msra.mxu0 %v7207_v0 }
 0x147   : > { %v1606_v7 = vsel %vm1585_vm1, %v1561_v39, %v10961_v37  ;;  %11264 = vst [vmem:[#allocation97_spill] sm:$0xff] %v7216_v23  ;;  %v1139_v39 = vrot.slane %v6841_v63, 7  ;;  %2009 = vmatprep.subr.bf16.mxu0 %v7216_v23  ;;  %v11268_v63 = vrot.slane %v6816_v14, 7  ;;  %v1145_v23 = vrot.slane %v6882_v49, 7  ;;  %v7254_v14 = vld [vmem:[%s10886_s10 + $0x90] ss:$8 sps:$4 sm:$0xff]  }
 0x148   : > { %11262 = vst [vmem:[#allocation95_spill] sm:$0xff] %v7195_v38  ;;  %v1706_v27 = vmul.f32 %v6793_v60, %v1606_v7  ;;  %v7210_v43 = vpop.f32.mrf.mxu0  ;;  %v7229_v7 = vld [vmem:[%s10886_s10 + $0xa0] ss:$8 sps:$4 sm:$0xff]   ;;  %11269 = vst [vmem:[#allocation101_spill] sm:$0xff] %v7254_v14 }
 0x149   : > { %11266 = vst [vmem:[#allocation99_spill] sm:$0xff] %v7229_v7  ;;  %v1192_v21 = vsel %vm1166_vm0, %v11268_v63, %v1139_v39  ;;  %v1190_v0 = vsel %vm1166_vm0, %v1139_v39, %v1141_v4  ;;  %v1147_v63 = vrot.slane %v6890_v13, 7  ;;  %v1146_v39 = vrot.slane %v6886_v12, 7  ;;  %v11309_v60 = vld [vmem:[#allocation74_spill] sm:$0xff] }
 0x14a   : > { %v7220_v33 = vadd.f32 %v1706_v27, %v6862_v2  ;;  %v7222_v37 = vpop.f32.mrf.mxu0  ;;  %v7237_v2 = vld [vmem:[%s10886_s10 + $0x94] ss:$8 sps:$4 sm:$0xff]   ;;  %2010 = vmatpush2.bf16.msra.mxu0 %v7229_v7  ;;  %v7266_v9 = vmul.f32 %v6770_v48, %v1192_v21  ;;  %v7269_v49 = vmul.f32 %v6772_v50, %v1190_v0  ;;  %v1188_v13 = vsel %vm1166_vm0, %v1141_v4, %v1143_v31 }
 0x14b   : > { %11267 = vst [vmem:[#allocation100_spill] sm:$0xff] %v7237_v2  ;;  %2011 = vmatprep.subr.bf16.mxu0 %v7237_v2  ;;  %v1185_v12 = vsel %vm1166_vm0, %v11273_v46, %v1144_v54  ;;  %v1186_v62 = vsel %vm1166_vm0, %v1143_v31, %v1145_v23  ;;  %v1148_v2 = vrot.slane %v6894_v25, 7  ;;  %v7285_v0 = vadd.f32 %v6864_v8, %v6825_v19 }
 0x14c   : > { %11265 = vst [vmem:[#allocation98_spill] sm:$0xff] %v7220_v33  ;;  %v7231_v35 = vpop.f32.mrf.mxu0  ;;  %11271 = vst [vmem:[#allocation103_spill] sm:$0xff] %v7266_v9  ;;  %v1184_v21 = vsel %vm1166_vm0, %v1145_v23, %v1147_v63  ;;  %v1149_v4 = vrot.slane %v6898_v10, 7  ;;  %v7295_v46 = vadd.f32 %v6874_v24, %v6799_v1  ;;  %v1183_v25 = vsel %vm1166_vm0, %v1144_v54, %v1146_v39 }
 0x14d   : > { %11272 = vst [vmem:[#allocation104_spill] sm:$0xff] %v7269_v49  ;;  %11274 = vst [vmem:[#allocation105_spill] sm:$0xff] %v7285_v0  ;;  %v1151_v31 = vrot.slane %v6906_v20, 7  ;;  %v1152_v8 = vrot.slane %v6910_v47, 7  ;;  %v7302_v48 = vmul.f32 %v6762_v44, %v1188_v13  ;;  %v7305_v10 = vmul.f32 %v6764_v45, %v1185_v12 }
 0x14e   : > { %v7243_v27 = vpop.f32.mrf.mxu0  ;;  %2012 = vmatpush2.bf16.msra.mxu0 %v7254_v14  ;;  %11275 = vst [vmem:[#allocation106_spill] sm:$0xff] %v7295_v46  ;;  %v1292_v23 = vmul.f32 %v6764_v45, %v1186_v62  ;;  %v7314_v54 = vadd.f32 %v6884_v59, %v6799_v1  ;;  %v881_v47 = vadd.f32 %v6888_v6, %v6825_v19  ;;  %v1153_v59 = vrot.slane %v6929_v34, 7 }
 0x14f   : > { %11276 = vst [vmem:[#allocation107_spill] sm:$0xff] %v7302_v48  ;;  %11277 = vst [vmem:[#allocation108_spill] sm:$0xff] %v7305_v10  ;;  %v1294_v20 = vmul.f32 %v6754_v40, %v1184_v21  ;;  %v1181_v13 = vsel %vm1166_vm0, %v1146_v39, %v1148_v2  ;;  %v7322_v12 = vmul.f32 %v6754_v40, %v1183_v25  ;;  %v1154_v39 = vrot.slane %v6940_v26, 7 }
 0x150   : > { %v7257_v32 = vpop.f32.mrf.mxu0  ;;  %v1182_v11 = vsel %vm1166_vm0, %v1147_v63, %v1149_v4  ;;  %v1179_v62 = vsel %vm1166_vm0, %v1148_v2, %v1150_v22  ;;  %v1180_v6 = vsel %vm1166_vm0, %v1149_v4, %v1151_v31  ;;  %v1177_v21 = vsel %vm1166_vm0, %v1150_v22, %v1152_v8 }
 0x151   : > { %11278 = vst [vmem:[#allocation109_spill] sm:$0xff] %v7322_v12  ;;  %v1155_v25 = vrot.slane %v6950_v42, 7  ;;  %v7339_v63 = vadd.f32 %v6892_v61, %v6799_v1  ;;  %v7342_v2 = vmul.f32 %v6756_v41, %v1181_v13  ;;  %v887_v34 = vadd.f32 %v6896_v5, %v6825_v19  ;;  %v11280_v61 = vld [vmem:[#allocation35_spill] sm:$0xff] }
 0x152   : > { %v7271_v7 = vpop.f32.mrf.mxu0  ;;  %v7348_v4 = vadd.f32 %v1292_v23, %v877_v55  ;;  %v1296_v22 = vmul.f32 %v6756_v41, %v1182_v11  ;;  %v889_v26 = vadd.f32 %v6900_v17, %v6799_v1  ;;  %v1297_v42 = vmul.f32 %v6746_v36, %v1179_v62  ;;  %v11283_v62 = vld [vmem:[#allocation50_spill] sm:$0xff] }
 0x153   : > { %v7354_v44 = vadd.f32 %v1294_v20, %v881_v47  ;;  %v891_v13 = vadd.f32 %v11280_v61, %v6825_v19  ;;  %v1298_v14 = vmul.f32 %v6746_v36, %v1180_v6  ;;  %v1299_v5 = vmul.f32 %v11281_v3, %v1177_v21  ;;  %v11282_v47 = vld [vmem:[#allocation47_spill] sm:$0xff]  ;;  %v11284_v61 = vld [vmem:[#allocation53_spill] sm:$0xff]  ;;  %v11285_v6 = vld [vmem:[#allocation56_spill] sm:$0xff] }
 0x154   : > { %v7291_v50 = vpop.f32.mrf.mxu0  ;;  %11279 = vst [vmem:[#allocation110_spill] sm:$0xff] %v7348_v4  ;;  %v1178_v55 = vsel %vm1166_vm0, %v1151_v31, %v1153_v59  ;;  %v1175_v11 = vsel %vm1166_vm0, %v1152_v8, %v1154_v39  ;;  %v1176_v17 = vsel %vm1166_vm0, %v1153_v59, %v1155_v25  ;;  %v1156_v20 = vrot.slane %v11282_v47, 7  ;;  %v11286_v21 = vld [vmem:[#allocation60_spill] sm:$0xff] }
 0x155   : > { %v1157_v41 = vrot.slane %v11283_v62, 7  ;;  %v1158_v29 = vrot.slane %v11284_v61, 7  ;;  %v1159_v36 = vrot.slane %v11285_v6, 7  ;;  %v1160_v38 = vrot.slane %v11286_v21, 7  ;;  %v11288_v8 = vld [vmem:[#allocation36_spill] sm:$0xff]  ;;  %v11290_v6 = vld [vmem:[#allocation42_spill] sm:$0xff] }
 0x156   : > { %v7310_v24 = vpop.f32.mrf.mxu0  ;;  %v1161_v31 = vrot.slane %v11287_v56, 7  ;;  %v7376_v33 = vadd.f32 %v1297_v42, %v889_v26  ;;  %v895_v57 = vadd.f32 %v11288_v8, %v6799_v1  ;;  %v1300_v59 = vmul.f32 %v11281_v3, %v1178_v55  ;;  %v11289_v62 = vld [vmem:[#allocation40_spill] sm:$0xff]  ;;  %v11298_v3 = vld [vmem:[#allocation9_spill] sm:$0xff] }
 0x157   : > { %v7381_v47 = vadd.f32 %v1296_v22, %v887_v34  ;;  %v897_v61 = vadd.f32 %v11289_v62, %v6825_v19  ;;  %v899_v28 = vadd.f32 %v11290_v6, %v6799_v1  ;;  %v11291_v21 = vld [vmem:[#allocation8_spill] sm:$0xff]  ;;  %v7390_v18 = vadd.f32 %v1298_v14, %v891_v13 }
 0x158   : > { %v7329_v45 = vpop.f32.mrf.mxu0  ;;  %v1301_v9 = vmul.f32 %v11291_v21, %v1175_v11  ;;  %v7392_v26 = vadd.f32 %v1299_v5, %v895_v57  ;;  %v1302_v42 = vmul.f32 %v11291_v21, %v1176_v17  ;;  %v1173_v34 = vsel %vm1166_vm0, %v1154_v39, %v1156_v20  ;;  %v11292_v5 = vld [vmem:[#allocation44_spill] sm:$0xff]  ;;  %v11293_v17 = vld [vmem:[#allocation66_spill] sm:$0xff] }
 0x159   : > { %v1174_v22 = vsel %vm1166_vm0, %v1155_v25, %v1157_v41  ;;  %v1171_v55 = vsel %vm1166_vm0, %v1156_v20, %v1158_v29  ;;  %v1172_v11 = vsel %vm1166_vm0, %v1157_v41, %v1159_v36  ;;  %v1169_v14 = vsel %vm1166_vm0, %v1158_v29, %v1160_v38  ;;  %v11295_v20 = vld [vmem:[#allocation70_spill] sm:$0xff] }
 0x15a   : > { %v7346_v40 = vpop.f32.mrf.mxu0  ;;  %v1170_v57 = vsel %vm1166_vm0, %v1159_v36, %v1161_v31  ;;  %v901_v39 = vadd.f32 %v11292_v5, %v6825_v19  ;;  %v11294_v8 = vrot.slane %v11293_v17, 7  ;;  %v11296_v62 = vrot.slane %v11295_v20, 7  ;;  %v11297_v36 = vld [vmem:[#allocation46_spill] sm:$0xff] }
 0x15b   : > { %v7419_v6 = vadd.f32 %v1300_v59, %v897_v61  ;;  %v7421_v29 = vadd.f32 %v1301_v9, %v899_v28  ;;  %v905_v21 = vadd.f32 %v11297_v36, %v6799_v1  ;;  %v1303_v49 = vmul.f32 %v11298_v3, %v1173_v34  ;;  %v11301_v59 = vld [vmem:[#allocation49_spill] sm:$0xff]  ;;  %v11302_v9 = vld [vmem:[#allocation7_spill] sm:$0xff] }
 0x15c   : > { %v7362_v23 = vpop.f32.mrf.mxu0  ;;  %v1167_v25 = vsel %vm1166_vm0, %v1160_v38, %v11294_v8  ;;  %v1168_v41 = vsel %vm1166_vm0, %v1161_v31, %v11296_v62  ;;  %v1304_v5 = vmul.f32 %v11298_v3, %v1174_v22  ;;  %v1305_v10 = vmul.f32 %v11299_v52, %v1171_v55  ;;  %v11300_v8 = vld [vmem:[#allocation5_spill] sm:$0xff]  ;;  %v11303_v22 = vld [vmem:[#allocation52_spill] sm:$0xff]  ;;  %v11304_v55 = vld [vmem:[#allocation55_spill] sm:$0xff] }
 0x15d   : > { %v1306_v38 = vmul.f32 %v11299_v52, %v1172_v11  ;;  %v1307_v20 = vmul.f32 %v11300_v8, %v1169_v14  ;;  %v1308_v31 = vmul.f32 %v11300_v8, %v1170_v57  ;;  %v907_v28 = vadd.f32 %v11301_v59, %v6825_v19  ;;  %v11305_v14 = vld [vmem:[#allocation59_spill] sm:$0xff]  ;;  %v11306_v57 = vld [vmem:[#allocation62_spill] sm:$0xff] }
 0x15e   : > { %v7374_v58 = vpop.f32.mrf.mxu0  ;;  %v1309_v61 = vmul.f32 %v11302_v9, %v1167_v25  ;;  %v1310_v62 = vmul.f32 %v11302_v9, %v1168_v41  ;;  %v7435_v34 = vadd.f32 %v1302_v42, %v901_v39  ;;  %v909_v3 = vadd.f32 %v11303_v22, %v6799_v1  ;;  %v11307_v25 = vld [vmem:[#allocation65_spill] sm:$0xff] }
 0x15f   : > { %v911_v11 = vadd.f32 %v11304_v55, %v6825_v19  ;;  %v915_v52 = vadd.f32 %v11305_v14, %v6799_v1  ;;  %v917_v8 = vadd.f32 %v11306_v57, %v6825_v19  ;;  %v7445_v59 = vadd.f32 %v1303_v49, %v905_v21  ;;  %v11308_v42 = vld [vmem:[#allocation69_spill] sm:$0xff] }
 0x160   : > { %v7388_v56 = vpop.f32.mrf.mxu0  ;;  %v919_v41 = vadd.f32 %v11307_v25, %v6799_v1  ;;  %v921_v39 = vadd.f32 %v11308_v42, %v6825_v19  ;;  %v1336_v46 = vadd.f32 %v1304_v5, %v907_v28  ;;  %v1337_v22 = vadd.f32 %v1305_v10, %v909_v3 }
 0x161   : > { %v1339_v48 = vadd.f32 %v1307_v20, %v915_v52  ;;  %v1340_v0 = vadd.f32 %v1308_v31, %v917_v8  ;;  %v1338_v55 = vadd.f32 %v1306_v38, %v911_v11  ;;  %v11007_v14 = vrot.slane %v11309_v60, 1 }
 0x162   : > { %v7407_v13 = vpop.f32.mrf.mxu0  ;;  %v1341_v4 = vadd.f32 %v1309_v61, %v919_v41  ;;  %v1342_v49 = vadd.f32 %v1310_v62, %v921_v39  ;;  %v1568_v1 = vrot.slane %v7243_v27, 1  ;;  %v1569_v42 = vrot.slane %v7257_v32, 1 }
 0x163   : > { %v1572_v3 = vrot.slane %v7310_v24, 1  ;;  %v1573_v52 = vrot.slane %v7329_v45, 1  ;;  %v1576_v38 = vrot.slane %v7374_v58, 1  ;;  %v1578_v8 = vrot.slane %v7407_v13, 1 }
 0x164   : > { %v1538_v17 = vpop.f32.mrf.mxu0  ;;  %v1574_v28 = vrot.slane %v7346_v40, 1  ;;  %v1575_v61 = vrot.slane %v7362_v23, 1  ;;  %v1577_v62 = vrot.slane %v7388_v56, 1  ;;  %v11312_v23 = vld [vmem:[#allocation6_spill] sm:$0xff] }
 0x165   : > { %v11313_v56 = vld [vmem:[#allocation2_spill] sm:$0xff]  ;;  %v1593_v21 = vsel %vm1585_vm1, %v1576_v38, %v1578_v8 }
 0x166   : > { %v1540_v36 = vpop.f32.mrf.mxu0 }
 0x167   : > { %v1580_v25 = vrot.slane %v1540_v36, 1  ;;  %v1579_v36 = vrot.slane %v1538_v17, 1 }
 0x168   : > { %v1544_v9 = vpop.f32.mrf.mxu0 }
 0x169   : > { %v1581_v10 = vrot.slane %v1544_v9, 1  ;;  %v1591_v45 = vsel %vm1585_vm1, %v1578_v8, %v1580_v25  ;;  %v11310_v9 = vld [vmem:[#allocation72_spill] sm:$0xff] }
 0x16a   : > { %v1546_v57 = vpop.f32.mrf.mxu0  ;;  %v11311_v13 = vrot.slane %v11310_v9, 1 }
 0x16b   : > { %v1582_v12 = vrot.slane %v1546_v57, 1  ;;  %v1588_v40 = vsel %vm1585_vm1, %v1579_v36, %v1581_v10  ;;  %v11314_v57 = vld [vmem:[#allocation3_spill] sm:$0xff] }
 0x16c   : > { %v1548_v5 = vpop.f32.mrf.mxu0  ;;  %v1724_v8 = vmul.f32 %v11312_v23, %v1588_v40  ;;  %v11317_v40 = vld [vmem:[#allocation15_spill] sm:$0xff] }
 0x16d   : > { %v1589_v20 = vsel %vm1585_vm1, %v1580_v25, %v1582_v12  ;;  %v1583_v31 = vrot.slane %v1548_v5, 1  ;;  %v1595_v25 = vsel %vm1585_vm1, %v1574_v28, %v1576_v38  ;;  %v1592_v38 = vsel %vm1585_vm1, %v1575_v61, %v1577_v62 }
 0x16e   : > { %v1550_v24 = vpop.f32.mrf.mxu0  ;;  %v1725_v39 = vmul.f32 %v11312_v23, %v1589_v20  ;;  %v1590_v20 = vsel %vm1585_vm1, %v1577_v62, %v1579_v36  ;;  %v1597_v62 = vsel %vm1585_vm1, %v1572_v3, %v1574_v28 }
 0x16f   : > { %v1586_v58 = vsel %vm1585_vm1, %v1581_v10, %v1583_v31  ;;  %v1616_v11 = vsel %vm1585_vm1, %v1583_v31, %v11311_v13  ;;  %v1584_v41 = vrot.slane %v1550_v24, 1  ;;  %v11315_v31 = vld [vmem:[#allocation11_spill] sm:$0xff] }
 0x170   : > { %v1726_v17 = vmul.f32 %v11313_v56, %v1586_v58  ;;  %v1728_v5 = vmul.f32 %v11314_v57, %v1616_v11  ;;  %v1723_v24 = vmul.f32 %v11315_v31, %v1591_v45  ;;  %v7505_v45 = vadd.f32 %v1725_v39, %v1338_v55  ;;  %v11318_v39 = vld [vmem:[#allocation14_spill] sm:$0xff] }
 0x171   : > { %v1587_v9 = vsel %vm1585_vm1, %v1582_v12, %v1584_v41  ;;  %v1617_v10 = vsel %vm1585_vm1, %v1584_v41, %v11007_v14  ;;  %v1721_v41 = vmul.f32 %v11316_v53, %v1593_v21  ;;  %v1719_v21 = vmul.f32 %v11317_v40, %v1595_v25 }
 0x172   : > { %v1727_v58 = vmul.f32 %v11313_v56, %v1587_v9  ;;  %v1729_v13 = vmul.f32 %v11314_v57, %v1617_v10  ;;  %v7496_v12 = vadd.f32 %v1726_v17, %v1339_v48  ;;  %v7498_v11 = vadd.f32 %v1728_v5, %v1341_v4 }
 0x173   : > { %v1570_v9 = vrot.slane %v7271_v7, 1  ;;  %v1571_v10 = vrot.slane %v7291_v50, 1  ;;  %v1722_v48 = vmul.f32 %v11315_v31, %v1590_v20  ;;  %v1594_v4 = vsel %vm1585_vm1, %v1573_v52, %v1575_v61 }
 0x174   : > { %v7501_v14 = vadd.f32 %v1727_v58, %v1340_v0  ;;  %v7503_v36 = vadd.f32 %v1729_v13, %v1342_v49  ;;  %v7517_v49 = vadd.f32 %v1723_v24, %v1336_v46  ;;  %v1720_v50 = vmul.f32 %v11316_v53, %v1592_v38  ;;  %v11319_v24 = vld [vmem:[#allocation19_spill] sm:$0xff] }
 0x175   : > { %v1599_v7 = vsel %vm1585_vm1, %v1570_v9, %v1572_v3  ;;  %v7522_v55 = vadd.f32 %v1724_v8, %v1337_v22  ;;  %v1778_v28 = vpack.c.bf16 %v7498_v11, %v7496_v12  ;;  %v1596_v61 = vsel %vm1585_vm1, %v1571_v10, %v1573_v52 }
 0x176   : > { %v1779_v0 = vpack.c.bf16 %v7503_v36, %v7501_v14  ;;  %v1717_v17 = vmul.f32 %v11318_v39, %v1597_v62  ;;  %v1777_v46 = vpack.c.bf16 %v7505_v45, %v7517_v49  ;;  %v7532_v5 = vadd.f32 %v1721_v41, %v7435_v34 }
 0x177   : > { %v1566_v3 = vrot.slane %v7222_v37, 1  ;;  %v1601_v22 = vsel %vm1585_vm1, %v1568_v1, %v1570_v9  ;;  %v1718_v25 = vmul.f32 %v11317_v40, %v1594_v4  ;;  %v7541_v52 = vadd.f32 %v1722_v48, %v7445_v59 }
 0x178   : > { %1780 = vmatprep.subr.bf16.mxu1 %v1779_v0  ;;  %v1567_v20 = vrot.slane %v7231_v35, 1  ;;  %v1598_v34 = vsel %vm1585_vm1, %v1569_v42, %v1571_v10  ;;  %v1715_v37 = vmul.f32 %v11319_v24, %v1599_v7  ;;  %v7550_v58 = vadd.f32 %v1719_v21, %v7419_v6  ;;  %v11320_v6 = vld [vmem:[#allocation18_spill] sm:$0xff] }
 0x179   : > { %1781 = vmatpush1.bf16.msra.mxu1 %v1778_v28  ;;  %v1603_v59 = vsel %vm1585_vm1, %v1566_v3, %v1568_v1  ;;  %v1716_v13 = vmul.f32 %v11318_v39, %v1596_v61  ;;  %v7558_v35 = vadd.f32 %v1720_v50, %v7421_v29  ;;  %v1776_v38 = vpack.c.bf16 %v7522_v55, %v7541_v52  ;;  %v11327_v61 = vld [vmem:[#allocation22_spill] sm:$0xff] }
 0x17a   : > { %1782 = vmatprep.subr.bf16.mxu1 %v1777_v46  ;;  %v1600_v8 = vsel %vm1585_vm1, %v1567_v20, %v1569_v42  ;;  %v1713_v41 = vmul.f32 %v11320_v6, %v1601_v22  ;;  %v1775_v27 = vpack.c.bf16 %v7532_v5, %v7550_v58  ;;  %v7570_v1 = vadd.f32 %v1717_v17, %v7390_v18  ;;  %v11329_v22 = vld [vmem:[#allocation87_spill] sm:$0xff] }
 0x17b   : > { %v1562_v9 = vrot.slane %v7171_v16, 1  ;;  %v11321_v29 = vrot.slane %v7197_v30, 1  ;;  %v1714_v32 = vmul.f32 %v11319_v24, %v1598_v34  ;;  %v7579_v62 = vadd.f32 %v1718_v25, %v7392_v26  ;;  %v11323_v16 = vld [vmem:[#allocation23_spill] sm:$0xff]  ;;  %v11331_v34 = vld [vmem:[#allocation33_spill] sm:$0xff] }
 0x17c   : > { %v1327_v42 = vadd.f32 %v7342_v2, %v7339_v63  ;;  %v11322_v48 = vrot.slane %v7210_v43, 1  ;;  %v1711_v4 = vmul.f32 %v11323_v16, %v1603_v59  ;;  %v7589_v21 = vadd.f32 %v1715_v37, %v7381_v47  ;;  %v11332_v59 = vld [vmem:[#allocation29_spill] sm:$0xff] }
 0x17d   : > { %v1605_v10 = vsel %vm1585_vm1, %v11321_v29, %v1566_v3  ;;  %1783 = vmatpush1.bf16.msra.mxu1 %v1776_v38  ;;  %v11324_v0 = vmov %v11321_v29  ;;  %v1712_v7 = vmul.f32 %v11320_v6, %v1600_v8  ;;  %v7597_v63 = vadd.f32 %v1716_v13, %v7376_v33  ;;  %v11328_v33 = vld [vmem:[#allocation109_spill] sm:$0xff]  ;;  %v11335_v8 = vld [vmem:[#allocation107_spill] sm:$0xff]  ;;  %v11337_v29 = vld [vmem:[#allocation108_spill] sm:$0xff] }
 0x17e   : > { %v1602_v18 = vsel %vm1585_vm1, %v11322_v48, %v1567_v20  ;;  %1784 = vmatprep.subr.bf16.mxu1 %v1775_v27  ;;  %v1607_v26 = vsel %vm1585_vm1, %v1562_v9, %v11324_v0  ;;  %v1774_v2 = vpack.c.bf16 %v7558_v35, %v7579_v62  ;;  %v11325_v50 = vmov %v11322_v48  ;;  %v11336_v27 = vld [vmem:[#allocation106_spill] sm:$0xff] }
 0x17f   : > { %v11326_v28 = vrot.slane %v7182_v15, 1  ;;  %v1709_v30 = vmul.f32 %v11327_v61, %v1605_v10  ;;  %v1773_v17 = vpack.c.bf16 %v7570_v1, %v7589_v21  ;;  %v7611_v46 = vadd.f32 %v1713_v41, %v7354_v44  ;;  %v11333_v44 = vld [vmem:[#allocation110_spill] sm:$0xff] }
 0x180   : > { %v1325_v3 = vadd.f32 %v11328_v33, %v7314_v54  ;;  %v11330_v25 = vrot.slane %v11329_v22, 1  ;;  %v1710_v15 = vmul.f32 %v11323_v16, %v1602_v18  ;;  %v7620_v20 = vadd.f32 %v1714_v32, %v1327_v42  ;;  %v11334_v54 = vld [vmem:[#allocation105_spill] sm:$0xff] }
 0x181   : > { %v1604_v47 = vsel %vm1585_vm1, %v11326_v28, %v11325_v50  ;;  %1785 = vmatpush1.bf16.msra.mxu1 %v1774_v2  ;;  %v867_v37 = vadd.f32 %v11331_v34, %v6825_v19  ;;  %v1707_v13 = vmul.f32 %v11332_v59, %v1607_v26  ;;  %v7626_v38 = vadd.f32 %v1711_v4, %v11333_v44  ;;  %v11338_v19 = vld [vmem:[#allocation27_spill] sm:$0xff]  ;;  %v11339_v4 = vld [vmem:[#allocation104_spill] sm:$0xff]  ;;  %v11347_v44 = vld [vmem:[#allocation98_spill] sm:$0xff] }
 0x182   : > { %v1609_v43 = vsel %vm1585_vm1, %v11330_v25, %v1562_v9  ;;  %1786 = vmatprep.subr.bf16.mxu1 %v1773_v17  ;;  %v1322_v41 = vadd.f32 %v11335_v8, %v11334_v54  ;;  %v1323_v9 = vadd.f32 %v11337_v29, %v11336_v27  ;;  %v1708_v10 = vmul.f32 %v11327_v61, %v1604_v47  ;;  %v11341_v28 = vld [vmem:[#allocation103_spill] sm:$0xff]  ;;  %v11345_v25 = vld [vmem:[#allocation34_spill] sm:$0xff]  ;;  %v11348_v54 = vld [vmem:[#allocation93_spill] sm:$0xff] }
 0x183   : > { %v7633_v32 = vadd.f32 %v1712_v7, %v1325_v3  ;;  %v1772_v42 = vpack.c.bf16 %v7597_v63, %v7620_v20  ;;  %v1705_v48 = vmul.f32 %v11338_v19, %v1609_v43  ;;  %v1771_v18 = vpack.c.bf16 %v7611_v46, %v7626_v38  ;;  %v11340_v7 = vld [vmem:[#allocation102_spill] sm:$0xff]  ;;  %v11342_v17 = vld [vmem:[#allocation79_spill] sm:$0xff]  ;;  %v11394_v61 = vld [vmem:[#allocation100_spill] sm:$0xff] }
 0x184   : > { %v1320_v0 = vadd.f32 %v11339_v4, %v867_v37  ;;  %v7641_v26 = vadd.f32 %v1709_v30, %v1322_v41  ;;  %v7643_v2 = vadd.f32 %v1710_v15, %v1323_v9  ;;  %v1318_v47 = vadd.f32 %v11341_v28, %v11340_v7  ;;  %v11346_v37 = vld [vmem:[#allocation78_spill] sm:$0xff]  ;;  %v11349_v41 = vld [vmem:[#allocation76_spill] sm:$0xff]  ;;  %v11351_v29 = vld [vmem:[#allocation91_spill] sm:$0xff] }
 0x185   : > { %1787 = vmatpush1.bf16.msra.mxu1 %v1772_v42  ;;  %v11343_v33 = vrot.slane %v11342_v17, 1  ;;  %v11344_v3 = vrot.slane %v11309_v60, 1  ;;  %v7656_v43 = vadd.f32 %v1708_v10, %v11345_v25  ;;  %v11352_v9 = vld [vmem:[#allocation95_spill] sm:$0xff]  ;;  %v11353_v42 = vld [vmem:[#allocation89_spill] sm:$0xff]  ;;  %v11355_v4 = vld [vmem:[#allocation86_spill] sm:$0xff]  ;;  %v11357_v28 = vmov 0  }
 0x186   : > { %1788 = vmatprep.subr.bf16.mxu1 %v1771_v18  ;;  %v7645_v50 = vadd.f32 %v1707_v13, %v1320_v0  ;;  %v1770_v30 = vpack.c.bf16 %v7633_v32, %v7643_v2  ;;  %v7662_v34 = vadd.f32 %v1705_v48, %v1318_v47  ;;  %v1766_v10 = vpack.c.bf16 %v11352_v9, %v11351_v29  ;;  %v11354_v18 = vld [vmem:[#allocation83_spill] sm:$0xff]  ;;  %v7681_v7 = vld [vmem:[%s10887_s11] sm:$0xf] }
 0x187   : > { %v1615_v22 = vsel %vm1585_vm1, %v11344_v3, %v11343_v33  ;;  %v1768_v60 = vpack.c.bf16 %v7656_v43, %v11347_v44  ;;  %v1764_v0 = vpack.c.bf16 %v11355_v4, %v11354_v18  ;;  %11356 = vst [vmem:[#allocation47_spill] sm:$0xff] %v7681_v7  ;;  %v7688_v47 = vld [vmem:[%s10886_s10 + $0x84] ss:$8 sps:$4 sm:$0xff]   ;;  %v7693_v17 = vld [vmem:[%s10886_s10 + $0x80] ss:$8 sps:$4 sm:$0xff]  }
 0x188   : > { %v1769_v15 = vpack.c.bf16 %v7641_v26, %v7645_v50  ;;  %v1699_v13 = vmul.f32 %v11346_v37, %v1615_v22  ;;  %v1767_v8 = vpack.c.bf16 %v7662_v34, %v11348_v54  ;;  %2013 = vmatprep.subr.bf16.mxu0 %v7688_v47 }
 0x189   : > { %1789 = vmatpush1.bf16.msra.mxu1 %v1770_v30  ;;  %2014 = vmatpush2.bf16.msra.mxu0 %v7693_v17 }
 0x18a   : > { %1790 = vmatprep.subr.bf16.mxu1 %v1769_v15  ;;  %v7670_v27 = vadd.f32 %v1699_v13, %v11349_v41 }
 0x18c   : > { %11350 = vst [vmem:[#allocation35_spill] sm:$0xff] %v7670_v27  ;;  %v1765_v48 = vpack.c.bf16 %v11353_v42, %v7670_v27 }
 0x18d   : > { %1791 = vmatpush1.bf16.msra.mxu1 %v1768_v60 }
 0x18e   : > { %1792 = vmatprep.subr.bf16.mxu1 %v1767_v8 }
 0x191   : > { %1793 = vmatpush1.bf16.msra.mxu1 %v1766_v10 }
 0x192   : > { %1794 = vmatprep.subr.bf16.mxu1 %v1765_v48 }
 0x195   : > { %1795 = vmatpush1.bf16.msra.mxu1 %v1764_v0  ;;  %v7703_v0 = vld [vmem:[%s10888_s12] sm:$0xff]  }
 0x196   : > { %11358 = vst [vmem:[#allocation50_spill] sm:$0xff] %v7703_v0 }
 0x198   : > { %1813 = vmatmul.mubr.bf16.vlgmr.msra.gmra.mxu1 %v7681_v7 }
 0x199   : > { %2323 = vmatprep.mubr.bf16.mxu1 %v11357_v28 }
 0x258   : > { %v1814_v33 = vpop.f32.mrf.mxu1 }
 0x259   : > { %v1821_v25 = vpack.c.bf16 %v1814_v33, %v1814_v33 }
 0x25a   : > { %v1816_v3 = vpop.f32.mrf.mxu1 }
 0x25b   : > { %v1822_v22 = vpack.c.bf16 %v1816_v3, %v1816_v3  ;;  %v11359_v3 = vld [vmem:[#allocation37_spill] sm:$0xff] }
 0x25c   : > { %v1818_v30 = vpop.f32.mrf.mxu1 }
 0x25d   : > { %2015 = vmatprep.mubr.bf16.mxu0 %v1822_v22  ;;  %v11360_v22 = vld [vmem:[#allocation38_spill] sm:$0xff]  ;;  %v7714_v30 = vld [vmem:[%s10888_s12 + $0x8] sm:$0xff]  }
 0x25e   : > { %v1819_v15 = vpop.f32.mrf.mxu1  ;;  %2016 = vmatmul.mubr.bf16.vlgmr.msra.gmra.mxu0 %v1821_v25  ;;  %v11361_v25 = vld [vmem:[#allocation39_spill] sm:$0xff]  ;;  %11362 = vst [vmem:[#allocation53_spill] sm:$0xff] %v7714_v30 }
 0x25f   : > { %2130 = vmatprep.mubr.bf16.mxu0 %v11357_v28  ;;  %v11363_v15 = vld [vmem:[#allocation41_spill] sm:$0xff] }
 0x31e   : > { %v2017_v13 = vpop.f32.mrf.mxu0 }
 0x31f   : > { %v2024_v60 = vpack.c.bf16 %v2017_v13, %v2017_v13  ;;  %v11364_v13 = vld [vmem:[#allocation43_spill] sm:$0xff] }
 0x320   : > { %v2019_v8 = vpop.f32.mrf.mxu0 }
 0x321   : > { %v2025_v41 = vpack.c.bf16 %v2019_v8, %v2019_v8  ;;  %v2093_v48 = vsel %vm2091_vm2, %v2024_v60, 0  ;;  %v11365_v60 = vld [vmem:[#allocation45_spill] sm:$0xff]  ;;  %v11366_v8 = vld [vmem:[#allocation48_spill] sm:$0xff] }
 0x322   : > { %v2021_v10 = vpop.f32.mrf.mxu0 }
 0x323   : > { %5666 = vmatprep.subr.msk.bf16.mxu0 %vm2091_vm2, %v2025_v41  ;;  %v7726_v41 = vld [vmem:[%s10888_s12 + $0x10] sm:$0xff]   ;;  %v11368_v10 = vld [vmem:[#allocation51_spill] sm:$0xff] }
 0x324   : > { %v2022_v33 = vpop.f32.mrf.mxu0  ;;  %2113 = vmatpush1.bf16.msra.mxu0 %v2093_v48  ;;  %11367 = vst [vmem:[#allocation56_spill] sm:$0xff] %v7726_v41  ;;  %v11369_v48 = vld [vmem:[#allocation54_spill] sm:$0xff] }
 0x325   : > { %2334 = vmatprep.subr.bf16.mxu0 %v11359_v3  ;;  %v11370_v33 = vld [vmem:[#allocation58_spill] sm:$0xff]  ;;  %v11371_v3 = vld [vmem:[#allocation61_spill] sm:$0xff] }
 0x327   : > { %5667 = vmatmul.mubr.msk.bf16.vlgmr.msra.gmra.mxu0 %vm2066_vm3, %v7703_v0 }
 0x328   : > { %2140 = vmatprep.mubr.bf16.mxu0 %v11357_v28  ;;  %2335 = vmatpush1.bf16.msra.mxu0 %v11360_v22  ;;  %v7738_v22 = vld [vmem:[%s10888_s12 + $0x18] sm:$0xff]  }
 0x329   : > { %2336 = vmatprep.subr.bf16.mxu0 %v11361_v25  ;;  %11372 = vst [vmem:[#allocation60_spill] sm:$0xff] %v7738_v22  ;;  %v11373_v25 = vld [vmem:[#allocation64_spill] sm:$0xff] }
 0x32c   : > { %2337 = vmatpush1.bf16.msra.mxu0 %v11363_v15  ;;  %v11374_v15 = vld [vmem:[#allocation67_spill] sm:$0xff] }
 0x32d   : > { %2338 = vmatprep.subr.bf16.mxu0 %v11364_v13  ;;  %v11375_v13 = vld [vmem:[#allocation71_spill] sm:$0xff] }
 0x32f   : > { %5668 = vmatmul.mubr.msk.bf16.gmra.mxu0 %vm2066_vm3, %v7714_v30 }
 0x330   : > { %2150 = vmatprep.mubr.bf16.mxu0 %v11357_v28  ;;  %2339 = vmatpush1.bf16.msra.mxu0 %v11365_v60  ;;  %v11376_v60 = vld [vmem:[#allocation73_spill] sm:$0xff] }
 0x331   : > { %2340 = vmatprep.subr.bf16.mxu0 %v11366_v8  ;;  %v7750_v8 = vld [vmem:[%s10888_s12 + $0x20] sm:$0xff]  }
 0x332   : > { %11377 = vst [vmem:[#allocation63_spill] sm:$0xff] %v7750_v8 }
 0x334   : > { %2341 = vmatpush1.bf16.msra.mxu0 %v11368_v10  ;;  %v11378_v10 = vld [vmem:[#allocation75_spill] sm:$0xff] }
 0x335   : > { %2342 = vmatprep.subr.bf16.mxu0 %v11369_v48  ;;  %v11379_v48 = vld [vmem:[#allocation77_spill] sm:$0xff] }
 0x337   : > { %5669 = vmatmul.mubr.msk.bf16.gmra.mxu0 %vm2066_vm3, %v7726_v41 }
 0x338   : > { %2160 = vmatprep.mubr.bf16.mxu0 %v11357_v28  ;;  %2343 = vmatpush1.bf16.msra.mxu0 %v11370_v33  ;;  %v11380_v33 = vld [vmem:[#allocation80_spill] sm:$0xff] }
 0x339   : > { %2344 = vmatprep.subr.bf16.mxu0 %v11371_v3  ;;  %v11381_v3 = vld [vmem:[#allocation81_spill] sm:$0xff] }
 0x33c   : > { %2345 = vmatpush1.bf16.msra.mxu0 %v11373_v25  ;;  %v7762_v25 = vld [vmem:[%s10888_s12 + $0x28] sm:$0xff]  }
 0x33d   : > { %2346 = vmatprep.subr.bf16.mxu0 %v11374_v15  ;;  %11382 = vst [vmem:[#allocation36_spill] sm:$0xff] %v7762_v25  ;;  %v11383_v15 = vld [vmem:[#allocation84_spill] sm:$0xff] }
 0x33f   : > { %5670 = vmatmul.mubr.msk.bf16.gmra.mxu0 %vm2066_vm3, %v7738_v22 }
 0x340   : > { %2170 = vmatprep.mubr.bf16.mxu0 %v11357_v28  ;;  %2347 = vmatpush1.bf16.msra.mxu0 %v11375_v13  ;;  %v11384_v13 = vld [vmem:[#allocation85_spill] sm:$0xff] }
 0x341   : > { %2348 = vmatprep.subr.bf16.mxu0 %v11376_v60  ;;  %v11385_v60 = vld [vmem:[#allocation88_spill] sm:$0xff] }
 0x344   : > { %2349 = vmatpush1.bf16.msra.mxu0 %v11378_v10  ;;  %v11386_v10 = vld [vmem:[#allocation90_spill] sm:$0xff] }
 0x345   : > { %2350 = vmatprep.subr.bf16.mxu0 %v11379_v48  ;;  %v7774_v48 = vld [vmem:[%s10888_s12 + $0x30] sm:$0xff]  }
 0x346   : > { %11387 = vst [vmem:[#allocation40_spill] sm:$0xff] %v7774_v48 }
 0x347   : > { %5671 = vmatmul.mubr.msk.bf16.gmra.mxu0 %vm2066_vm3, %v7750_v8 }
 0x348   : > { %2180 = vmatprep.mubr.bf16.mxu0 %v11357_v28  ;;  %2351 = vmatpush2.bf16.msra.mxu0 %v11380_v33  ;;  %v11388_v33 = vld [vmem:[#allocation92_spill] sm:$0xff] }
 0x349   : > { %2352 = vmatprep.subr.bf16.mxu0 %v11381_v3  ;;  %v11389_v3 = vld [vmem:[#allocation94_spill] sm:$0xff] }
 0x34c   : > { %2353 = vmatpush2.bf16.msra.mxu0 %v11383_v15  ;;  %v11390_v15 = vld [vmem:[#allocation96_spill] sm:$0xff] }
 0x34d   : > { %2354 = vmatprep.subr.bf16.mxu0 %v11384_v13  ;;  %v11391_v13 = vld [vmem:[#allocation97_spill] sm:$0xff] }
 0x34f   : > { %5672 = vmatmul.mubr.msk.bf16.gmra.mxu0 %vm2066_vm3, %v7762_v25 }
 0x350   : > { %2190 = vmatprep.mubr.bf16.mxu0 %v11357_v28  ;;  %2355 = vmatpush2.bf16.msra.mxu0 %v11385_v60  ;;  %v7786_v60 = vld [vmem:[%s10888_s12 + $0x38] sm:$0xff]  }
 0x351   : > { %2356 = vmatprep.subr.bf16.mxu0 %v11386_v10  ;;  %11392 = vst [vmem:[#allocation42_spill] sm:$0xff] %v7786_v60  ;;  %v11393_v10 = vld [vmem:[#allocation99_spill] sm:$0xff] }
 0x354   : > { %2357 = vmatpush2.bf16.msra.mxu0 %v11388_v33  ;;  %v11395_v33 = vld [vmem:[#allocation101_spill] sm:$0xff] }
 0x355   : > { %2358 = vmatprep.subr.bf16.mxu0 %v11389_v3 }
 0x357   : > { %5673 = vmatmul.mubr.msk.bf16.gmra.mxu0 %vm2066_vm3, %v7774_v48 }
 0x358   : > { %2200 = vmatprep.mubr.bf16.mxu0 %v11357_v28  ;;  %2359 = vmatpush2.bf16.msra.mxu0 %v11390_v15 }
 0x359   : > { %2360 = vmatprep.subr.bf16.mxu0 %v11391_v13 }
 0x35c   : > { %2361 = vmatpush2.bf16.msra.mxu0 %v11393_v10 }
 0x35d   : > { %2362 = vmatprep.subr.bf16.mxu0 %v11394_v61 }
 0x35f   : > { %5674 = vmatmul.mubr.msk.bf16.gmra.mxu0 %vm2066_vm3, %v7786_v60 }
 0x360   : > { %2363 = vmatpush2.bf16.msra.mxu0 %v11395_v33 }
 0x361   : > { %2364 = vmatprep.subr.bf16.mxu0 %v7688_v47 }
 0x364   : > { %2365 = vmatpush2.bf16.msra.mxu0 %v7693_v17 }
 0x3e7   : > { %v7795_v3 = vpop.f32.mrf.mxu0 }
 0x3e8   : > { %11396 = vst [vmem:[#allocation44_spill] sm:$0xff] %v7795_v3 }
 0x3e9   : > { %v7797_v15 = vpop.f32.mrf.mxu0 }
 0x3ea   : > { %11397 = vst [vmem:[#allocation66_spill] sm:$0xff] %v7797_v15 }
 0x3eb   : > { %v7799_v13 = vpop.f32.mrf.mxu0 }
 0x3ec   : > { %11398 = vst [vmem:[#allocation70_spill] sm:$0xff] %v7799_v13 }
 0x3ed   : > { %v7801_v16 = vpop.f32.mrf.mxu0 }
 0x3ef   : > { %v7803_v10 = vpop.f32.mrf.mxu0 }
 0x3f1   : > { %v7805_v61 = vpop.f32.mrf.mxu0 }
 0x3f3   : > { %v7807_v6 = vpop.f32.mrf.mxu0 }
 0x3f5   : > { %v7809_v24 = vpop.f32.mrf.mxu0 }
 0x3f7   : > { %v7811_v33 = vpop.f32.mrf.mxu0 }
 0x3f9   : > { %v7813_v47 = vpop.f32.mrf.mxu0 }
 0x3fb   : > { %v7815_v17 = vpop.f32.mrf.mxu0 }
 0x3fd   : > { %v7817_v39 = vpop.f32.mrf.mxu0 }
 0x3ff   : > { %v7819_v40 = vpop.f32.mrf.mxu0 }
 0x401   : > { %v2164_v53 = vpop.f32.mrf.mxu0 }
 0x403   : > { %v2166_v31 = vpop.f32.mrf.mxu0 }
 0x405   : > { %v2168_v57 = vpop.f32.mrf.mxu0 }
 0x407   : > { %v2172_v56 = vpop.f32.mrf.mxu0 }
 0x409   : > { %v2174_v23 = vpop.f32.mrf.mxu0 }
 0x40b   : > { %v2176_v59 = vpop.f32.mrf.mxu0 }
 0x40d   : > { %v2178_v19 = vpop.f32.mrf.mxu0 }
 0x40f   : > { %v2182_v37 = vpop.f32.mrf.mxu0 }
 0x411   : > { %v2184_v51 = vpop.f32.mrf.mxu0 }
 0x413   : > { %v2186_v60 = vpop.f32.mrf.mxu0 }
 0x415   : > { %v2188_v48 = vpop.f32.mrf.mxu0 }
 0x417   : > { %v2192_v25 = vpop.f32.mrf.mxu0 }
 0x419   : > { %v2194_v8 = vpop.f32.mrf.mxu0 }
 0x41a   : > { %v7834_v27 = vsub.f32 %v7517_v49, %v2194_v8 }
 0x41b   : > { %v2196_v22 = vpop.f32.mrf.mxu0 }
 0x41c   : > { %v7840_v29 = vsub.f32 %v7522_v55, %v2196_v22 }
 0x41d   : > { %v2198_v41 = vpop.f32.mrf.mxu0 }
 0x41e   : > { %v7822_v7 = vsub.f32 %v7505_v45, %v2198_v41  ;;  %v7845_v45 = vsub.f32 %v7532_v5, %v2188_v48  ;;  %v2268_v5 = vmul.f32 %v7834_v27, %v7834_v27  ;;  %v2269_v41 = vmul.f32 %v7840_v29, %v7840_v29 }
 0x41f   : > { %v2202_v30 = vpop.f32.mrf.mxu0 }
 0x420   : > { %v7831_v4 = vsub.f32 %v7496_v12, %v2202_v30  ;;  %v2270_v12 = vmul.f32 %v7822_v7, %v7822_v7  ;;  %v7864_v30 = vsub.f32 %v7558_v35, %v2186_v60  ;;  %v2266_v8 = vmul.f32 %v7845_v45, %v7845_v45 }
 0x421   : > { %v2204_v0 = vpop.f32.mrf.mxu0  ;;  %v7879_v35 = vsub.f32 %v7589_v21, %v2174_v23  ;;  %v7894_v23 = vsub.f32 %v7620_v20, %v2172_v56  ;;  %v7910_v56 = vsub.f32 %v7641_v26, %v7817_v39  ;;  %v7928_v26 = vsub.f32 %v7656_v43, %v7815_v17 }
 0x422   : > { %v7825_v18 = vsub.f32 %v7501_v14, %v2204_v0  ;;  %v2271_v55 = vmul.f32 %v7831_v4, %v7831_v4  ;;  %v7946_v17 = vsub.f32 %v11348_v54, %v7805_v61 }
 0x423   : > { %v2206_v28 = vpop.f32.mrf.mxu0 }
 0x424   : > { %v7828_v3 = vsub.f32 %v7498_v11, %v2206_v28  ;;  %v2272_v11 = vmul.f32 %v7825_v18, %v7825_v18  ;;  %v7859_v28 = vsub.f32 %v7550_v58, %v2184_v51  ;;  %v2288_v51 = vpack.c.bf16 %v2270_v12, %v2268_v5 }
 0x425   : > { %v2208_v13 = vpop.f32.mrf.mxu0  ;;  %v7874_v58 = vsub.f32 %v7579_v62, %v2182_v37  ;;  %v7889_v62 = vsub.f32 %v7611_v46, %v2168_v57  ;;  %v7904_v57 = vsub.f32 %v7633_v32, %v2166_v31  ;;  %v2259_v31 = vmul.f32 %v7894_v23, %v7894_v23 }
 0x426   : > { %v7837_v15 = vsub.f32 %v7503_v36, %v2208_v13  ;;  %v2273_v14 = vmul.f32 %v7828_v3, %v7828_v3  ;;  %v7854_v36 = vsub.f32 %v7541_v52, %v2192_v25  ;;  %v7869_v52 = vsub.f32 %v7570_v1, %v2178_v19 }
 0x427   : > { %v2264_v48 = vmul.f32 %v7859_v28, %v7859_v28  ;;  %v7884_v1 = vsub.f32 %v7597_v63, %v2176_v59  ;;  %v2265_v19 = vmul.f32 %v7864_v30, %v7864_v30  ;;  %v2263_v21 = vmul.f32 %v7874_v58, %v7874_v58 }
 0x428   : > { %v2274_v49 = vmul.f32 %v7837_v15, %v7837_v15  ;;  %v2289_v22 = vpack.c.bf16 %v2273_v14, %v2271_v55  ;;  %v2267_v25 = vmul.f32 %v7854_v36, %v7854_v36  ;;  %v2262_v37 = vmul.f32 %v7869_v52, %v7869_v52  ;;  %v11399_v55 = vld [vmem:[#allocation91_spill] sm:$0xff] }
 0x429   : > { %v2286_v13 = vpack.c.bf16 %v2266_v8, %v2264_v48  ;;  %v7899_v63 = vsub.f32 %v7626_v38, %v2164_v53  ;;  %v2260_v59 = vmul.f32 %v7879_v35, %v7879_v35  ;;  %v2261_v46 = vmul.f32 %v7884_v1, %v7884_v1 }
 0x42a   : > { %v2290_v0 = vpack.c.bf16 %v2274_v49, %v2272_v11  ;;  %v2287_v60 = vpack.c.bf16 %v2269_v41, %v2267_v25  ;;  %v2285_v14 = vpack.c.bf16 %v2265_v19, %v2263_v21  ;;  %v2258_v20 = vmul.f32 %v7889_v62, %v7889_v62  ;;  %v11404_v19 = vld [vmem:[#allocation44_spill] sm:$0xff] }
 0x42b   : > { %v2284_v53 = vpack.c.bf16 %v2262_v37, %v2260_v59  ;;  %v7916_v38 = vsub.f32 %v7643_v2, %v7819_v40  ;;  %v7922_v32 = vsub.f32 %v7645_v50, %v7813_v47  ;;  %v2256_v39 = vmul.f32 %v7899_v63, %v7899_v63 }
 0x42c   : > { %2291 = vmatprep.subr.bf16.mxu1 %v2290_v0  ;;  %v2257_v40 = vmul.f32 %v7904_v57, %v7904_v57  ;;  %v2283_v2 = vpack.c.bf16 %v2261_v46, %v2259_v31  ;;  %v7934_v12 = vsub.f32 %v7662_v34, %v7809_v24  ;;  %v2254_v50 = vmul.f32 %v7910_v56, %v7910_v56  ;;  %v11401_v0 = vld [vmem:[#allocation35_spill] sm:$0xff] }
 0x42d   : > { %2292 = vmatpush1.bf16.msra.mxu1 %v2289_v22  ;;  %v2282_v47 = vpack.c.bf16 %v2258_v20, %v2256_v39  ;;  %v7940_v11 = vsub.f32 %v11347_v44, %v7811_v33  ;;  %v2255_v43 = vmul.f32 %v7916_v38, %v7916_v38  ;;  %v2252_v24 = vmul.f32 %v7922_v32, %v7922_v32  ;;  %v11403_v22 = vld [vmem:[#allocation86_spill] sm:$0xff]  ;;  %v11406_v31 = vld [vmem:[#allocation47_spill] sm:$0xff] }
 0x42e   : > { %2293 = vmatprep.subr.bf16.mxu1 %v2288_v51  ;;  %v7952_v34 = vsub.f32 %v11352_v9, %v7807_v6  ;;  %v2253_v44 = vmul.f32 %v7928_v26, %v7928_v26  ;;  %v7958_v49 = vsub.f32 %v11353_v42, %v7801_v16  ;;  %v2250_v54 = vmul.f32 %v7934_v12, %v7934_v12  ;;  %v11400_v9 = vld [vmem:[#allocation66_spill] sm:$0xff] }
 0x42f   : > { %v2281_v33 = vpack.c.bf16 %v2257_v40, %v2255_v43  ;;  %v2280_v61 = vpack.c.bf16 %v2254_v50, %v2252_v24  ;;  %v7964_v5 = vsub.f32 %v11399_v55, %v7803_v10  ;;  %v2251_v6 = vmul.f32 %v7940_v11, %v7940_v11  ;;  %v11402_v42 = vld [vmem:[#allocation70_spill] sm:$0xff]  ;;  %v6063_v55 = vld [vmem:[%s10882_s6 + $0x54] ss:$8 sps:$4 sm:$0xff]  }
 0x430   : > { %v7970_v41 = vsub.f32 %v11401_v0, %v11400_v9  ;;  %v2248_v16 = vmul.f32 %v7946_v17, %v7946_v17  ;;  %v7976_v8 = vsub.f32 %v11403_v22, %v11402_v42  ;;  %v2249_v10 = vmul.f32 %v7952_v34, %v7952_v34  ;;  %v6069_v9 = vld [vmem:[%s10882_s6 + $0x44] ss:$8 sps:$4 sm:$0xff]   ;;  %v6067_v0 = vld [vmem:[%s10882_s6 + $0x40] ss:$8 sps:$4 sm:$0xff]   ;;  %v6073_v42 = vld [vmem:[%s10882_s6 + $0x30] ss:$8 sps:$4 sm:$0xff]  }
 0x431   : > { %2294 = vmatpush1.bf16.msra.mxu1 %v2287_v60  ;;  %v2279_v51 = vpack.c.bf16 %v2253_v44, %v2251_v6  ;;  %v2246_v25 = vmul.f32 %v7958_v49, %v7958_v49  ;;  %v11405_v60 = vld [vmem:[#allocation83_spill] sm:$0xff]  ;;  %v11407_v39 = vmov 0   ;;  %v6049_v44 = vld [vmem:[%s10882_s6 + $0x70] ss:$8 sps:$4 sm:$0xff]  }
 0x432   : > { %2295 = vmatprep.subr.bf16.mxu1 %v2286_v13  ;;  %v2278_v48 = vpack.c.bf16 %v2250_v54, %v2248_v16  ;;  %v7984_v37 = vsub.f32 %v11405_v60, %v11404_v19  ;;  %v2247_v13 = vmul.f32 %v7964_v5, %v7964_v5  ;;  %v2244_v21 = vmul.f32 %v7970_v41, %v7970_v41  ;;  %v6057_v54 = vld [vmem:[%s10882_s6 + $0x64] ss:$8 sps:$4 sm:$0xff]   ;;  %v6061_v6 = vld [vmem:[%s10882_s6 + $0x50] ss:$8 sps:$4 sm:$0xff]   ;;  %v6075_v16 = vld [vmem:[%s10882_s6 + $0x34] ss:$8 sps:$4 sm:$0xff]  }
 0x433   : > { %v2245_v59 = vmul.f32 %v7976_v8, %v7976_v8  ;;  %v6081_v22 = vld [vmem:[%s10882_s6 + $0x24] ss:$8 sps:$4 sm:$0xff]   ;;  %v6091_v19 = vld [vmem:[%s10882_s6] ss:$8 sps:$4 sm:$0xff]   ;;  %v6099_v60 = vld [vmem:[%s10882_s6 + $0xf4] ss:$8 sps:$4 sm:$0xff]  }
 0x434   : > { %v2277_v46 = vpack.c.bf16 %v2249_v10, %v2247_v13  ;;  %v2243_v20 = vmul.f32 %v7984_v37, %v7984_v37  ;;  %v6079_v10 = vld [vmem:[%s10882_s6 + $0x20] ss:$8 sps:$4 sm:$0xff]   ;;  %v6097_v13 = vld [vmem:[%s10882_s6 + $0xf0] ss:$8 sps:$4 sm:$0xff]  }
 0x435   : > { %2296 = vmatpush1.bf16.msra.mxu1 %v2285_v14  ;;  %v2276_v14 = vpack.c.bf16 %v2246_v25, %v2244_v21  ;;  %v6085_v25 = vld [vmem:[%s10882_s6 + $0x10] ss:$8 sps:$4 sm:$0xff]   ;;  %v6105_v21 = vld [vmem:[%s10882_s6 + $0xe4] ss:$8 sps:$4 sm:$0xff]  }
 0x436   : > { %2297 = vmatprep.subr.bf16.mxu1 %v2284_v53  ;;  %v2275_v53 = vpack.c.bf16 %v2245_v59, %v2243_v20  ;;  %v6103_v59 = vld [vmem:[%s10882_s6 + $0xe0] ss:$8 sps:$4 sm:$0xff]   ;;  %v6117_v20 = vld [vmem:[%s10882_s6 + $0xc4] ss:$8 sps:$4 sm:$0xff]  }
 0x439   : > { %2298 = vmatpush1.bf16.msra.mxu1 %v2283_v2 }
 0x43a   : > { %2299 = vmatprep.subr.bf16.mxu1 %v2282_v47 }
 0x43d   : > { %2300 = vmatpush1.bf16.msra.mxu1 %v2281_v33  ;;  %v6051_v33 = vld [vmem:[%s10882_s6 + $0x74] ss:$8 sps:$4 sm:$0xff]  }
 0x43e   : > { %2301 = vmatprep.subr.bf16.mxu1 %v2280_v61  ;;  %3174 = vmatprep.subr.bf16.mxu0 %v6051_v33  ;;  %v6055_v61 = vld [vmem:[%s10882_s6 + $0x60] ss:$8 sps:$4 sm:$0xff]  }
 0x441   : > { %2302 = vmatpush1.bf16.msra.mxu1 %v2279_v51  ;;  %v6087_v51 = vld [vmem:[%s10882_s6 + $0x14] ss:$8 sps:$4 sm:$0xff]  }
 0x442   : > { %2303 = vmatprep.subr.bf16.mxu1 %v2278_v48  ;;  %v6093_v48 = vld [vmem:[%s10882_s6 + $0x4] ss:$8 sps:$4 sm:$0xff]  }
 0x445   : > { %2304 = vmatpush1.bf16.msra.mxu1 %v2277_v46  ;;  %v6111_v46 = vld [vmem:[%s10882_s6 + $0xd4] ss:$8 sps:$4 sm:$0xff]  }
 0x446   : > { %2305 = vmatprep.subr.bf16.mxu1 %v2276_v14  ;;  %v6109_v14 = vld [vmem:[%s10882_s6 + $0xd0] ss:$8 sps:$4 sm:$0xff]  }
 0x449   : > { %2306 = vmatpush1.bf16.msra.mxu1 %v2275_v53  ;;  %v6115_v53 = vld [vmem:[%s10882_s6 + $0xc0] ss:$8 sps:$4 sm:$0xff]  }
 0x44c   : > { %2324 = vmatmul.mubr.bf16.vlgmr.msra.gmra.mxu1 %v11406_v31 }
 0x44d   : > { %2417 = vmatprep.mubr.bf16.mxu1 %v11407_v39 }
 0x50c   : > { %v2325_v40 = vpop.f32.mrf.mxu1 }
 0x50d   : > { %v2332_v47 = vpack.c.bf16 %v2325_v40, %v2325_v40 }
 0x50e   : > { %v2327_v2 = vpop.f32.mrf.mxu1 }
 0x50f   : > { %v2333_v50 = vpack.c.bf16 %v2327_v2, %v2327_v2 }
 0x510   : > { %v2329_v43 = vpop.f32.mrf.mxu1 }
 0x511   : > { %2366 = vmatprep.mubr.bf16.mxu0 %v2333_v50 }
 0x512   : > { %v2330_v24 = vpop.f32.mrf.mxu1  ;;  %2367 = vmatmul.mubr.bf16.vlgmr.msra.gmra.mxu0 %v2332_v47 }
 0x513   : > { %3175 = vmatpush1.bf16.msra.mxu0 %v6049_v44 }
 0x514   : > { %3176 = vmatprep.subr.bf16.mxu0 %v6057_v54 }
 0x517   : > { %3177 = vmatpush1.bf16.msra.mxu0 %v6055_v61  ;;  %v6048_v61 = vld [vmem:[%s10882_s6 + $0x174] ss:$8 sps:$4 sm:$0xff]  }
 0x518   : > { %3178 = vmatprep.subr.bf16.mxu0 %v6063_v55 }
 0x51b   : > { %3179 = vmatpush1.bf16.msra.mxu0 %v6061_v6  ;;  %v6046_v6 = vld [vmem:[%s10882_s6 + $0x170] ss:$8 sps:$4 sm:$0xff]  }
 0x51c   : > { %3180 = vmatprep.subr.bf16.mxu0 %v6069_v9  ;;  %v6054_v9 = vld [vmem:[%s10882_s6 + $0x164] ss:$8 sps:$4 sm:$0xff]  }
 0x51f   : > { %3181 = vmatpush1.bf16.msra.mxu0 %v6067_v0  ;;  %v11408_v0 = vld [vmem:[#allocation50_spill] sm:$0xff] }
 0x520   : > { %3182 = vmatprep.subr.bf16.mxu0 %v6075_v16  ;;  %v6052_v16 = vld [vmem:[%s10882_s6 + $0x160] ss:$8 sps:$4 sm:$0xff]  }
 0x523   : > { %3183 = vmatpush1.bf16.msra.mxu0 %v6073_v42  ;;  %v6060_v42 = vld [vmem:[%s10882_s6 + $0x154] ss:$8 sps:$4 sm:$0xff]  }
 0x524   : > { %3184 = vmatprep.subr.bf16.mxu0 %v6081_v22  ;;  %v6058_v22 = vld [vmem:[%s10882_s6 + $0x150] ss:$8 sps:$4 sm:$0xff]  }
 0x527   : > { %3185 = vmatpush1.bf16.msra.mxu0 %v6079_v10  ;;  %v6066_v10 = vld [vmem:[%s10882_s6 + $0x144] ss:$8 sps:$4 sm:$0xff]  }
 0x528   : > { %3186 = vmatprep.subr.bf16.mxu0 %v6087_v51  ;;  %v11409_v51 = vld [vmem:[#allocation53_spill] sm:$0xff] }
 0x52b   : > { %3187 = vmatpush1.bf16.msra.mxu0 %v6085_v25  ;;  %v6064_v25 = vld [vmem:[%s10882_s6 + $0x140] ss:$8 sps:$4 sm:$0xff]  }
 0x52c   : > { %3188 = vmatprep.subr.bf16.mxu0 %v6093_v48  ;;  %v6072_v48 = vld [vmem:[%s10882_s6 + $0x134] ss:$8 sps:$4 sm:$0xff]  }
 0x52f   : > { %3189 = vmatpush1.bf16.msra.mxu0 %v6091_v19  ;;  %v6070_v19 = vld [vmem:[%s10882_s6 + $0x130] ss:$8 sps:$4 sm:$0xff]  }
 0x530   : > { %3190 = vmatprep.subr.bf16.mxu0 %v6099_v60  ;;  %v6078_v60 = vld [vmem:[%s10882_s6 + $0x124] ss:$8 sps:$4 sm:$0xff]  }
 0x533   : > { %3191 = vmatpush2.bf16.msra.mxu0 %v6097_v13  ;;  %v11410_v13 = vld [vmem:[#allocation56_spill] sm:$0xff] }
 0x534   : > { %3192 = vmatprep.subr.bf16.mxu0 %v6105_v21  ;;  %v6076_v21 = vld [vmem:[%s10882_s6 + $0x120] ss:$8 sps:$4 sm:$0xff]  }
 0x537   : > { %3193 = vmatpush2.bf16.msra.mxu0 %v6103_v59  ;;  %v6084_v59 = vld [vmem:[%s10882_s6 + $0x114] ss:$8 sps:$4 sm:$0xff]  }
 0x538   : > { %3194 = vmatprep.subr.bf16.mxu0 %v6111_v46  ;;  %v6082_v46 = vld [vmem:[%s10882_s6 + $0x110] ss:$8 sps:$4 sm:$0xff]  }
 0x53b   : > { %3195 = vmatpush2.bf16.msra.mxu0 %v6109_v14  ;;  %v6090_v14 = vld [vmem:[%s10882_s6 + $0x104] ss:$8 sps:$4 sm:$0xff]  }
 0x53c   : > { %3196 = vmatprep.subr.bf16.mxu0 %v6117_v20  ;;  %v11411_v20 = vld [vmem:[#allocation60_spill] sm:$0xff] }
 0x53f   : > { %3197 = vmatpush2.bf16.msra.mxu0 %v6115_v53  ;;  %v6088_v53 = vld [vmem:[%s10882_s6 + $0x100] ss:$8 sps:$4 sm:$0xff]  }
 0x5d2   : > { %v2368_v31 = vpop.f32.mrf.mxu0 }
 0x5d3   : > { %v2369_v40 = vadd.f32 1e-05, %v2368_v31  ;;  %v6096_v31 = vld [vmem:[%s10882_s6 + $0x1f4] ss:$8 sps:$4 sm:$0xff]  }
 0x5d4   : > { %v2370_v2 = vpop.f32.mrf.mxu0 }
 0x5d5   : > { %6214 = vrsqrt.f32 %v2369_v40  ;;  %v2371_v50 = vadd.f32 1e-05, %v2370_v2  ;;  %v6094_v40 = vld [vmem:[%s10882_s6 + $0x1f0] ss:$8 sps:$4 sm:$0xff]   ;;  %v6102_v2 = vld [vmem:[%s10882_s6 + $0x1e4] ss:$8 sps:$4 sm:$0xff]  }
 0x5d6   : > { %v2372_v47 = vpop.f32.mrf.mxu0 }
 0x5d7   : > { %6216 = vrsqrt.f32 %v2371_v50  ;;  %v11412_v50 = vld [vmem:[#allocation63_spill] sm:$0xff] }
 0x5d8   : > { %v2373_v43 = vpop.f32.mrf.mxu0  ;;  %v6100_v47 = vld [vmem:[%s10882_s6 + $0x1e0] ss:$8 sps:$4 sm:$0xff]  }
 0x5d9   : > { %v6108_v43 = vld [vmem:[%s10882_s6 + $0x1d4] ss:$8 sps:$4 sm:$0xff]  }
 0x5e2   : > { %v6215_v24 = vpop.eup %6214 }
 0x5e3   : > { %v2377_v44 = vpack.c.bf16 %v6215_v24, %v6215_v24  ;;  %v6106_v24 = vld [vmem:[%s10882_s6 + $0x1d0] ss:$8 sps:$4 sm:$0xff]  }
 0x5e4   : > { %v6217_v33 = vpop.eup %6216 }
 0x5e5   : > { %v2378_v54 = vpack.c.bf16 %v6217_v33, %v6217_v33  ;;  %v2380_v55 = vsel %vm2091_vm2, %v2377_v44, 0  ;;  %v6114_v44 = vld [vmem:[%s10882_s6 + $0x1c4] ss:$8 sps:$4 sm:$0xff]   ;;  %v11413_v33 = vld [vmem:[#allocation36_spill] sm:$0xff] }
 0x5e7   : > { %5675 = vmatprep.subr.msk.bf16.mxu1 %vm2091_vm2, %v2378_v54  ;;  %v6112_v54 = vld [vmem:[%s10882_s6 + $0x1c0] ss:$8 sps:$4 sm:$0xff]  }
 0x5e8   : > { %2400 = vmatpush1.bf16.msra.mxu1 %v2380_v55  ;;  %v11415_v55 = vld [vmem:[#allocation42_spill] sm:$0xff] }
 0x5e9   : > { %2869 = vmatprep.subr.bf16.mxu1 %v6048_v61  ;;  %v11414_v61 = vld [vmem:[#allocation40_spill] sm:$0xff] }
 0x5eb   : > { %5676 = vmatmul.mubr.msk.bf16.vlgmr.msra.gmra.mxu1 %vm2066_vm3, %v11408_v0  ;;  %v6118_v0 = vld [vmem:[%s10882_s6 + $0x1b0] ss:$8 sps:$4 sm:$0xff]  }
 0x5ec   : > { %2427 = vmatprep.mubr.bf16.mxu1 %v11407_v39  ;;  %2870 = vmatpush1.bf16.msra.mxu1 %v6046_v6  ;;  %v6120_v6 = vld [vmem:[%s10882_s6 + $0x1b4] ss:$8 sps:$4 sm:$0xff]  }
 0x5ed   : > { %2871 = vmatprep.subr.bf16.mxu1 %v6054_v9  ;;  %v6123_v9 = vld [vmem:[%s10882_s6 + $0xb4] ss:$8 sps:$4 sm:$0xff]  }
 0x5ee   : > { %3198 = vmatprep.subr.bf16.mxu0 %v6123_v9 }
 0x5f0   : > { %2872 = vmatpush1.bf16.msra.mxu1 %v6052_v16  ;;  %v6121_v16 = vld [vmem:[%s10882_s6 + $0xb0] ss:$8 sps:$4 sm:$0xff]  }
 0x5f1   : > { %2873 = vmatprep.subr.bf16.mxu1 %v6060_v42  ;;  %3199 = vmatpush2.bf16.msra.mxu0 %v6121_v16  ;;  %v6126_v42 = vld [vmem:[%s10882_s6 + $0x1a4] ss:$8 sps:$4 sm:$0xff]  }
 0x5f3   : > { %5677 = vmatmul.mubr.msk.bf16.gmra.mxu1 %vm2066_vm3, %v11409_v51  ;;  %v6127_v51 = vld [vmem:[%s10882_s6 + $0xa0] ss:$8 sps:$4 sm:$0xff]  }
 0x5f4   : > { %2437 = vmatprep.mubr.bf16.mxu1 %v11407_v39  ;;  %2874 = vmatpush1.bf16.msra.mxu1 %v6058_v22  ;;  %v6129_v22 = vld [vmem:[%s10882_s6 + $0xa4] ss:$8 sps:$4 sm:$0xff]  }
 0x5f5   : > { %2875 = vmatprep.subr.bf16.mxu1 %v6066_v10  ;;  %v6124_v10 = vld [vmem:[%s10882_s6 + $0x1a0] ss:$8 sps:$4 sm:$0xff]   ;;  %3200 = vmatprep.subr.bf16.mxu0 %v6129_v22 }
 0x5f6   : > { %3201 = vmatpush2.bf16.msra.mxu0 %v6127_v51 }
 0x5f8   : > { %2876 = vmatpush1.bf16.msra.mxu1 %v6064_v25  ;;  %v6132_v25 = vld [vmem:[%s10882_s6 + $0x194] ss:$8 sps:$4 sm:$0xff]  }
 0x5f9   : > { %2877 = vmatprep.subr.bf16.mxu1 %v6072_v48  ;;  %v6135_v48 = vld [vmem:[%s10882_s6 + $0x94] ss:$8 sps:$4 sm:$0xff]  }
 0x5fa   : > { %3202 = vmatprep.subr.bf16.mxu0 %v6135_v48 }
 0x5fb   : > { %5678 = vmatmul.mubr.msk.bf16.gmra.mxu1 %vm2066_vm3, %v11410_v13  ;;  %v6138_v13 = vld [vmem:[%s10882_s6 + $0x184] ss:$8 sps:$4 sm:$0xff]  }
 0x5fc   : > { %2447 = vmatprep.mubr.bf16.mxu1 %v11407_v39  ;;  %2878 = vmatpush1.bf16.msra.mxu1 %v6070_v19  ;;  %v6130_v19 = vld [vmem:[%s10882_s6 + $0x190] ss:$8 sps:$4 sm:$0xff]  }
 0x5fd   : > { %2879 = vmatprep.subr.bf16.mxu1 %v6078_v60  ;;  %v6133_v60 = vld [vmem:[%s10882_s6 + $0x90] ss:$8 sps:$4 sm:$0xff]  }
 0x5fe   : > { %3203 = vmatpush2.bf16.msra.mxu0 %v6133_v60 }
 0x600   : > { %2880 = vmatpush1.bf16.msra.mxu1 %v6076_v21  ;;  %v6141_v21 = vld [vmem:[%s10882_s6 + $0x84] ss:$8 sps:$4 sm:$0xff]  }
 0x601   : > { %2881 = vmatprep.subr.bf16.mxu1 %v6084_v59  ;;  %v6136_v59 = vld [vmem:[%s10882_s6 + $0x180] ss:$8 sps:$4 sm:$0xff]   ;;  %3204 = vmatprep.subr.bf16.mxu0 %v6141_v21 }
 0x603   : > { %5679 = vmatmul.mubr.msk.bf16.gmra.mxu1 %vm2066_vm3, %v11411_v20  ;;  %v1762_v20 = vld [vmem:[%s10880_s4] sm:$0x3] }
 0x604   : > { %2457 = vmatprep.mubr.bf16.mxu1 %v11407_v39  ;;  %2882 = vmatpush1.bf16.msra.mxu1 %v6082_v46  ;;  %v6139_v46 = vld [vmem:[%s10882_s6 + $0x80] ss:$8 sps:$4 sm:$0xff]  }
 0x605   : > { %2883 = vmatprep.subr.bf16.mxu1 %v6090_v14  ;;  %3205 = vmatpush2.bf16.msra.mxu0 %v6139_v46  ;;  %v6144_v14 = vld [vmem:[%s10882_s6 + $0x274] ss:$8 sps:$4 sm:$0xff]  }
 0x608   : > { %2884 = vmatpush1.bf16.msra.mxu1 %v6088_v53  ;;  %v11416_v53 = vld [vmem:[#allocation28_spill] sm:$0xff] }
 0x609   : > { %2885 = vmatprep.subr.bf16.mxu1 %v6096_v31  ;;  %v8220_v31 = vrot.slane %v1762_v20, %v11416_v53 }
 0x60b   : > { %5680 = vmatmul.mubr.msk.bf16.gmra.mxu1 %vm2066_vm3, %v11412_v50 }
 0x60c   : > { %2467 = vmatprep.mubr.bf16.mxu1 %v11407_v39  ;;  %2886 = vmatpush2.bf16.msra.mxu1 %v6094_v40  ;;  %v11417_v40 = vld [vmem:[#allocation31_spill] sm:$0xff] }
 0x60d   : > { %2887 = vmatprep.subr.bf16.mxu1 %v6102_v2  ;;  %v8223_v2 = vrot.slane %v1762_v20, %v11417_v40 }
 0x610   : > { %2888 = vmatpush2.bf16.msra.mxu1 %v6100_v47 }
 0x611   : > { %2889 = vmatprep.subr.bf16.mxu1 %v6108_v43 }
 0x613   : > { %5681 = vmatmul.mubr.msk.bf16.gmra.mxu1 %vm2066_vm3, %v11413_v33 }
 0x614   : > { %2477 = vmatprep.mubr.bf16.mxu1 %v11407_v39  ;;  %2890 = vmatpush2.bf16.msra.mxu1 %v6106_v24 }
 0x615   : > { %2891 = vmatprep.subr.bf16.mxu1 %v6114_v44  ;;  %v1763_v44 = vld [vmem:[%s10881_s5] sm:$0x3] }
 0x618   : > { %2892 = vmatpush2.bf16.msra.mxu1 %v6112_v54 }
 0x619   : > { %2893 = vmatprep.subr.bf16.mxu1 %v6120_v6 }
 0x61b   : > { %5682 = vmatmul.mubr.msk.bf16.gmra.mxu1 %vm2066_vm3, %v11414_v61 }
 0x61c   : > { %2487 = vmatprep.mubr.bf16.mxu1 %v11407_v39  ;;  %2894 = vmatpush2.bf16.msra.mxu1 %v6118_v0  ;;  %v8237_v0 = vrot.slane %v1763_v44, %v11416_v53 }
 0x61d   : > { %2895 = vmatprep.subr.bf16.mxu1 %v6126_v42 }
 0x620   : > { %2896 = vmatpush2.bf16.msra.mxu1 %v6124_v10 }
 0x621   : > { %2897 = vmatprep.subr.bf16.mxu1 %v6132_v25 }
 0x623   : > { %5683 = vmatmul.mubr.msk.bf16.gmra.mxu1 %vm2066_vm3, %v11415_v55  ;;  %v8233_v55 = vrot.slane %v1763_v44, %v11417_v40 }
 0x624   : > { %2898 = vmatpush2.bf16.msra.mxu1 %v6130_v19 }
 0x625   : > { %2899 = vmatprep.subr.bf16.mxu1 %v6138_v13 }
 0x628   : > { %2900 = vmatpush2.bf16.msra.mxu1 %v6136_v59 }
 0x629   : > { %3608 = vmatprep.subr.bf16.mxu1 %v6144_v14 }
 0x6ab   : > { %v2419_v50 = vpop.f32.mrf.mxu1 }
 0x6ac   : > { %v2509_v43 = vmul.f32 %v8220_v31, %v2419_v50 }
 0x6ad   : > { %v2421_v47 = vpop.f32.mrf.mxu1 }
 0x6ae   : > { %v2510_v24 = vmul.f32 %v8223_v2, %v2421_v47  ;;  %v2541_v9 = vmul.f32 %v2509_v43, %v7984_v37 }
 0x6af   : > { %v2423_v33 = vpop.f32.mrf.mxu1 }
 0x6b0   : > { %v2511_v54 = vmul.f32 %v8220_v31, %v2423_v33  ;;  %v2542_v61 = vmul.f32 %v2510_v24, %v7970_v41  ;;  %v2584_v48 = vadd.f32 %v8237_v0, %v2541_v9  ;;  %v6142_v33 = vld [vmem:[%s10882_s6 + $0x270] ss:$8 sps:$4 sm:$0xff]  }
 0x6b1   : > { %v2425_v6 = vpop.f32.mrf.mxu1 }
 0x6b2   : > { %v2543_v16 = vmul.f32 %v2511_v54, %v7976_v8  ;;  %v2512_v42 = vmul.f32 %v8223_v2, %v2425_v6  ;;  %v2585_v41 = vadd.f32 %v8233_v55, %v2542_v61  ;;  %v2616_v20 = vmax.f32 %v2584_v48, 0.0  ;;  %v6150_v48 = vld [vmem:[%s10882_s6 + $0x254] ss:$8 sps:$4 sm:$0xff]  }
 0x6b3   : > { %v2429_v22 = vpop.f32.mrf.mxu1 }
 0x6b4   : > { %v2586_v10 = vadd.f32 %v8237_v0, %v2543_v16  ;;  %v2544_v51 = vmul.f32 %v2512_v42, %v7958_v49  ;;  %v2513_v37 = vmul.f32 %v8220_v31, %v2429_v22  ;;  %v2617_v59 = vmax.f32 %v2585_v41, 0.0 }
 0x6b5   : > { %v2431_v25 = vpop.f32.mrf.mxu1 }
 0x6b6   : > { %v2587_v19 = vadd.f32 %v8233_v55, %v2544_v51  ;;  %v2514_v60 = vmul.f32 %v8223_v2, %v2431_v25  ;;  %v2618_v8 = vmax.f32 %v2586_v10, 0.0  ;;  %v2545_v50 = vmul.f32 %v2513_v37, %v7964_v5  ;;  %v6147_v5 = vld [vmem:[%s10882_s6 + $0x264] ss:$8 sps:$4 sm:$0xff]   ;;  %v6145_v10 = vld [vmem:[%s10882_s6 + $0x260] ss:$8 sps:$4 sm:$0xff]  }
 0x6b7   : > { %v2433_v13 = vpop.f32.mrf.mxu1 }
 0x6b8   : > { %v2515_v21 = vmul.f32 %v8220_v31, %v2433_v13  ;;  %v2546_v46 = vmul.f32 %v2514_v60, %v7946_v17  ;;  %v2619_v49 = vmax.f32 %v2587_v19, 0.0  ;;  %v8258_v54 = vpack.c.bf16 %v2618_v8, %v2616_v20 }
 0x6b9   : > { %v2435_v14 = vpop.f32.mrf.mxu1  ;;  %v2588_v16 = vadd.f32 %v8237_v0, %v2545_v50 }
 0x6ba   : > { %v2547_v47 = vmul.f32 %v2515_v21, %v7952_v34  ;;  %v2516_v43 = vmul.f32 %v8223_v2, %v2435_v14  ;;  %v8253_v44 = vpack.c.bf16 %v2619_v49, %v2617_v59  ;;  %v2589_v34 = vadd.f32 %v8233_v55, %v2546_v46  ;;  %v6148_v49 = vld [vmem:[%s10882_s6 + $0x250] ss:$8 sps:$4 sm:$0xff]  }
 0x6bb   : > { %v2439_v24 = vpop.f32.mrf.mxu1  ;;  %v2620_v8 = vmax.f32 %v2588_v16, 0.0 }
 0x6bc   : > { %v2590_v17 = vadd.f32 %v8237_v0, %v2547_v47  ;;  %v2548_v61 = vmul.f32 %v2516_v43, %v7934_v12  ;;  %v2517_v6 = vmul.f32 %v8220_v31, %v2439_v24  ;;  %2901 = vmatprep.mubr.bf16.mxu1 %v8253_v44  ;;  %3206 = vmatprep.mubr.bf16.mxu0 %v8253_v44  ;;  %v2621_v19 = vmax.f32 %v2589_v34, 0.0 }
 0x6bd   : > { %v2441_v9 = vpop.f32.mrf.mxu1  ;;  %2902 = vmatmul.mubr.bf16.vlgmr.msra.gmra.mxu1 %v8258_v54  ;;  %3207 = vmatmul.mubr.bf16.vlgmr.msra.gmra.mxu0 %v8258_v54 }
 0x6be   : > { %v2591_v42 = vadd.f32 %v8233_v55, %v2548_v61  ;;  %v2518_v22 = vmul.f32 %v8223_v2, %v2441_v9  ;;  %3609 = vmatpush1.bf16.msra.mxu1 %v6142_v33  ;;  %v2622_v51 = vmax.f32 %v2590_v17, 0.0  ;;  %v2549_v37 = vmul.f32 %v2517_v6, %v7940_v11  ;;  %v6151_v61 = vld [vmem:[%s10882_s6 + $0x240] ss:$8 sps:$4 sm:$0xff]   ;;  %v6156_v9 = vld [vmem:[%s10882_s6 + $0x234] ss:$8 sps:$4 sm:$0xff]  }
 0x6bf   : > { %v2443_v12 = vpop.f32.mrf.mxu1  ;;  %3610 = vmatprep.subr.bf16.mxu1 %v6147_v5 }
 0x6c0   : > { %v2519_v41 = vmul.f32 %v8220_v31, %v2443_v12  ;;  %v2623_v25 = vmax.f32 %v2591_v42, 0.0  ;;  %v2550_v60 = vmul.f32 %v2518_v22, %v7922_v32  ;;  %v8292_v50 = vpack.c.bf16 %v2622_v51, %v2620_v8  ;;  %v6153_v32 = vld [vmem:[%s10882_s6 + $0x244] ss:$8 sps:$4 sm:$0xff]  }
 0x6c1   : > { %v2445_v13 = vpop.f32.mrf.mxu1 }
 0x6c2   : > { %v2551_v21 = vmul.f32 %v2519_v41, %v7928_v26  ;;  %v2520_v59 = vmul.f32 %v8223_v2, %v2445_v13  ;;  %3611 = vmatpush1.bf16.msra.mxu1 %v6145_v10  ;;  %v8285_v14 = vpack.c.bf16 %v2623_v25, %v2621_v19  ;;  %v2592_v26 = vadd.f32 %v8237_v0, %v2549_v37  ;;  %v6154_v19 = vld [vmem:[%s10882_s6 + $0x230] ss:$8 sps:$4 sm:$0xff]  }
 0x6c3   : > { %v2449_v46 = vpop.f32.mrf.mxu1  ;;  %3612 = vmatprep.subr.bf16.mxu1 %v6150_v48  ;;  %v2593_v47 = vadd.f32 %v8233_v55, %v2550_v60 }
 0x6c4   : > { %v2594_v20 = vadd.f32 %v8237_v0, %v2551_v21  ;;  %v2552_v11 = vmul.f32 %v2520_v59, %v7910_v56  ;;  %2911 = vmatprep.mubr.bf16.mxu1 %v8285_v14  ;;  %3216 = vmatprep.mubr.bf16.mxu0 %v8285_v14  ;;  %v2521_v56 = vmul.f32 %v8220_v31, %v2449_v46  ;;  %v2624_v12 = vmax.f32 %v2592_v26, 0.0  ;;  %v6162_v26 = vld [vmem:[%s10882_s6 + $0x214] ss:$8 sps:$4 sm:$0xff]  }
 0x6c5   : > { %v2451_v43 = vpop.f32.mrf.mxu1  ;;  %2912 = vmatmul.mubr.bf16.gmra.mxu1 %v8292_v50  ;;  %3217 = vmatmul.mubr.bf16.gmra.mxu0 %v8292_v50  ;;  %v2625_v16 = vmax.f32 %v2593_v47, 0.0 }
 0x6c6   : > { %v2595_v24 = vadd.f32 %v8233_v55, %v2552_v11  ;;  %v2522_v33 = vmul.f32 %v8223_v2, %v2451_v43  ;;  %3613 = vmatpush1.bf16.msra.mxu1 %v6148_v49  ;;  %v2626_v5 = vmax.f32 %v2594_v20, 0.0  ;;  %v2553_v10 = vmul.f32 %v2521_v56, %v7916_v38  ;;  %v6157_v49 = vld [vmem:[%s10882_s6 + $0x220] ss:$8 sps:$4 sm:$0xff]  }
 0x6c7   : > { %v2453_v17 = vpop.f32.mrf.mxu1  ;;  %3614 = vmatprep.subr.bf16.mxu1 %v6153_v32 }
 0x6c8   : > { %v2523_v34 = vmul.f32 %v8220_v31, %v2453_v17  ;;  %v2627_v6 = vmax.f32 %v2595_v24, 0.0  ;;  %v2554_v42 = vmul.f32 %v2522_v33, %v7899_v63  ;;  %v8324_v60 = vpack.c.bf16 %v2626_v5, %v2624_v12 }
 0x6c9   : > { %v2455_v22 = vpop.f32.mrf.mxu1  ;;  %v2596_v21 = vadd.f32 %v8237_v0, %v2553_v10 }
 0x6ca   : > { %v2555_v51 = vmul.f32 %v2523_v34, %v7904_v57  ;;  %v2524_v41 = vmul.f32 %v8223_v2, %v2455_v22  ;;  %3615 = vmatpush1.bf16.msra.mxu1 %v6151_v61  ;;  %v8317_v48 = vpack.c.bf16 %v2627_v6, %v2625_v16  ;;  %v6159_v57 = vld [vmem:[%s10882_s6 + $0x224] ss:$8 sps:$4 sm:$0xff]   ;;  %v2597_v38 = vadd.f32 %v8233_v55, %v2554_v42  ;;  %v6160_v6 = vld [vmem:[%s10882_s6 + $0x210] ss:$8 sps:$4 sm:$0xff]  }
 0x6cb   : > { %v2459_v25 = vpop.f32.mrf.mxu1  ;;  %3616 = vmatprep.subr.bf16.mxu1 %v6156_v9  ;;  %v2628_v33 = vmax.f32 %v2596_v21, 0.0 }
 0x6cc   : > { %v2598_v37 = vadd.f32 %v8237_v0, %v2555_v51  ;;  %v2556_v63 = vmul.f32 %v2524_v41, %v7889_v62  ;;  %v2525_v13 = vmul.f32 %v8220_v31, %v2459_v25  ;;  %2921 = vmatprep.mubr.bf16.mxu1 %v8317_v48  ;;  %3226 = vmatprep.mubr.bf16.mxu0 %v8317_v48  ;;  %v2629_v47 = vmax.f32 %v2597_v38, 0.0  ;;  %v6163_v41 = vld [vmem:[%s10882_s6 + $0x200] ss:$8 sps:$4 sm:$0xff]  }
 0x6cd   : > { %v2461_v8 = vpop.f32.mrf.mxu1  ;;  %2922 = vmatmul.mubr.bf16.gmra.mxu1 %v8324_v60  ;;  %3227 = vmatmul.mubr.bf16.gmra.mxu0 %v8324_v60 }
 0x6ce   : > { %v2599_v62 = vadd.f32 %v8233_v55, %v2556_v63  ;;  %v2526_v59 = vmul.f32 %v8223_v2, %v2461_v8  ;;  %3617 = vmatpush1.bf16.msra.mxu1 %v6154_v19  ;;  %v2630_v20 = vmax.f32 %v2598_v37, 0.0  ;;  %v2557_v43 = vmul.f32 %v2525_v13, %v7894_v23  ;;  %v6168_v63 = vld [vmem:[%s10882_s6 + $0x2f4] ss:$8 sps:$4 sm:$0xff]  }
 0x6cf   : > { %v2463_v46 = vpop.f32.mrf.mxu1  ;;  %3618 = vmatprep.subr.bf16.mxu1 %v6159_v57 }
 0x6d0   : > { %v2527_v11 = vmul.f32 %v8220_v31, %v2463_v46  ;;  %v2631_v32 = vmax.f32 %v2599_v62, 0.0  ;;  %v2558_v24 = vmul.f32 %v2526_v59, %v7879_v35  ;;  %v8356_v16 = vpack.c.bf16 %v2630_v20, %v2628_v33  ;;  %v6165_v35 = vld [vmem:[%s10882_s6 + $0x204] ss:$8 sps:$4 sm:$0xff]   ;;  %v6166_v20 = vld [vmem:[%s10882_s6 + $0x2f0] ss:$8 sps:$4 sm:$0xff]  }
 0x6d1   : > { %v2465_v56 = vpop.f32.mrf.mxu1  ;;  %v6169_v33 = vld [vmem:[%s10882_s6 + $0x2e0] ss:$8 sps:$4 sm:$0xff]  }
 0x6d2   : > { %v2559_v17 = vmul.f32 %v2527_v11, %v7884_v1  ;;  %v2528_v61 = vmul.f32 %v8223_v2, %v2465_v56  ;;  %3619 = vmatpush1.bf16.msra.mxu1 %v6157_v49  ;;  %v8349_v34 = vpack.c.bf16 %v2631_v32, %v2629_v47  ;;  %v2600_v1 = vadd.f32 %v8237_v0, %v2557_v43 }
 0x6d3   : > { %v2469_v5 = vpop.f32.mrf.mxu1  ;;  %3620 = vmatprep.subr.bf16.mxu1 %v6162_v26  ;;  %v2601_v42 = vadd.f32 %v8233_v55, %v2558_v24 }
 0x6d4   : > { %v2602_v9 = vadd.f32 %v8237_v0, %v2559_v17  ;;  %v2560_v23 = vmul.f32 %v2528_v61, %v7869_v52  ;;  %2931 = vmatprep.mubr.bf16.mxu1 %v8349_v34  ;;  %3236 = vmatprep.mubr.bf16.mxu0 %v8349_v34  ;;  %v2529_v52 = vmul.f32 %v8220_v31, %v2469_v5  ;;  %v2632_v8 = vmax.f32 %v2600_v1, 0.0 }
 0x6d5   : > { %v2471_v22 = vpop.f32.mrf.mxu1  ;;  %2932 = vmatmul.mubr.bf16.gmra.mxu1 %v8356_v16  ;;  %3237 = vmatmul.mubr.bf16.gmra.mxu0 %v8356_v16  ;;  %v2633_v57 = vmax.f32 %v2601_v42, 0.0 }
 0x6d6   : > { %v2603_v12 = vadd.f32 %v8233_v55, %v2560_v23  ;;  %v2530_v10 = vmul.f32 %v8223_v2, %v2471_v22  ;;  %3621 = vmatpush1.bf16.msra.mxu1 %v6160_v6  ;;  %v2634_v25 = vmax.f32 %v2602_v9, 0.0  ;;  %v2561_v21 = vmul.f32 %v2529_v52, %v7874_v58  ;;  %v6174_v6 = vld [vmem:[%s10882_s6 + $0x2d4] ss:$8 sps:$4 sm:$0xff]  }
 0x6d7   : > { %v2473_v51 = vpop.f32.mrf.mxu1  ;;  %3622 = vmatprep.subr.bf16.mxu1 %v6165_v35 }
 0x6d8   : > { %v2531_v19 = vmul.f32 %v8220_v31, %v2473_v51  ;;  %v2635_v37 = vmax.f32 %v2603_v12, 0.0  ;;  %v2562_v38 = vmul.f32 %v2530_v10, %v7859_v28  ;;  %v8388_v32 = vpack.c.bf16 %v2634_v25, %v2632_v8  ;;  %v6172_v51 = vld [vmem:[%s10882_s6 + $0x2d0] ss:$8 sps:$4 sm:$0xff]  }
 0x6d9   : > { %v2475_v13 = vpop.f32.mrf.mxu1  ;;  %v2604_v43 = vadd.f32 %v8237_v0, %v2561_v21 }
 0x6da   : > { %v2563_v62 = vmul.f32 %v2531_v19, %v7864_v30  ;;  %v2532_v59 = vmul.f32 %v8223_v2, %v2475_v13  ;;  %3623 = vmatpush1.bf16.msra.mxu1 %v6163_v41  ;;  %v8381_v49 = vpack.c.bf16 %v2635_v37, %v2633_v57  ;;  %v6171_v30 = vld [vmem:[%s10882_s6 + $0x2e4] ss:$8 sps:$4 sm:$0xff]   ;;  %v2605_v58 = vadd.f32 %v8233_v55, %v2562_v38  ;;  %v6175_v13 = vld [vmem:[%s10882_s6 + $0x2c0] ss:$8 sps:$4 sm:$0xff]  }
 0x6db   : > { %v2479_v46 = vpop.f32.mrf.mxu1  ;;  %3624 = vmatprep.subr.bf16.mxu1 %v6168_v63  ;;  %v2636_v42 = vmax.f32 %v2604_v43, 0.0 }
 0x6dc   : > { %v2606_v11 = vadd.f32 %v8237_v0, %v2563_v62  ;;  %v2564_v28 = vmul.f32 %v2532_v59, %v7845_v45  ;;  %v2533_v26 = vmul.f32 %v8220_v31, %v2479_v46  ;;  %2941 = vmatprep.mubr.bf16.mxu1 %v8381_v49  ;;  %3246 = vmatprep.mubr.bf16.mxu0 %v8381_v49  ;;  %v2637_v9 = vmax.f32 %v2605_v58, 0.0  ;;  %v6180_v46 = vld [vmem:[%s10882_s6 + $0x2b4] ss:$8 sps:$4 sm:$0xff]  }
 0x6dd   : > { %v2481_v47 = vpop.f32.mrf.mxu1  ;;  %2942 = vmatmul.mubr.bf16.gmra.mxu1 %v8388_v32  ;;  %3247 = vmatmul.mubr.bf16.gmra.mxu0 %v8388_v32 }
 0x6de   : > { %v2607_v45 = vadd.f32 %v8233_v55, %v2564_v28  ;;  %v2534_v24 = vmul.f32 %v8223_v2, %v2481_v47  ;;  %3625 = vmatpush2.bf16.msra.mxu1 %v6166_v20  ;;  %v2638_v17 = vmax.f32 %v2606_v11, 0.0  ;;  %v2565_v23 = vmul.f32 %v2533_v26, %v7854_v36 }
 0x6df   : > { %v2483_v56 = vpop.f32.mrf.mxu1  ;;  %3626 = vmatprep.subr.bf16.mxu1 %v6171_v30 }
 0x6e0   : > { %v2535_v61 = vmul.f32 %v8220_v31, %v2483_v56  ;;  %v2639_v5 = vmax.f32 %v2607_v45, 0.0  ;;  %v2566_v35 = vmul.f32 %v2534_v24, %v7834_v27  ;;  %v8420_v25 = vpack.c.bf16 %v2638_v17, %v2636_v42  ;;  %v6177_v27 = vld [vmem:[%s10882_s6 + $0x2c4] ss:$8 sps:$4 sm:$0xff]   ;;  %v8526_v42 = vld [vmem:[%s10886_s10 + $0x50] ss:$8 sps:$4 sm:$0xff]  }
 0x6e1   : > { %v2485_v1 = vpop.f32.mrf.mxu1  ;;  %11423 = vst [vmem:[#allocation62_spill] sm:$0xff] %v8526_v42 }
 0x6e2   : > { %v2567_v22 = vmul.f32 %v2535_v61, %v7840_v29  ;;  %v2536_v12 = vmul.f32 %v8223_v2, %v2485_v1  ;;  %3627 = vmatpush2.bf16.msra.mxu1 %v6169_v33  ;;  %v8413_v10 = vpack.c.bf16 %v2639_v5, %v2637_v9  ;;  %v2608_v29 = vadd.f32 %v8237_v0, %v2565_v23  ;;  %v6186_v61 = vld [vmem:[%s10882_s6 + $0x294] ss:$8 sps:$4 sm:$0xff]   ;;  %v6189_v9 = vld [vmem:[%s10882_s6 + $0x284] ss:$8 sps:$4 sm:$0xff]   ;;  %v6187_v23 = vld [vmem:[%s10882_s6 + $0x280] ss:$8 sps:$4 sm:$0xff]  }
 0x6e3   : > { %v2489_v52 = vpop.f32.mrf.mxu1  ;;  %3628 = vmatprep.subr.bf16.mxu1 %v6174_v6  ;;  %v2609_v19 = vadd.f32 %v8233_v55, %v2566_v35  ;;  %v8492_v35 = vld [vmem:[%s10886_s10 + $0x74] ss:$8 sps:$4 sm:$0xff]   ;;  %v8506_v1 = vld [vmem:[%s10886_s10 + $0x64] ss:$8 sps:$4 sm:$0xff]  }
 0x6e4   : > { %v2610_v41 = vadd.f32 %v8237_v0, %v2567_v22  ;;  %v2568_v36 = vmul.f32 %v2536_v12, %v7822_v7  ;;  %2951 = vmatprep.mubr.bf16.mxu1 %v8413_v10  ;;  %3256 = vmatprep.mubr.bf16.mxu0 %v8413_v10  ;;  %v2537_v7 = vmul.f32 %v8220_v31, %v2489_v52  ;;  %v2640_v28 = vmax.f32 %v2608_v29, 0.0  ;;  %v8532_v22 = vld [vmem:[%s10886_s10 + $0x44] ss:$8 sps:$4 sm:$0xff]   ;;  %v8552_v12 = vld [vmem:[%s10886_s10 + $0x30] ss:$8 sps:$4 sm:$0xff]  }
 0x6e5   : > { %v2491_v37 = vpop.f32.mrf.mxu1  ;;  %2952 = vmatmul.mubr.bf16.gmra.mxu1 %v8420_v25  ;;  %3257 = vmatmul.mubr.bf16.gmra.mxu0 %v8420_v25  ;;  %v2641_v20 = vmax.f32 %v2609_v19, 0.0  ;;  %11418 = vst [vmem:[#allocation46_spill] sm:$0xff] %v8492_v35  ;;  %11420 = vst [vmem:[#allocation52_spill] sm:$0xff] %v8506_v1  ;;  %v8558_v52 = vld [vmem:[%s10886_s10 + $0x24] ss:$8 sps:$4 sm:$0xff]  }
 0x6e6   : > { %v2611_v63 = vadd.f32 %v8233_v55, %v2568_v36  ;;  %v2538_v57 = vmul.f32 %v8223_v2, %v2491_v37  ;;  %3629 = vmatpush2.bf16.msra.mxu1 %v6172_v51  ;;  %v2642_v8 = vmax.f32 %v2610_v41, 0.0  ;;  %v2569_v30 = vmul.f32 %v2537_v7, %v7831_v4  ;;  %v6183_v4 = vld [vmem:[%s10882_s6 + $0x2a4] ss:$8 sps:$4 sm:$0xff]   ;;  %11424 = vst [vmem:[#allocation65_spill] sm:$0xff] %v8532_v22  ;;  %v8578_v51 = vld [vmem:[%s10886_s10 + $0x10] ss:$8 sps:$4 sm:$0xff]  }
 0x6e7   : > { %v2493_v38 = vpop.f32.mrf.mxu1  ;;  %3630 = vmatprep.subr.bf16.mxu1 %v6177_v27  ;;  %11427 = vst [vmem:[#allocation72_spill] sm:$0xff] %v8552_v12  ;;  %11428 = vst [vmem:[#allocation109_spill] sm:$0xff] %v8558_v52  ;;  %v8584_v41 = vld [vmem:[%s10886_s10 + $0x4] ss:$8 sps:$4 sm:$0xff]   ;;  %v8604_v36 = vld [vmem:[%s10886_s10 + $0xf0] ss:$8 sps:$4 sm:$0xff]  }
 0x6e8   : > { %v2570_v21 = vmul.f32 %v2538_v57, %v7825_v18  ;;  %v2539_v62 = vmul.f32 %v8220_v31, %v2493_v38  ;;  %v2643_v59 = vmax.f32 %v2611_v63, 0.0  ;;  %v6178_v18 = vld [vmem:[%s10882_s6 + $0x2b0] ss:$8 sps:$4 sm:$0xff]   ;;  %v8453_v24 = vpack.c.bf16 %v2642_v8, %v2640_v28  ;;  %11431 = vst [vmem:[#allocation110_spill] sm:$0xff] %v8578_v51  ;;  %11432 = vst [vmem:[#allocation105_spill] sm:$0xff] %v8584_v41 }
 0x6e9   : > { %v2495_v11 = vpop.f32.mrf.mxu1  ;;  %11435 = vst [vmem:[#allocation108_spill] sm:$0xff] %v8604_v36  ;;  %v8610_v27 = vld [vmem:[%s10886_s10 + $0xe4] ss:$8 sps:$4 sm:$0xff]   ;;  %v8630_v29 = vld [vmem:[%s10886_s10 + $0xd0] ss:$8 sps:$4 sm:$0xff]  }
 0x6ea   : > { %v2571_v58 = vmul.f32 %v2539_v62, %v7828_v3  ;;  %v2540_v26 = vmul.f32 %v8223_v2, %v2495_v11  ;;  %3631 = vmatpush2.bf16.msra.mxu1 %v6175_v13  ;;  %v8445_v47 = vpack.c.bf16 %v2643_v59, %v2641_v20  ;;  %v2613_v31 = vadd.f32 %v8233_v55, %v2570_v21  ;;  %v8636_v19 = vld [vmem:[%s10886_s10 + $0xc4] ss:$8 sps:$4 sm:$0xff]   ;;  %v8648_v37 = vld [vmem:[%s10886_s10 + $0xb4] ss:$8 sps:$4 sm:$0xff]   ;;  %v8656_v63 = vld [vmem:[%s10886_s10 + $0xb0] ss:$8 sps:$4 sm:$0xff]  }
 0x6eb   : > { %3632 = vmatprep.subr.bf16.mxu1 %v6180_v46  ;;  %v2612_v3 = vadd.f32 %v8237_v0, %v2569_v30  ;;  %11436 = vst [vmem:[#allocation104_spill] sm:$0xff] %v8610_v27  ;;  %11439 = vst [vmem:[#allocation79_spill] sm:$0xff] %v8630_v29  ;;  %v8662_v7 = vld [vmem:[%s10886_s10 + $0xa4] ss:$8 sps:$4 sm:$0xff]   ;;  %v8668_v57 = vld [vmem:[%s10886_s10 + $0xa0] ss:$8 sps:$4 sm:$0xff]  }
 0x6ec   : > { %v2614_v43 = vadd.f32 %v8237_v0, %v2571_v58  ;;  %v2572_v45 = vmul.f32 %v2540_v26, %v7837_v15  ;;  %2961 = vmatprep.mubr.bf16.mxu1 %v8445_v47  ;;  %3266 = vmatprep.mubr.bf16.mxu0 %v8445_v47  ;;  %v6181_v15 = vld [vmem:[%s10882_s6 + $0x2a0] ss:$8 sps:$4 sm:$0xff]   ;;  %v2645_v56 = vmax.f32 %v2613_v31, 0.0  ;;  %11440 = vst [vmem:[#allocation34_spill] sm:$0xff] %v8636_v19  ;;  %11442 = vst [vmem:[#allocation93_spill] sm:$0xff] %v8648_v37 }
 0x6ed   : > { %2962 = vmatmul.mubr.bf16.gmra.mxu1 %v8453_v24  ;;  %3267 = vmatmul.mubr.bf16.gmra.mxu0 %v8453_v24  ;;  %v2644_v0 = vmax.f32 %v2612_v3, 0.0  ;;  %11443 = vst [vmem:[#allocation76_spill] sm:$0xff] %v8656_v63  ;;  %11444 = vst [vmem:[#allocation95_spill] sm:$0xff] %v8662_v7  ;;  %v8674_v38 = vld [vmem:[%s10886_s10 + $0x94] ss:$8 sps:$4 sm:$0xff]  }
 0x6ee   : > { %v2615_v2 = vadd.f32 %v8233_v55, %v2572_v45  ;;  %3633 = vmatpush2.bf16.msra.mxu1 %v6178_v18  ;;  %v2646_v33 = vmax.f32 %v2614_v43, 0.0  ;;  %v6184_v55 = vld [vmem:[%s10882_s6 + $0x290] ss:$8 sps:$4 sm:$0xff]   ;;  %11445 = vst [vmem:[#allocation89_spill] sm:$0xff] %v8668_v57  ;;  %11446 = vst [vmem:[#allocation37_spill] sm:$0xff] %v8674_v38 }
 0x6ef   : > { %3634 = vmatprep.subr.bf16.mxu1 %v6183_v4  ;;  %v8681_v13 = vld [vmem:[%s10886_s10 + $0x90] ss:$8 sps:$4 sm:$0xff]   ;;  %v8687_v8 = vld [vmem:[%s10886_s10 + $0x84] ss:$8 sps:$4 sm:$0xff]   ;;  %v8693_v21 = vld [vmem:[%s10886_s10 + $0x80] ss:$8 sps:$4 sm:$0xff]  }
 0x6f0   : > { %v2647_v17 = vmax.f32 %v2615_v2, 0.0  ;;  %v8477_v6 = vpack.c.bf16 %v2646_v33, %v2644_v0  ;;  %11447 = vst [vmem:[#allocation38_spill] sm:$0xff] %v8681_v13  ;;  %11448 = vst [vmem:[#allocation39_spill] sm:$0xff] %v8687_v8  ;;  %v2664_v11 = vld [vmem:[%s10883_s7] sm:$0x3] }
 0x6f1   : > { %11449 = vst [vmem:[#allocation41_spill] sm:$0xff] %v8693_v21  ;;  %v11451_v2 = vld [vmem:[#allocation30_spill] sm:$0xff] }
 0x6f2   : > { %v8470_v5 = vpack.c.bf16 %v2647_v17, %v2645_v56  ;;  %3635 = vmatpush2.bf16.msra.mxu1 %v6181_v15 }
 0x6f3   : > { %3636 = vmatprep.subr.bf16.mxu1 %v6186_v61 }
 0x6f4   : > { %2971 = vmatprep.mubr.bf16.mxu1 %v8470_v5  ;;  %3276 = vmatprep.mubr.bf16.mxu0 %v8470_v5 }
 0x6f5   : > { %2972 = vmatmul.mubr.bf16.gmra.mxu1 %v8477_v6  ;;  %3277 = vmatmul.mubr.bf16.gmra.mxu0 %v8477_v6 }
 0x6f6   : > { %3637 = vmatpush2.bf16.msra.mxu1 %v6184_v55  ;;  %3640 = vmatprep.mubr.bf16.mxu1 %v8253_v44  ;;  %v8500_v44 = vld [vmem:[%s10886_s10 + $0x70] ss:$8 sps:$4 sm:$0xff]  }
 0x6f7   : > { %3638 = vmatprep.subr.bf16.mxu1 %v6189_v9  ;;  %3899 = vmatprep.mubr.bf16.mxu0 %v11407_v39  ;;  %11419 = vst [vmem:[#allocation49_spill] sm:$0xff] %v8500_v44 }
 0x6fa   : > { %3639 = vmatpush2.bf16.msra.mxu1 %v6187_v23  ;;  %v8731_v23 = vrot.slane %v2664_v11, %v11417_v40 }
 0x6fb   : > { %3910 = vmatprep.subr.bf16.mxu1 %v8492_v35 }
 0x6fd   : > { %3641 = vmatmul.mubr.bf16.vlgmr.msra.gmra.mxu1 %v8258_v54  ;;  %v8512_v54 = vld [vmem:[%s10886_s10 + $0x60] ss:$8 sps:$4 sm:$0xff]  }
 0x6fe   : > { %3650 = vmatprep.mubr.bf16.mxu1 %v8285_v14  ;;  %3911 = vmatpush1.bf16.msra.mxu1 %v8500_v44  ;;  %11421 = vst [vmem:[#allocation55_spill] sm:$0xff] %v8512_v54  ;;  %v8518_v14 = vld [vmem:[%s10886_s10 + $0x54] ss:$8 sps:$4 sm:$0xff]  }
 0x6ff   : > { %3912 = vmatprep.subr.bf16.mxu1 %v8506_v1  ;;  %11422 = vst [vmem:[#allocation59_spill] sm:$0xff] %v8518_v14 }
 0x702   : > { %3913 = vmatpush1.bf16.msra.mxu1 %v8512_v54 }
 0x703   : > { %3914 = vmatprep.subr.bf16.mxu1 %v8518_v14 }
 0x705   : > { %3651 = vmatmul.mubr.bf16.gmra.mxu1 %v8292_v50  ;;  %v8538_v50 = vld [vmem:[%s10886_s10 + $0x40] ss:$8 sps:$4 sm:$0xff]  }
 0x706   : > { %3660 = vmatprep.mubr.bf16.mxu1 %v8317_v48  ;;  %3915 = vmatpush1.bf16.msra.mxu1 %v8526_v42  ;;  %11425 = vst [vmem:[#allocation69_spill] sm:$0xff] %v8538_v50  ;;  %v8544_v48 = vld [vmem:[%s10886_s10 + $0x34] ss:$8 sps:$4 sm:$0xff]  }
 0x707   : > { %3916 = vmatprep.subr.bf16.mxu1 %v8532_v22  ;;  %11426 = vst [vmem:[#allocation74_spill] sm:$0xff] %v8544_v48 }
 0x70a   : > { %3917 = vmatpush1.bf16.msra.mxu1 %v8538_v50 }
 0x70b   : > { %3918 = vmatprep.subr.bf16.mxu1 %v8544_v48 }
 0x70d   : > { %3661 = vmatmul.mubr.bf16.gmra.mxu1 %v8324_v60  ;;  %v8564_v60 = vld [vmem:[%s10886_s10 + $0x20] ss:$8 sps:$4 sm:$0xff]  }
 0x70e   : > { %3670 = vmatprep.mubr.bf16.mxu1 %v8349_v34  ;;  %3919 = vmatpush1.bf16.msra.mxu1 %v8552_v12  ;;  %11429 = vst [vmem:[#allocation87_spill] sm:$0xff] %v8564_v60  ;;  %v8570_v34 = vld [vmem:[%s10886_s10 + $0x14] ss:$8 sps:$4 sm:$0xff]  }
 0x70f   : > { %3920 = vmatprep.subr.bf16.mxu1 %v8558_v52  ;;  %11430 = vst [vmem:[#allocation33_spill] sm:$0xff] %v8570_v34 }
 0x712   : > { %3921 = vmatpush1.bf16.msra.mxu1 %v8564_v60 }
 0x713   : > { %3922 = vmatprep.subr.bf16.mxu1 %v8570_v34 }
 0x715   : > { %3671 = vmatmul.mubr.bf16.gmra.mxu1 %v8356_v16  ;;  %v8590_v16 = vld [vmem:[%s10886_s10] ss:$8 sps:$4 sm:$0xff]  }
 0x716   : > { %3680 = vmatprep.mubr.bf16.mxu1 %v8381_v49  ;;  %3923 = vmatpush1.bf16.msra.mxu1 %v8578_v51  ;;  %11433 = vst [vmem:[#allocation107_spill] sm:$0xff] %v8590_v16  ;;  %v8596_v49 = vld [vmem:[%s10886_s10 + $0xf4] ss:$8 sps:$4 sm:$0xff]  }
 0x717   : > { %3924 = vmatprep.subr.bf16.mxu1 %v8584_v41  ;;  %11434 = vst [vmem:[#allocation106_spill] sm:$0xff] %v8596_v49 }
 0x71a   : > { %3925 = vmatpush1.bf16.msra.mxu1 %v8590_v16 }
 0x71b   : > { %3926 = vmatprep.subr.bf16.mxu1 %v8596_v49 }
 0x71d   : > { %3681 = vmatmul.mubr.bf16.gmra.mxu1 %v8388_v32  ;;  %v8616_v32 = vld [vmem:[%s10886_s10 + $0xe0] ss:$8 sps:$4 sm:$0xff]  }
 0x71e   : > { %3690 = vmatprep.mubr.bf16.mxu1 %v8413_v10  ;;  %3927 = vmatpush2.bf16.msra.mxu1 %v8604_v36  ;;  %11437 = vst [vmem:[#allocation102_spill] sm:$0xff] %v8616_v32  ;;  %v8622_v10 = vld [vmem:[%s10886_s10 + $0xd4] ss:$8 sps:$4 sm:$0xff]  }
 0x71f   : > { %3928 = vmatprep.subr.bf16.mxu1 %v8610_v27  ;;  %11438 = vst [vmem:[#allocation103_spill] sm:$0xff] %v8622_v10 }
 0x722   : > { %3929 = vmatpush2.bf16.msra.mxu1 %v8616_v32 }
 0x723   : > { %3930 = vmatprep.subr.bf16.mxu1 %v8622_v10 }
 0x725   : > { %3691 = vmatmul.mubr.bf16.gmra.mxu1 %v8420_v25  ;;  %v8642_v25 = vld [vmem:[%s10886_s10 + $0xc0] ss:$8 sps:$4 sm:$0xff]  }
 0x726   : > { %3700 = vmatprep.mubr.bf16.mxu1 %v8445_v47  ;;  %3931 = vmatpush2.bf16.msra.mxu1 %v8630_v29  ;;  %11441 = vst [vmem:[#allocation98_spill] sm:$0xff] %v8642_v25  ;;  %v8709_v47 = vrot.slane %v2664_v11, %v11416_v53  ;;  %v11454_v53 = vld [vmem:[#allocation24_spill] sm:$0xff] }
 0x727   : > { %3932 = vmatprep.subr.bf16.mxu1 %v8636_v19 }
 0x72a   : > { %3933 = vmatpush2.bf16.msra.mxu1 %v8642_v25 }
 0x72b   : > { %3934 = vmatprep.subr.bf16.mxu1 %v8648_v37 }
 0x72d   : > { %3701 = vmatmul.mubr.bf16.gmra.mxu1 %v8453_v24 }
 0x72e   : > { %3710 = vmatprep.mubr.bf16.mxu1 %v8470_v5  ;;  %3935 = vmatpush2.bf16.msra.mxu1 %v8656_v63 }
 0x72f   : > { %3936 = vmatprep.subr.bf16.mxu1 %v8662_v7 }
 0x732   : > { %3937 = vmatpush2.bf16.msra.mxu1 %v8668_v57 }
 0x733   : > { %3938 = vmatprep.subr.bf16.mxu1 %v8674_v38 }
 0x735   : > { %3711 = vmatmul.mubr.bf16.gmra.mxu1 %v8477_v6 }
 0x736   : > { %3939 = vmatpush2.bf16.msra.mxu1 %v8681_v13 }
 0x737   : > { %3940 = vmatprep.subr.bf16.mxu1 %v8687_v8 }
 0x73a   : > { %3941 = vmatpush2.bf16.msra.mxu1 %v8693_v21 }
 0x77d   : > { %v8696_v62 = vpop.f32.mrf.mxu1  ;;  %v8698_v59 = vpop.f32.mrf.mxu0 }
 0x77e   : > { %v11032_v58 = vrot.slane %v8698_v59, 7 }
 0x77f   : > { %v8700_v46 = vpop.f32.mrf.mxu1  ;;  %v8702_v20 = vpop.f32.mrf.mxu0 }
 0x780   : > { %v11033_v43 = vrot.slane %v8702_v20, 7 }
 0x781   : > { %v2907_v28 = vpop.f32.mrf.mxu1  ;;  %v3212_v30 = vpop.f32.mrf.mxu0 }
 0x782   : > { %v3289_v26 = vrot.slane %v3212_v30, 7  ;;  %v2908_v3 = vadd.f32 %v2907_v28, %v8709_v47  ;;  %v11452_v30 = vld [vmem:[#allocation32_spill] sm:$0xff] }
 0x783   : > { %v8711_v18 = vpop.f32.mrf.mxu1  ;;  %v3214_v31 = vpop.f32.mrf.mxu0 }
 0x784   : > { %v3347_v24 = vsel %vm1166_vm0, %v11032_v58, %v3289_v26  ;;  %v3290_v4 = vrot.slane %v3214_v31, 7 }
 0x785   : > { %v3353_v15 = vmul.f32 %v3347_v24, %v11451_v2  ;;  %v2913_v56 = vpop.f32.mrf.mxu1  ;;  %v3218_v33 = vpop.f32.mrf.mxu0 }
 0x786   : > { %v8724_v17 = vsel %vm1166_vm0, %v11033_v43, %v3290_v4  ;;  %v3291_v61 = vrot.slane %v3218_v33, 7  ;;  %v2914_v28 = vadd.f32 %v2913_v56, %v8709_v47 }
 0x787   : > { %v8726_v0 = vadd.f32 %v3353_v15, %v2908_v3  ;;  %v2915_v5 = vpop.f32.mrf.mxu1  ;;  %v3220_v55 = vpop.f32.mrf.mxu0 }
 0x788   : > { %v3345_v6 = vsel %vm1166_vm0, %v3289_v26, %v3291_v61  ;;  %v3292_v9 = vrot.slane %v3220_v55, 7  ;;  %v2916_v43 = vadd.f32 %v2915_v5, %v8731_v23 }
 0x789   : > { %v3355_v31 = vmul.f32 %v3345_v6, %v11452_v30  ;;  %v2917_v24 = vpop.f32.mrf.mxu1  ;;  %v3222_v58 = vpop.f32.mrf.mxu0 }
 0x78a   : > { %v3346_v33 = vsel %vm1166_vm0, %v3290_v4, %v3292_v9  ;;  %v3293_v3 = vrot.slane %v3222_v58, 7  ;;  %v2918_v6 = vadd.f32 %v2917_v24, %v8709_v47 }
 0x78b   : > { %v8737_v15 = vadd.f32 %v3355_v31, %v2914_v28  ;;  %v3356_v26 = vmul.f32 %v3346_v33, %v11452_v30  ;;  %v8741_v55 = vpop.f32.mrf.mxu1  ;;  %v3224_v11 = vpop.f32.mrf.mxu0 }
 0x78c   : > { %11453 = vst [vmem:[#allocation43_spill] sm:$0xff] %v8741_v55  ;;  %v3343_v56 = vsel %vm1166_vm0, %v3291_v61, %v3293_v3  ;;  %v3294_v40 = vrot.slane %v3224_v11, 7  ;;  %v11469_v55 = vrot.slane %v8698_v59, 7 }
 0x78d   : > { %v3357_v21 = vmul.f32 %v3343_v56, %v11454_v53  ;;  %v2923_v8 = vpop.f32.mrf.mxu1  ;;  %v3228_v4 = vpop.f32.mrf.mxu0  ;;  %v8747_v58 = vadd.f32 %v3356_v26, %v2916_v43  ;;  %v11456_v56 = vld [vmem:[#allocation25_spill] sm:$0xff] }
 0x78e   : > { %v8751_v5 = vsel %vm1166_vm0, %v3292_v9, %v3294_v40  ;;  %v3295_v28 = vrot.slane %v3228_v4, 7  ;;  %v2924_v11 = vadd.f32 %v2923_v8, %v8709_v47 }
 0x78f   : > { %11455 = vst [vmem:[#allocation45_spill] sm:$0xff] %v8751_v5  ;;  %v8753_v30 = vadd.f32 %v3357_v21, %v2918_v6  ;;  %v2925_v31 = vpop.f32.mrf.mxu1  ;;  %v8755_v33 = vpop.f32.mrf.mxu0 }
 0x790   : > { %v3341_v61 = vsel %vm1166_vm0, %v3293_v3, %v3295_v28  ;;  %v11041_v24 = vrot.slane %v8755_v33, 7  ;;  %v2926_v3 = vadd.f32 %v2925_v31, %v8731_v23 }
 0x791   : > { %v3359_v43 = vmul.f32 %v3341_v61, %v11456_v56  ;;  %v2927_v26 = vpop.f32.mrf.mxu1  ;;  %v8762_v13 = vpop.f32.mrf.mxu0 }
 0x792   : > { %v3342_v21 = vsel %vm1166_vm0, %v3294_v40, %v11041_v24  ;;  %v11045_v9 = vrot.slane %v8762_v13, 7  ;;  %v2928_v57 = vadd.f32 %v2927_v26, %v8709_v47  ;;  %v11457_v40 = vld [vmem:[#allocation20_spill] sm:$0xff] }
 0x793   : > { %v8769_v6 = vadd.f32 %v3359_v43, %v2924_v11  ;;  %v3360_v4 = vmul.f32 %v3342_v21, %v11456_v56  ;;  %v8773_v38 = vpop.f32.mrf.mxu1  ;;  %v8775_v8 = vpop.f32.mrf.mxu0 }
 0x794   : > { %v3339_v61 = vsel %vm1166_vm0, %v3295_v28, %v11045_v9 }
 0x795   : > { %v3361_v24 = vmul.f32 %v3339_v61, %v11457_v40  ;;  %v8783_v7 = vpop.f32.mrf.mxu1  ;;  %v8785_v11 = vpop.f32.mrf.mxu0  ;;  %v8787_v31 = vadd.f32 %v3360_v4, %v2926_v3 }
 0x797   : > { %11458 = vst [vmem:[#allocation48_spill] sm:$0xff] %v8787_v31  ;;  %v8789_v56 = vadd.f32 %v3361_v24, %v2928_v57  ;;  %v8791_v43 = vpop.f32.mrf.mxu1  ;;  %v8793_v21 = vpop.f32.mrf.mxu0 }
 0x799   : > { %11459 = vst [vmem:[#allocation51_spill] sm:$0xff] %v8789_v56  ;;  %v8795_v63 = vpop.f32.mrf.mxu1  ;;  %v8797_v37 = vpop.f32.mrf.mxu0 }
 0x79b   : > { %v8799_v28 = vpop.f32.mrf.mxu1  ;;  %v8801_v26 = vpop.f32.mrf.mxu0 }
 0x79d   : > { %v8803_v61 = vpop.f32.mrf.mxu1  ;;  %v8805_v9 = vpop.f32.mrf.mxu0 }
 0x79f   : > { %v8807_v3 = vpop.f32.mrf.mxu1  ;;  %v8809_v57 = vpop.f32.mrf.mxu0 }
 0x7a1   : > { %v8811_v24 = vpop.f32.mrf.mxu1  ;;  %v8813_v4 = vpop.f32.mrf.mxu0 }
 0x7a3   : > { %v8815_v25 = vpop.f32.mrf.mxu1  ;;  %v8817_v19 = vpop.f32.mrf.mxu0 }
 0x7a5   : > { %v8819_v29 = vpop.f32.mrf.mxu1  ;;  %v8821_v10 = vpop.f32.mrf.mxu0 }
 0x7a7   : > { %v8823_v32 = vpop.f32.mrf.mxu1  ;;  %v8825_v27 = vpop.f32.mrf.mxu0 }
 0x7a9   : > { %v8827_v36 = vpop.f32.mrf.mxu1  ;;  %v8829_v49 = vpop.f32.mrf.mxu0 }
 0x7ab   : > { %v8831_v16 = vpop.f32.mrf.mxu1  ;;  %v8833_v41 = vpop.f32.mrf.mxu0 }
 0x7ad   : > { %v8835_v51 = vpop.f32.mrf.mxu1  ;;  %v8837_v34 = vpop.f32.mrf.mxu0 }
 0x7ae   : > { %11460 = vst [vmem:[#allocation54_spill] sm:$0xff] %v8835_v51 }
 0x7af   : > { %v8839_v60 = vpop.f32.mrf.mxu1  ;;  %v8841_v52 = vpop.f32.mrf.mxu0 }
 0x7b0   : > { %11461 = vst [vmem:[#allocation58_spill] sm:$0xff] %v8839_v60 }
 0x7b1   : > { %v8843_v12 = vpop.f32.mrf.mxu1  ;;  %v8845_v48 = vpop.f32.mrf.mxu0 }
 0x7b2   : > { %11462 = vst [vmem:[#allocation61_spill] sm:$0xff] %v8843_v12  ;;  %v2906_v12 = vadd.f32 %v8700_v46, %v8731_v23 }
 0x7b3   : > { %v8847_v50 = vpop.f32.mrf.mxu1  ;;  %v8849_v22 = vpop.f32.mrf.mxu0 }
 0x7b4   : > { %11463 = vst [vmem:[#allocation64_spill] sm:$0xff] %v8847_v50 }
 0x7b5   : > { %v8851_v42 = vpop.f32.mrf.mxu1  ;;  %v8853_v14 = vpop.f32.mrf.mxu0 }
 0x7b6   : > { %11464 = vst [vmem:[#allocation67_spill] sm:$0xff] %v8851_v42 }
 0x7b7   : > { %v8855_v54 = vpop.f32.mrf.mxu1  ;;  %v8857_v1 = vpop.f32.mrf.mxu0 }
 0x7b8   : > { %11465 = vst [vmem:[#allocation71_spill] sm:$0xff] %v8855_v54  ;;  %v11470_v54 = vld [vmem:[#allocation68_spill] sm:$0xff] }
 0x7b9   : > { %v8859_v44 = vpop.f32.mrf.mxu1  ;;  %v8861_v35 = vpop.f32.mrf.mxu0 }
 0x7ba   : > { %11466 = vst [vmem:[#allocation73_spill] sm:$0xff] %v8859_v44  ;;  %11467 = vst [vmem:[#allocation75_spill] sm:$0xff] %v8861_v35  ;;  %v11071_v39 = vrot.slane %v8861_v35, 7  ;;  %v2904_v44 = vadd.f32 %v8696_v62, %v8709_v47 }
 0x7bb   : > { %v8864_v56 = vpop.f32.mrf.mxu1  ;;  %v8866_v31 = vpop.f32.mrf.mxu0 }
 0x7bc   : > { %11468 = vst [vmem:[#allocation77_spill] sm:$0xff] %v8864_v56  ;;  %v3349_v5 = vsel %vm1166_vm0, %v11071_v39, %v11469_v55  ;;  %v11073_v53 = vrot.slane %v8866_v31, 7  ;;  %v11472_v56 = vrot.slane %v8702_v20, 7 }
 0x7bd   : > { %v3351_v42 = vmul.f32 %v3349_v5, %v11470_v54  ;;  %v8878_v50 = vpop.f32.mrf.mxu1 }
 0x7be   : > { %11471 = vst [vmem:[#allocation80_spill] sm:$0xff] %v8878_v50  ;;  %v3350_v59 = vsel %vm1166_vm0, %v11073_v53, %v11472_v56  ;;  %v11075_v5 = vrot.slane %v8878_v50, 1  ;;  %v11476_v53 = vld [vmem:[#allocation78_spill] sm:$0xff]  ;;  %v2910_v50 = vadd.f32 %v8711_v18, %v8731_v23 }
 0x7bf   : > { %v3383_v55 = vadd.f32 %v3351_v42, %v2904_v44  ;;  %v3352_v39 = vmul.f32 %v3350_v59, %v11470_v54  ;;  %v8889_v60 = vpop.f32.mrf.mxu1  ;;  %v3354_v54 = vmul.f32 %v8724_v17, %v11451_v2 }
 0x7c0   : > { %11473 = vst [vmem:[#allocation81_spill] sm:$0xff] %v8889_v60 }
 0x7c1   : > { %v3646_v62 = vpop.f32.mrf.mxu1  ;;  %v8891_v51 = vadd.f32 %v3352_v39, %v2906_v12 }
 0x7c2   : > { %v3723_v35 = vrot.slane %v3646_v62, 1 }
 0x7c3   : > { %11474 = vst [vmem:[#allocation84_spill] sm:$0xff] %v8891_v51  ;;  %v8894_v20 = vpop.f32.mrf.mxu1 }
 0x7c4   : > { %11475 = vst [vmem:[#allocation85_spill] sm:$0xff] %v8894_v20  ;;  %v3781_v56 = vsel %vm1585_vm1, %v11075_v5, %v3723_v35  ;;  %v11079_v12 = vrot.slane %v8894_v20, 1  ;;  %v11478_v5 = vld [vmem:[#allocation82_spill] sm:$0xff] }
 0x7c5   : > { %v3785_v46 = vmul.f32 %v3781_v56, %v11476_v53  ;;  %v3652_v44 = vpop.f32.mrf.mxu1 }
 0x7c6   : > { %v3725_v42 = vrot.slane %v3652_v44, 1 }
 0x7c7   : > { %v8903_v59 = vadd.f32 %v3785_v46, %v3383_v55  ;;  %v3654_v39 = vpop.f32.mrf.mxu1 }
 0x7c8   : > { %v3779_v62 = vsel %vm1585_vm1, %v3723_v35, %v3725_v42  ;;  %v3726_v51 = vrot.slane %v3654_v39, 1  ;;  %v3386_v35 = vadd.f32 %v3354_v54, %v2910_v50 }
 0x7c9   : > { %11477 = vst [vmem:[#allocation88_spill] sm:$0xff] %v8903_v59  ;;  %v3787_v60 = vmul.f32 %v3779_v62, %v11478_v5  ;;  %v3656_v56 = vpop.f32.mrf.mxu1  ;;  %v11481_v62 = vld [vmem:[#allocation57_spill] sm:$0xff] }
 0x7ca   : > { %v3780_v2 = vsel %vm1585_vm1, %v11079_v12, %v3726_v51  ;;  %v3727_v17 = vrot.slane %v3656_v56, 1  ;;  %v11484_v56 = vld [vmem:[#allocation27_spill] sm:$0xff]  ;;  %v3300_v12 = vrot.slane %v8793_v21, 7  ;;  %v3303_v21 = vrot.slane %v8805_v9, 7 }
 0x7cb   : > { %v8916_v55 = vadd.f32 %v3787_v60, %v8726_v0  ;;  %v3788_v46 = vmul.f32 %v3780_v2, %v11478_v5  ;;  %v8919_v44 = vpop.f32.mrf.mxu1 }
 0x7cc   : > { %11480 = vst [vmem:[#allocation92_spill] sm:$0xff] %v8919_v44  ;;  %v3777_v18 = vsel %vm1585_vm1, %v3725_v42, %v3727_v17  ;;  %v11080_v39 = vrot.slane %v8919_v44, 1  ;;  %v11525_v44 = vld [vmem:[#allocation10_spill] sm:$0xff] }
 0x7cd   : > { %11479 = vst [vmem:[#allocation90_spill] sm:$0xff] %v8916_v55  ;;  %v3789_v59 = vmul.f32 %v3777_v18, %v11481_v62  ;;  %v3662_v53 = vpop.f32.mrf.mxu1  ;;  %v8925_v20 = vadd.f32 %v3788_v46, %v3386_v35  ;;  %v11490_v55 = vrot.slane %v8762_v13, 7 }
 0x7ce   : > { %v3778_v60 = vsel %vm1585_vm1, %v3726_v51, %v11080_v39  ;;  %v3729_v0 = vrot.slane %v3662_v53, 1  ;;  %v3301_v39 = vrot.slane %v8797_v37, 7  ;;  %v8989_v37 = vadd.f32 %v8773_v38, %v8731_v23 }
 0x7cf   : > { %11482 = vst [vmem:[#allocation94_spill] sm:$0xff] %v8925_v20  ;;  %v8932_v5 = vadd.f32 %v3789_v59, %v8737_v15  ;;  %v3790_v50 = vmul.f32 %v3778_v60, %v11481_v62  ;;  %v8935_v54 = vpop.f32.mrf.mxu1  ;;  %v3307_v38 = vrot.slane %v8821_v10, 7  ;;  %v2940_v10 = vadd.f32 %v8799_v28, %v8731_v23 }
 0x7d0   : > { %v3775_v42 = vsel %vm1585_vm1, %v3727_v17, %v3729_v0  ;;  %v11487_v17 = vld [vmem:[#allocation29_spill] sm:$0xff]  ;;  %11491 = vst [vmem:[#allocation101_spill] sm:$0xff] %v8989_v37 }
 0x7d1   : > { %11483 = vst [vmem:[#allocation96_spill] sm:$0xff] %v8932_v5  ;;  %v3791_v2 = vmul.f32 %v3775_v42, %v11484_v56  ;;  %v8940_v46 = vpop.f32.mrf.mxu1  ;;  %v8943_v35 = vadd.f32 %v3790_v50, %v8747_v58  ;;  %v3298_v42 = vrot.slane %v8775_v8, 7  ;;  %v11501_v56 = vld [vmem:[#allocation13_spill] sm:$0xff] }
 0x7d2   : > { %v11081_v51 = vrot.slane %v8940_v46, 1 }
 0x7d3   : > { %11485 = vst [vmem:[#allocation97_spill] sm:$0xff] %v8943_v35  ;;  %v8947_v53 = vadd.f32 %v3791_v2, %v8753_v30  ;;  %v8949_v15 = vpop.f32.mrf.mxu1  ;;  %v3299_v2 = vrot.slane %v8785_v11, 7  ;;  %v3338_v11 = vsel %vm1166_vm0, %v3298_v42, %v3300_v12 }
 0x7d4   : > { %v3773_v59 = vsel %vm1585_vm1, %v3729_v0, %v11081_v51  ;;  %v3302_v0 = vrot.slane %v8801_v26, 7  ;;  %v3304_v26 = vrot.slane %v8809_v57, 7 }
 0x7d5   : > { %11486 = vst [vmem:[#allocation99_spill] sm:$0xff] %v8947_v53  ;;  %v3793_v18 = vmul.f32 %v3773_v59, %v11487_v17  ;;  %v8956_v62 = vpop.f32.mrf.mxu1  ;;  %v3337_v8 = vsel %vm1166_vm0, %v11490_v55, %v3299_v2  ;;  %v8999_v55 = vadd.f32 %v8783_v7, %v8709_v47  ;;  %v3335_v9 = vsel %vm1166_vm0, %v3299_v2, %v3301_v39  ;;  %v11518_v17 = vld [vmem:[#allocation81_spill] sm:$0xff] }
 0x7d6   : > { %v9018_v2 = vadd.f32 %v8795_v63, %v8709_v47  ;;  %v3308_v63 = vrot.slane %v8825_v27, 7  ;;  %v2946_v27 = vadd.f32 %v8807_v3, %v8731_v23 }
 0x7d7   : > { %v8959_v60 = vadd.f32 %v3793_v18, %v8769_v6  ;;  %v8961_v58 = vpop.f32.mrf.mxu1  ;;  %v11489_v18 = vrot.slane %v8755_v33, 7  ;;  %v3336_v33 = vsel %vm1166_vm0, %v3300_v12, %v3302_v0  ;;  %11492 = vst [vmem:[#allocation91_spill] sm:$0xff] %v8999_v55  ;;  %v11494_v12 = vld [vmem:[#allocation21_spill] sm:$0xff] }
 0x7d8   : > { %v9009_v57 = vmul.f32 %v3337_v8, %v11494_v12  ;;  %v3364_v53 = vmul.f32 %v3338_v11, %v11494_v12 }
 0x7d9   : > { %11488 = vst [vmem:[#allocation100_spill] sm:$0xff] %v8959_v60  ;;  %v8963_v50 = vpop.f32.mrf.mxu1  ;;  %v3340_v51 = vsel %vm1166_vm0, %v11489_v18, %v3298_v42  ;;  %v3305_v18 = vrot.slane %v8813_v4, 7  ;;  %v3306_v42 = vrot.slane %v8817_v19, 7  ;;  %v2936_v4 = vadd.f32 %v8791_v43, %v8731_v23  ;;  %v11496_v19 = vld [vmem:[#allocation16_spill] sm:$0xff] }
 0x7da   : > { %v9006_v20 = vmul.f32 %v3340_v51, %v11457_v40  ;;  %11495 = vst [vmem:[#allocation35_spill] sm:$0xff] %v9009_v57  ;;  %v3366_v40 = vmul.f32 %v3336_v33, %v11496_v19  ;;  %v3333_v51 = vsel %vm1166_vm0, %v3301_v39, %v3303_v21  ;;  %v9026_v8 = vmul.f32 %v3335_v9, %v11496_v19  ;;  %v11498_v19 = vld [vmem:[#allocation17_spill] sm:$0xff] }
 0x7db   : > { %v8965_v30 = vpop.f32.mrf.mxu1  ;;  %v3334_v43 = vsel %vm1166_vm0, %v3302_v0, %v3304_v26  ;;  %v3331_v11 = vsel %vm1166_vm0, %v3303_v21, %v3305_v18  ;;  %v3332_v28 = vsel %vm1166_vm0, %v3304_v26, %v3306_v42  ;;  %v3329_v33 = vsel %vm1166_vm0, %v3305_v18, %v3307_v38  ;;  %v11557_v45 = vld [vmem:[#allocation97_spill] sm:$0xff] }
 0x7dc   : > { %11493 = vst [vmem:[#allocation66_spill] sm:$0xff] %v9006_v20  ;;  %11497 = vst [vmem:[#allocation70_spill] sm:$0xff] %v9026_v8  ;;  %v3309_v39 = vrot.slane %v8829_v49, 7  ;;  %v3310_v9 = vrot.slane %v8833_v41, 7  ;;  %v9043_v0 = vadd.f32 %v8803_v61, %v8709_v47  ;;  %v9046_v21 = vmul.f32 %v3333_v51, %v11498_v19  ;;  %v11500_v41 = vld [vmem:[#allocation12_spill] sm:$0xff] }
 0x7dd   : > { %v8971_v59 = vpop.f32.mrf.mxu1  ;;  %v9052_v26 = vadd.f32 %v3364_v53, %v2936_v4  ;;  %v3368_v18 = vmul.f32 %v3334_v43, %v11498_v19  ;;  %v2948_v49 = vadd.f32 %v8811_v24, %v8709_v47  ;;  %v3369_v35 = vmul.f32 %v3331_v11, %v11500_v41 }
 0x7de   : > { %v9058_v60 = vadd.f32 %v3366_v40, %v2940_v10  ;;  %v2950_v61 = vadd.f32 %v8815_v25, %v8731_v23  ;;  %v3370_v51 = vmul.f32 %v3332_v28, %v11500_v41  ;;  %v3371_v3 = vmul.f32 %v3329_v33, %v11501_v56 }
 0x7df   : > { %v8974_v6 = vpop.f32.mrf.mxu1  ;;  %11499 = vst [vmem:[#allocation86_spill] sm:$0xff] %v9052_v26  ;;  %v3330_v53 = vsel %vm1166_vm0, %v3306_v42, %v3308_v63  ;;  %v3327_v43 = vsel %vm1166_vm0, %v3307_v38, %v3309_v39  ;;  %v3328_v24 = vsel %vm1166_vm0, %v3308_v63, %v3310_v9  ;;  %v3311_v10 = vrot.slane %v8837_v34, 7 }
 0x7e0   : > { %v3312_v40 = vrot.slane %v8841_v52, 7  ;;  %v3313_v25 = vrot.slane %v8845_v48, 7  ;;  %v3314_v11 = vrot.slane %v8849_v22, 7  ;;  %v3315_v28 = vrot.slane %v8853_v14, 7  ;;  %v11502_v14 = vld [vmem:[#allocation8_spill] sm:$0xff] }
 0x7e1   : > { %v8995_v13 = vpop.f32.mrf.mxu1  ;;  %v3316_v42 = vrot.slane %v8857_v1, 7  ;;  %v9080_v19 = vadd.f32 %v3369_v35, %v2948_v49  ;;  %v2954_v38 = vadd.f32 %v8819_v29, %v8709_v47  ;;  %v3372_v63 = vmul.f32 %v3330_v53, %v11501_v56 }
 0x7e2   : > { %v9085_v34 = vadd.f32 %v3368_v18, %v2946_v27  ;;  %v2956_v48 = vadd.f32 %v8823_v32, %v8731_v23  ;;  %v2958_v22 = vadd.f32 %v8827_v36, %v8709_v47  ;;  %v3373_v52 = vmul.f32 %v3327_v43, %v11502_v14 }
 0x7e3   : > { %v9014_v7 = vpop.f32.mrf.mxu1  ;;  %v9094_v41 = vadd.f32 %v3370_v51, %v2950_v61  ;;  %v9096_v35 = vadd.f32 %v3371_v3, %v2954_v38  ;;  %v3374_v29 = vmul.f32 %v3328_v24, %v11502_v14  ;;  %v3325_v56 = vsel %vm1166_vm0, %v3309_v39, %v3311_v10  ;;  %v11503_v51 = vld [vmem:[#allocation75_spill] sm:$0xff] }
 0x7e4   : > { %v3326_v27 = vsel %vm1166_vm0, %v3310_v9, %v3312_v40  ;;  %v3323_v32 = vsel %vm1166_vm0, %v3311_v10, %v3313_v25  ;;  %v3324_v36 = vsel %vm1166_vm0, %v3312_v40, %v3314_v11  ;;  %v3321_v18 = vsel %vm1166_vm0, %v3313_v25, %v3315_v28  ;;  %v11506_v40 = vld [vmem:[#allocation54_spill] sm:$0xff] }
 0x7e5   : > { %v9033_v12 = vpop.f32.mrf.mxu1  ;;  %v3322_v49 = vsel %vm1166_vm0, %v3314_v11, %v3316_v42  ;;  %v2960_v39 = vadd.f32 %v8831_v16, %v8731_v23  ;;  %v11504_v3 = vrot.slane %v11503_v51, 7  ;;  %v11505_v53 = vrot.slane %v8866_v31, 7  ;;  %v11507_v11 = vld [vmem:[#allocation9_spill] sm:$0xff]  ;;  %v11508_v51 = vld [vmem:[#allocation4_spill] sm:$0xff] }
 0x7e6   : > { %v9123_v24 = vadd.f32 %v3372_v63, %v2956_v48  ;;  %v9125_v10 = vadd.f32 %v3373_v52, %v2958_v22  ;;  %v2964_v25 = vadd.f32 %v11506_v40, %v8709_v47  ;;  %v3375_v38 = vmul.f32 %v3325_v56, %v11507_v11  ;;  %v11509_v31 = vld [vmem:[#allocation5_spill] sm:$0xff]  ;;  %v11510_v63 = vld [vmem:[#allocation58_spill] sm:$0xff]  ;;  %v11511_v22 = vld [vmem:[#allocation7_spill] sm:$0xff] }
 0x7e7   : > { %v9050_v5 = vpop.f32.mrf.mxu1  ;;  %v3319_v9 = vsel %vm1166_vm0, %v3315_v28, %v11504_v3  ;;  %v3320_v43 = vsel %vm1166_vm0, %v3316_v42, %v11505_v53  ;;  %v3376_v16 = vmul.f32 %v3326_v27, %v11507_v11  ;;  %v3377_v57 = vmul.f32 %v3323_v32, %v11508_v51  ;;  %v11512_v27 = vld [vmem:[#allocation61_spill] sm:$0xff]  ;;  %v11513_v32 = vld [vmem:[#allocation64_spill] sm:$0xff] }
 0x7e8   : > { %v3378_v28 = vmul.f32 %v3324_v36, %v11508_v51  ;;  %v3379_v3 = vmul.f32 %v3321_v18, %v11509_v31  ;;  %v3380_v42 = vmul.f32 %v3322_v49, %v11509_v31  ;;  %v2966_v48 = vadd.f32 %v11510_v63, %v8731_v23  ;;  %v11514_v18 = vld [vmem:[#allocation67_spill] sm:$0xff] }
 0x7e9   : > { %v9066_v4 = vpop.f32.mrf.mxu1  ;;  %v3381_v52 = vmul.f32 %v3319_v9, %v11511_v22  ;;  %v3382_v53 = vmul.f32 %v3320_v43, %v11511_v22  ;;  %v9139_v56 = vadd.f32 %v3374_v29, %v2960_v39  ;;  %v2968_v11 = vadd.f32 %v11512_v27, %v8709_v47  ;;  %v11515_v49 = vld [vmem:[#allocation71_spill] sm:$0xff]  ;;  %v11516_v9 = vld [vmem:[#allocation73_spill] sm:$0xff] }
 0x7ea   : > { %v2970_v36 = vadd.f32 %v11513_v32, %v8731_v23  ;;  %v2974_v51 = vadd.f32 %v11514_v18, %v8709_v47  ;;  %v2976_v31 = vadd.f32 %v11515_v49, %v8731_v23  ;;  %v9149_v63 = vadd.f32 %v3375_v38, %v2964_v25  ;;  %v11517_v29 = vld [vmem:[#allocation77_spill] sm:$0xff] }
 0x7eb   : > { %v9078_v33 = vpop.f32.mrf.mxu1  ;;  %v2978_v43 = vadd.f32 %v11516_v9, %v8709_v47  ;;  %v2980_v39 = vadd.f32 %v11517_v29, %v8731_v23  ;;  %v3408_v55 = vadd.f32 %v3376_v16, %v2966_v48  ;;  %v3409_v27 = vadd.f32 %v3377_v57, %v2968_v11 }
 0x7ec   : > { %v3411_v20 = vadd.f32 %v3379_v3, %v2974_v51  ;;  %v3412_v37 = vadd.f32 %v3380_v42, %v2976_v31  ;;  %v3410_v32 = vadd.f32 %v3378_v28, %v2970_v36  ;;  %v11089_v18 = vrot.slane %v11518_v17, 1  ;;  %v11519_v31 = vld [vmem:[#allocation80_spill] sm:$0xff] }
 0x7ed   : > { %v9092_v1 = vpop.f32.mrf.mxu1  ;;  %v3413_v26 = vadd.f32 %v3381_v52, %v2978_v43  ;;  %v3414_v25 = vadd.f32 %v3382_v53, %v2980_v39  ;;  %v3736_v47 = vrot.slane %v8965_v30, 1  ;;  %v3737_v29 = vrot.slane %v8971_v59, 1 }
 0x7ee   : > { %v3740_v57 = vrot.slane %v9014_v7, 1  ;;  %v3741_v16 = vrot.slane %v9033_v12, 1  ;;  %v3744_v42 = vrot.slane %v9078_v33, 1  ;;  %v3742_v11 = vrot.slane %v9050_v5, 1 }
 0x7ef   : > { %v9111_v61 = vpop.f32.mrf.mxu1  ;;  %v3745_v36 = vrot.slane %v9092_v1, 1  ;;  %v11522_v1 = vld [vmem:[#allocation2_spill] sm:$0xff] }
 0x7f0   : > { %v3746_v48 = vrot.slane %v9111_v61, 1  ;;  %v11520_v61 = vrot.slane %v11519_v31, 1 }
 0x7f1   : > { %v3706_v14 = vpop.f32.mrf.mxu1 }
 0x7f2   : > { %v3747_v51 = vrot.slane %v3706_v14, 1  ;;  %v3760_v38 = vsel %vm1585_vm1, %v3744_v42, %v3746_v48 }
 0x7f3   : > { %v3708_v40 = vpop.f32.mrf.mxu1 }
 0x7f4   : > { %v3748_v9 = vrot.slane %v3708_v40, 1  ;;  %v3743_v40 = vrot.slane %v9066_v4, 1  ;;  %v11521_v4 = vld [vmem:[#allocation6_spill] sm:$0xff] }
 0x7f5   : > { %v3712_v22 = vpop.f32.mrf.mxu1 }
 0x7f6   : > { %v3749_v28 = vrot.slane %v3712_v22, 1  ;;  %v3758_v12 = vsel %vm1585_vm1, %v3746_v48, %v3748_v9 }
 0x7f7   : > { %v3714_v49 = vpop.f32.mrf.mxu1 }
 0x7f8   : > { %v3750_v8 = vrot.slane %v3714_v49, 1  ;;  %v3755_v5 = vsel %vm1585_vm1, %v3747_v51, %v3749_v28  ;;  %v11523_v49 = vld [vmem:[#allocation3_spill] sm:$0xff] }
 0x7f9   : > { %v3716_v3 = vpop.f32.mrf.mxu1  ;;  %v3811_v48 = vmul.f32 %v3755_v5, %v11521_v4  ;;  %v11526_v5 = vld [vmem:[#allocation15_spill] sm:$0xff] }
 0x7fa   : > { %v3756_v52 = vsel %vm1585_vm1, %v3748_v9, %v3750_v8  ;;  %v3751_v53 = vrot.slane %v3716_v3, 1  ;;  %v3762_v9 = vsel %vm1585_vm1, %v3742_v11, %v3744_v42  ;;  %v3759_v42 = vsel %vm1585_vm1, %v3743_v40, %v3745_v36 }
 0x7fb   : > { %v3718_v7 = vpop.f32.mrf.mxu1  ;;  %v3812_v22 = vmul.f32 %v3756_v52, %v11521_v4  ;;  %v3757_v52 = vsel %vm1585_vm1, %v3745_v36, %v3747_v51  ;;  %v3764_v36 = vsel %vm1585_vm1, %v3740_v57, %v3742_v11  ;;  %v11527_v4 = vld [vmem:[#allocation14_spill] sm:$0xff] }
 0x7fc   : > { %v3753_v33 = vsel %vm1585_vm1, %v3749_v28, %v3751_v53  ;;  %v3783_v43 = vsel %vm1585_vm1, %v3751_v53, %v11520_v61  ;;  %v3752_v39 = vrot.slane %v3718_v7, 1  ;;  %v11524_v53 = vld [vmem:[#allocation11_spill] sm:$0xff] }
 0x7fd   : > { %v3813_v14 = vmul.f32 %v3753_v33, %v11522_v1  ;;  %v3815_v3 = vmul.f32 %v3783_v43, %v11523_v49  ;;  %v3810_v7 = vmul.f32 %v3758_v12, %v11524_v53  ;;  %v9209_v12 = vadd.f32 %v3812_v22, %v3410_v32 }
 0x7fe   : > { %v3754_v31 = vsel %vm1585_vm1, %v3750_v8, %v3752_v39  ;;  %v3784_v28 = vsel %vm1585_vm1, %v3752_v39, %v11089_v18  ;;  %v3808_v39 = vmul.f32 %v3760_v38, %v11525_v44  ;;  %v3806_v38 = vmul.f32 %v3762_v9, %v11526_v5  ;;  %v11528_v9 = vld [vmem:[#allocation19_spill] sm:$0xff] }
 0x7ff   : > { %v3814_v33 = vmul.f32 %v3754_v31, %v11522_v1  ;;  %v3816_v61 = vmul.f32 %v3784_v28, %v11523_v49  ;;  %v9200_v8 = vadd.f32 %v3813_v14, %v3411_v20  ;;  %v9202_v43 = vadd.f32 %v3815_v3, %v3413_v26 }
 0x800   : > { %v3738_v1 = vrot.slane %v8974_v6, 1  ;;  %v3739_v49 = vrot.slane %v8995_v13, 1  ;;  %v3809_v20 = vmul.f32 %v3757_v52, %v11524_v53  ;;  %v3761_v26 = vsel %vm1585_vm1, %v3741_v16, %v3743_v40 }
 0x801   : > { %v9205_v18 = vadd.f32 %v3814_v33, %v3412_v37  ;;  %v9207_v51 = vadd.f32 %v3816_v61, %v3414_v25  ;;  %v9221_v25 = vadd.f32 %v3810_v7, %v3408_v55  ;;  %v3807_v13 = vmul.f32 %v3759_v42, %v11525_v44 }
 0x802   : > { %v3766_v6 = vsel %vm1585_vm1, %v3738_v1, %v3740_v57  ;;  %v9226_v32 = vadd.f32 %v3811_v48, %v3409_v27  ;;  %v3865_v11 = vpack.c.bf16 %v9202_v43, %v9200_v8  ;;  %v3763_v40 = vsel %vm1585_vm1, %v3739_v49, %v3741_v16 }
 0x803   : > { %v3866_v37 = vpack.c.bf16 %v9207_v51, %v9205_v18  ;;  %v3804_v22 = vmul.f32 %v3764_v36, %v11527_v4  ;;  %v3864_v55 = vpack.c.bf16 %v9209_v12, %v9221_v25  ;;  %v9236_v14 = vadd.f32 %v3808_v39, %v9139_v56 }
 0x804   : > { %v3734_v57 = vrot.slane %v8961_v58, 1  ;;  %v3768_v44 = vsel %vm1585_vm1, %v3736_v47, %v3738_v1  ;;  %v3805_v27 = vmul.f32 %v3761_v26, %v11526_v5  ;;  %v9245_v16 = vadd.f32 %v3809_v20, %v9149_v63  ;;  %v11536_v5 = vld [vmem:[#allocation22_spill] sm:$0xff] }
 0x805   : > { %3867 = vmatprep.subr.bf16.mxu0 %v3866_v37  ;;  %v3735_v3 = vrot.slane %v8963_v50, 1  ;;  %v3765_v56 = vsel %vm1585_vm1, %v3737_v29, %v3739_v49  ;;  %v3802_v58 = vmul.f32 %v3766_v6, %v11528_v9  ;;  %v9254_v31 = vadd.f32 %v3806_v38, %v9123_v24  ;;  %v11529_v24 = vld [vmem:[#allocation18_spill] sm:$0xff] }
 0x806   : > { %3868 = vmatpush1.bf16.msra.mxu0 %v3865_v11  ;;  %v3770_v63 = vsel %vm1585_vm1, %v3734_v57, %v3736_v47  ;;  %v3803_v28 = vmul.f32 %v3763_v40, %v11527_v4  ;;  %v9262_v50 = vadd.f32 %v3807_v13, %v9125_v10  ;;  %v3863_v52 = vpack.c.bf16 %v9226_v32, %v9245_v16  ;;  %v11538_v13 = vld [vmem:[#allocation92_spill] sm:$0xff] }
 0x807   : > { %3869 = vmatprep.subr.bf16.mxu0 %v3864_v55  ;;  %v3767_v53 = vsel %vm1585_vm1, %v3735_v3, %v3737_v29  ;;  %v3800_v7 = vmul.f32 %v3768_v44, %v11529_v24  ;;  %v3862_v30 = vpack.c.bf16 %v9236_v14, %v9254_v31  ;;  %v9274_v47 = vadd.f32 %v3804_v22, %v9094_v41  ;;  %v11540_v4 = vld [vmem:[#allocation24_spill] sm:$0xff]  ;;  %v11541_v22 = vld [vmem:[#allocation45_spill] sm:$0xff] }
 0x808   : > { %v3730_v33 = vrot.slane %v8935_v54, 1  ;;  %v11530_v10 = vrot.slane %v8949_v15, 1  ;;  %v3801_v59 = vmul.f32 %v3765_v56, %v11528_v9  ;;  %v9283_v42 = vadd.f32 %v3805_v27, %v9096_v35  ;;  %v11532_v54 = vld [vmem:[#allocation23_spill] sm:$0xff] }
 0x809   : > { %v3399_v29 = vadd.f32 %v9046_v21, %v9043_v0  ;;  %v11531_v48 = vrot.slane %v8956_v62, 1  ;;  %v3798_v39 = vmul.f32 %v3770_v63, %v11532_v54  ;;  %v9293_v1 = vadd.f32 %v3802_v58, %v9085_v34  ;;  %v11546_v9 = vld [vmem:[#allocation91_spill] sm:$0xff] }
 0x80a   : > { %v3772_v61 = vsel %vm1585_vm1, %v11530_v10, %v3734_v57  ;;  %3870 = vmatpush1.bf16.msra.mxu0 %v3863_v52  ;;  %v11533_v49 = vmov %v11530_v10  ;;  %v3799_v36 = vmul.f32 %v3767_v53, %v11529_v24  ;;  %v9301_v0 = vadd.f32 %v3803_v28, %v9080_v19  ;;  %v11537_v19 = vld [vmem:[#allocation70_spill] sm:$0xff]  ;;  %v11542_v57 = vld [vmem:[#allocation29_spill] sm:$0xff]  ;;  %v11547_v58 = vld [vmem:[#allocation35_spill] sm:$0xff] }
 0x80b   : > { %v3769_v41 = vsel %vm1585_vm1, %v11531_v48, %v3735_v3  ;;  %3871 = vmatprep.subr.bf16.mxu0 %v3862_v30  ;;  %v3774_v35 = vsel %vm1585_vm1, %v3730_v33, %v11533_v49  ;;  %v3861_v21 = vpack.c.bf16 %v9262_v50, %v9283_v42  ;;  %v11534_v20 = vmov %v11531_v48  ;;  %v11545_v3 = vld [vmem:[#allocation66_spill] sm:$0xff]  ;;  %v11548_v24 = vld [vmem:[#allocation43_spill] sm:$0xff] }
 0x80c   : > { %v11535_v26 = vrot.slane %v8940_v46, 1  ;;  %v3796_v15 = vmul.f32 %v3772_v61, %v11536_v5  ;;  %v3860_v38 = vpack.c.bf16 %v9274_v47, %v9293_v1  ;;  %v9315_v37 = vadd.f32 %v3800_v7, %v9058_v60  ;;  %v11543_v60 = vld [vmem:[#allocation86_spill] sm:$0xff]  ;;  %v11549_v30 = vld [vmem:[#allocation27_spill] sm:$0xff] }
 0x80d   : > { %v3397_v6 = vadd.f32 %v11537_v19, %v9018_v2  ;;  %v11539_v11 = vrot.slane %v11538_v13, 1  ;;  %v3797_v46 = vmul.f32 %v3769_v41, %v11532_v54  ;;  %v9324_v40 = vadd.f32 %v3801_v59, %v3399_v29  ;;  %v11544_v2 = vld [vmem:[#allocation101_spill] sm:$0xff]  ;;  %v11550_v29 = vld [vmem:[#allocation48_spill] sm:$0xff] }
 0x80e   : > { %v3771_v34 = vsel %vm1585_vm1, %v11535_v26, %v11534_v20  ;;  %3872 = vmatpush1.bf16.msra.mxu0 %v3861_v21  ;;  %v3358_v55 = vmul.f32 %v11541_v22, %v11540_v4  ;;  %v3794_v44 = vmul.f32 %v3774_v35, %v11542_v57  ;;  %v9330_v27 = vadd.f32 %v3798_v39, %v11543_v60  ;;  %v11551_v54 = vld [vmem:[#allocation85_spill] sm:$0xff]  ;;  %v11554_v35 = vld [vmem:[#allocation51_spill] sm:$0xff]  ;;  %v11558_v19 = vld [vmem:[#allocation84_spill] sm:$0xff] }
 0x80f   : > { %v3776_v62 = vsel %vm1585_vm1, %v11539_v11, %v3730_v33  ;;  %3873 = vmatprep.subr.bf16.mxu0 %v3860_v38  ;;  %v3394_v56 = vadd.f32 %v11545_v3, %v11544_v2  ;;  %v3395_v63 = vadd.f32 %v11547_v58, %v11546_v9  ;;  %v3795_v28 = vmul.f32 %v3771_v34, %v11536_v5  ;;  %v11555_v34 = vld [vmem:[#allocation78_spill] sm:$0xff]  ;;  %v11560_v13 = vld [vmem:[#allocation96_spill] sm:$0xff]  ;;  %v11561_v11 = vld [vmem:[#allocation99_spill] sm:$0xff] }
 0x810   : > { %v9337_v52 = vadd.f32 %v3799_v36, %v3397_v6  ;;  %v3859_v53 = vpack.c.bf16 %v9301_v0, %v9324_v40  ;;  %v2920_v7 = vadd.f32 %v11548_v24, %v8731_v23  ;;  %v3792_v33 = vmul.f32 %v3776_v62, %v11549_v30  ;;  %v11563_v22 = vld [vmem:[#allocation88_spill] sm:$0xff] }
 0x811   : > { %v3858_v10 = vpack.c.bf16 %v9315_v37, %v9330_v27  ;;  %v9346_v61 = vadd.f32 %v3796_v15, %v3394_v56  ;;  %v9348_v59 = vadd.f32 %v3797_v46, %v3395_v63  ;;  %v9351_v48 = vadd.f32 %v3794_v44, %v11550_v29  ;;  %v11556_v15 = vld [vmem:[#allocation100_spill] sm:$0xff]  ;;  %v11562_v46 = vld [vmem:[#allocation94_spill] sm:$0xff] }
 0x812   : > { %3874 = vmatpush1.bf16.msra.mxu0 %v3859_v53  ;;  %v3390_v41 = vadd.f32 %v3358_v55, %v2920_v7  ;;  %v11552_v39 = vrot.slane %v11551_v54, 1  ;;  %v11553_v49 = vrot.slane %v11518_v17, 1  ;;  %v9360_v36 = vadd.f32 %v3795_v28, %v11554_v35  ;;  %v11564_v55 = vld [vmem:[#allocation90_spill] sm:$0xff]  ;;  %v11569_v54 = vld [vmem:[#allocation49_spill] sm:$0xff]  ;;  %v9408_v35 = vld [vmem:[%s10888_s12 + $0x8] sm:$0xff]  }
 0x813   : > { %3875 = vmatprep.subr.bf16.mxu0 %v3858_v10  ;;  %v3857_v21 = vpack.c.bf16 %v9337_v52, %v9348_v59  ;;  %v3856_v20 = vpack.c.bf16 %v9346_v61, %v9351_v48  ;;  %v3853_v62 = vpack.c.bf16 %v11561_v11, %v11560_v13  ;;  %v3851_v57 = vpack.c.bf16 %v11564_v55, %v11563_v22  ;;  %v9385_v44 = vld [vmem:[%s10887_s11] sm:$0xf] }
 0x814   : > { %v3782_v23 = vsel %vm1585_vm1, %v11553_v49, %v11552_v39  ;;  %v9366_v26 = vadd.f32 %v3792_v33, %v3390_v41  ;;  %v3855_v17 = vpack.c.bf16 %v9360_v36, %v11556_v15  ;;  %11565 = vst [vmem:[#allocation83_spill] sm:$0xff] %v9385_v44  ;;  %v11566_v60 = vmov 0   ;;  %v11567_v29 = vld [vmem:[#allocation46_spill] sm:$0xff]  ;;  %v11570_v39 = vld [vmem:[#allocation52_spill] sm:$0xff]  ;;  %v11571_v49 = vld [vmem:[#allocation55_spill] sm:$0xff] }
 0x815   : > { %v3786_v5 = vmul.f32 %v3782_v23, %v11555_v34  ;;  %v9396_v41 = vld [vmem:[%s10888_s12] sm:$0xff]   ;;  %v11572_v23 = vld [vmem:[#allocation59_spill] sm:$0xff]  ;;  %11573 = vst [vmem:[#allocation50_spill] sm:$0xff] %v9408_v35  ;;  %v11576_v34 = vld [vmem:[#allocation69_spill] sm:$0xff] }
 0x816   : > { %3876 = vmatpush1.bf16.msra.mxu0 %v3857_v21  ;;  %v3854_v38 = vpack.c.bf16 %v9366_v26, %v11557_v45  ;;  %11568 = vst [vmem:[#allocation47_spill] sm:$0xff] %v9396_v41  ;;  %v11574_v21 = vld [vmem:[#allocation62_spill] sm:$0xff] }
 0x817   : > { %3877 = vmatprep.subr.bf16.mxu0 %v3856_v20  ;;  %v9374_v6 = vadd.f32 %v3786_v5, %v11558_v19  ;;  %v11575_v20 = vld [vmem:[#allocation65_spill] sm:$0xff]  ;;  %v11577_v5 = vld [vmem:[#allocation74_spill] sm:$0xff] }
 0x818   : > { %v11580_v19 = vld [vmem:[#allocation109_spill] sm:$0xff] }
 0x819   : > { %11559 = vst [vmem:[#allocation44_spill] sm:$0xff] %v9374_v6  ;;  %v3852_v4 = vpack.c.bf16 %v11562_v46, %v9374_v6 }
 0x81a   : > { %3878 = vmatpush1.bf16.msra.mxu0 %v3855_v17  ;;  %v9420_v17 = vld [vmem:[%s10888_s12 + $0x10] sm:$0xff]  }
 0x81b   : > { %3879 = vmatprep.subr.bf16.mxu0 %v3854_v38  ;;  %11578 = vst [vmem:[#allocation53_spill] sm:$0xff] %v9420_v17  ;;  %v11579_v38 = vld [vmem:[#allocation72_spill] sm:$0xff] }
 0x81e   : > { %3880 = vmatpush1.bf16.msra.mxu0 %v3853_v62  ;;  %v11581_v62 = vld [vmem:[#allocation87_spill] sm:$0xff] }
 0x81f   : > { %3881 = vmatprep.subr.bf16.mxu0 %v3852_v4  ;;  %v11582_v4 = vld [vmem:[#allocation33_spill] sm:$0xff] }
 0x822   : > { %3882 = vmatpush1.bf16.msra.mxu0 %v3851_v57  ;;  %v9432_v57 = vld [vmem:[%s10888_s12 + $0x18] sm:$0xff]  }
 0x823   : > { %11583 = vst [vmem:[#allocation56_spill] sm:$0xff] %v9432_v57 }
 0x825   : > { %3900 = vmatmul.mubr.bf16.vlgmr.msra.gmra.mxu0 %v9385_v44 }
 0x826   : > { %3991 = vmatprep.mubr.bf16.mxu0 %v11566_v60 }
 0x8e5   : > { %v3901_v2 = vpop.f32.mrf.mxu0 }
 0x8e6   : > { %v3908_v9 = vpack.c.bf16 %v3901_v2, %v3901_v2  ;;  %v11584_v2 = vld [vmem:[#allocation110_spill] sm:$0xff] }
 0x8e7   : > { %v3903_v3 = vpop.f32.mrf.mxu0 }
 0x8e8   : > { %v3909_v56 = vpack.c.bf16 %v3903_v3, %v3903_v3  ;;  %v11585_v3 = vld [vmem:[#allocation105_spill] sm:$0xff] }
 0x8e9   : > { %v3905_v58 = vpop.f32.mrf.mxu0 }
 0x8ea   : > { %3942 = vmatprep.mubr.bf16.mxu1 %v3909_v56  ;;  %v11586_v56 = vld [vmem:[#allocation107_spill] sm:$0xff]  ;;  %v9444_v58 = vld [vmem:[%s10888_s12 + $0x20] sm:$0xff]  }
 0x8eb   : > { %v3906_v63 = vpop.f32.mrf.mxu0  ;;  %3943 = vmatmul.mubr.bf16.vlgmr.msra.gmra.mxu1 %v3908_v9  ;;  %v11587_v9 = vld [vmem:[#allocation106_spill] sm:$0xff]  ;;  %11588 = vst [vmem:[#allocation60_spill] sm:$0xff] %v9444_v58 }
 0x8ec   : > { %4184 = vmatprep.mubr.bf16.mxu1 %v11566_v60  ;;  %v11589_v63 = vld [vmem:[#allocation108_spill] sm:$0xff] }
 0x9ab   : > { %v3944_v28 = vpop.f32.mrf.mxu1 }
 0x9ac   : > { %v3951_v53 = vpack.c.bf16 %v3944_v28, %v3944_v28  ;;  %v11590_v28 = vld [vmem:[#allocation104_spill] sm:$0xff] }
 0x9ad   : > { %v3946_v24 = vpop.f32.mrf.mxu1 }
 0x9ae   : > { %v3952_v7 = vpack.c.bf16 %v3946_v24, %v3946_v24  ;;  %v3954_v33 = vsel %vm2091_vm2, %v3951_v53, 0  ;;  %v11591_v53 = vld [vmem:[#allocation102_spill] sm:$0xff]  ;;  %v11592_v24 = vld [vmem:[#allocation103_spill] sm:$0xff] }
 0x9af   : > { %v3948_v30 = vpop.f32.mrf.mxu1 }
 0x9b0   : > { %5844 = vmatprep.subr.msk.bf16.mxu0 %vm2091_vm2, %v3952_v7  ;;  %v9456_v7 = vld [vmem:[%s10888_s12 + $0x28] sm:$0xff]  }
 0x9b1   : > { %v3949_v10 = vpop.f32.mrf.mxu1  ;;  %3974 = vmatpush1.bf16.msra.mxu0 %v3954_v33  ;;  %11593 = vst [vmem:[#allocation63_spill] sm:$0xff] %v9456_v7  ;;  %v11594_v30 = vld [vmem:[#allocation79_spill] sm:$0xff]  ;;  %v11595_v33 = vld [vmem:[#allocation34_spill] sm:$0xff] }
 0x9b2   : > { %4195 = vmatprep.subr.bf16.mxu0 %v11567_v29  ;;  %v11596_v10 = vld [vmem:[#allocation98_spill] sm:$0xff]  ;;  %v11597_v29 = vld [vmem:[#allocation93_spill] sm:$0xff] }
 0x9b4   : > { %5845 = vmatmul.mubr.msk.bf16.vlgmr.msra.gmra.mxu0 %vm2066_vm3, %v9396_v41 }
 0x9b5   : > { %4001 = vmatprep.mubr.bf16.mxu0 %v11566_v60  ;;  %4196 = vmatpush1.bf16.msra.mxu0 %v11569_v54  ;;  %v9468_v54 = vld [vmem:[%s10888_s12 + $0x30] sm:$0xff]  }
 0x9b6   : > { %4197 = vmatprep.subr.bf16.mxu0 %v11570_v39  ;;  %11598 = vst [vmem:[#allocation36_spill] sm:$0xff] %v9468_v54  ;;  %v11599_v39 = vld [vmem:[#allocation76_spill] sm:$0xff] }
 0x9b9   : > { %4198 = vmatpush1.bf16.msra.mxu0 %v11571_v49  ;;  %v11600_v49 = vld [vmem:[#allocation95_spill] sm:$0xff] }
 0x9ba   : > { %4199 = vmatprep.subr.bf16.mxu0 %v11572_v23  ;;  %v11601_v23 = vld [vmem:[#allocation89_spill] sm:$0xff] }
 0x9bc   : > { %5846 = vmatmul.mubr.msk.bf16.gmra.mxu0 %vm2066_vm3, %v9408_v35 }
 0x9bd   : > { %4011 = vmatprep.mubr.bf16.mxu0 %v11566_v60  ;;  %4200 = vmatpush1.bf16.msra.mxu0 %v11574_v21  ;;  %v11602_v21 = vld [vmem:[#allocation37_spill] sm:$0xff] }
 0x9be   : > { %4201 = vmatprep.subr.bf16.mxu0 %v11575_v20  ;;  %v9480_v20 = vld [vmem:[%s10888_s12 + $0x38] sm:$0xff]  }
 0x9bf   : > { %11603 = vst [vmem:[#allocation40_spill] sm:$0xff] %v9480_v20 }
 0x9c1   : > { %4202 = vmatpush1.bf16.msra.mxu0 %v11576_v34  ;;  %v11604_v34 = vld [vmem:[#allocation38_spill] sm:$0xff] }
 0x9c2   : > { %4203 = vmatprep.subr.bf16.mxu0 %v11577_v5  ;;  %v11605_v5 = vld [vmem:[#allocation39_spill] sm:$0xff] }
 0x9c4   : > { %5847 = vmatmul.mubr.msk.bf16.gmra.mxu0 %vm2066_vm3, %v9420_v17 }
 0x9c5   : > { %4021 = vmatprep.mubr.bf16.mxu0 %v11566_v60  ;;  %4204 = vmatpush1.bf16.msra.mxu0 %v11579_v38  ;;  %v11606_v38 = vld [vmem:[#allocation41_spill] sm:$0xff] }
 0x9c6   : > { %4205 = vmatprep.subr.bf16.mxu0 %v11580_v19 }
 0x9c9   : > { %4206 = vmatpush1.bf16.msra.mxu0 %v11581_v62 }
 0x9ca   : > { %4207 = vmatprep.subr.bf16.mxu0 %v11582_v4 }
 0x9cc   : > { %5848 = vmatmul.mubr.msk.bf16.gmra.mxu0 %vm2066_vm3, %v9432_v57 }
 0x9cd   : > { %4031 = vmatprep.mubr.bf16.mxu0 %v11566_v60  ;;  %4208 = vmatpush1.bf16.msra.mxu0 %v11584_v2 }
 0x9ce   : > { %4209 = vmatprep.subr.bf16.mxu0 %v11585_v3 }
 0x9d1   : > { %4210 = vmatpush1.bf16.msra.mxu0 %v11586_v56 }
 0x9d2   : > { %4211 = vmatprep.subr.bf16.mxu0 %v11587_v9 }
 0x9d4   : > { %5849 = vmatmul.mubr.msk.bf16.gmra.mxu0 %vm2066_vm3, %v9444_v58 }
 0x9d5   : > { %4041 = vmatprep.mubr.bf16.mxu0 %v11566_v60  ;;  %4212 = vmatpush2.bf16.msra.mxu0 %v11589_v63 }
 0x9d6   : > { %4213 = vmatprep.subr.bf16.mxu0 %v11590_v28 }
 0x9d9   : > { %4214 = vmatpush2.bf16.msra.mxu0 %v11591_v53 }
 0x9da   : > { %4215 = vmatprep.subr.bf16.mxu0 %v11592_v24 }
 0x9dc   : > { %5850 = vmatmul.mubr.msk.bf16.gmra.mxu0 %vm2066_vm3, %v9456_v7 }
 0x9dd   : > { %4051 = vmatprep.mubr.bf16.mxu0 %v11566_v60  ;;  %4216 = vmatpush2.bf16.msra.mxu0 %v11594_v30 }
 0x9de   : > { %4217 = vmatprep.subr.bf16.mxu0 %v11595_v33 }
 0x9e1   : > { %4218 = vmatpush2.bf16.msra.mxu0 %v11596_v10 }
 0x9e2   : > { %4219 = vmatprep.subr.bf16.mxu0 %v11597_v29 }
 0x9e4   : > { %5851 = vmatmul.mubr.msk.bf16.gmra.mxu0 %vm2066_vm3, %v9468_v54 }
 0x9e5   : > { %4061 = vmatprep.mubr.bf16.mxu0 %v11566_v60  ;;  %4220 = vmatpush2.bf16.msra.mxu0 %v11599_v39 }
 0x9e6   : > { %4221 = vmatprep.subr.bf16.mxu0 %v11600_v49 }
 0x9e9   : > { %4222 = vmatpush2.bf16.msra.mxu0 %v11601_v23 }
 0x9ea   : > { %4223 = vmatprep.subr.bf16.mxu0 %v11602_v21 }
 0x9ec   : > { %5852 = vmatmul.mubr.msk.bf16.gmra.mxu0 %vm2066_vm3, %v9480_v20 }
 0x9ed   : > { %4224 = vmatpush2.bf16.msra.mxu0 %v11604_v34 }
 0x9ee   : > { %4225 = vmatprep.subr.bf16.mxu0 %v11605_v5 }
 0x9f1   : > { %4226 = vmatpush2.bf16.msra.mxu0 %v11606_v38 }
 0xa74   : > { %v9487_v19 = vpop.f32.mrf.mxu0 }
 0xa75   : > { %11607 = vst [vmem:[#allocation42_spill] sm:$0xff] %v9487_v19 }
 0xa76   : > { %v9489_v62 = vpop.f32.mrf.mxu0 }
 0xa77   : > { %11608 = vst [vmem:[#allocation26_spill] sm:$0xff] %v9489_v62 }
 0xa78   : > { %v9491_v4 = vpop.f32.mrf.mxu0 }
 0xa79   : > { %11609 = vst [vmem:[#allocation30_spill] sm:$0xff] %v9491_v4 }
 0xa7a   : > { %v9493_v2 = vpop.f32.mrf.mxu0 }
 0xa7c   : > { %v9495_v3 = vpop.f32.mrf.mxu0 }
 0xa7e   : > { %v9497_v56 = vpop.f32.mrf.mxu0 }
 0xa80   : > { %v9499_v9 = vpop.f32.mrf.mxu0 }
 0xa82   : > { %v9501_v63 = vpop.f32.mrf.mxu0 }
 0xa84   : > { %v9503_v28 = vpop.f32.mrf.mxu0 }
 0xa86   : > { %v9505_v53 = vpop.f32.mrf.mxu0 }
 0xa88   : > { %v9507_v24 = vpop.f32.mrf.mxu0 }
 0xa8a   : > { %v9509_v30 = vpop.f32.mrf.mxu0 }
 0xa8c   : > { %v9511_v33 = vpop.f32.mrf.mxu0 }
 0xa8e   : > { %v4025_v10 = vpop.f32.mrf.mxu0 }
 0xa90   : > { %v4027_v29 = vpop.f32.mrf.mxu0 }
 0xa92   : > { %v4029_v39 = vpop.f32.mrf.mxu0 }
 0xa94   : > { %v4033_v49 = vpop.f32.mrf.mxu0 }
 0xa96   : > { %v4035_v23 = vpop.f32.mrf.mxu0 }
 0xa98   : > { %v4037_v21 = vpop.f32.mrf.mxu0 }
 0xa9a   : > { %v4039_v34 = vpop.f32.mrf.mxu0 }
 0xa9c   : > { %v4043_v5 = vpop.f32.mrf.mxu0 }
 0xa9e   : > { %v4045_v38 = vpop.f32.mrf.mxu0 }
 0xaa0   : > { %v4047_v20 = vpop.f32.mrf.mxu0 }
 0xaa2   : > { %v4049_v54 = vpop.f32.mrf.mxu0 }
 0xaa4   : > { %v4053_v7 = vpop.f32.mrf.mxu0 }
 0xaa6   : > { %v4055_v58 = vpop.f32.mrf.mxu0 }
 0xaa7   : > { %v9526_v6 = vsub.f32 %v9221_v25, %v4055_v58 }
 0xaa8   : > { %v4057_v57 = vpop.f32.mrf.mxu0 }
 0xaa9   : > { %11614 = vst [vmem:[#allocation82_spill] sm:$0xff] %v9526_v6  ;;  %v9532_v13 = vsub.f32 %v9226_v32, %v4057_v57 }
 0xaaa   : > { %v4059_v17 = vpop.f32.mrf.mxu0 }
 0xaab   : > { %v9514_v44 = vsub.f32 %v9209_v12, %v4059_v17  ;;  %11616 = vst [vmem:[#allocation21_spill] sm:$0xff] %v9532_v13  ;;  %v9537_v12 = vsub.f32 %v9236_v14, %v4049_v54  ;;  %v4129_v14 = vmul.f32 %v9526_v6, %v9526_v6  ;;  %v4130_v17 = vmul.f32 %v9532_v13, %v9532_v13 }
 0xaac   : > { %v4063_v35 = vpop.f32.mrf.mxu0 }
 0xaad   : > { %11610 = vst [vmem:[#allocation32_spill] sm:$0xff] %v9514_v44  ;;  %v9523_v55 = vsub.f32 %v9200_v8, %v4063_v35  ;;  %11617 = vst [vmem:[#allocation16_spill] sm:$0xff] %v9537_v12  ;;  %v4131_v8 = vmul.f32 %v9514_v44, %v9514_v44  ;;  %v9556_v35 = vsub.f32 %v9262_v50, %v4047_v20 }
 0xaae   : > { %v4065_v41 = vpop.f32.mrf.mxu0  ;;  %v4127_v58 = vmul.f32 %v9537_v12, %v9537_v12  ;;  %v9571_v50 = vsub.f32 %v9293_v1, %v4035_v23  ;;  %v9586_v1 = vsub.f32 %v9324_v40, %v4033_v49  ;;  %v9602_v40 = vsub.f32 %v9346_v61, %v9509_v30 }
 0xaaf   : > { %v9517_v22 = vsub.f32 %v9205_v18, %v4065_v41  ;;  %11613 = vst [vmem:[#allocation68_spill] sm:$0xff] %v9523_v55  ;;  %v4132_v32 = vmul.f32 %v9523_v55, %v9523_v55  ;;  %11620 = vst [vmem:[#allocation13_spill] sm:$0xff] %v9556_v35  ;;  %v9620_v30 = vsub.f32 %v9360_v36, %v9507_v24 }
 0xab0   : > { %v4067_v60 = vpop.f32.mrf.mxu0  ;;  %11623 = vst [vmem:[#allocation54_spill] sm:$0xff] %v9571_v50  ;;  %11626 = vst [vmem:[#allocation5_spill] sm:$0xff] %v9586_v1  ;;  %v9638_v24 = vsub.f32 %v11557_v45, %v9497_v56 }
 0xab1   : > { %11611 = vst [vmem:[#allocation25_spill] sm:$0xff] %v9517_v22  ;;  %v9520_v19 = vsub.f32 %v9202_v43, %v4067_v60  ;;  %v4133_v43 = vmul.f32 %v9517_v22, %v9517_v22  ;;  %v9551_v60 = vsub.f32 %v9254_v31, %v4045_v38  ;;  %v4149_v31 = vpack.c.bf16 %v4131_v8, %v4129_v14  ;;  %v9941_v22 = vld [vmem:[%s10886_s10 + $0x80] ss:$8 sps:$4 sm:$0xff]  }
 0xab2   : > { %v4069_v4 = vpop.f32.mrf.mxu0  ;;  %11629 = vst [vmem:[#allocation61_spill] sm:$0xff] %v9602_v40  ;;  %11632 = vst [vmem:[#allocation71_spill] sm:$0xff] %v9620_v30  ;;  %v9626_v8 = vsub.f32 %v9366_v26, %v9501_v63  ;;  %v9644_v63 = vsub.f32 %v11561_v11, %v9499_v9  ;;  %v11640_v9 = vld [vmem:[#allocation26_spill] sm:$0xff] }
 0xab3   : > { %11612 = vst [vmem:[#allocation20_spill] sm:$0xff] %v9520_v19  ;;  %v9529_v62 = vsub.f32 %v9207_v51, %v4069_v4  ;;  %v4134_v18 = vmul.f32 %v9520_v19, %v9520_v19  ;;  %v9546_v51 = vsub.f32 %v9245_v16, %v4053_v7  ;;  %11619 = vst [vmem:[#allocation12_spill] sm:$0xff] %v9551_v60  ;;  %v9935_v19 = vld [vmem:[%s10886_s10 + $0x84] ss:$8 sps:$4 sm:$0xff]  }
 0xab4   : > { %v9561_v16 = vsub.f32 %v9274_v47, %v4039_v34  ;;  %v9566_v7 = vsub.f32 %v9283_v42, %v4043_v5  ;;  %v4125_v20 = vmul.f32 %v9551_v60, %v9551_v60  ;;  %v9576_v47 = vsub.f32 %v9301_v0, %v4037_v21  ;;  %11633 = vst [vmem:[#allocation73_spill] sm:$0xff] %v9626_v8 }
 0xab5   : > { %11615 = vst [vmem:[#allocation57_spill] sm:$0xff] %v9529_v62  ;;  %v4135_v25 = vmul.f32 %v9529_v62, %v9529_v62  ;;  %11618 = vst [vmem:[#allocation17_spill] sm:$0xff] %v9546_v51  ;;  %v4150_v57 = vpack.c.bf16 %v4134_v18, %v4132_v32  ;;  %v4128_v54 = vmul.f32 %v9546_v51, %v9546_v51  ;;  %v11638_v32 = vld [vmem:[#allocation96_spill] sm:$0xff] }
 0xab6   : > { %11621 = vst [vmem:[#allocation8_spill] sm:$0xff] %v9561_v16  ;;  %11622 = vst [vmem:[#allocation75_spill] sm:$0xff] %v9566_v7  ;;  %v4126_v4 = vmul.f32 %v9556_v35, %v9556_v35  ;;  %v9581_v42 = vsub.f32 %v9315_v37, %v4029_v39  ;;  %v4123_v5 = vmul.f32 %v9561_v16, %v9561_v16  ;;  %v9929_v62 = vld [vmem:[%s10886_s10 + $0x90] ss:$8 sps:$4 sm:$0xff]  }
 0xab7   : > { %v4151_v41 = vpack.c.bf16 %v4135_v25, %v4133_v43  ;;  %11624 = vst [vmem:[#allocation9_spill] sm:$0xff] %v9576_v47  ;;  %v4148_v34 = vpack.c.bf16 %v4130_v17, %v4128_v54  ;;  %v4147_v38 = vpack.c.bf16 %v4127_v58, %v4125_v20  ;;  %v4124_v23 = vmul.f32 %v9566_v7, %v9566_v7 }
 0xab8   : > { %11625 = vst [vmem:[#allocation4_spill] sm:$0xff] %v9581_v42  ;;  %v9591_v0 = vsub.f32 %v9330_v27, %v4025_v10  ;;  %v4121_v21 = vmul.f32 %v9571_v50, %v9571_v50  ;;  %v9596_v37 = vsub.f32 %v9337_v52, %v4027_v29  ;;  %v4122_v39 = vmul.f32 %v9576_v47, %v9576_v47  ;;  %v11663_v47 = vld [vmem:[#allocation47_spill] sm:$0xff] }
 0xab9   : > { %4152 = vmatprep.subr.bf16.mxu1 %v4151_v41  ;;  %v4146_v18 = vpack.c.bf16 %v4126_v4, %v4124_v23  ;;  %v4119_v49 = vmul.f32 %v9581_v42, %v9581_v42  ;;  %v9608_v10 = vsub.f32 %v9348_v59, %v9511_v33  ;;  %v4120_v52 = vmul.f32 %v9586_v1, %v9586_v1  ;;  %v11641_v41 = vld [vmem:[#allocation44_spill] sm:$0xff]  ;;  %v11646_v4 = vld [vmem:[#allocation42_spill] sm:$0xff] }
 0xaba   : > { %4153 = vmatpush1.bf16.msra.mxu1 %v4150_v57  ;;  %11627 = vst [vmem:[#allocation58_spill] sm:$0xff] %v9591_v0  ;;  %11628 = vst [vmem:[#allocation7_spill] sm:$0xff] %v9596_v37  ;;  %v4145_v27 = vpack.c.bf16 %v4123_v5, %v4121_v21  ;;  %v9614_v29 = vsub.f32 %v9351_v48, %v9505_v53  ;;  %v4117_v61 = vmul.f32 %v9591_v0, %v9591_v0  ;;  %v11644_v57 = vld [vmem:[#allocation90_spill] sm:$0xff]  ;;  %v11667_v0 = vld [vmem:[#allocation60_spill] sm:$0xff] }
 0xabb   : > { %4154 = vmatprep.subr.bf16.mxu1 %v4149_v31  ;;  %11630 = vst [vmem:[#allocation64_spill] sm:$0xff] %v9608_v10  ;;  %v4118_v59 = vmul.f32 %v9596_v37, %v9596_v37  ;;  %v4144_v33 = vpack.c.bf16 %v4122_v39, %v4120_v52  ;;  %v4115_v48 = vmul.f32 %v9602_v40, %v9602_v40  ;;  %11635 = vst [vmem:[#allocation81_spill] sm:$0xff] %v9638_v24  ;;  %v11649_v52 = vld [vmem:[#allocation83_spill] sm:$0xff] }
 0xabc   : > { %11631 = vst [vmem:[#allocation67_spill] sm:$0xff] %v9614_v29  ;;  %v4143_v53 = vpack.c.bf16 %v4119_v49, %v4117_v61  ;;  %v9632_v43 = vsub.f32 %v11556_v15, %v9503_v28  ;;  %v4116_v36 = vmul.f32 %v9608_v10, %v9608_v10  ;;  %v4113_v26 = vmul.f32 %v9614_v29, %v9614_v29 }
 0xabd   : > { %11636 = vst [vmem:[#allocation80_spill] sm:$0xff] %v9644_v63  ;;  %v4114_v15 = vmul.f32 %v9620_v30, %v9620_v30  ;;  %v9650_v25 = vsub.f32 %v11562_v46, %v9493_v2  ;;  %v4111_v45 = vmul.f32 %v9626_v8, %v9626_v8  ;;  %v9656_v14 = vsub.f32 %v11638_v32, %v9495_v3  ;;  %v11643_v2 = vld [vmem:[#allocation30_spill] sm:$0xff]  ;;  %v6198_v32 = vld [vmem:[%s10889_s13 + $0x54] ss:$8 sps:$4 sm:$0xff]  }
 0xabe   : > { %4155 = vmatpush1.bf16.msra.mxu1 %v4148_v34  ;;  %11634 = vst [vmem:[#allocation77_spill] sm:$0xff] %v9632_v43  ;;  %v4142_v28 = vpack.c.bf16 %v4118_v59, %v4116_v36  ;;  %v4141_v56 = vpack.c.bf16 %v4115_v48, %v4113_v26  ;;  %v4112_v11 = vmul.f32 %v9632_v43, %v9632_v43  ;;  %v11647_v34 = vld [vmem:[#allocation88_spill] sm:$0xff]  ;;  %v11650_v61 = vmov 0   ;;  %11660 = vst [vmem:[#allocation45_spill] sm:$0xff] %v9929_v62  ;;  %v11668_v43 = vld [vmem:[#allocation63_spill] sm:$0xff] }
 0xabf   : > { %4156 = vmatprep.subr.bf16.mxu1 %v4147_v38  ;;  %11637 = vst [vmem:[#allocation6_spill] sm:$0xff] %v9650_v25  ;;  %11639 = vst [vmem:[#allocation2_spill] sm:$0xff] %v9656_v14  ;;  %v9662_v17 = vsub.f32 %v11641_v41, %v11640_v9  ;;  %v4109_v46 = vmul.f32 %v9638_v24, %v9638_v24  ;;  %v9668_v58 = vsub.f32 %v11644_v57, %v11643_v2  ;;  %v6192_v59 = vld [vmem:[%s10889_s13 + $0x74] ss:$8 sps:$4 sm:$0xff]   ;;  %v6190_v36 = vld [vmem:[%s10889_s13 + $0x70] ss:$8 sps:$4 sm:$0xff]  }
 0xac0   : > { %v4110_v3 = vmul.f32 %v9644_v63, %v9644_v63  ;;  %v4140_v31 = vpack.c.bf16 %v4114_v15, %v4112_v11  ;;  %v4107_v54 = vmul.f32 %v9650_v25, %v9650_v25  ;;  %v9676_v5 = vsub.f32 %v11647_v34, %v11646_v4  ;;  %4617 = vmatprep.subr.bf16.mxu0 %v6192_v59  ;;  %v6196_v11 = vld [vmem:[%s10889_s13 + $0x50] ss:$8 sps:$4 sm:$0xff]   ;;  %v6201_v9 = vld [vmem:[%s10889_s13 + $0x44] ss:$8 sps:$4 sm:$0xff]   ;;  %v6199_v41 = vld [vmem:[%s10889_s13 + $0x40] ss:$8 sps:$4 sm:$0xff]  }
 0xac1   : > { %11642 = vst [vmem:[#allocation3_spill] sm:$0xff] %v9662_v17  ;;  %11645 = vst [vmem:[#allocation11_spill] sm:$0xff] %v9668_v58  ;;  %v4139_v20 = vpack.c.bf16 %v4111_v45, %v4109_v46  ;;  %v4108_v38 = vmul.f32 %v9656_v14, %v9656_v14  ;;  %v4105_v23 = vmul.f32 %v9662_v17, %v9662_v17  ;;  %v6204_v46 = vld [vmem:[%s10889_s13 + $0x34] ss:$8 sps:$4 sm:$0xff]   ;;  %v6202_v2 = vld [vmem:[%s10889_s13 + $0x30] ss:$8 sps:$4 sm:$0xff]  }
 0xac2   : > { %4157 = vmatpush1.bf16.msra.mxu1 %v4146_v18  ;;  %11648 = vst [vmem:[#allocation10_spill] sm:$0xff] %v9676_v5  ;;  %v4106_v21 = vmul.f32 %v9668_v58, %v9668_v58  ;;  %v4104_v49 = vmul.f32 %v9676_v5, %v9676_v5  ;;  %v6207_v57 = vld [vmem:[%s10889_s13 + $0x24] ss:$8 sps:$4 sm:$0xff]   ;;  %v6211_v4 = vld [vmem:[%s10889_s13] ss:$8 sps:$4 sm:$0xff]   ;;  %11661 = vst [vmem:[#allocation29_spill] sm:$0xff] %v9935_v19 }
 0xac3   : > { %4158 = vmatprep.subr.bf16.mxu1 %v4145_v27  ;;  %v4138_v39 = vpack.c.bf16 %v4110_v3, %v4108_v38  ;;  %v4137_v18 = vpack.c.bf16 %v4107_v54, %v4105_v23  ;;  %v6205_v3 = vld [vmem:[%s10889_s13 + $0x20] ss:$8 sps:$4 sm:$0xff]   ;;  %v6208_v54 = vld [vmem:[%s10889_s13 + $0x10] ss:$8 sps:$4 sm:$0xff]   ;;  %v9740_v34 = vld [vmem:[%s10886_s10 + $0x74] ss:$8 sps:$4 sm:$0xff]  }
 0xac4   : > { %v4136_v27 = vpack.c.bf16 %v4106_v21, %v4104_v49  ;;  %v6268_v38 = vld [vmem:[%s6508_s28] sm:$0xff]   ;;  %v9748_v23 = vld [vmem:[%s10886_s10 + $0x70] ss:$8 sps:$4 sm:$0xff]   ;;  %v6273_v49 = vld [vmem:[%s6508_s28 + $0x8] sm:$0xff]   ;;  %11662 = vst [vmem:[#allocation86_spill] sm:$0xff] %v9941_v22 }
 0xac5   : > { %v9754_v21 = vld [vmem:[%s10886_s10 + $0x64] ss:$8 sps:$4 sm:$0xff]   ;;  %v11669_v25 = vld [vmem:[#allocation36_spill] sm:$0xff] }
 0xac6   : > { %4159 = vmatpush1.bf16.msra.mxu1 %v4144_v33  ;;  %v9780_v59 = vld [vmem:[%s10886_s10 + $0x44] ss:$8 sps:$4 sm:$0xff]  }
 0xac7   : > { %4160 = vmatprep.subr.bf16.mxu1 %v4143_v53 }
 0xaca   : > { %4161 = vmatpush1.bf16.msra.mxu1 %v4142_v28  ;;  %v6195_v28 = vld [vmem:[%s10889_s13 + $0x64] ss:$8 sps:$4 sm:$0xff]  }
 0xacb   : > { %4162 = vmatprep.subr.bf16.mxu1 %v4141_v56  ;;  %v6193_v56 = vld [vmem:[%s10889_s13 + $0x60] ss:$8 sps:$4 sm:$0xff]  }
 0xace   : > { %4163 = vmatpush1.bf16.msra.mxu1 %v4140_v31  ;;  %v6210_v31 = vld [vmem:[%s10889_s13 + $0x14] ss:$8 sps:$4 sm:$0xff]  }
 0xacf   : > { %4164 = vmatprep.subr.bf16.mxu1 %v4139_v20  ;;  %v6213_v20 = vld [vmem:[%s10889_s13 + $0x4] ss:$8 sps:$4 sm:$0xff]  }
 0xad2   : > { %4165 = vmatpush1.bf16.msra.mxu1 %v4138_v39  ;;  %v9760_v39 = vld [vmem:[%s10886_s10 + $0x60] ss:$8 sps:$4 sm:$0xff]  }
 0xad3   : > { %4166 = vmatprep.subr.bf16.mxu1 %v4137_v18  ;;  %v9766_v18 = vld [vmem:[%s10886_s10 + $0x54] ss:$8 sps:$4 sm:$0xff]  }
 0xad6   : > { %4167 = vmatpush1.bf16.msra.mxu1 %v4136_v27  ;;  %v9774_v27 = vld [vmem:[%s10886_s10 + $0x50] ss:$8 sps:$4 sm:$0xff]  }
 0xad9   : > { %4185 = vmatmul.mubr.bf16.vlgmr.msra.gmra.mxu1 %v11649_v52 }
 0xada   : > { %4278 = vmatprep.mubr.bf16.mxu1 %v11650_v61 }
 0xb99   : > { %v4186_v33 = vpop.f32.mrf.mxu1 }
 0xb9a   : > { %v4193_v26 = vpack.c.bf16 %v4186_v33, %v4186_v33  ;;  %v9786_v33 = vld [vmem:[%s10886_s10 + $0x40] ss:$8 sps:$4 sm:$0xff]  }
 0xb9b   : > { %v4188_v48 = vpop.f32.mrf.mxu1 }
 0xb9c   : > { %v4194_v53 = vpack.c.bf16 %v4188_v48, %v4188_v48  ;;  %v9792_v48 = vld [vmem:[%s10886_s10 + $0x34] ss:$8 sps:$4 sm:$0xff]  }
 0xb9d   : > { %v4190_v15 = vpop.f32.mrf.mxu1 }
 0xb9e   : > { %4227 = vmatprep.mubr.bf16.mxu0 %v4194_v53  ;;  %v6278_v53 = vld [vmem:[%s6508_s28 + $0x10] sm:$0xff]   ;;  %v9812_v15 = vld [vmem:[%s10886_s10 + $0x20] ss:$8 sps:$4 sm:$0xff]  }
 0xb9f   : > { %v4191_v45 = vpop.f32.mrf.mxu1  ;;  %4228 = vmatmul.mubr.bf16.vlgmr.msra.gmra.mxu0 %v4193_v26  ;;  %v9806_v26 = vld [vmem:[%s10886_s10 + $0x24] ss:$8 sps:$4 sm:$0xff]  }
 0xba0   : > { %4618 = vmatpush1.bf16.msra.mxu0 %v6190_v36  ;;  %4649 = vmatprep.mubr.bf16.mxu0 %v11650_v61  ;;  %v9800_v36 = vld [vmem:[%s10886_s10 + $0x30] ss:$8 sps:$4 sm:$0xff]  }
 0xba1   : > { %4619 = vmatprep.subr.bf16.mxu0 %v6195_v28  ;;  %v9818_v28 = vld [vmem:[%s10886_s10 + $0x14] ss:$8 sps:$4 sm:$0xff]  }
 0xba2   : > { %v6283_v45 = vld [vmem:[%s6508_s28 + $0x18] sm:$0xff]  }
 0xba4   : > { %4620 = vmatpush1.bf16.msra.mxu0 %v6193_v56  ;;  %v9826_v56 = vld [vmem:[%s10886_s10 + $0x10] ss:$8 sps:$4 sm:$0xff]  }
 0xba5   : > { %4621 = vmatprep.subr.bf16.mxu0 %v6198_v32  ;;  %v9832_v32 = vld [vmem:[%s10886_s10 + $0x4] ss:$8 sps:$4 sm:$0xff]  }
 0xba8   : > { %4622 = vmatpush1.bf16.msra.mxu0 %v6196_v11  ;;  %v9838_v11 = vld [vmem:[%s10886_s10] ss:$8 sps:$4 sm:$0xff]  }
 0xba9   : > { %4623 = vmatprep.subr.bf16.mxu0 %v6201_v9  ;;  %v9844_v9 = vld [vmem:[%s10886_s10 + $0xf4] ss:$8 sps:$4 sm:$0xff]  }
 0xbac   : > { %4624 = vmatpush1.bf16.msra.mxu0 %v6199_v41  ;;  %v6288_v41 = vld [vmem:[%s6508_s28 + $0x20] sm:$0xff]  }
 0xbad   : > { %4625 = vmatprep.subr.bf16.mxu0 %v6204_v46  ;;  %v9852_v46 = vld [vmem:[%s10886_s10 + $0xf0] ss:$8 sps:$4 sm:$0xff]  }
 0xbb0   : > { %4626 = vmatpush1.bf16.msra.mxu0 %v6202_v2  ;;  %v9858_v2 = vld [vmem:[%s10886_s10 + $0xe4] ss:$8 sps:$4 sm:$0xff]  }
 0xbb1   : > { %4627 = vmatprep.subr.bf16.mxu0 %v6207_v57  ;;  %v9864_v57 = vld [vmem:[%s10886_s10 + $0xe0] ss:$8 sps:$4 sm:$0xff]  }
 0xbb4   : > { %4628 = vmatpush1.bf16.msra.mxu0 %v6205_v3  ;;  %v9870_v3 = vld [vmem:[%s10886_s10 + $0xd4] ss:$8 sps:$4 sm:$0xff]  }
 0xbb5   : > { %4629 = vmatprep.subr.bf16.mxu0 %v6210_v31  ;;  %11651 = vst [vmem:[#allocation15_spill] sm:$0xff] %v9870_v3  ;;  %v6293_v31 = vld [vmem:[%s6508_s28 + $0x28] sm:$0xff]  }
 0xbb8   : > { %4630 = vmatpush1.bf16.msra.mxu0 %v6208_v54  ;;  %v9878_v54 = vld [vmem:[%s10886_s10 + $0xd0] ss:$8 sps:$4 sm:$0xff]  }
 0xbb9   : > { %4631 = vmatprep.subr.bf16.mxu0 %v6213_v20  ;;  %11652 = vst [vmem:[#allocation14_spill] sm:$0xff] %v9878_v54  ;;  %v9884_v20 = vld [vmem:[%s10886_s10 + $0xc4] ss:$8 sps:$4 sm:$0xff]  }
 0xbba   : > { %11653 = vst [vmem:[#allocation19_spill] sm:$0xff] %v9884_v20 }
 0xbbc   : > { %4632 = vmatpush1.bf16.msra.mxu0 %v6211_v4  ;;  %v9890_v4 = vld [vmem:[%s10886_s10 + $0xc0] ss:$8 sps:$4 sm:$0xff]  }
 0xbbd   : > { %4791 = vmatprep.subr.bf16.mxu0 %v9740_v34  ;;  %11654 = vst [vmem:[#allocation18_spill] sm:$0xff] %v9890_v4 }
 0xbbf   : > { %4650 = vmatmul.mubr.bf16.vlgmr.msra.gmra.mxu0 %v6268_v38  ;;  %v9896_v38 = vld [vmem:[%s10886_s10 + $0xb4] ss:$8 sps:$4 sm:$0xff]  }
 0xbc0   : > { %4659 = vmatprep.mubr.bf16.mxu0 %v11650_v61  ;;  %4792 = vmatpush1.bf16.msra.mxu0 %v9748_v23  ;;  %11655 = vst [vmem:[#allocation23_spill] sm:$0xff] %v9896_v38 }
 0xbc1   : > { %4793 = vmatprep.subr.bf16.mxu0 %v9754_v21 }
 0xbc4   : > { %4794 = vmatpush1.bf16.msra.mxu0 %v9760_v39 }
 0xbc5   : > { %4795 = vmatprep.subr.bf16.mxu0 %v9766_v18 }
 0xbc7   : > { %4660 = vmatmul.mubr.bf16.gmra.mxu0 %v6273_v49  ;;  %v6298_v49 = vld [vmem:[%s6508_s28 + $0x30] sm:$0xff]  }
 0xbc8   : > { %4669 = vmatprep.mubr.bf16.mxu0 %v11650_v61  ;;  %4796 = vmatpush1.bf16.msra.mxu0 %v9774_v27 }
 0xbc9   : > { %4797 = vmatprep.subr.bf16.mxu0 %v9780_v59 }
 0xbcc   : > { %4798 = vmatpush1.bf16.msra.mxu0 %v9786_v33 }
 0xbcd   : > { %4799 = vmatprep.subr.bf16.mxu0 %v9792_v48 }
 0xbcf   : > { %4670 = vmatmul.mubr.bf16.gmra.mxu0 %v6278_v53  ;;  %v9904_v53 = vld [vmem:[%s10886_s10 + $0xb0] ss:$8 sps:$4 sm:$0xff]  }
 0xbd0   : > { %4679 = vmatprep.mubr.bf16.mxu0 %v11650_v61  ;;  %4800 = vmatpush1.bf16.msra.mxu0 %v9800_v36  ;;  %11656 = vst [vmem:[#allocation22_spill] sm:$0xff] %v9904_v53 }
 0xbd1   : > { %4801 = vmatprep.subr.bf16.mxu0 %v9806_v26 }
 0xbd4   : > { %4802 = vmatpush1.bf16.msra.mxu0 %v9812_v15 }
 0xbd5   : > { %4803 = vmatprep.subr.bf16.mxu0 %v9818_v28 }
 0xbd7   : > { %4680 = vmatmul.mubr.bf16.gmra.mxu0 %v6283_v45  ;;  %v9910_v45 = vld [vmem:[%s10886_s10 + $0xa4] ss:$8 sps:$4 sm:$0xff]  }
 0xbd8   : > { %4689 = vmatprep.mubr.bf16.mxu0 %v11650_v61  ;;  %4804 = vmatpush1.bf16.msra.mxu0 %v9826_v56  ;;  %11657 = vst [vmem:[#allocation70_spill] sm:$0xff] %v9910_v45 }
 0xbd9   : > { %4805 = vmatprep.subr.bf16.mxu0 %v9832_v32 }
 0xbdc   : > { %4806 = vmatpush1.bf16.msra.mxu0 %v9838_v11 }
 0xbdd   : > { %4807 = vmatprep.subr.bf16.mxu0 %v9844_v9 }
 0xbdf   : > { %4690 = vmatmul.mubr.bf16.gmra.mxu0 %v6288_v41  ;;  %v9916_v41 = vld [vmem:[%s10886_s10 + $0xa0] ss:$8 sps:$4 sm:$0xff]  }
 0xbe0   : > { %4699 = vmatprep.mubr.bf16.mxu0 %v11650_v61  ;;  %4808 = vmatpush2.bf16.msra.mxu0 %v9852_v46  ;;  %11658 = vst [vmem:[#allocation92_spill] sm:$0xff] %v9916_v41 }
 0xbe1   : > { %4809 = vmatprep.subr.bf16.mxu0 %v9858_v2 }
 0xbe4   : > { %4810 = vmatpush2.bf16.msra.mxu0 %v9864_v57 }
 0xbe5   : > { %4811 = vmatprep.subr.bf16.mxu0 %v9870_v3 }
 0xbe7   : > { %4700 = vmatmul.mubr.bf16.gmra.mxu0 %v6293_v31  ;;  %v9922_v31 = vld [vmem:[%s10886_s10 + $0x94] ss:$8 sps:$4 sm:$0xff]  }
 0xbe8   : > { %4709 = vmatprep.mubr.bf16.mxu0 %v11650_v61  ;;  %4812 = vmatpush2.bf16.msra.mxu0 %v9878_v54  ;;  %11659 = vst [vmem:[#allocation24_spill] sm:$0xff] %v9922_v31 }
 0xbe9   : > { %4813 = vmatprep.subr.bf16.mxu0 %v9884_v20 }
 0xbec   : > { %4814 = vmatpush2.bf16.msra.mxu0 %v9890_v4 }
 0xbed   : > { %4815 = vmatprep.subr.bf16.mxu0 %v9896_v38 }
 0xbef   : > { %4710 = vmatmul.mubr.bf16.gmra.mxu0 %v6298_v49  ;;  %v6303_v49 = vld [vmem:[%s6508_s28 + $0x38] sm:$0xff]  }
 0xbf0   : > { %4719 = vmatprep.mubr.bf16.mxu0 %v11650_v61  ;;  %4816 = vmatpush2.bf16.msra.mxu0 %v9904_v53 }
 0xbf1   : > { %4817 = vmatprep.subr.bf16.mxu0 %v9910_v45 }
 0xbf4   : > { %4818 = vmatpush2.bf16.msra.mxu0 %v9916_v41  ;;  %v11672_v41 = vld [vmem:[#allocation31_spill] sm:$0xff] }
 0xbf5   : > { %4819 = vmatprep.subr.bf16.mxu0 %v9922_v31 }
 0xbf7   : > { %4720 = vmatmul.mubr.bf16.gmra.mxu0 %v6303_v49 }
 0xbf8   : > { %4820 = vmatpush2.bf16.msra.mxu0 %v9929_v62 }
 0xbf9   : > { %4821 = vmatprep.subr.bf16.mxu0 %v9935_v19  ;;  %v11671_v19 = vld [vmem:[#allocation28_spill] sm:$0xff] }
 0xbfc   : > { %4822 = vmatpush2.bf16.msra.mxu0 %v9941_v22  ;;  %v4525_v22 = vld [vmem:[%s10890_s14] sm:$0x3] }
 0xbfd   : > { %5076 = vmatprep.subr.bf16.mxu0 %v9740_v34  ;;  %v10001_v62 = vrot.slane %v4525_v22, %v11671_v19  ;;  %v4534_v45 = vrot.slane %v4525_v22, %v11672_v41 }
 0xc5f   : > { %v4229_v49 = vpop.f32.mrf.mxu0 }
 0xc60   : > { %v4230_v55 = vadd.f32 1e-05, %v4229_v49  ;;  %v11666_v49 = vld [vmem:[#allocation56_spill] sm:$0xff] }
 0xc61   : > { %v4231_v44 = vpop.f32.mrf.mxu0 }
 0xc62   : > { %6218 = vrsqrt.f32 %v4230_v55  ;;  %v4232_v13 = vadd.f32 1e-05, %v4231_v44  ;;  %v11664_v55 = vld [vmem:[#allocation50_spill] sm:$0xff] }
 0xc63   : > { %v4233_v6 = vpop.f32.mrf.mxu0 }
 0xc64   : > { %6220 = vrsqrt.f32 %v4232_v13 }
 0xc65   : > { %v4234_v51 = vpop.f32.mrf.mxu0 }
 0xc66   : > { %v11665_v51 = vld [vmem:[#allocation53_spill] sm:$0xff] }
 0xc6f   : > { %v6219_v12 = vpop.eup %6218 }
 0xc70   : > { %v4238_v35 = vpack.c.bf16 %v6219_v12, %v6219_v12 }
 0xc71   : > { %v6221_v60 = vpop.eup %6220 }
 0xc72   : > { %v4239_v7 = vpack.c.bf16 %v6221_v60, %v6221_v60  ;;  %v4241_v16 = vsel %vm2091_vm2, %v4238_v35, 0 }
 0xc74   : > { %5853 = vmatprep.subr.msk.bf16.mxu1 %vm2091_vm2, %v4239_v7 }
 0xc75   : > { %4261 = vmatpush1.bf16.msra.mxu1 %v4241_v16 }
 0xc78   : > { %5854 = vmatmul.mubr.msk.bf16.vlgmr.msra.gmra.mxu1 %vm2066_vm3, %v11663_v47 }
 0xc79   : > { %4288 = vmatprep.mubr.bf16.mxu1 %v11650_v61 }
 0xc7f   : > { %v9950_v34 = vpop.f32.mrf.mxu0 }
 0xc80   : > { %5855 = vmatmul.mubr.msk.bf16.gmra.mxu1 %vm2066_vm3, %v11664_v55 }
 0xc81   : > { %v9954_v6 = vpop.f32.mrf.mxu0  ;;  %4298 = vmatprep.mubr.bf16.mxu1 %v11650_v61 }
 0xc83   : > { %v9957_v13 = vpop.f32.mrf.mxu0 }
 0xc85   : > { %v9959_v44 = vpop.f32.mrf.mxu0 }
 0xc87   : > { %v9961_v12 = vpop.f32.mrf.mxu0 }
 0xc88   : > { %5856 = vmatmul.mubr.msk.bf16.gmra.mxu1 %vm2066_vm3, %v11665_v51 }
 0xc89   : > { %v9965_v60 = vpop.f32.mrf.mxu0  ;;  %4308 = vmatprep.mubr.bf16.mxu1 %v11650_v61 }
 0xc8b   : > { %v9968_v35 = vpop.f32.mrf.mxu0 }
 0xc8d   : > { %v9970_v16 = vpop.f32.mrf.mxu0 }
 0xc8f   : > { %v9972_v7 = vpop.f32.mrf.mxu0 }
 0xc90   : > { %5857 = vmatmul.mubr.msk.bf16.gmra.mxu1 %vm2066_vm3, %v11666_v49  ;;  %v11670_v49 = vld [vmem:[#allocation40_spill] sm:$0xff] }
 0xc91   : > { %v9976_v50 = vpop.f32.mrf.mxu0  ;;  %4318 = vmatprep.mubr.bf16.mxu1 %v11650_v61 }
 0xc93   : > { %v9979_v1 = vpop.f32.mrf.mxu0 }
 0xc95   : > { %v9981_v42 = vpop.f32.mrf.mxu0 }
 0xc97   : > { %v9983_v37 = vpop.f32.mrf.mxu0 }
 0xc98   : > { %5858 = vmatmul.mubr.msk.bf16.gmra.mxu1 %vm2066_vm3, %v11667_v0 }
 0xc99   : > { %v4683_v10 = vpop.f32.mrf.mxu0  ;;  %4328 = vmatprep.mubr.bf16.mxu1 %v11650_v61 }
 0xc9b   : > { %v4685_v40 = vpop.f32.mrf.mxu0 }
 0xc9d   : > { %v4687_v30 = vpop.f32.mrf.mxu0 }
 0xc9f   : > { %v4691_v29 = vpop.f32.mrf.mxu0 }
 0xca0   : > { %5859 = vmatmul.mubr.msk.bf16.gmra.mxu1 %vm2066_vm3, %v11668_v43 }
 0xca1   : > { %v4693_v8 = vpop.f32.mrf.mxu0  ;;  %4338 = vmatprep.mubr.bf16.mxu1 %v11650_v61 }
 0xca3   : > { %v4695_v63 = vpop.f32.mrf.mxu0 }
 0xca5   : > { %v4697_v24 = vpop.f32.mrf.mxu0 }
 0xca6   : > { %v10039_v41 = vadd.f32 %v4697_v24, %v4534_v45 }
 0xca7   : > { %v4701_v14 = vpop.f32.mrf.mxu0 }
 0xca8   : > { %5860 = vmatmul.mubr.msk.bf16.gmra.mxu1 %vm2066_vm3, %v11669_v25 }
 0xca9   : > { %v4703_v58 = vpop.f32.mrf.mxu0  ;;  %4348 = vmatprep.mubr.bf16.mxu1 %v11650_v61 }
 0xcab   : > { %v4705_v17 = vpop.f32.mrf.mxu0 }
 0xcad   : > { %v4707_v5 = vpop.f32.mrf.mxu0 }
 0xcaf   : > { %v4711_v0 = vpop.f32.mrf.mxu0 }
 0xcb0   : > { %5861 = vmatmul.mubr.msk.bf16.gmra.mxu1 %vm2066_vm3, %v11670_v49 }
 0xcb1   : > { %v4713_v51 = vpop.f32.mrf.mxu0  ;;  %4780 = vmatprep.mubr.bf16.mxu1 %v11650_v61 }
 0xcb2   : > { %v10016_v3 = vadd.f32 %v4713_v51, %v4534_v45  ;;  %v10032_v51 = vadd.f32 %v4703_v58, %v4534_v45  ;;  %v10049_v58 = vadd.f32 %v4695_v63, %v10001_v62 }
 0xcb3   : > { %v4715_v43 = vpop.f32.mrf.mxu0 }
 0xcb4   : > { %v10021_v22 = vadd.f32 %v4715_v43, %v10001_v62 }
 0xcb5   : > { %v4717_v55 = vpop.f32.mrf.mxu0 }
 0xcb6   : > { %v10007_v38 = vadd.f32 %v4717_v55, %v4534_v45  ;;  %v10025_v55 = vadd.f32 %v4707_v5, %v4534_v45 }
 0xcb7   : > { %v4721_v47 = vpop.f32.mrf.mxu0 }
 0xcb8   : > { %v10014_v54 = vadd.f32 %v4721_v47, %v10001_v62  ;;  %v10030_v47 = vadd.f32 %v4711_v0, %v10001_v62  ;;  %v4743_v5 = vpack.c.bf16 %v10025_v55, %v10032_v51  ;;  %v10046_v0 = vadd.f32 %v4693_v8, %v4534_v45 }
 0xcb9   : > { %v4723_v25 = vpop.f32.mrf.mxu0  ;;  %v10063_v8 = vadd.f32 %v4685_v40, %v10001_v62  ;;  %v10081_v40 = vadd.f32 %v9979_v1, %v10001_v62  ;;  %v10099_v1 = vadd.f32 %v9968_v35, %v10001_v62  ;;  %v10117_v35 = vadd.f32 %v9957_v13, %v10001_v62 }
 0xcba   : > { %v10009_v4 = vadd.f32 %v4723_v25, %v4534_v45  ;;  %v4745_v25 = vpack.c.bf16 %v10007_v38, %v10016_v3  ;;  %v4744_v43 = vpack.c.bf16 %v10021_v22, %v10030_v47  ;;  %v4741_v24 = vpack.c.bf16 %v10039_v41, %v10046_v0 }
 0xcbb   : > { %v4725_v31 = vpop.f32.mrf.mxu0  ;;  %11675 = vst [vmem:[#allocation91_spill] sm:$0xff] %v10117_v35 }
 0xcbc   : > { %v10005_v53 = vadd.f32 %v4725_v31, %v10001_v62 }
 0xcbd   : > { %v4727_v49 = vpop.f32.mrf.mxu0 }
 0xcbe   : > { %v10011_v20 = vadd.f32 %v4727_v49, %v4534_v45  ;;  %v4746_v31 = vpack.c.bf16 %v10005_v53, %v10014_v54  ;;  %v10035_v49 = vadd.f32 %v4705_v17, %v10001_v62 }
 0xcc0   : > { %v4747_v19 = vpack.c.bf16 %v10011_v20, %v10009_v4 }
 0xcc2   : > { %4748 = vmatprep.subr.bf16.mxu1 %v4747_v19  ;;  %v10044_v19 = vadd.f32 %v4701_v14, %v10001_v62  ;;  %v10060_v14 = vadd.f32 %v4683_v10, %v4534_v45  ;;  %v10077_v10 = vadd.f32 %v9976_v50, %v4534_v45  ;;  %v10095_v50 = vadd.f32 %v9965_v60, %v4534_v45 }
 0xcc3   : > { %4749 = vmatpush1.bf16.msra.mxu1 %v4746_v31  ;;  %v10053_v31 = vadd.f32 %v4687_v30, %v4534_v45  ;;  %v10113_v60 = vadd.f32 %v9954_v6, %v4534_v45 }
 0xcc4   : > { %4750 = vmatprep.subr.bf16.mxu1 %v4745_v25  ;;  %v4742_v17 = vpack.c.bf16 %v10035_v49, %v10044_v19  ;;  %v10058_v25 = vadd.f32 %v4691_v29, %v10001_v62  ;;  %v10074_v29 = vadd.f32 %v9983_v37, %v10001_v62  ;;  %v10092_v37 = vadd.f32 %v9972_v7, %v10001_v62 }
 0xcc5   : > { %v4739_v30 = vpack.c.bf16 %v10053_v31, %v10060_v14  ;;  %v10110_v7 = vadd.f32 %v9961_v12, %v10001_v62  ;;  %11674 = vst [vmem:[#allocation66_spill] sm:$0xff] %v10113_v60 }
 0xcc6   : > { %v4740_v63 = vpack.c.bf16 %v10049_v58, %v10058_v25 }
 0xcc7   : > { %4751 = vmatpush1.bf16.msra.mxu1 %v4744_v43  ;;  %v10068_v43 = vadd.f32 %v9981_v42, %v4534_v45  ;;  %v4738_v42 = vpack.c.bf16 %v10063_v8, %v10074_v29  ;;  %11673 = vst [vmem:[#allocation101_spill] sm:$0xff] %v10110_v7 }
 0xcc8   : > { %4752 = vmatprep.subr.bf16.mxu1 %v4743_v5  ;;  %v10086_v5 = vadd.f32 %v9970_v16, %v4534_v45  ;;  %v4736_v16 = vpack.c.bf16 %v10081_v40, %v10092_v37 }
 0xccb   : > { %4753 = vmatpush1.bf16.msra.mxu1 %v4742_v17  ;;  %v4737_v17 = vpack.c.bf16 %v10068_v43, %v10077_v10 }
 0xccc   : > { %4754 = vmatprep.subr.bf16.mxu1 %v4741_v24  ;;  %v10104_v24 = vadd.f32 %v9959_v44, %v4534_v45  ;;  %v4734_v44 = vpack.c.bf16 %v10099_v1, %v10110_v7 }
 0xccf   : > { %4755 = vmatpush1.bf16.msra.mxu1 %v4740_v63  ;;  %v4735_v63 = vpack.c.bf16 %v10086_v5, %v10095_v50 }
 0xcd0   : > { %4756 = vmatprep.subr.bf16.mxu1 %v4739_v30  ;;  %v4733_v30 = vpack.c.bf16 %v10104_v24, %v10113_v60 }
 0xcd3   : > { %4757 = vmatpush1.bf16.msra.mxu1 %v4738_v42  ;;  %v10125_v42 = vadd.f32 %v9950_v34, %v10001_v62 }
 0xcd4   : > { %4758 = vmatprep.subr.bf16.mxu1 %v4737_v17 }
 0xcd5   : > { %11676 = vst [vmem:[#allocation35_spill] sm:$0xff] %v10125_v42  ;;  %v4732_v45 = vpack.c.bf16 %v10117_v35, %v10125_v42 }
 0xcd7   : > { %4759 = vmatpush1.bf16.msra.mxu1 %v4736_v16 }
 0xcd8   : > { %4760 = vmatprep.subr.bf16.mxu1 %v4735_v63 }
 0xcdb   : > { %4761 = vmatpush1.bf16.msra.mxu1 %v4734_v44 }
 0xcdc   : > { %4762 = vmatprep.subr.bf16.mxu1 %v4733_v30 }
 0xcdf   : > { %4763 = vmatpush1.bf16.msra.mxu1 %v4732_v45 }
 0xce2   : > { %4781 = vmatmul.mubr.bf16.vlgmr.msra.gmra.mxu1 %v11649_v52 }
 0xce3   : > { %4872 = vmatprep.mubr.bf16.mxu1 %v11650_v61 }
 0xd38   : > { %v10131_v6 = vpop.f32.mrf.mxu1 }
 0xd39   : > { %11677 = vst [vmem:[#allocation43_spill] sm:$0xff] %v10131_v6 }
 0xd3a   : > { %v10133_v13 = vpop.f32.mrf.mxu1 }
 0xd3b   : > { %11678 = vst [vmem:[#allocation27_spill] sm:$0xff] %v10133_v13 }
 0xd3c   : > { %v10135_v12 = vpop.f32.mrf.mxu1 }
 0xd3d   : > { %11679 = vst [vmem:[#allocation48_spill] sm:$0xff] %v10135_v12 }
 0xd3e   : > { %v10137_v17 = vpop.f32.mrf.mxu1 }
 0xd3f   : > { %11680 = vst [vmem:[#allocation85_spill] sm:$0xff] %v10137_v17 }
 0xd40   : > { %v10139_v62 = vpop.f32.mrf.mxu1 }
 0xd41   : > { %11681 = vst [vmem:[#allocation51_spill] sm:$0xff] %v10139_v62 }
 0xd42   : > { %v10141_v34 = vpop.f32.mrf.mxu1 }
 0xd43   : > { %11682 = vst [vmem:[#allocation78_spill] sm:$0xff] %v10141_v34 }
 0xd44   : > { %v10143_v16 = vpop.f32.mrf.mxu1 }
 0xd45   : > { %11683 = vst [vmem:[#allocation100_spill] sm:$0xff] %v10143_v16 }
 0xd46   : > { %v10145_v63 = vpop.f32.mrf.mxu1 }
 0xd47   : > { %11684 = vst [vmem:[#allocation97_spill] sm:$0xff] %v10145_v63 }
 0xd48   : > { %v10147_v44 = vpop.f32.mrf.mxu1 }
 0xd49   : > { %11685 = vst [vmem:[#allocation84_spill] sm:$0xff] %v10147_v44 }
 0xd4a   : > { %v10149_v52 = vpop.f32.mrf.mxu1 }
 0xd4b   : > { %11686 = vst [vmem:[#allocation99_spill] sm:$0xff] %v10149_v52 }
 0xd4c   : > { %v10151_v30 = vpop.f32.mrf.mxu1 }
 0xd4d   : > { %11687 = vst [vmem:[#allocation94_spill] sm:$0xff] %v10151_v30 }
 0xd4e   : > { %v10153_v45 = vpop.f32.mrf.mxu1 }
 0xd4f   : > { %11688 = vst [vmem:[#allocation46_spill] sm:$0xff] %v10153_v45 }
 0xd50   : > { %v10155_v13 = vpop.f32.mrf.mxu1 }
 0xd51   : > { %11689 = vst [vmem:[#allocation49_spill] sm:$0xff] %v10155_v13 }
 0xd52   : > { %v10157_v12 = vpop.f32.mrf.mxu1 }
 0xd53   : > { %11690 = vst [vmem:[#allocation52_spill] sm:$0xff] %v10157_v12 }
 0xd54   : > { %v10159_v17 = vpop.f32.mrf.mxu1 }
 0xd55   : > { %11691 = vst [vmem:[#allocation55_spill] sm:$0xff] %v10159_v17 }
 0xd56   : > { %v10161_v62 = vpop.f32.mrf.mxu1 }
 0xd57   : > { %11692 = vst [vmem:[#allocation59_spill] sm:$0xff] %v10161_v62 }
 0xd58   : > { %v10163_v34 = vpop.f32.mrf.mxu1 }
 0xd59   : > { %11693 = vst [vmem:[#allocation62_spill] sm:$0xff] %v10163_v34 }
 0xd5a   : > { %v10165_v16 = vpop.f32.mrf.mxu1 }
 0xd5b   : > { %11694 = vst [vmem:[#allocation65_spill] sm:$0xff] %v10165_v16 }
 0xd5c   : > { %v10167_v63 = vpop.f32.mrf.mxu1 }
 0xd5d   : > { %11695 = vst [vmem:[#allocation69_spill] sm:$0xff] %v10167_v63 }
 0xd5e   : > { %v10169_v44 = vpop.f32.mrf.mxu1 }
 0xd5f   : > { %11696 = vst [vmem:[#allocation74_spill] sm:$0xff] %v10169_v44 }
 0xd60   : > { %v10171_v52 = vpop.f32.mrf.mxu1 }
 0xd61   : > { %11697 = vst [vmem:[#allocation72_spill] sm:$0xff] %v10171_v52 }
 0xd62   : > { %v10173_v30 = vpop.f32.mrf.mxu1 }
 0xd63   : > { %11698 = vst [vmem:[#allocation109_spill] sm:$0xff] %v10173_v30 }
 0xd64   : > { %v10175_v45 = vpop.f32.mrf.mxu1 }
 0xd65   : > { %11699 = vst [vmem:[#allocation87_spill] sm:$0xff] %v10175_v45 }
 0xd66   : > { %v10177_v13 = vpop.f32.mrf.mxu1 }
 0xd67   : > { %11700 = vst [vmem:[#allocation33_spill] sm:$0xff] %v10177_v13 }
 0xd68   : > { %v10179_v12 = vpop.f32.mrf.mxu1 }
 0xd69   : > { %11701 = vst [vmem:[#allocation110_spill] sm:$0xff] %v10179_v12 }
 0xd6a   : > { %v10181_v17 = vpop.f32.mrf.mxu1 }
 0xd6b   : > { %11702 = vst [vmem:[#allocation105_spill] sm:$0xff] %v10181_v17 }
 0xd6c   : > { %v10183_v62 = vpop.f32.mrf.mxu1 }
 0xd6d   : > { %11703 = vst [vmem:[#allocation107_spill] sm:$0xff] %v10183_v62 }
 0xd6e   : > { %v10185_v34 = vpop.f32.mrf.mxu1 }
 0xd6f   : > { %11704 = vst [vmem:[#allocation106_spill] sm:$0xff] %v10185_v34 }
 0xd70   : > { %v10187_v16 = vpop.f32.mrf.mxu1 }
 0xd71   : > { %11705 = vst [vmem:[#allocation108_spill] sm:$0xff] %v10187_v16 }
 0xd72   : > { %v10189_v63 = vpop.f32.mrf.mxu1 }
 0xd73   : > { %11706 = vst [vmem:[#allocation104_spill] sm:$0xff] %v10189_v63 }
 0xd74   : > { %v10191_v44 = vpop.f32.mrf.mxu1 }
 0xd75   : > { %11707 = vst [vmem:[#allocation102_spill] sm:$0xff] %v10191_v44 }
 0xd76   : > { %v10193_v52 = vpop.f32.mrf.mxu1 }
 0xd77   : > { %11708 = vst [vmem:[#allocation103_spill] sm:$0xff] %v10193_v52 }
 0xda2   : > { %v4782_v30 = vpop.f32.mrf.mxu1 }
 0xda3   : > { %v4789_v13 = vpack.c.bf16 %v4782_v30, %v4782_v30  ;;  %v11725_v30 = vld [vmem:[#allocation60_spill] sm:$0xff] }
 0xda4   : > { %v4784_v45 = vpop.f32.mrf.mxu1 }
 0xda5   : > { %v4790_v6 = vpack.c.bf16 %v4784_v45, %v4784_v45  ;;  %v11726_v45 = vld [vmem:[#allocation63_spill] sm:$0xff] }
 0xda6   : > { %v4786_v42 = vpop.f32.mrf.mxu1 }
 0xda7   : > { %4823 = vmatprep.mubr.bf16.mxu0 %v4790_v6  ;;  %v11721_v42 = vld [vmem:[#allocation47_spill] sm:$0xff]  ;;  %v11722_v6 = vld [vmem:[#allocation50_spill] sm:$0xff] }
 0xda8   : > { %v4787_v12 = vpop.f32.mrf.mxu1  ;;  %4824 = vmatmul.mubr.bf16.vlgmr.msra.gmra.mxu0 %v4789_v13  ;;  %v11723_v13 = vld [vmem:[#allocation53_spill] sm:$0xff] }
 0xda9   : > { %5077 = vmatpush1.bf16.msra.mxu0 %v9748_v23  ;;  %v11709_v23 = vld [vmem:[#allocation15_spill] sm:$0xff]  ;;  %v11724_v12 = vld [vmem:[#allocation56_spill] sm:$0xff] }
 0xdaa   : > { %5078 = vmatprep.subr.bf16.mxu0 %v9754_v21  ;;  %v11710_v21 = vld [vmem:[#allocation14_spill] sm:$0xff] }
 0xdad   : > { %5079 = vmatpush1.bf16.msra.mxu0 %v9760_v39  ;;  %v11711_v39 = vld [vmem:[#allocation19_spill] sm:$0xff] }
 0xdae   : > { %5080 = vmatprep.subr.bf16.mxu0 %v9766_v18  ;;  %v11712_v18 = vld [vmem:[#allocation18_spill] sm:$0xff] }
 0xdb1   : > { %5081 = vmatpush1.bf16.msra.mxu0 %v9774_v27  ;;  %v11713_v27 = vld [vmem:[#allocation23_spill] sm:$0xff] }
 0xdb2   : > { %5082 = vmatprep.subr.bf16.mxu0 %v9780_v59  ;;  %v11714_v59 = vld [vmem:[#allocation22_spill] sm:$0xff] }
 0xdb5   : > { %5083 = vmatpush1.bf16.msra.mxu0 %v9786_v33  ;;  %v11715_v33 = vld [vmem:[#allocation70_spill] sm:$0xff] }
 0xdb6   : > { %5084 = vmatprep.subr.bf16.mxu0 %v9792_v48  ;;  %v11716_v48 = vld [vmem:[#allocation92_spill] sm:$0xff] }
 0xdb9   : > { %5085 = vmatpush1.bf16.msra.mxu0 %v9800_v36  ;;  %v11717_v36 = vld [vmem:[#allocation24_spill] sm:$0xff] }
 0xdba   : > { %5086 = vmatprep.subr.bf16.mxu0 %v9806_v26  ;;  %v11718_v26 = vld [vmem:[#allocation45_spill] sm:$0xff] }
 0xdbd   : > { %5087 = vmatpush1.bf16.msra.mxu0 %v9812_v15  ;;  %v11719_v15 = vld [vmem:[#allocation29_spill] sm:$0xff] }
 0xdbe   : > { %5088 = vmatprep.subr.bf16.mxu0 %v9818_v28  ;;  %v11720_v28 = vld [vmem:[#allocation86_spill] sm:$0xff] }
 0xdc1   : > { %5089 = vmatpush1.bf16.msra.mxu0 %v9826_v56 }
 0xdc2   : > { %5090 = vmatprep.subr.bf16.mxu0 %v9832_v32 }
 0xdc5   : > { %5091 = vmatpush1.bf16.msra.mxu0 %v9838_v11 }
 0xdc6   : > { %5092 = vmatprep.subr.bf16.mxu0 %v9844_v9 }
 0xdc9   : > { %5093 = vmatpush2.bf16.msra.mxu0 %v9852_v46 }
 0xdca   : > { %5094 = vmatprep.subr.bf16.mxu0 %v9858_v2 }
 0xdcd   : > { %5095 = vmatpush2.bf16.msra.mxu0 %v9864_v57 }
 0xdce   : > { %5096 = vmatprep.subr.bf16.mxu0 %v11709_v23  ;;  %v11727_v23 = vld [vmem:[#allocation36_spill] sm:$0xff] }
 0xdd1   : > { %5097 = vmatpush2.bf16.msra.mxu0 %v11710_v21  ;;  %v11728_v21 = vld [vmem:[#allocation40_spill] sm:$0xff] }
 0xdd2   : > { %5098 = vmatprep.subr.bf16.mxu0 %v11711_v39 }
 0xdd5   : > { %5099 = vmatpush2.bf16.msra.mxu0 %v11712_v18 }
 0xdd6   : > { %5100 = vmatprep.subr.bf16.mxu0 %v11713_v27 }
 0xdd9   : > { %5101 = vmatpush2.bf16.msra.mxu0 %v11714_v59 }
 0xdda   : > { %5102 = vmatprep.subr.bf16.mxu0 %v11715_v33 }
 0xddd   : > { %5103 = vmatpush2.bf16.msra.mxu0 %v11716_v48 }
 0xdde   : > { %5104 = vmatprep.subr.bf16.mxu0 %v11717_v36 }
 0xde1   : > { %5105 = vmatpush2.bf16.msra.mxu0 %v11718_v26 }
 0xde2   : > { %5106 = vmatprep.subr.bf16.mxu0 %v11719_v15 }
 0xde5   : > { %5107 = vmatpush2.bf16.msra.mxu0 %v11720_v28 }
 0xe68   : > { %v4825_v56 = vpop.f32.mrf.mxu0 }
 0xe69   : > { %v4832_v32 = vpack.c.bf16 %v4825_v56, %v4825_v56 }
 0xe6a   : > { %v4827_v11 = vpop.f32.mrf.mxu0 }
 0xe6b   : > { %v4833_v9 = vpack.c.bf16 %v4827_v11, %v4827_v11  ;;  %v4835_v2 = vsel %vm2091_vm2, %v4832_v32, 0 }
 0xe6c   : > { %v4829_v46 = vpop.f32.mrf.mxu0 }
 0xe6d   : > { %5878 = vmatprep.subr.msk.bf16.mxu1 %vm2091_vm2, %v4833_v9 }
 0xe6e   : > { %v4830_v57 = vpop.f32.mrf.mxu0  ;;  %4855 = vmatpush1.bf16.msra.mxu1 %v4835_v2 }
 0xe71   : > { %5879 = vmatmul.mubr.msk.bf16.vlgmr.msra.gmra.mxu1 %vm2066_vm3, %v11721_v42 }
 0xe72   : > { %4882 = vmatprep.mubr.bf16.mxu1 %v11650_v61 }
 0xe79   : > { %5880 = vmatmul.mubr.msk.bf16.gmra.mxu1 %vm2066_vm3, %v11722_v6 }
 0xe7a   : > { %4892 = vmatprep.mubr.bf16.mxu1 %v11650_v61 }
 0xe81   : > { %5881 = vmatmul.mubr.msk.bf16.gmra.mxu1 %vm2066_vm3, %v11723_v13 }
 0xe82   : > { %4902 = vmatprep.mubr.bf16.mxu1 %v11650_v61 }
 0xe89   : > { %5882 = vmatmul.mubr.msk.bf16.gmra.mxu1 %vm2066_vm3, %v11724_v12 }
 0xe8a   : > { %4912 = vmatprep.mubr.bf16.mxu1 %v11650_v61 }
 0xe91   : > { %5883 = vmatmul.mubr.msk.bf16.gmra.mxu1 %vm2066_vm3, %v11725_v30 }
 0xe92   : > { %4922 = vmatprep.mubr.bf16.mxu1 %v11650_v61 }
 0xe99   : > { %5884 = vmatmul.mubr.msk.bf16.gmra.mxu1 %vm2066_vm3, %v11726_v45 }
 0xe9a   : > { %4932 = vmatprep.mubr.bf16.mxu1 %v11650_v61 }
 0xea1   : > { %5885 = vmatmul.mubr.msk.bf16.gmra.mxu1 %vm2066_vm3, %v11727_v23 }
 0xea2   : > { %4942 = vmatprep.mubr.bf16.mxu1 %v11650_v61 }
 0xea9   : > { %5886 = vmatmul.mubr.msk.bf16.gmra.mxu1 %vm2066_vm3, %v11728_v21 }
 0xeaa   : > { %5065 = vmatprep.mubr.bf16.mxu1 %v11650_v61 }
 0xf31   : > { %v10252_v39 = vpop.f32.mrf.mxu1 }
 0xf32   : > { %11729 = vst [vmem:[#allocation79_spill] sm:$0xff] %v10252_v39 }
 0xf33   : > { %v10254_v18 = vpop.f32.mrf.mxu1 }
 0xf34   : > { %11730 = vst [vmem:[#allocation34_spill] sm:$0xff] %v10254_v18 }
 0xf35   : > { %v10256_v27 = vpop.f32.mrf.mxu1 }
 0xf36   : > { %11731 = vst [vmem:[#allocation98_spill] sm:$0xff] %v10256_v27 }
 0xf37   : > { %v10258_v59 = vpop.f32.mrf.mxu1 }
 0xf39   : > { %v10260_v33 = vpop.f32.mrf.mxu1 }
 0xf3b   : > { %v10262_v48 = vpop.f32.mrf.mxu1 }
 0xf3d   : > { %v10264_v36 = vpop.f32.mrf.mxu1 }
 0xf3f   : > { %v10266_v26 = vpop.f32.mrf.mxu1 }
 0xf41   : > { %v10268_v15 = vpop.f32.mrf.mxu1 }
 0xf43   : > { %v10270_v28 = vpop.f32.mrf.mxu1 }
 0xf45   : > { %v10272_v56 = vpop.f32.mrf.mxu1 }
 0xf47   : > { %v10274_v32 = vpop.f32.mrf.mxu1 }
 0xf49   : > { %v10276_v11 = vpop.f32.mrf.mxu1 }
 0xf4b   : > { %v4906_v9 = vpop.f32.mrf.mxu1 }
 0xf4d   : > { %v4908_v46 = vpop.f32.mrf.mxu1 }
 0xf4f   : > { %v4910_v2 = vpop.f32.mrf.mxu1 }
 0xf51   : > { %v4914_v57 = vpop.f32.mrf.mxu1 }
 0xf53   : > { %v4916_v42 = vpop.f32.mrf.mxu1 }
 0xf55   : > { %v4918_v6 = vpop.f32.mrf.mxu1 }
 0xf57   : > { %v4920_v13 = vpop.f32.mrf.mxu1 }
 0xf59   : > { %v4924_v12 = vpop.f32.mrf.mxu1 }
 0xf5b   : > { %v4926_v30 = vpop.f32.mrf.mxu1 }
 0xf5d   : > { %v4928_v45 = vpop.f32.mrf.mxu1 }
 0xf5f   : > { %v4930_v23 = vpop.f32.mrf.mxu1 }
 0xf61   : > { %v4934_v21 = vpop.f32.mrf.mxu1 }
 0xf63   : > { %v4936_v52 = vpop.f32.mrf.mxu1 }
 0xf64   : > { %v10291_v60 = vsub.f32 %v10016_v3, %v4936_v52 }
 0xf65   : > { %v4938_v44 = vpop.f32.mrf.mxu1 }
 0xf66   : > { %v10297_v7 = vsub.f32 %v10021_v22, %v4938_v44 }
 0xf67   : > { %v4940_v63 = vpop.f32.mrf.mxu1 }
 0xf68   : > { %v10279_v17 = vsub.f32 %v10007_v38, %v4940_v63  ;;  %v10302_v38 = vsub.f32 %v10025_v55, %v4930_v23  ;;  %v5010_v55 = vmul.f32 %v10291_v60, %v10291_v60  ;;  %v5011_v63 = vmul.f32 %v10297_v7, %v10297_v7 }
 0xf69   : > { %v4944_v16 = vpop.f32.mrf.mxu1 }
 0xf6a   : > { %v10288_v35 = vsub.f32 %v10014_v54, %v4944_v16  ;;  %v5012_v54 = vmul.f32 %v10279_v17, %v10279_v17  ;;  %v10321_v16 = vsub.f32 %v10035_v49, %v4928_v45  ;;  %v5008_v52 = vmul.f32 %v10302_v38, %v10302_v38 }
 0xf6b   : > { %v4946_v34 = vpop.f32.mrf.mxu1  ;;  %v10336_v49 = vsub.f32 %v10046_v0, %v4916_v42  ;;  %v10351_v0 = vsub.f32 %v10058_v25, %v4914_v57  ;;  %v10367_v25 = vsub.f32 %v10068_v43, %v10274_v32  ;;  %v10385_v32 = vsub.f32 %v10081_v40, %v10272_v56 }
 0xf6c   : > { %v10282_v61 = vsub.f32 %v10009_v4, %v4946_v34  ;;  %11734 = vst [vmem:[#allocation95_spill] sm:$0xff] %v10288_v35  ;;  %v5013_v22 = vmul.f32 %v10288_v35, %v10288_v35  ;;  %v10403_v56 = vsub.f32 %v10095_v50, %v10262_v48 }
 0xf6d   : > { %v4948_v62 = vpop.f32.mrf.mxu1 }
 0xf6e   : > { %11732 = vst [vmem:[#allocation93_spill] sm:$0xff] %v10282_v61  ;;  %v10285_v39 = vsub.f32 %v10005_v53, %v4948_v62  ;;  %v5014_v53 = vmul.f32 %v10282_v61, %v10282_v61  ;;  %v10316_v62 = vsub.f32 %v10032_v51, %v4926_v30  ;;  %v5030_v51 = vpack.c.bf16 %v5012_v54, %v5010_v55 }
 0xf6f   : > { %v4950_v27 = vpop.f32.mrf.mxu1  ;;  %v10391_v54 = vsub.f32 %v10086_v5, %v10266_v26  ;;  %v10409_v26 = vsub.f32 %v10099_v1, %v10264_v36  ;;  %v11737_v36 = vld [vmem:[#allocation34_spill] sm:$0xff] }
 0xf70   : > { %11733 = vst [vmem:[#allocation76_spill] sm:$0xff] %v10285_v39  ;;  %v10294_v18 = vsub.f32 %v10011_v20, %v4950_v27  ;;  %v5015_v4 = vmul.f32 %v10285_v39, %v10285_v39  ;;  %v10311_v20 = vsub.f32 %v10030_v47, %v4934_v21  ;;  %v10326_v47 = vsub.f32 %v10039_v41, %v4920_v13  ;;  %v11769_v39 = vld [vmem:[#allocation49_spill] sm:$0xff] }
 0xf71   : > { %v10331_v27 = vsub.f32 %v10044_v19, %v4924_v12  ;;  %v5006_v45 = vmul.f32 %v10316_v62, %v10316_v62  ;;  %v10341_v41 = vsub.f32 %v10049_v58, %v4918_v6  ;;  %v5007_v13 = vmul.f32 %v10321_v16, %v10321_v16 }
 0xf72   : > { %11735 = vst [vmem:[#allocation89_spill] sm:$0xff] %v10294_v18  ;;  %v5016_v3 = vmul.f32 %v10294_v18, %v10294_v18  ;;  %v5031_v44 = vpack.c.bf16 %v5015_v4, %v5013_v22  ;;  %v5009_v30 = vmul.f32 %v10311_v20, %v10311_v20  ;;  %v10346_v19 = vsub.f32 %v10053_v31, %v4910_v2  ;;  %v11736_v22 = vld [vmem:[#allocation101_spill] sm:$0xff]  ;;  %v11768_v18 = vld [vmem:[#allocation46_spill] sm:$0xff] }
 0xf73   : > { %v5004_v12 = vmul.f32 %v10326_v47, %v10326_v47  ;;  %v5028_v21 = vpack.c.bf16 %v5008_v52, %v5006_v45  ;;  %v5005_v42 = vmul.f32 %v10331_v27, %v10331_v27  ;;  %v10356_v58 = vsub.f32 %v10060_v14, %v4906_v9 }
 0xf74   : > { %v5032_v34 = vpack.c.bf16 %v5016_v3, %v5014_v53  ;;  %v5029_v23 = vpack.c.bf16 %v5011_v63, %v5009_v30  ;;  %v5002_v6 = vmul.f32 %v10336_v49, %v10336_v49  ;;  %v10361_v31 = vsub.f32 %v10063_v8, %v4908_v46 }
 0xf75   : > { %v5003_v2 = vmul.f32 %v10341_v41, %v10341_v41  ;;  %v5027_v4 = vpack.c.bf16 %v5007_v13, %v5005_v42  ;;  %v5000_v57 = vmul.f32 %v10346_v19, %v10346_v19  ;;  %v10373_v9 = vsub.f32 %v10074_v29, %v10276_v11  ;;  %v11741_v13 = vld [vmem:[#allocation79_spill] sm:$0xff] }
 0xf76   : > { %5033 = vmatprep.subr.bf16.mxu1 %v5032_v34  ;;  %v5026_v14 = vpack.c.bf16 %v5004_v12, %v5002_v6  ;;  %v5001_v8 = vmul.f32 %v10351_v0, %v10351_v0  ;;  %v10379_v46 = vsub.f32 %v10077_v10, %v10270_v28  ;;  %v4998_v43 = vmul.f32 %v10356_v58, %v10356_v58  ;;  %v11738_v34 = vld [vmem:[#allocation66_spill] sm:$0xff] }
 0xf77   : > { %5034 = vmatpush1.bf16.msra.mxu1 %v5031_v44  ;;  %v4999_v29 = vmul.f32 %v10361_v31, %v10361_v31  ;;  %v4996_v10 = vmul.f32 %v10367_v25, %v10367_v25  ;;  %v10397_v53 = vsub.f32 %v10092_v37, %v10268_v15  ;;  %v4997_v40 = vmul.f32 %v10373_v9, %v10373_v9  ;;  %v11740_v44 = vld [vmem:[#allocation91_spill] sm:$0xff] }
 0xf78   : > { %5035 = vmatprep.subr.bf16.mxu1 %v5030_v51  ;;  %v5025_v11 = vpack.c.bf16 %v5003_v2, %v5001_v8  ;;  %v5024_v28 = vpack.c.bf16 %v5000_v57, %v4998_v43  ;;  %v4994_v5 = vmul.f32 %v10379_v46, %v10379_v46  ;;  %v4995_v37 = vmul.f32 %v10385_v32, %v10385_v32  ;;  %v6307_v8 = vld [vmem:[%s10887_s11] sm:$0xf] }
 0xf79   : > { %v5023_v15 = vpack.c.bf16 %v4999_v29, %v4997_v40  ;;  %v10415_v3 = vsub.f32 %v10104_v24, %v10258_v59  ;;  %v4992_v50 = vmul.f32 %v10391_v54, %v10391_v54  ;;  %v10421_v55 = vsub.f32 %v11736_v22, %v10260_v33  ;;  %v11739_v59 = vld [vmem:[#allocation98_spill] sm:$0xff] }
 0xf7a   : > { %v5022_v48 = vpack.c.bf16 %v4996_v10, %v4994_v5  ;;  %v4993_v1 = vmul.f32 %v10397_v53, %v10397_v53  ;;  %v10427_v63 = vsub.f32 %v11738_v34, %v11737_v36  ;;  %v4990_v24 = vmul.f32 %v10403_v56, %v10403_v56 }
 0xf7b   : > { %5036 = vmatpush1.bf16.msra.mxu1 %v5029_v23  ;;  %v10433_v52 = vsub.f32 %v11740_v44, %v11739_v59  ;;  %v4991_v33 = vmul.f32 %v10409_v26, %v10409_v26  ;;  %v4988_v30 = vmul.f32 %v10415_v3, %v10415_v3  ;;  %v11742_v23 = vld [vmem:[#allocation35_spill] sm:$0xff]  ;;  %v11743_v43 = vmov 0  }
 0xf7c   : > { %5037 = vmatprep.subr.bf16.mxu1 %v5028_v21  ;;  %v5021_v51 = vpack.c.bf16 %v4995_v37, %v4993_v1  ;;  %v5020_v45 = vpack.c.bf16 %v4992_v50, %v4990_v24  ;;  %v10441_v12 = vsub.f32 %v11742_v23, %v11741_v13  ;;  %v4989_v21 = vmul.f32 %v10421_v55, %v10421_v55  ;;  %v6312_v13 = vld [vmem:[%s10888_s12 + $0x20] sm:$0xff]   ;;  %v6313_v23 = vld [vmem:[%s10888_s12 + $0x28] sm:$0xff]  }
 0xf7d   : > { %v4986_v42 = vmul.f32 %v10427_v63, %v10427_v63  ;;  %v4987_v6 = vmul.f32 %v10433_v52, %v10433_v52 }
 0xf7e   : > { %v5019_v2 = vpack.c.bf16 %v4991_v33, %v4989_v21  ;;  %v4985_v57 = vmul.f32 %v10441_v12, %v10441_v12  ;;  %v6308_v33 = vld [vmem:[%s10888_s12] sm:$0xff]   ;;  %v6314_v21 = vld [vmem:[%s10888_s12 + $0x30] sm:$0xff]  }
 0xf7f   : > { %5038 = vmatpush1.bf16.msra.mxu1 %v5027_v4  ;;  %v5018_v4 = vpack.c.bf16 %v4988_v30, %v4986_v42  ;;  %v6310_v30 = vld [vmem:[%s10888_s12 + $0x10] sm:$0xff]   ;;  %v6315_v42 = vld [vmem:[%s10888_s12 + $0x38] sm:$0xff]  }
 0xf80   : > { %5039 = vmatprep.subr.bf16.mxu1 %v5026_v14  ;;  %v5017_v14 = vpack.c.bf16 %v4987_v6, %v4985_v57  ;;  %v3849_v6 = vld [vmem:[%s10884_s8] sm:$0x3]  ;;  %v11745_v57 = vld [vmem:[#allocation31_spill] sm:$0xff] }
 0xf83   : > { %5040 = vmatpush1.bf16.msra.mxu1 %v5025_v11 }
 0xf84   : > { %5041 = vmatprep.subr.bf16.mxu1 %v5024_v28 }
 0xf87   : > { %5042 = vmatpush1.bf16.msra.mxu1 %v5023_v15 }
 0xf88   : > { %5043 = vmatprep.subr.bf16.mxu1 %v5022_v48 }
 0xf8b   : > { %5044 = vmatpush1.bf16.msra.mxu1 %v5021_v51  ;;  %v6309_v51 = vld [vmem:[%s10888_s12 + $0x8] sm:$0xff]  }
 0xf8c   : > { %5045 = vmatprep.subr.bf16.mxu1 %v5020_v45  ;;  %v6311_v45 = vld [vmem:[%s10888_s12 + $0x18] sm:$0xff]  }
 0xf8f   : > { %5046 = vmatpush1.bf16.msra.mxu1 %v5019_v2  ;;  %v11744_v2 = vld [vmem:[#allocation28_spill] sm:$0xff] }
 0xf90   : > { %5047 = vmatprep.subr.bf16.mxu1 %v5018_v4  ;;  %v10500_v4 = vrot.slane %v3849_v6, %v11744_v2 }
 0xf93   : > { %5048 = vmatpush1.bf16.msra.mxu1 %v5017_v14  ;;  %v10503_v14 = vrot.slane %v3849_v6, %v11745_v57  ;;  %v4730_v6 = vld [vmem:[%s10891_s15] sm:$0x3] }
 0xf96   : > { %5066 = vmatmul.mubr.bf16.vlgmr.msra.gmra.mxu1 %v6307_v8  ;;  %v11746_v8 = vld [vmem:[#allocation43_spill] sm:$0xff] }
 0xf97   : > { %5159 = vmatprep.mubr.bf16.mxu1 %v11743_v43 }
0x1056   : > { %v5067_v29 = vpop.f32.mrf.mxu1 }
0x1057   : > { %v5074_v28 = vpack.c.bf16 %v5067_v29, %v5067_v29  ;;  %v4370_v29 = vmul.f32 %v10500_v4, %v11746_v8  ;;  %v11758_v8 = vld [vmem:[#allocation2_spill] sm:$0xff] }
0x1058   : > { %v5069_v11 = vpop.f32.mrf.mxu1 }
0x1059   : > { %v5075_v10 = vpack.c.bf16 %v5069_v11, %v5069_v11 }
0x105a   : > { %v5071_v40 = vpop.f32.mrf.mxu1 }
0x105b   : > { %5108 = vmatprep.mubr.bf16.mxu0 %v5075_v10  ;;  %v3850_v10 = vld [vmem:[%s10885_s9] sm:$0x3] }
0x105c   : > { %5109 = vmatmul.mubr.bf16.vlgmr.msra.gmra.mxu0 %v5074_v28  ;;  %v5072_v5 = vpop.f32.mrf.mxu1  ;;  %v11748_v28 = vld [vmem:[#allocation48_spill] sm:$0xff] }
0x105d   : > { %v4372_v40 = vmul.f32 %v10500_v4, %v11748_v28  ;;  %v11749_v5 = vld [vmem:[#allocation85_spill] sm:$0xff] }
0x111c   : > { %v5110_v37 = vpop.f32.mrf.mxu0 }
0x111d   : > { %v5111_v15 = vadd.f32 1e-05, %v5110_v37  ;;  %v4373_v37 = vmul.f32 %v10503_v14, %v11749_v5  ;;  %v11760_v5 = vld [vmem:[#allocation81_spill] sm:$0xff] }
0x111e   : > { %v5112_v50 = vpop.f32.mrf.mxu0 }
0x111f   : > { %6222 = vrsqrt.f32 %v5111_v15  ;;  %v5113_v48 = vadd.f32 1e-05, %v5112_v50  ;;  %v11750_v15 = vld [vmem:[#allocation51_spill] sm:$0xff] }
0x1120   : > { %v5114_v22 = vpop.f32.mrf.mxu0  ;;  %v4374_v50 = vmul.f32 %v10500_v4, %v11750_v15  ;;  %v10547_v15 = vrot.slane %v4730_v6, %v11744_v2 }
0x1121   : > { %6224 = vrsqrt.f32 %v5113_v48  ;;  %v11751_v48 = vld [vmem:[#allocation10_spill] sm:$0xff] }
0x1122   : > { %v5115_v1 = vpop.f32.mrf.mxu0  ;;  %v4402_v22 = vmul.f32 %v4370_v29, %v11751_v48  ;;  %v4406_v29 = vmul.f32 %v4374_v50, %v11758_v8 }
0x1123   : > { %v10520_v1 = vrot.slane %v3850_v10, %v11744_v2 }
0x112c   : > { %v6223_v36 = vpop.eup %6222 }
0x112d   : > { %v5119_v34 = vpack.c.bf16 %v6223_v36, %v6223_v36  ;;  %v11752_v36 = vld [vmem:[#allocation3_spill] sm:$0xff] }
0x112e   : > { %v6225_v24 = vpop.eup %6224 }
0x112f   : > { %v5120_v59 = vpack.c.bf16 %v6225_v24, %v6225_v24  ;;  %v5122_v44 = vsel %vm2091_vm2, %v5119_v34, 0  ;;  %v10524_v24 = vrot.slane %v3850_v10, %v11745_v57  ;;  %v11759_v10 = vld [vmem:[#allocation84_spill] sm:$0xff] }
0x1130   : > { %v4378_v28 = vmul.f32 %v10500_v4, %v11759_v10 }
0x1131   : > { %5887 = vmatprep.subr.msk.bf16.mxu1 %vm2091_vm2, %v5120_v59  ;;  %v11753_v59 = vld [vmem:[#allocation11_spill] sm:$0xff] }
0x1132   : > { %5142 = vmatpush1.bf16.msra.mxu1 %v5122_v44  ;;  %v4404_v44 = vmul.f32 %v4372_v40, %v11753_v59  ;;  %v11762_v59 = vld [vmem:[#allocation73_spill] sm:$0xff] }
0x1134   : > { %v10543_v40 = vadd.f32 %v10520_v1, %v4404_v44  ;;  %v4731_v44 = vld [vmem:[%s10892_s16] sm:$0x3] }
0x1135   : > { %5888 = vmatmul.mubr.msk.bf16.vlgmr.msra.gmra.mxu1 %vm2066_vm3, %v6308_v33  ;;  %v11754_v33 = vld [vmem:[#allocation78_spill] sm:$0xff] }
0x1136   : > { %5169 = vmatprep.mubr.bf16.mxu1 %v11743_v43 }
0x113d   : > { %5889 = vmatmul.mubr.msk.bf16.gmra.mxu1 %vm2066_vm3, %v6309_v51  ;;  %v4375_v51 = vmul.f32 %v10503_v14, %v11754_v33  ;;  %v11763_v33 = vld [vmem:[#allocation99_spill] sm:$0xff] }
0x113e   : > { %5179 = vmatprep.mubr.bf16.mxu1 %v11743_v43 }
0x1145   : > { %5890 = vmatmul.mubr.msk.bf16.gmra.mxu1 %vm2066_vm3, %v6310_v30  ;;  %v11755_v30 = vld [vmem:[#allocation6_spill] sm:$0xff] }
0x1146   : > { %5189 = vmatprep.mubr.bf16.mxu1 %v11743_v43 }
0x114d   : > { %5891 = vmatmul.mubr.msk.bf16.gmra.mxu1 %vm2066_vm3, %v6311_v45  ;;  %v4405_v45 = vmul.f32 %v4373_v37, %v11755_v30  ;;  %v4407_v37 = vmul.f32 %v4375_v51, %v11760_v5  ;;  %v10560_v30 = vadd.f32 %v10520_v1, %v4406_v29  ;;  %v10563_v51 = vrot.slane %v4730_v6, %v11745_v57 }
0x114e   : > { %5199 = vmatprep.mubr.bf16.mxu1 %v11743_v43  ;;  %v4479_v5 = vmax.f32 %v10543_v40, 0.0  ;;  %v10574_v29 = vrot.slane %v4731_v44, %v11744_v2  ;;  %v10588_v2 = vrot.slane %v4731_v44, %v11745_v57 }
0x114f   : > { %v10550_v48 = vadd.f32 %v10524_v24, %v4405_v45 }
0x1151   : > { %v4480_v6 = vmax.f32 %v10550_v48, 0.0 }
0x1155   : > { %5892 = vmatmul.mubr.msk.bf16.gmra.mxu1 %vm2066_vm3, %v6312_v13  ;;  %v11756_v13 = vld [vmem:[#allocation100_spill] sm:$0xff] }
0x1156   : > { %5209 = vmatprep.mubr.bf16.mxu1 %v11743_v43 }
0x115d   : > { %5893 = vmatmul.mubr.msk.bf16.gmra.mxu1 %vm2066_vm3, %v6313_v23  ;;  %v4376_v23 = vmul.f32 %v10500_v4, %v11756_v13 }
0x115e   : > { %5219 = vmatprep.mubr.bf16.mxu1 %v11743_v43 }
0x1165   : > { %5894 = vmatmul.mubr.msk.bf16.gmra.mxu1 %vm2066_vm3, %v6314_v21  ;;  %v11757_v21 = vld [vmem:[#allocation97_spill] sm:$0xff] }
0x1166   : > { %5229 = vmatprep.mubr.bf16.mxu1 %v11743_v43  ;;  %v11747_v43 = vld [vmem:[#allocation27_spill] sm:$0xff] }
0x1167   : > { %v4371_v11 = vmul.f32 %v10503_v14, %v11747_v43  ;;  %v4445_v43 = vadd.f32 %v10520_v1, %v4402_v22 }
0x1169   : > { %v4403_v34 = vmul.f32 %v4371_v11, %v11752_v36  ;;  %v11761_v36 = vld [vmem:[#allocation80_spill] sm:$0xff]  ;;  %v4477_v13 = vmax.f32 %v4445_v43, 0.0 }
0x116a   : > { %v4408_v50 = vmul.f32 %v4376_v23, %v11761_v36  ;;  %v11765_v23 = vld [vmem:[#allocation94_spill] sm:$0xff]  ;;  %v10570_v36 = vadd.f32 %v10524_v24, %v4407_v37 }
0x116b   : > { %v4446_v11 = vadd.f32 %v10524_v24, %v4403_v34  ;;  %v4379_v34 = vmul.f32 %v10503_v14, %v11763_v33 }
0x116c   : > { %v10578_v43 = vadd.f32 %v10520_v1, %v4408_v50  ;;  %v11767_v50 = vld [vmem:[#allocation71_spill] sm:$0xff]  ;;  %v4482_v37 = vmax.f32 %v10570_v36, 0.0 }
0x116d   : > { %5895 = vmatmul.mubr.msk.bf16.gmra.mxu1 %vm2066_vm3, %v6315_v42  ;;  %v4377_v42 = vmul.f32 %v10503_v14, %v11757_v21  ;;  %v4478_v45 = vmax.f32 %v4446_v11, 0.0  ;;  %v11764_v21 = vld [vmem:[#allocation77_spill] sm:$0xff] }
0x116e   : > { %v4410_v8 = vmul.f32 %v4378_v28, %v11764_v21  ;;  %v11766_v28 = vld [vmem:[#allocation67_spill] sm:$0xff] }
0x116f   : > { %v4409_v22 = vmul.f32 %v4377_v42, %v11762_v59  ;;  %v4380_v42 = vmul.f32 %v10500_v4, %v11765_v23  ;;  %v4411_v33 = vmul.f32 %v4379_v34, %v11766_v28  ;;  %v4382_v34 = vmul.f32 %v10500_v4, %v11769_v39 }
0x1170   : > { %v10591_v48 = vadd.f32 %v10520_v1, %v4410_v8 }
0x1171   : > { %v10581_v11 = vadd.f32 %v10524_v24, %v4409_v22  ;;  %v4381_v22 = vmul.f32 %v10503_v14, %v11768_v18  ;;  %v11770_v18 = vld [vmem:[#allocation52_spill] sm:$0xff] }
0x1172   : > { %v4383_v39 = vmul.f32 %v10503_v14, %v11770_v18  ;;  %v11773_v18 = vld [vmem:[#allocation58_spill] sm:$0xff] }
0x11f5   : > { %v5161_v10 = vpop.f32.mrf.mxu1 }
0x11f6   : > { %v5251_v59 = vmul.f32 %v10547_v15, %v5161_v10  ;;  %v4412_v10 = vmul.f32 %v4380_v42, %v11767_v50  ;;  %v11771_v42 = vld [vmem:[#allocation61_spill] sm:$0xff] }
0x11f7   : > { %v5163_v40 = vpop.f32.mrf.mxu1  ;;  %v4413_v8 = vmul.f32 %v4381_v22, %v11771_v42  ;;  %v4415_v22 = vmul.f32 %v4383_v39, %v11773_v18  ;;  %v11774_v42 = vld [vmem:[#allocation55_spill] sm:$0xff] }
0x11f8   : > { %v5283_v21 = vmul.f32 %v5251_v59, %v10441_v12  ;;  %v5252_v23 = vmul.f32 %v10563_v51, %v5163_v40  ;;  %v10606_v59 = vadd.f32 %v10524_v24, %v4411_v33  ;;  %v11772_v33 = vld [vmem:[#allocation64_spill] sm:$0xff]  ;;  %v11776_v18 = vld [vmem:[#allocation59_spill] sm:$0xff] }
0x11f9   : > { %v5165_v28 = vpop.f32.mrf.mxu1  ;;  %v4414_v61 = vmul.f32 %v4382_v34, %v11772_v33  ;;  %v4384_v34 = vmul.f32 %v10500_v4, %v11774_v42 }
0x11fa   : > { %v5326_v12 = vadd.f32 %v10574_v29, %v5283_v21  ;;  %v5284_v57 = vmul.f32 %v5252_v23, %v10427_v63  ;;  %v5253_v44 = vmul.f32 %v10547_v15, %v5165_v28  ;;  %v10615_v28 = vadd.f32 %v10520_v1, %v4412_v10 }
0x11fb   : > { %v5167_v40 = vpop.f32.mrf.mxu1  ;;  %v4486_v10 = vmax.f32 %v10606_v59, 0.0  ;;  %v10639_v39 = vadd.f32 %v10520_v1, %v4414_v61  ;;  %v4385_v61 = vmul.f32 %v10503_v14, %v11776_v18 }
0x11fc   : > { %v5358_v50 = vadd.f32 %v5326_v12, %v4477_v13  ;;  %v5327_v36 = vadd.f32 %v10588_v2, %v5284_v57  ;;  %v5285_v21 = vmul.f32 %v5253_v44, %v10433_v52  ;;  %v5254_v63 = vmul.f32 %v10563_v51, %v5167_v40 }
0x11fd   : > { %v5171_v13 = vpop.f32.mrf.mxu1 }
0x11fe   : > { %v5390_v12 = vmax.f32 %v5358_v50, 0.0  ;;  %v5359_v52 = vadd.f32 %v5327_v36, %v4478_v45  ;;  %v5328_v57 = vadd.f32 %v10574_v29, %v5285_v21  ;;  %v5286_v44 = vmul.f32 %v5254_v63, %v10415_v3 }
0x11ff   : > { %v5255_v40 = vmul.f32 %v10547_v15, %v5171_v13  ;;  %v5173_v33 = vpop.f32.mrf.mxu1  ;;  %v4487_v3 = vmax.f32 %v10615_v28, 0.0  ;;  %v10636_v36 = vadd.f32 %v10524_v24, %v4413_v8 }
0x1200   : > { %5422 = vst [vmem:[%s10622_s1] sm:$0xff] %v5390_v12  ;;  %v5391_v23 = vmax.f32 %v5359_v52, 0.0  ;;  %v5360_v35 = vadd.f32 %v5328_v57, %v4479_v5  ;;  %v5329_v45 = vadd.f32 %v10588_v2, %v5286_v44  ;;  %v5256_v50 = vmul.f32 %v10563_v51, %v5173_v33  ;;  %v11775_v44 = vld [vmem:[#allocation7_spill] sm:$0xff]  ;;  %v11777_v33 = vld [vmem:[#allocation62_spill] sm:$0xff] }
0x1201   : > { %v5287_v21 = vmul.f32 %v5255_v40, %v10421_v55  ;;  %v5175_v63 = vpop.f32.mrf.mxu1  ;;  %v10646_v57 = vadd.f32 %v10524_v24, %v4415_v22  ;;  %v4416_v8 = vmul.f32 %v4384_v34, %v11775_v44  ;;  %v4488_v40 = vmax.f32 %v10636_v36, 0.0  ;;  %v11779_v44 = vld [vmem:[#allocation4_spill] sm:$0xff] }
0x1202   : > { %5423 = vst [vmem:[%s10622_s1 + $0x8] sm:$0xff] %v5391_v23  ;;  %v5392_v13 = vmax.f32 %v5360_v35, 0.0  ;;  %v5361_v12 = vadd.f32 %v5329_v45, %v4480_v6  ;;  %v5288_v5 = vmul.f32 %v5256_v50, %v10403_v56  ;;  %v5257_v52 = vmul.f32 %v10547_v15, %v5175_v63 }
0x1203   : > { %v5330_v42 = vadd.f32 %v10574_v29, %v5287_v21  ;;  %v5177_v55 = vpop.f32.mrf.mxu1  ;;  %v4489_v22 = vmax.f32 %v10639_v39, 0.0  ;;  %v4386_v34 = vmul.f32 %v10500_v4, %v11777_v33  ;;  %v11778_v45 = vmax.f32 %v10560_v30, 0.0  ;;  %v11782_v33 = vld [vmem:[#allocation65_spill] sm:$0xff] }
0x1204   : > { %5424 = vst [vmem:[%s10622_s1 + $0x10] sm:$0xff] %v5392_v13  ;;  %v5393_v23 = vmax.f32 %v5361_v12, 0.0  ;;  %v5331_v35 = vadd.f32 %v10588_v2, %v5288_v5  ;;  %v5289_v56 = vmul.f32 %v5257_v52, %v10409_v26  ;;  %v5258_v6 = vmul.f32 %v10563_v51, %v5177_v55 }
0x1205   : > { %v5362_v50 = vadd.f32 %v5330_v42, %v11778_v45  ;;  %v5181_v21 = vpop.f32.mrf.mxu1  ;;  %v4490_v5 = vmax.f32 %v10646_v57, 0.0  ;;  %v10668_v52 = vadd.f32 %v10520_v1, %v4416_v8  ;;  %v4417_v18 = vmul.f32 %v4385_v61, %v11779_v44  ;;  %v11783_v8 = vld [vmem:[#allocation69_spill] sm:$0xff]  ;;  %v11785_v44 = vld [vmem:[#allocation74_spill] sm:$0xff] }
0x1206   : > { %5425 = vst [vmem:[%s10622_s1 + $0x18] sm:$0xff] %v5393_v23  ;;  %v5363_v63 = vadd.f32 %v5331_v35, %v4482_v37  ;;  %v5332_v13 = vadd.f32 %v10574_v29, %v5289_v56  ;;  %v5290_v26 = vmul.f32 %v5258_v6, %v10391_v54  ;;  %v5259_v12 = vmul.f32 %v10547_v15, %v5181_v21  ;;  %v11781_v56 = vld [vmem:[#allocation5_spill] sm:$0xff] }
0x1207   : > { %v5394_v30 = vmax.f32 %v5362_v50, 0.0  ;;  %v5183_v42 = vpop.f32.mrf.mxu1  ;;  %v11780_v37 = vmax.f32 %v10578_v43, 0.0  ;;  %v4418_v6 = vmul.f32 %v4386_v34, %v11781_v56  ;;  %v4387_v45 = vmul.f32 %v10503_v14, %v11782_v33 }
0x1208   : > { %v5395_v55 = vmax.f32 %v5363_v63, 0.0  ;;  %v5333_v35 = vadd.f32 %v10588_v2, %v5290_v26  ;;  %v5291_v54 = vmul.f32 %v5259_v12, %v10397_v53  ;;  %v4388_v21 = vmul.f32 %v10500_v4, %v11783_v8  ;;  %v11788_v8 = vld [vmem:[#allocation9_spill] sm:$0xff] }
0x1209   : > { %v5364_v23 = vadd.f32 %v5332_v13, %v11780_v37  ;;  %5426 = vst [vmem:[%s10622_s1 + $0x20] sm:$0xff] %v5394_v30  ;;  %v5260_v61 = vmul.f32 %v10563_v51, %v5183_v42  ;;  %v5185_v50 = vpop.f32.mrf.mxu1  ;;  %v11784_v63 = vmax.f32 %v10581_v11, 0.0  ;;  %v4491_v26 = vmax.f32 %v10668_v52, 0.0 }
0x120a   : > { %5427 = vst [vmem:[%s10622_s1 + $0x28] sm:$0xff] %v5395_v55  ;;  %v5334_v53 = vadd.f32 %v10574_v29, %v5291_v54  ;;  %v5261_v34 = vmul.f32 %v10547_v15, %v5185_v50  ;;  %v10689_v12 = vadd.f32 %v10524_v24, %v4417_v18  ;;  %v4389_v30 = vmul.f32 %v10503_v14, %v11785_v44  ;;  %v11787_v18 = vld [vmem:[#allocation54_spill] sm:$0xff] }
0x120b   : > { %v5396_v43 = vmax.f32 %v5364_v23, 0.0  ;;  %v5365_v13 = vadd.f32 %v5333_v35, %v11784_v63  ;;  %v5292_v42 = vmul.f32 %v5260_v61, %v10379_v46  ;;  %v5187_v55 = vpop.f32.mrf.mxu1  ;;  %v11786_v11 = vmax.f32 %v10591_v48, 0.0 }
0x120c   : > { %v5293_v35 = vmul.f32 %v5261_v34, %v10385_v32  ;;  %v5262_v54 = vmul.f32 %v10563_v51, %v5187_v55  ;;  %v10700_v56 = vadd.f32 %v10520_v1, %v4418_v6  ;;  %v4419_v33 = vmul.f32 %v4387_v45, %v11787_v18  ;;  %v11790_v34 = vld [vmem:[#allocation72_spill] sm:$0xff]  ;;  %v11792_v18 = vld [vmem:[#allocation109_spill] sm:$0xff] }
0x120d   : > { %5428 = vst [vmem:[%s10622_s1 + $0x30] sm:$0xff] %v5396_v43  ;;  %v5397_v37 = vmax.f32 %v5365_v13, 0.0  ;;  %v5366_v23 = vadd.f32 %v5334_v53, %v11786_v11  ;;  %v4420_v50 = vmul.f32 %v4388_v21, %v11788_v8  ;;  %v5335_v46 = vadd.f32 %v10588_v2, %v5292_v42  ;;  %v5191_v61 = vpop.f32.mrf.mxu1  ;;  %v11789_v53 = vld [vmem:[#allocation8_spill] sm:$0xff] }
0x120e   : > { %v5336_v48 = vadd.f32 %v10574_v29, %v5293_v35  ;;  %v5294_v63 = vmul.f32 %v5262_v54, %v10367_v25  ;;  %v5263_v32 = vmul.f32 %v10547_v15, %v5191_v61  ;;  %v4492_v13 = vmax.f32 %v10689_v12, 0.0  ;;  %v11791_v54 = vld [vmem:[#allocation75_spill] sm:$0xff] }
0x120f   : > { %5429 = vst [vmem:[%s10622_s1 + $0x38] sm:$0xff] %v5397_v37  ;;  %v5398_v43 = vmax.f32 %v5366_v23, 0.0  ;;  %v4421_v6 = vmul.f32 %v4389_v30, %v11789_v53  ;;  %v4390_v45 = vmul.f32 %v10500_v4, %v11790_v34  ;;  %v5367_v21 = vadd.f32 %v5335_v46, %v4486_v10  ;;  %v5193_v44 = vpop.f32.mrf.mxu1 }
0x1210   : > { %v5368_v42 = vadd.f32 %v5336_v48, %v4487_v3  ;;  %v5337_v25 = vadd.f32 %v10588_v2, %v5294_v63  ;;  %v5295_v55 = vmul.f32 %v5263_v32, %v10373_v9  ;;  %v5264_v12 = vmul.f32 %v10563_v51, %v5193_v44  ;;  %v11793_v48 = vld [vmem:[#allocation87_spill] sm:$0xff]  ;;  %v11794_v44 = vld [vmem:[#allocation12_spill] sm:$0xff] }
0x1211   : > { %5430 = vst [vmem:[%s10622_s1 + $0x40] sm:$0xff] %v5398_v43  ;;  %v4493_v30 = vmax.f32 %v10700_v56, 0.0  ;;  %v10723_v37 = vadd.f32 %v10524_v24, %v4419_v33  ;;  %v10726_v59 = vadd.f32 %v10520_v1, %v4420_v50  ;;  %v5399_v10 = vmax.f32 %v5367_v21, 0.0  ;;  %v5195_v11 = vpop.f32.mrf.mxu1 }
0x1212   : > { %v5400_v28 = vmax.f32 %v5368_v42, 0.0  ;;  %v5369_v3 = vadd.f32 %v5337_v25, %v4488_v40  ;;  %v5338_v23 = vadd.f32 %v10574_v29, %v5295_v55  ;;  %v5296_v9 = vmul.f32 %v5264_v12, %v10356_v58  ;;  %v11795_v12 = vld [vmem:[#allocation13_spill] sm:$0xff] }
0x1213   : > { %v10733_v35 = vadd.f32 %v10524_v24, %v4421_v6  ;;  %v4422_v56 = vmul.f32 %v4390_v45, %v11791_v54  ;;  %v4391_v33 = vmul.f32 %v10503_v14, %v11792_v18  ;;  %5431 = vst [vmem:[%s10622_s1 + $0x48] sm:$0xff] %v5399_v10  ;;  %v5265_v8 = vmul.f32 %v10547_v15, %v5195_v11  ;;  %v5197_v50 = vpop.f32.mrf.mxu1  ;;  %v11797_v11 = vld [vmem:[#allocation110_spill] sm:$0xff] }
0x1214   : > { %5432 = vst [vmem:[%s10622_s1 + $0x50] sm:$0xff] %v5400_v28  ;;  %v5401_v36 = vmax.f32 %v5369_v3, 0.0  ;;  %v5370_v40 = vadd.f32 %v5338_v23, %v4489_v22  ;;  %v5339_v58 = vadd.f32 %v10588_v2, %v5296_v9  ;;  %v5266_v46 = vmul.f32 %v10563_v51, %v5197_v50 }
0x1215   : > { %v4494_v61 = vmax.f32 %v10723_v37, 0.0  ;;  %v4495_v43 = vmax.f32 %v10726_v59, 0.0  ;;  %v4392_v63 = vmul.f32 %v10500_v4, %v11793_v48  ;;  %v5297_v32 = vmul.f32 %v5265_v8, %v10361_v31  ;;  %v5201_v53 = vpop.f32.mrf.mxu1  ;;  %v11796_v59 = vld [vmem:[#allocation33_spill] sm:$0xff] }
0x1216   : > { %5433 = vst [vmem:[%s10622_s1 + $0x58] sm:$0xff] %v5401_v36  ;;  %v5402_v6 = vmax.f32 %v5370_v40, 0.0  ;;  %v5371_v39 = vadd.f32 %v5339_v58, %v4490_v5  ;;  %v5298_v22 = vmul.f32 %v5266_v46, %v10346_v19  ;;  %v5267_v34 = vmul.f32 %v10547_v15, %v5201_v53  ;;  %v11798_v8 = vld [vmem:[#allocation105_spill] sm:$0xff]  ;;  %v11799_v46 = vld [vmem:[#allocation16_spill] sm:$0xff] }
0x1217   : > { %v4496_v45 = vmax.f32 %v10733_v35, 0.0  ;;  %v10757_v21 = vadd.f32 %v10520_v1, %v4422_v56  ;;  %v4423_v42 = vmul.f32 %v4391_v33, %v11794_v44  ;;  %v5340_v31 = vadd.f32 %v10574_v29, %v5297_v32  ;;  %v5203_v25 = vpop.f32.mrf.mxu1 }
0x1218   : > { %5434 = vst [vmem:[%s10622_s1 + $0x60] sm:$0xff] %v5402_v6  ;;  %v5403_v55 = vmax.f32 %v5371_v39, 0.0  ;;  %v5341_v57 = vadd.f32 %v10588_v2, %v5298_v22  ;;  %v5299_v5 = vmul.f32 %v5267_v34, %v10351_v0  ;;  %v5268_v19 = vmul.f32 %v10563_v51, %v5203_v25 }
0x1219   : > { %v4424_v37 = vmul.f32 %v4392_v63, %v11795_v12  ;;  %v4393_v10 = vmul.f32 %v10503_v14, %v11796_v59  ;;  %v4394_v28 = vmul.f32 %v10500_v4, %v11797_v11  ;;  %v5372_v3 = vadd.f32 %v5340_v31, %v4491_v26  ;;  %v5205_v23 = vpop.f32.mrf.mxu1  ;;  %v11800_v63 = vld [vmem:[#allocation17_spill] sm:$0xff] }
0x121a   : > { %5435 = vst [vmem:[%s10622_s1 + $0x68] sm:$0xff] %v5403_v55  ;;  %v5373_v9 = vadd.f32 %v5341_v57, %v4492_v13  ;;  %v5342_v54 = vadd.f32 %v10574_v29, %v5299_v5  ;;  %v5300_v0 = vmul.f32 %v5268_v19, %v10336_v49  ;;  %v5269_v56 = vmul.f32 %v10547_v15, %v5205_v23  ;;  %v11803_v23 = vld [vmem:[#allocation21_spill] sm:$0xff] }
0x121b   : > { %v4497_v18 = vmax.f32 %v10757_v21, 0.0  ;;  %v4466_v33 = vadd.f32 %v10524_v24, %v4423_v42  ;;  %v4395_v50 = vmul.f32 %v10503_v14, %v11798_v8  ;;  %v5404_v52 = vmax.f32 %v5372_v3, 0.0  ;;  %v5207_v26 = vpop.f32.mrf.mxu1  ;;  %v11801_v21 = vld [vmem:[#allocation82_spill] sm:$0xff]  ;;  %v11802_v42 = vld [vmem:[#allocation107_spill] sm:$0xff] }
0x121c   : > { %v5405_v36 = vmax.f32 %v5373_v9, 0.0  ;;  %v5374_v40 = vadd.f32 %v5342_v54, %v4493_v30  ;;  %v5343_v13 = vadd.f32 %v10588_v2, %v5300_v0  ;;  %v5301_v58 = vmul.f32 %v5269_v56, %v10341_v41  ;;  %v11804_v54 = vld [vmem:[#allocation106_spill] sm:$0xff] }
0x121d   : > { %v4467_v49 = vadd.f32 %v10520_v1, %v4424_v37  ;;  %v4425_v48 = vmul.f32 %v4393_v10, %v11799_v46  ;;  %v4426_v32 = vmul.f32 %v4394_v28, %v11800_v63  ;;  %5436 = vst [vmem:[%s10622_s1 + $0x70] sm:$0xff] %v5404_v52  ;;  %v5270_v53 = vmul.f32 %v10563_v51, %v5207_v26  ;;  %v5211_v6 = vpop.f32.mrf.mxu1  ;;  %v11806_v63 = vld [vmem:[#allocation32_spill] sm:$0xff] }
0x121e   : > { %5437 = vst [vmem:[%s10622_s1 + $0x78] sm:$0xff] %v5405_v36  ;;  %v5406_v39 = vmax.f32 %v5374_v40, 0.0  ;;  %v5375_v22 = vadd.f32 %v5343_v13, %v4494_v61  ;;  %v5344_v30 = vadd.f32 %v10574_v29, %v5301_v58  ;;  %v5271_v34 = vmul.f32 %v10547_v15, %v5211_v6  ;;  %v11805_v40 = vld [vmem:[#allocation108_spill] sm:$0xff] }
0x121f   : > { %v4498_v41 = vmax.f32 %v4466_v33, 0.0  ;;  %v4427_v44 = vmul.f32 %v4395_v50, %v11801_v21  ;;  %v4396_v31 = vmul.f32 %v10500_v4, %v11802_v42  ;;  %v5302_v25 = vmul.f32 %v5270_v53, %v10326_v47  ;;  %v5213_v55 = vpop.f32.mrf.mxu1  ;;  %v11808_v21 = vld [vmem:[#allocation104_spill] sm:$0xff]  ;;  %v11809_v42 = vld [vmem:[#allocation102_spill] sm:$0xff] }
0x1220   : > { %5438 = vst [vmem:[%s10622_s1 + $0x80] sm:$0xff] %v5406_v39  ;;  %v5407_v57 = vmax.f32 %v5375_v22, 0.0  ;;  %v5376_v5 = vadd.f32 %v5344_v30, %v4495_v43  ;;  %v5303_v19 = vmul.f32 %v5271_v34, %v10331_v27  ;;  %v5272_v61 = vmul.f32 %v10563_v51, %v5213_v55 }
0x1221   : > { %v4499_v12 = vmax.f32 %v4467_v49, 0.0  ;;  %v4468_v37 = vadd.f32 %v10524_v24, %v4425_v48  ;;  %v4469_v59 = vadd.f32 %v10520_v1, %v4426_v32  ;;  %v5345_v10 = vadd.f32 %v10588_v2, %v5302_v25  ;;  %v5215_v11 = vpop.f32.mrf.mxu1 }
0x1222   : > { %5439 = vst [vmem:[%s10622_s1 + $0x88] sm:$0xff] %v5407_v57  ;;  %v5408_v28 = vmax.f32 %v5376_v5, 0.0  ;;  %v5346_v47 = vadd.f32 %v10574_v29, %v5303_v19  ;;  %v5304_v3 = vmul.f32 %v5272_v61, %v10316_v62  ;;  %v5273_v43 = vmul.f32 %v10547_v15, %v5215_v11 }
0x1223   : > { %v4470_v27 = vadd.f32 %v10524_v24, %v4427_v44  ;;  %v4428_v9 = vmul.f32 %v4396_v31, %v11803_v23  ;;  %v4397_v0 = vmul.f32 %v10503_v14, %v11804_v54  ;;  %v5377_v56 = vadd.f32 %v5345_v10, %v4496_v45  ;;  %v5217_v33 = vpop.f32.mrf.mxu1  ;;  %v11812_v23 = vld [vmem:[#allocation20_spill] sm:$0xff] }
0x1224   : > { %5440 = vst [vmem:[%s10622_s1 + $0x90] sm:$0xff] %v5408_v28  ;;  %v5378_v8 = vadd.f32 %v5346_v47, %v4497_v18  ;;  %v5347_v50 = vadd.f32 %v10588_v2, %v5304_v3  ;;  %v5305_v62 = vmul.f32 %v5273_v43, %v10321_v16  ;;  %v5274_v52 = vmul.f32 %v10563_v51, %v5217_v33  ;;  %v11811_v43 = vld [vmem:[#allocation25_spill] sm:$0xff] }
0x1225   : > { %v4500_v26 = vmax.f32 %v4468_v37, 0.0  ;;  %v4501_v36 = vmax.f32 %v4469_v59, 0.0  ;;  %v4398_v13 = vmul.f32 %v10500_v4, %v11805_v40  ;;  %v5409_v58 = vmax.f32 %v5377_v56, 0.0  ;;  %v5221_v49 = vpop.f32.mrf.mxu1  ;;  %v11810_v59 = vld [vmem:[#allocation103_spill] sm:$0xff] }
0x1226   : > { %v5410_v35 = vmax.f32 %v5378_v8, 0.0  ;;  %v5379_v45 = vadd.f32 %v5347_v50, %v4498_v41  ;;  %v5348_v46 = vadd.f32 %v10574_v29, %v5305_v62  ;;  %v5306_v18 = vmul.f32 %v5274_v52, %v10302_v38  ;;  %v11807_v41 = vld [vmem:[#allocation68_spill] sm:$0xff]  ;;  %v11813_v50 = vld [vmem:[#allocation57_spill] sm:$0xff] }
0x1227   : > { %v4502_v48 = vmax.f32 %v4470_v27, 0.0  ;;  %v4471_v16 = vadd.f32 %v10520_v1, %v4428_v9  ;;  %v4429_v32 = vmul.f32 %v4397_v0, %v11806_v63  ;;  %5441 = vst [vmem:[%s10622_s1 + $0x98] sm:$0xff] %v5409_v58  ;;  %v5275_v53 = vmul.f32 %v10547_v15, %v5221_v49  ;;  %v5223_v6 = vpop.f32.mrf.mxu1  ;;  %v11814_v58 = vld [vmem:[#allocation95_spill] sm:$0xff] }
0x1228   : > { %5442 = vst [vmem:[%s10622_s1 + $0xa0] sm:$0xff] %v5410_v35  ;;  %v5411_v39 = vmax.f32 %v5379_v45, 0.0  ;;  %v5380_v22 = vadd.f32 %v5348_v46, %v4499_v12  ;;  %v5349_v30 = vadd.f32 %v10588_v2, %v5306_v18  ;;  %v5276_v34 = vmul.f32 %v10563_v51, %v5223_v6  ;;  %v11815_v6 = vld [vmem:[#allocation93_spill] sm:$0xff] }
0x1229   : > { %v4430_v38 = vmul.f32 %v4398_v13, %v11807_v41  ;;  %v4399_v44 = vmul.f32 %v10503_v14, %v11808_v21  ;;  %v4400_v31 = vmul.f32 %v10500_v4, %v11809_v42  ;;  %v5307_v25 = vmul.f32 %v5275_v53, %v10311_v20  ;;  %v5225_v55 = vpop.f32.mrf.mxu1 }
0x122a   : > { %5443 = vst [vmem:[%s10622_s1 + $0xa8] sm:$0xff] %v5411_v39  ;;  %v5412_v57 = vmax.f32 %v5380_v22, 0.0  ;;  %v5381_v5 = vadd.f32 %v5349_v30, %v4500_v26  ;;  %v5308_v19 = vmul.f32 %v5276_v34, %v10291_v60  ;;  %v5277_v61 = vmul.f32 %v10547_v15, %v5225_v55  ;;  %v11816_v34 = vld [vmem:[#allocation76_spill] sm:$0xff] }
0x122b   : > { %v4503_v12 = vmax.f32 %v4471_v16, 0.0  ;;  %v4472_v37 = vadd.f32 %v10524_v24, %v4429_v32  ;;  %v4401_v10 = vmul.f32 %v10503_v14, %v11810_v59  ;;  %v5350_v11 = vadd.f32 %v10574_v29, %v5307_v25  ;;  %v5227_v4 = vpop.f32.mrf.mxu1 }
0x122c   : > { %5444 = vst [vmem:[%s10622_s1 + $0xb0] sm:$0xff] %v5412_v57  ;;  %v5413_v20 = vmax.f32 %v5381_v5, 0.0  ;;  %v5351_v28 = vadd.f32 %v10588_v2, %v5308_v19  ;;  %v5309_v47 = vmul.f32 %v5277_v61, %v10297_v7  ;;  %v5278_v60 = vmul.f32 %v10563_v51, %v5227_v4 }
0x122d   : > { %v4473_v3 = vadd.f32 %v10520_v1, %v4430_v38  ;;  %v4431_v27 = vmul.f32 %v4399_v44, %v11811_v43  ;;  %v4432_v9 = vmul.f32 %v4400_v31, %v11812_v23  ;;  %v5382_v54 = vadd.f32 %v5350_v11, %v4501_v36  ;;  %v5231_v0 = vpop.f32.mrf.mxu1  ;;  %v11817_v31 = vld [vmem:[#allocation89_spill] sm:$0xff] }
0x122e   : > { %5445 = vst [vmem:[%s10622_s1 + $0xb8] sm:$0xff] %v5413_v20  ;;  %v5383_v14 = vadd.f32 %v5351_v28, %v4502_v48  ;;  %v5352_v56 = vadd.f32 %v10574_v29, %v5309_v47  ;;  %v5310_v33 = vmul.f32 %v5278_v60, %v10279_v17  ;;  %v5279_v7 = vmul.f32 %v10547_v15, %v5231_v0 }
0x122f   : > { %v4504_v8 = vmax.f32 %v4472_v37, 0.0  ;;  %v4433_v62 = vmul.f32 %v4401_v10, %v11813_v50  ;;  %v5414_v52 = vmax.f32 %v5382_v54, 0.0  ;;  %v5233_v26 = vpop.f32.mrf.mxu1  ;;  %v4505_v35 = vmax.f32 %v4473_v3, 0.0 }
0x1230   : > { %v5415_v40 = vmax.f32 %v5383_v14, 0.0  ;;  %v5384_v13 = vadd.f32 %v5352_v56, %v4503_v12  ;;  %v5353_v36 = vadd.f32 %v10588_v2, %v5310_v33  ;;  %v5311_v49 = vmul.f32 %v5279_v7, %v11814_v58 }
0x1231   : > { %v4474_v45 = vadd.f32 %v10524_v24, %v4431_v27  ;;  %v4475_v17 = vadd.f32 %v10520_v1, %v4432_v9  ;;  %5446 = vst [vmem:[%s10622_s1 + $0xc0] sm:$0xff] %v5414_v52  ;;  %v5280_v46 = vmul.f32 %v10563_v51, %v5233_v26  ;;  %v5235_v18 = vpop.f32.mrf.mxu1  ;;  %v4476_v53 = vadd.f32 %v10524_v24, %v4433_v62 }
0x1232   : > { %5447 = vst [vmem:[%s10622_s1 + $0xc8] sm:$0xff] %v5415_v40  ;;  %v5416_v48 = vmax.f32 %v5384_v13, 0.0  ;;  %v5385_v16 = vadd.f32 %v5353_v36, %v4504_v8  ;;  %v5354_v63 = vadd.f32 %v10574_v29, %v5311_v49  ;;  %v5281_v32 = vmul.f32 %v10547_v15, %v5235_v18 }
0x1233   : > { %v5312_v39 = vmul.f32 %v5280_v46, %v11815_v6  ;;  %v5237_v22 = vpop.f32.mrf.mxu1  ;;  %v4506_v21 = vmax.f32 %v4474_v45, 0.0  ;;  %v4507_v42 = vmax.f32 %v4475_v17, 0.0  ;;  %v4508_v57 = vmax.f32 %v4476_v53, 0.0 }
0x1234   : > { %5448 = vst [vmem:[%s10622_s1 + $0xd0] sm:$0xff] %v5416_v48  ;;  %v5417_v1 = vmax.f32 %v5385_v16, 0.0  ;;  %v5386_v30 = vadd.f32 %v5354_v63, %v4505_v35  ;;  %v5313_v41 = vmul.f32 %v5281_v32, %v11816_v34  ;;  %v5282_v38 = vmul.f32 %v10563_v51, %v5237_v22 }
0x1235   : > { %v5355_v44 = vadd.f32 %v10588_v2, %v5312_v39 }
0x1236   : > { %5449 = vst [vmem:[%s10622_s1 + $0xd8] sm:$0xff] %v5417_v1  ;;  %v5418_v24 = vmax.f32 %v5386_v30, 0.0  ;;  %v5356_v15 = vadd.f32 %v10574_v29, %v5313_v41  ;;  %v5314_v25 = vmul.f32 %v5282_v38, %v11817_v31 }
0x1237   : > { %v5387_v55 = vadd.f32 %v5355_v44, %v4506_v21 }
0x1238   : > { %5450 = vst [vmem:[%s10622_s1 + $0xe0] sm:$0xff] %v5418_v24  ;;  %v5388_v5 = vadd.f32 %v5356_v15, %v4507_v42  ;;  %v5357_v19 = vadd.f32 %v10588_v2, %v5314_v25 }
0x1239   : > { %v5419_v51 = vmax.f32 %v5387_v55, 0.0 }
0x123a   : > { %v5420_v61 = vmax.f32 %v5388_v5, 0.0  ;;  %v5389_v12 = vadd.f32 %v5357_v19, %v4508_v57 }
0x123b   : > { %5451 = vst [vmem:[%s10622_s1 + $0xe8] sm:$0xff] %v5419_v51 }
0x123c   : > { %5452 = vst [vmem:[%s10622_s1 + $0xf0] sm:$0xff] %v5420_v61  ;;  %v5421_v37 = vmax.f32 %v5389_v12, 0.0 }
0x123e   : > { %5453 = vst [vmem:[%s10622_s1 + $0xf8] sm:$0xff] %v5421_v37 }
0x123f PF: > { %s27_s24 = sadd.s32 1, %s6322_s24  }
0x1240   : > { %p24_p4 = scmp.ge.s32.totalorder %s27_s24, 4  }
0x1242   :  { %26 = sbr.rel (!%p24_p4) target bundleno = 3 (0x3), region = 123 }

</bundles_post_ra>
